<compile_context>
chip_gen: v5e
topology: v5e:2x2
jax: 0.10.0
libtpu: 0.0.40
codegen_flags: <defaults>
</compile_context>

<pallas_src>
import jax
import jax.numpy as jnp
from jax.experimental import pallas as pl
from jax.experimental.pallas import tpu as pltpu


# ------------------------- single fused Net kernel -------------------------

def _net_kernel(xsrc_ref, xdec_ref,
                enc_w_ref, enc_b_ref,
                dec_w_ref, dec_b_ref,
                attn_w_ref, attn_b_ref,
                fcw_ref, fcb_ref,
                enc_out_ref, logits_ref, hid_ref, cell_ref):
    S, B, _E = xsrc_ref.shape
    Tm1 = xdec_ref.shape[0]
    G = enc_b_ref.shape[1] // 4        # encoder combined gate width = 2*H_enc = 4E
    Hh = G // 2                        # per-direction encoder hidden
    D = G                              # enc_out feature dim (= 4E)
    Hd = hid_ref.shape[1]              # decoder hidden (= 4E, == G)

    enc_w = enc_w_ref[...]
    enc_b = enc_b_ref[...]

    # ---- encoder: both LSTM directions fused, statically unrolled over S ----
    # State layout: h/c = [h_fwd | h_bwd] of shape (B, 2*H_enc); gate columns
    # are interleaved so every gate slice is a lane-aligned 128-wide chunk.
    h = jnp.zeros((B, G), jnp.float32)
    c = jnp.zeros((B, G), jnp.float32)
    for t in range(S):
        z = jnp.concatenate([xsrc_ref[t], xsrc_ref[S - 1 - t], h], axis=1)
        gates = (jnp.dot(z, enc_w, preferred_element_type=jnp.float32) + enc_b)
        i = jax.nn.sigmoid(gates[:, 0:G])
        f = jax.nn.sigmoid(gates[:, G:2 * G])
        gg = jnp.tanh(gates[:, 2 * G:3 * G])
        o = jax.nn.sigmoid(gates[:, 3 * G:4 * G])
        c = f * c + i * gg
        h = o * jnp.tanh(c)
        # enc_out layout: row s holds [b0: fwd(s)|bwd(s), b1: fwd(s)|bwd(s), ...].
        # fwd half written at time t, bwd half at time S-1-t (VMEM-resident, so
        # the 64-lane partial stores never touch the HBM path).
        for b in range(B):
            enc_out_ref[t:t + 1, b * D:b * D + Hh] = h[b:b + 1, 0:Hh]
            enc_out_ref[S - 1 - t:S - t, b * D + Hh:(b + 1) * D] = h[b:b + 1, Hh:G]

    # ---- attn_key: hoisted out of the decoder loop (enc_out is constant) ----
    enc_all = enc_out_ref[...]                       # (S, B*D)
    attn_w = attn_w_ref[...]
    attn_b = attn_b_ref[...]
    ak_flat = jnp.concatenate(
        [jnp.dot(enc_all[:, b * D:(b + 1) * D], attn_w,
                 preferred_element_type=jnp.float32) + attn_b
         for b in range(B)], axis=1)                 # (S, B*D)

    dec_w = dec_w_ref[...]
    dec_b = dec_b_ref[...]
    fcw = fcw_ref[...]
    fcb = fcb_ref[...]

    # ---- decoder: LSTM cell + attention + fc, statically unrolled over T-1 ----
    hd, cd = h, c                                    # [h_fwd|h_bwd] -> decoder init
    for t in range(Tm1):
        z = jnp.concatenate([xdec_ref[t], hd], axis=1)
        gates = (jnp.dot(z, dec_w, preferred_element_type=jnp.float32) + dec_b)
        i = jax.nn.sigmoid(gates[:, 0:Hd])
        f = jax.nn.sigmoid(gates[:, Hd:2 * Hd])
        gg = jnp.tanh(gates[:, 2 * Hd:3 * Hd])
        o = jax.nn.sigmoid(gates[:, 3 * Hd:4 * Hd])
        cd = f * cd + i * gg
        hd = o * jnp.tanh(cd)

        # Attention, faithful to PyTorch's flatten(1) @ hidden.view(-1) trick:
        # scores are summed over the batch; one softmax over S shared by all rows.
        h_flat = jnp.concatenate([hd[b:b + 1] for b in range(B)], axis=1)  # (1, B*Hd)
        scores = jax.lax.dot_general(h_flat, ak_flat, (((1,), (1,)), ((), ())),
                                     preferred_element_type=jnp.float32)  # (1, S)
        m = jnp.max(scores, axis=1, keepdims=True)
        e = jnp.exp(scores - m)
        pr = e * pl.reciprocal(jnp.sum(e, axis=1, keepdims=True), approx=True)
        ctx_flat = jnp.dot(pr, enc_all, preferred_element_type=jnp.float32)  # (1, B*D)
        ctx = jnp.concatenate([ctx_flat[:, b * D:(b + 1) * D] for b in range(B)],
                              axis=0)                                         # (B, D)

        xcat = jnp.concatenate([hd, ctx], axis=1)                             # (B, Hd+D)
        logits_ref[t] = (jnp.dot(xcat, fcw, preferred_element_type=jnp.float32)
                         + fcb)

    hid_ref[...] = hd
    cell_ref[...] = cd


# ------------------------------ model wrapper ------------------------------

def net_forward(p, src, trg):
    B, T = trg.shape
    S = src.shape[1]
    V = p["fc_b"].shape[1]
    D = p["attn_w"].shape[0]            # 4E
    Hd = D
    Vp = p["fc_w_pad"].shape[1]

    x_src = jnp.transpose(jnp.take(p["emb_src"], src, axis=0), (1, 0, 2))      # (S,B,E)
    # TODO(synk): PyTorch flips a coin (random.random() < 0.5) each step between
    # greedy feedback (pred.argmax) and teacher forcing; made deterministic here
    # by always teacher-forcing with the ground-truth token.
    x_dec = jnp.transpose(jnp.take(p["emb_trg"], trg[:, :T - 1], axis=0),
                          (1, 0, 2))                                           # (T-1,B,E)

    vmem = lambda: pl.BlockSpec(memory_space=pltpu.MemorySpace.VMEM)
    enc_flat, logits_pad, hid, cel = pl.pallas_call(
        _net_kernel,
        out_shape=(jax.ShapeDtypeStruct((S, B * D), jnp.float32),
                   jax.ShapeDtypeStruct((T - 1, B, Vp), jnp.float32),
                   jax.ShapeDtypeStruct((B, Hd), jnp.float32),
                   jax.ShapeDtypeStruct((B, Hd), jnp.float32)),
        in_specs=[vmem() for _ in range(10)],
        out_specs=(vmem(), vmem(), vmem(), vmem()),
    )(x_src, x_dec,
      p["enc_w_packed"], p["enc_b_packed"],
      p["dec_w_packed"], p["dec_b"],
      p["attn_w"], p["attn_b"],
      p["fc_w_pad"], p["fc_b_pad"])

    enc_out = jnp.transpose(enc_flat.reshape(S, B, D), (1, 0, 2))              # (B,S,4E)
    logits = jnp.transpose(logits_pad, (1, 0, 2))[:, :, :V]                    # (B,T-1,V)
    prediction = jnp.concatenate(
        [jnp.zeros((B, 1, V), jnp.float32), logits], axis=1)                   # pred[:,0]=0
    return prediction, enc_out, hid[None], cel[None]


# --------------------------- pure-JAX reference ---------------------------

def net_forward_ref(p, src, trg):
    B, T = trg.shape
    S = src.shape[1]
    V = p["fc_b"].shape[1]
    G = p["enc_b_packed"].shape[1] // 4
    Hh = G // 2
    D = G
    x = jnp.take(p["emb_src"], src, axis=0)                    # (B,S,E)
    h = jnp.zeros((B, G), jnp.float32)
    c = jnp.zeros((B, G), jnp.float32)
    enc_out = jnp.zeros((B, S, D), jnp.float32)
    for t in range(S):
        z = jnp.concatenate([x[:, t], x[:, S - 1 - t], h], axis=1)
        gates = z @ p["enc_w_packed"] + p["enc_b_packed"]
        i = jax.nn.sigmoid(gates[:, :G]); f = jax.nn.sigmoid(gates[:, G:2 * G])
        g = jnp.tanh(gates[:, 2 * G:3 * G]); o = jax.nn.sigmoid(gates[:, 3 * G:])
        c = f * c + i * g
        h = o * jnp.tanh(c)
        enc_out = enc_out.at[:, t, :Hh].set(h[:, :Hh])
        enc_out = enc_out.at[:, S - 1 - t, Hh:].set(h[:, Hh:])
    attn_key = enc_out @ p["attn_w"] + p["attn_b"]              # (B,S,D)

    dec_x = jnp.take(p["emb_trg"], trg[:, :T - 1], axis=0)      # (B,T-1,E)
    hd, cd = h, c
    Hd = hd.shape[1]
    logits_list = []
    for t in range(T - 1):
        z = jnp.concatenate([dec_x[:, t], hd], axis=1)
        gates = z @ p["dec_w_packed"] + p["dec_b"]
        i = jax.nn.sigmoid(gates[:, :Hd]); f = jax.nn.sigmoid(gates[:, Hd:2 * Hd])
        g = jnp.tanh(gates[:, 2 * Hd:3 * Hd]); o = jax.nn.sigmoid(gates[:, 3 * Hd:])
        cd = f * cd + i * g
        hd = o * jnp.tanh(cd)
        scores = jnp.einsum('bsd,bd->s', attn_key, hd)          # summed over batch
        pr = jax.nn.softmax(scores)
        ctx = jnp.einsum('s,bsd->bd', pr, enc_out)
        xcat = jnp.concatenate([hd, ctx], axis=1)
        logits_list.append(xcat @ p["fc_w"] + p["fc_b"])
    logits = jnp.stack(logits_list, axis=1)
    prediction = jnp.concatenate(
        [jnp.zeros((B, 1, V), jnp.float32), logits], axis=1)
    return prediction, enc_out, hd[None], cd[None]


# --------------------------- deterministic init ---------------------------

def init_params(key, vocab_src, vocab_trg, E):
    H_enc = 2 * E     # encoder hidden per direction
    H_dec = 4 * E     # decoder hidden
    ks = jax.random.split(key, 20)

    def u(k, shape, fan):
        bound = 1.0 / jnp.sqrt(jnp.float32(fan))
        return jax.random.uniform(k, shape, jnp.float32, -bound, bound)

    return {
        "emb_src":   jax.random.normal(ks[0], (vocab_src, E), jnp.float32) * 0.1,
        "emb_trg":   jax.random.normal(ks[1], (vocab_trg, E), jnp.float32) * 0.1,
        # encoder bidirectional LSTM (weights stored (in, out); b = b_ih + b_hh)
        "enc_w_ih_f": u(ks[2], (E, 4 * H_enc), H_enc),
        "enc_w_hh_f": u(ks[3], (H_enc, 4 * H_enc), H_enc),
        "enc_b_f":    u(ks[4], (1, 4 * H_enc), H_enc),
        "enc_w_ih_b": u(ks[5], (E, 4 * H_enc), H_enc),
        "enc_w_hh_b": u(ks[6], (H_enc, 4 * H_enc), H_enc),
        "enc_b_b":    u(ks[7], (1, 4 * H_enc), H_enc),
        # decoder LSTM
        "dec_w_ih":   u(ks[8], (E, 4 * H_dec), H_dec),
        "dec_w_hh":   u(ks[9], (H_dec, 4 * H_dec), H_dec),
        "dec_b":      u(ks[10], (1, 4 * H_dec), H_dec),
        # attn_key_layer: Linear(4E, 4E)
        "attn_w":     u(ks[11], (H_dec, H_dec), H_dec),
        "attn_b":     u(ks[12], (1, H_dec), H_dec),
        # fc_layer: Linear(8E, vocab_trg)
        "fc_w":       u(ks[13], (2 * H_dec, vocab_trg), 2 * H_dec),
        "fc_b":       u(ks[14], (1, vocab_trg), 2 * H_dec),
    }


def pack_params(p):
    """Build the fused/packed weights consumed by the Pallas kernel (once)."""
    E = p["enc_w_ih_f"].shape[0]
    H = p["enc_w_hh_f"].shape[0]        # encoder hidden per direction (2E)
    V = p["fc_b"].shape[1]
    V_pad = ((V + 127) // 128) * 128    # lane-dense logits width

    # Encoder: block-diagonal weight over rows [x_f, x_b, h_f, h_b] with gate
    # columns interleaved per direction -> in-kernel gate slices are 128-wide
    # lane-aligned chunks and the state layout is [h_fwd | h_bwd].
    zx = jnp.zeros((E, H), jnp.float32)
    zh = jnp.zeros((H, H), jnp.float32)
    w_cols, b_cols = [], []
    for k in range(4):                  # gate order: i, f, g, o
        sl = slice(k * H, (k + 1) * H)
        w_cols.append(jnp.concatenate(
            [p["enc_w_ih_f"][:, sl], zx, p["enc_w_hh_f"][:, sl], zh], axis=0))
        w_cols.append(jnp.concatenate(
            [zx, p["enc_w_ih_b"][:, sl], zh, p["enc_w_hh_b"][:, sl]], axis=0))
        b_cols.append(p["enc_b_f"][:, sl])
        b_cols.append(p["enc_b_b"][:, sl])

    packed = dict(p)
    packed["enc_w_packed"] = jnp.concatenate(w_cols, axis=1)   # (2E+2H, 8H)
    packed["enc_b_packed"] = jnp.concatenate(b_cols, axis=1)   # (1, 8H)
    # Decoder: concat input/recurrent weights so the cell is one matmul.
    packed["dec_w_packed"] = jnp.concatenate(
        [p["dec_w_ih"], p["dec_w_hh"]], axis=0)                # (E+4E, 16E)
    # fc layer padded to a lane-dense output width (sliced back in wrapper).
    packed["fc_w_pad"] = jnp.pad(p["fc_w"], ((0, 0), (0, V_pad - V)))
    packed["fc_b_pad"] = jnp.pad(p["fc_b"], ((0, 0), (0, V_pad - V)))
    return packed


# ---------------------------------- main ----------------------------------

if __name__ == "__main__":
    B, S_src, T_trg = 2, 8, 6
    E = 32
    V_src, V_trg = 40, 48

    key = jax.random.PRNGKey(0)
    k_params, k_src, k_trg = jax.random.split(key, 3)

    params = pack_params(init_params(k_params, V_src, V_trg, E))
    src = jax.random.randint(k_src, (B, S_src), 0, V_src, dtype=jnp.int32)
    trg = jax.random.randint(k_trg, (B, T_trg), 0, V_trg, dtype=jnp.int32)

    fwd = jax.jit(net_forward)
    prediction, enc_out, hidden, cell = fwd(params, src, trg)
    jax.block_until_ready((prediction, enc_out, hidden, cell))

    assert prediction.shape == (B, T_trg, V_trg)
    assert enc_out.shape == (B, S_src, 4 * E)
    assert hidden.shape == (1, B, 4 * E)
    assert cell.shape == (1, B, 4 * E)
    assert bool(jnp.all(jnp.isfinite(prediction)))

    # Check against a pure-JAX reference (same packed weights, exact softmax).
    ref_pred, ref_enc, ref_hid, ref_cell = jax.jit(net_forward_ref)(params, src, trg)
    assert bool(jnp.allclose(prediction, ref_pred, atol=2e-2, rtol=2e-2))
    assert bool(jnp.allclose(enc_out, ref_enc, atol=2e-2, rtol=2e-2))
    assert bool(jnp.allclose(hidden, ref_hid, atol=2e-2, rtol=2e-2))
    assert bool(jnp.allclose(cell, ref_cell, atol=2e-2, rtol=2e-2))

    print("KERNEL_OK")
</pallas_src>

<mosaic_0001>
module attributes {stable_mosaic.version = 11 : i64} {
  func.func @_net_kernel(%arg0: memref<8x2x32xf32, #tpu.memory_space<vmem>>, %arg1: memref<5x2x32xf32, #tpu.memory_space<vmem>>, %arg2: memref<192x512xf32, #tpu.memory_space<vmem>>, %arg3: memref<1x512xf32, #tpu.memory_space<vmem>>, %arg4: memref<160x512xf32, #tpu.memory_space<vmem>>, %arg5: memref<1x512xf32, #tpu.memory_space<vmem>>, %arg6: memref<128x128xf32, #tpu.memory_space<vmem>>, %arg7: memref<1x128xf32, #tpu.memory_space<vmem>>, %arg8: memref<256x128xf32, #tpu.memory_space<vmem>>, %arg9: memref<1x128xf32, #tpu.memory_space<vmem>>, %arg10: memref<8x256xf32, #tpu.memory_space<vmem>>, %arg11: memref<5x2x128xf32, #tpu.memory_space<vmem>>, %arg12: memref<2x128xf32, #tpu.memory_space<vmem>>, %arg13: memref<2x128xf32, #tpu.memory_space<vmem>>) attributes {dimension_semantics = [], scalar_prefetch = 0 : i64, scratch_operands = 0 : i64, tpu.core_type = #tpu.core_type<tc>} {
    %c0 = arith.constant 0 : index
    %c0_0 = arith.constant 0 : index
    %0 = vector.load %arg2[%c0, %c0_0] : memref<192x512xf32, #tpu.memory_space<vmem>>, vector<192x512xf32>
    %c0_1 = arith.constant 0 : index
    %c0_2 = arith.constant 0 : index
    %1 = vector.load %arg3[%c0_1, %c0_2] : memref<1x512xf32, #tpu.memory_space<vmem>>, vector<1x512xf32>
    %cst = arith.constant 0.000000e+00 : f32
    %2 = vector.broadcast %cst : f32 to vector<2x128xf32>
    %cst_3 = arith.constant 0.000000e+00 : f32
    %3 = vector.broadcast %cst_3 : f32 to vector<2x128xf32>
    %c0_4 = arith.constant 0 : index
    %c0_5 = arith.constant 0 : index
    %c0_6 = arith.constant 0 : index
    %4 = vector.load %arg0[%c0_4, %c0_5, %c0_6] : memref<8x2x32xf32, #tpu.memory_space<vmem>>, vector<1x2x32xf32>
    %5 = vector.shape_cast %4 : vector<1x2x32xf32> to vector<2x32xf32>
    %c7 = arith.constant 7 : index
    %c0_7 = arith.constant 0 : index
    %c0_8 = arith.constant 0 : index
    %6 = vector.load %arg0[%c7, %c0_7, %c0_8] : memref<8x2x32xf32, #tpu.memory_space<vmem>>, vector<1x2x32xf32>
    %7 = vector.shape_cast %6 : vector<1x2x32xf32> to vector<2x32xf32>
    %8 = tpu.concatenate %5, %7, %2 in 1 : vector<2x32xf32>, vector<2x32xf32>, vector<2x128xf32> -> vector<2x192xf32>
    %cst_9 = arith.constant dense<0.000000e+00> : vector<2x512xf32>
    %9 = tpu.matmul %8, %0, %cst_9 {dimension_numbers = #tpu.dot_dimension_numbers<[1], [0], [0], [1], [0, 0, 1, 1], [], []>} : vector<2x192xf32>, vector<192x512xf32>, vector<2x512xf32> -> vector<2x512xf32>
    %10 = vector.broadcast %1 : vector<1x512xf32> to vector<2x512xf32>
    %11 = arith.addf %9, %10 : vector<2x512xf32>
    %12 = vector.extract_strided_slice %11 {offsets = [0, 0], sizes = [2, 128], strides = [1, 1]} : vector<2x512xf32> to vector<2x128xf32>
    %13 = arith.negf %12 : vector<2x128xf32>
    %14 = math.exp %13 : vector<2x128xf32>
    %cst_10 = arith.constant 1.000000e+00 : f32
    %15 = vector.broadcast %cst_10 : f32 to vector<2x128xf32>
    %16 = arith.addf %15, %14 : vector<2x128xf32>
    %17 = arith.divf %15, %16 : vector<2x128xf32>
    %18 = vector.extract_strided_slice %11 {offsets = [0, 128], sizes = [2, 128], strides = [1, 1]} : vector<2x512xf32> to vector<2x128xf32>
    %19 = arith.negf %18 : vector<2x128xf32>
    %20 = math.exp %19 : vector<2x128xf32>
    %cst_11 = arith.constant 1.000000e+00 : f32
    %21 = vector.broadcast %cst_11 : f32 to vector<2x128xf32>
    %22 = arith.addf %21, %20 : vector<2x128xf32>
    %23 = arith.divf %21, %22 : vector<2x128xf32>
    %24 = vector.extract_strided_slice %11 {offsets = [0, 256], sizes = [2, 128], strides = [1, 1]} : vector<2x512xf32> to vector<2x128xf32>
    %25 = math.tanh %24 : vector<2x128xf32>
    %26 = vector.extract_strided_slice %11 {offsets = [0, 384], sizes = [2, 128], strides = [1, 1]} : vector<2x512xf32> to vector<2x128xf32>
    %27 = arith.negf %26 : vector<2x128xf32>
    %28 = math.exp %27 : vector<2x128xf32>
    %cst_12 = arith.constant 1.000000e+00 : f32
    %29 = vector.broadcast %cst_12 : f32 to vector<2x128xf32>
    %30 = arith.addf %29, %28 : vector<2x128xf32>
    %31 = arith.divf %29, %30 : vector<2x128xf32>
    %32 = arith.mulf %23, %3 : vector<2x128xf32>
    %33 = arith.mulf %17, %25 : vector<2x128xf32>
    %34 = arith.addf %32, %33 : vector<2x128xf32>
    %35 = math.tanh %34 : vector<2x128xf32>
    %36 = arith.mulf %31, %35 : vector<2x128xf32>
    %37 = vector.extract_strided_slice %36 {offsets = [0, 0], sizes = [1, 64], strides = [1, 1]} : vector<2x128xf32> to vector<1x64xf32>
    %c0_13 = arith.constant 0 : index
    %c0_14 = arith.constant 0 : index
    %38 = vector.load %arg10[%c0_13, %c0_14] : memref<8x256xf32, #tpu.memory_space<vmem>>, vector<1x64xf32>
    tpu.vector_store %arg10[%c0_13, %c0_14], %37 {strides = array<i32>} : memref<8x256xf32, #tpu.memory_space<vmem>>, vector<1x64xf32>,
    %39 = vector.extract_strided_slice %36 {offsets = [0, 64], sizes = [1, 64], strides = [1, 1]} : vector<2x128xf32> to vector<1x64xf32>
    %c7_15 = arith.constant 7 : index
    %c64 = arith.constant 64 : index
    %40 = vector.load %arg10[%c7_15, %c64] : memref<8x256xf32, #tpu.memory_space<vmem>>, vector<1x64xf32>
    tpu.vector_store %arg10[%c7_15, %c64], %39 {strides = array<i32>} : memref<8x256xf32, #tpu.memory_space<vmem>>, vector<1x64xf32>,
    %41 = vector.extract_strided_slice %36 {offsets = [1, 0], sizes = [1, 64], strides = [1, 1]} : vector<2x128xf32> to vector<1x64xf32>
    %c0_16 = arith.constant 0 : index
    %c128 = arith.constant 128 : index
    %42 = vector.load %arg10[%c0_16, %c128] : memref<8x256xf32, #tpu.memory_space<vmem>>, vector<1x64xf32>
    tpu.vector_store %arg10[%c0_16, %c128], %41 {strides = array<i32>} : memref<8x256xf32, #tpu.memory_space<vmem>>, vector<1x64xf32>,
    %43 = vector.extract_strided_slice %36 {offsets = [1, 64], sizes = [1, 64], strides = [1, 1]} : vector<2x128xf32> to vector<1x64xf32>
    %c7_17 = arith.constant 7 : index
    %c192 = arith.constant 192 : index
    %44 = vector.load %arg10[%c7_17, %c192] : memref<8x256xf32, #tpu.memory_space<vmem>>, vector<1x64xf32>
    tpu.vector_store %arg10[%c7_17, %c192], %43 {strides = array<i32>} : memref<8x256xf32, #tpu.memory_space<vmem>>, vector<1x64xf32>,
    %c1 = arith.constant 1 : index
    %c0_18 = arith.constant 0 : index
    %c0_19 = arith.constant 0 : index
    %45 = vector.load %arg0[%c1, %c0_18, %c0_19] : memref<8x2x32xf32, #tpu.memory_space<vmem>>, vector<1x2x32xf32>
    %46 = vector.shape_cast %45 : vector<1x2x32xf32> to vector<2x32xf32>
    %c6 = arith.constant 6 : index
    %c0_20 = arith.constant 0 : index
    %c0_21 = arith.constant 0 : index
    %47 = vector.load %arg0[%c6, %c0_20, %c0_21] : memref<8x2x32xf32, #tpu.memory_space<vmem>>, vector<1x2x32xf32>
    %48 = vector.shape_cast %47 : vector<1x2x32xf32> to vector<2x32xf32>
    %49 = tpu.concatenate %46, %48, %36 in 1 : vector<2x32xf32>, vector<2x32xf32>, vector<2x128xf32> -> vector<2x192xf32>
    %cst_22 = arith.constant dense<0.000000e+00> : vector<2x512xf32>
    %50 = tpu.matmul %49, %0, %cst_22 {dimension_numbers = #tpu.dot_dimension_numbers<[1], [0], [0], [1], [0, 0, 1, 1], [], []>} : vector<2x192xf32>, vector<192x512xf32>, vector<2x512xf32> -> vector<2x512xf32>
    %51 = vector.broadcast %1 : vector<1x512xf32> to vector<2x512xf32>
    %52 = arith.addf %50, %51 : vector<2x512xf32>
    %53 = vector.extract_strided_slice %52 {offsets = [0, 0], sizes = [2, 128], strides = [1, 1]} : vector<2x512xf32> to vector<2x128xf32>
    %54 = arith.negf %53 : vector<2x128xf32>
    %55 = math.exp %54 : vector<2x128xf32>
    %cst_23 = arith.constant 1.000000e+00 : f32
    %56 = vector.broadcast %cst_23 : f32 to vector<2x128xf32>
    %57 = arith.addf %56, %55 : vector<2x128xf32>
    %58 = arith.divf %56, %57 : vector<2x128xf32>
    %59 = vector.extract_strided_slice %52 {offsets = [0, 128], sizes = [2, 128], strides = [1, 1]} : vector<2x512xf32> to vector<2x128xf32>
    %60 = arith.negf %59 : vector<2x128xf32>
    %61 = math.exp %60 : vector<2x128xf32>
    %cst_24 = arith.constant 1.000000e+00 : f32
    %62 = vector.broadcast %cst_24 : f32 to vector<2x128xf32>
    %63 = arith.addf %62, %61 : vector<2x128xf32>
    %64 = arith.divf %62, %63 : vector<2x128xf32>
    %65 = vector.extract_strided_slice %52 {offsets = [0, 256], sizes = [2, 128], strides = [1, 1]} : vector<2x512xf32> to vector<2x128xf32>
    %66 = math.tanh %65 : vector<2x128xf32>
    %67 = vector.extract_strided_slice %52 {offsets = [0, 384], sizes = [2, 128], strides = [1, 1]} : vector<2x512xf32> to vector<2x128xf32>
    %68 = arith.negf %67 : vector<2x128xf32>
    %69 = math.exp %68 : vector<2x128xf32>
    %cst_25 = arith.constant 1.000000e+00 : f32
    %70 = vector.broadcast %cst_25 : f32 to vector<2x128xf32>
    %71 = arith.addf %70, %69 : vector<2x128xf32>
    %72 = arith.divf %70, %71 : vector<2x128xf32>
    %73 = arith.mulf %64, %34 : vector<2x128xf32>
    %74 = arith.mulf %58, %66 : vector<2x128xf32>
    %75 = arith.addf %73, %74 : vector<2x128xf32>
    %76 = math.tanh %75 : vector<2x128xf32>
    %77 = arith.mulf %72, %76 : vector<2x128xf32>
    %78 = vector.extract_strided_slice %77 {offsets = [0, 0], sizes = [1, 64], strides = [1, 1]} : vector<2x128xf32> to vector<1x64xf32>
    %c1_26 = arith.constant 1 : index
    %c0_27 = arith.constant 0 : index
    %79 = vector.load %arg10[%c1_26, %c0_27] : memref<8x256xf32, #tpu.memory_space<vmem>>, vector<1x64xf32>
    tpu.vector_store %arg10[%c1_26, %c0_27], %78 {strides = array<i32>} : memref<8x256xf32, #tpu.memory_space<vmem>>, vector<1x64xf32>,
    %80 = vector.extract_strided_slice %77 {offsets = [0, 64], sizes = [1, 64], strides = [1, 1]} : vector<2x128xf32> to vector<1x64xf32>
    %c6_28 = arith.constant 6 : index
    %c64_29 = arith.constant 64 : index
    %81 = vector.load %arg10[%c6_28, %c64_29] : memref<8x256xf32, #tpu.memory_space<vmem>>, vector<1x64xf32>
    tpu.vector_store %arg10[%c6_28, %c64_29], %80 {strides = array<i32>} : memref<8x256xf32, #tpu.memory_space<vmem>>, vector<1x64xf32>,
    %82 = vector.extract_strided_slice %77 {offsets = [1, 0], sizes = [1, 64], strides = [1, 1]} : vector<2x128xf32> to vector<1x64xf32>
    %c1_30 = arith.constant 1 : index
    %c128_31 = arith.constant 128 : index
    %83 = vector.load %arg10[%c1_30, %c128_31] : memref<8x256xf32, #tpu.memory_space<vmem>>, vector<1x64xf32>
    tpu.vector_store %arg10[%c1_30, %c128_31], %82 {strides = array<i32>} : memref<8x256xf32, #tpu.memory_space<vmem>>, vector<1x64xf32>,
    %84 = vector.extract_strided_slice %77 {offsets = [1, 64], sizes = [1, 64], strides = [1, 1]} : vector<2x128xf32> to vector<1x64xf32>
    %c6_32 = arith.constant 6 : index
    %c192_33 = arith.constant 192 : index
    %85 = vector.load %arg10[%c6_32, %c192_33] : memref<8x256xf32, #tpu.memory_space<vmem>>, vector<1x64xf32>
    tpu.vector_store %arg10[%c6_32, %c192_33], %84 {strides = array<i32>} : memref<8x256xf32, #tpu.memory_space<vmem>>, vector<1x64xf32>,
    %c2 = arith.constant 2 : index
    %c0_34 = arith.constant 0 : index
    %c0_35 = arith.constant 0 : index
    %86 = vector.load %arg0[%c2, %c0_34, %c0_35] : memref<8x2x32xf32, #tpu.memory_space<vmem>>, vector<1x2x32xf32>
    %87 = vector.shape_cast %86 : vector<1x2x32xf32> to vector<2x32xf32>
    %c5 = arith.constant 5 : index
    %c0_36 = arith.constant 0 : index
    %c0_37 = arith.constant 0 : index
    %88 = vector.load %arg0[%c5, %c0_36, %c0_37] : memref<8x2x32xf32, #tpu.memory_space<vmem>>, vector<1x2x32xf32>
    %89 = vector.shape_cast %88 : vector<1x2x32xf32> to vector<2x32xf32>
    %90 = tpu.concatenate %87, %89, %77 in 1 : vector<2x32xf32>, vector<2x32xf32>, vector<2x128xf32> -> vector<2x192xf32>
    %cst_38 = arith.constant dense<0.000000e+00> : vector<2x512xf32>
    %91 = tpu.matmul %90, %0, %cst_38 {dimension_numbers = #tpu.dot_dimension_numbers<[1], [0], [0], [1], [0, 0, 1, 1], [], []>} : vector<2x192xf32>, vector<192x512xf32>, vector<2x512xf32> -> vector<2x512xf32>
    %92 = vector.broadcast %1 : vector<1x512xf32> to vector<2x512xf32>
    %93 = arith.addf %91, %92 : vector<2x512xf32>
    %94 = vector.extract_strided_slice %93 {offsets = [0, 0], sizes = [2, 128], strides = [1, 1]} : vector<2x512xf32> to vector<2x128xf32>
    %95 = arith.negf %94 : vector<2x128xf32>
    %96 = math.exp %95 : vector<2x128xf32>
    %cst_39 = arith.constant 1.000000e+00 : f32
    %97 = vector.broadcast %cst_39 : f32 to vector<2x128xf32>
    %98 = arith.addf %97, %96 : vector<2x128xf32>
    %99 = arith.divf %97, %98 : vector<2x128xf32>
    %100 = vector.extract_strided_slice %93 {offsets = [0, 128], sizes = [2, 128], strides = [1, 1]} : vector<2x512xf32> to vector<2x128xf32>
    %101 = arith.negf %100 : vector<2x128xf32>
    %102 = math.exp %101 : vector<2x128xf32>
    %cst_40 = arith.constant 1.000000e+00 : f32
    %103 = vector.broadcast %cst_40 : f32 to vector<2x128xf32>
    %104 = arith.addf %103, %102 : vector<2x128xf32>
    %105 = arith.divf %103, %104 : vector<2x128xf32>
    %106 = vector.extract_strided_slice %93 {offsets = [0, 256], sizes = [2, 128], strides = [1, 1]} : vector<2x512xf32> to vector<2x128xf32>
    %107 = math.tanh %106 : vector<2x128xf32>
    %108 = vector.extract_strided_slice %93 {offsets = [0, 384], sizes = [2, 128], strides = [1, 1]} : vector<2x512xf32> to vector<2x128xf32>
    %109 = arith.negf %108 : vector<2x128xf32>
    %110 = math.exp %109 : vector<2x128xf32>
    %cst_41 = arith.constant 1.000000e+00 : f32
    %111 = vector.broadcast %cst_41 : f32 to vector<2x128xf32>
    %112 = arith.addf %111, %110 : vector<2x128xf32>
    %113 = arith.divf %111, %112 : vector<2x128xf32>
    %114 = arith.mulf %105, %75 : vector<2x128xf32>
    %115 = arith.mulf %99, %107 : vector<2x128xf32>
    %116 = arith.addf %114, %115 : vector<2x128xf32>
    %117 = math.tanh %116 : vector<2x128xf32>
    %118 = arith.mulf %113, %117 : vector<2x128xf32>
    %119 = vector.extract_strided_slice %118 {offsets = [0, 0], sizes = [1, 64], strides = [1, 1]} : vector<2x128xf32> to vector<1x64xf32>
    %c2_42 = arith.constant 2 : index
    %c0_43 = arith.constant 0 : index
    %120 = vector.load %arg10[%c2_42, %c0_43] : memref<8x256xf32, #tpu.memory_space<vmem>>, vector<1x64xf32>
    tpu.vector_store %arg10[%c2_42, %c0_43], %119 {strides = array<i32>} : memref<8x256xf32, #tpu.memory_space<vmem>>, vector<1x64xf32>,
    %121 = vector.extract_strided_slice %118 {offsets = [0, 64], sizes = [1, 64], strides = [1, 1]} : vector<2x128xf32> to vector<1x64xf32>
    %c5_44 = arith.constant 5 : index
    %c64_45 = arith.constant 64 : index
    %122 = vector.load %arg10[%c5_44, %c64_45] : memref<8x256xf32, #tpu.memory_space<vmem>>, vector<1x64xf32>
    tpu.vector_store %arg10[%c5_44, %c64_45], %121 {strides = array<i32>} : memref<8x256xf32, #tpu.memory_space<vmem>>, vector<1x64xf32>,
    %123 = vector.extract_strided_slice %118 {offsets = [1, 0], sizes = [1, 64], strides = [1, 1]} : vector<2x128xf32> to vector<1x64xf32>
    %c2_46 = arith.constant 2 : index
    %c128_47 = arith.constant 128 : index
    %124 = vector.load %arg10[%c2_46, %c128_47] : memref<8x256xf32, #tpu.memory_space<vmem>>, vector<1x64xf32>
    tpu.vector_store %arg10[%c2_46, %c128_47], %123 {strides = array<i32>} : memref<8x256xf32, #tpu.memory_space<vmem>>, vector<1x64xf32>,
    %125 = vector.extract_strided_slice %118 {offsets = [1, 64], sizes = [1, 64], strides = [1, 1]} : vector<2x128xf32> to vector<1x64xf32>
    %c5_48 = arith.constant 5 : index
    %c192_49 = arith.constant 192 : index
    %126 = vector.load %arg10[%c5_48, %c192_49] : memref<8x256xf32, #tpu.memory_space<vmem>>, vector<1x64xf32>
    tpu.vector_store %arg10[%c5_48, %c192_49], %125 {strides = array<i32>} : memref<8x256xf32, #tpu.memory_space<vmem>>, vector<1x64xf32>,
    %c3 = arith.constant 3 : index
    %c0_50 = arith.constant 0 : index
    %c0_51 = arith.constant 0 : index
    %127 = vector.load %arg0[%c3, %c0_50, %c0_51] : memref<8x2x32xf32, #tpu.memory_space<vmem>>, vector<1x2x32xf32>
    %128 = vector.shape_cast %127 : vector<1x2x32xf32> to vector<2x32xf32>
    %c4 = arith.constant 4 : index
    %c0_52 = arith.constant 0 : index
    %c0_53 = arith.constant 0 : index
    %129 = vector.load %arg0[%c4, %c0_52, %c0_53] : memref<8x2x32xf32, #tpu.memory_space<vmem>>, vector<1x2x32xf32>
    %130 = vector.shape_cast %129 : vector<1x2x32xf32> to vector<2x32xf32>
    %131 = tpu.concatenate %128, %130, %118 in 1 : vector<2x32xf32>, vector<2x32xf32>, vector<2x128xf32> -> vector<2x192xf32>
    %cst_54 = arith.constant dense<0.000000e+00> : vector<2x512xf32>
    %132 = tpu.matmul %131, %0, %cst_54 {dimension_numbers = #tpu.dot_dimension_numbers<[1], [0], [0], [1], [0, 0, 1, 1], [], []>} : vector<2x192xf32>, vector<192x512xf32>, vector<2x512xf32> -> vector<2x512xf32>
    %133 = vector.broadcast %1 : vector<1x512xf32> to vector<2x512xf32>
    %134 = arith.addf %132, %133 : vector<2x512xf32>
    %135 = vector.extract_strided_slice %134 {offsets = [0, 0], sizes = [2, 128], strides = [1, 1]} : vector<2x512xf32> to vector<2x128xf32>
    %136 = arith.negf %135 : vector<2x128xf32>
    %137 = math.exp %136 : vector<2x128xf32>
    %cst_55 = arith.constant 1.000000e+00 : f32
    %138 = vector.broadcast %cst_55 : f32 to vector<2x128xf32>
    %139 = arith.addf %138, %137 : vector<2x128xf32>
    %140 = arith.divf %138, %139 : vector<2x128xf32>
    %141 = vector.extract_strided_slice %134 {offsets = [0, 128], sizes = [2, 128], strides = [1, 1]} : vector<2x512xf32> to vector<2x128xf32>
    %142 = arith.negf %141 : vector<2x128xf32>
    %143 = math.exp %142 : vector<2x128xf32>
    %cst_56 = arith.constant 1.000000e+00 : f32
    %144 = vector.broadcast %cst_56 : f32 to vector<2x128xf32>
    %145 = arith.addf %144, %143 : vector<2x128xf32>
    %146 = arith.divf %144, %145 : vector<2x128xf32>
    %147 = vector.extract_strided_slice %134 {offsets = [0, 256], sizes = [2, 128], strides = [1, 1]} : vector<2x512xf32> to vector<2x128xf32>
    %148 = math.tanh %147 : vector<2x128xf32>
    %149 = vector.extract_strided_slice %134 {offsets = [0, 384], sizes = [2, 128], strides = [1, 1]} : vector<2x512xf32> to vector<2x128xf32>
    %150 = arith.negf %149 : vector<2x128xf32>
    %151 = math.exp %150 : vector<2x128xf32>
    %cst_57 = arith.constant 1.000000e+00 : f32
    %152 = vector.broadcast %cst_57 : f32 to vector<2x128xf32>
    %153 = arith.addf %152, %151 : vector<2x128xf32>
    %154 = arith.divf %152, %153 : vector<2x128xf32>
    %155 = arith.mulf %146, %116 : vector<2x128xf32>
    %156 = arith.mulf %140, %148 : vector<2x128xf32>
    %157 = arith.addf %155, %156 : vector<2x128xf32>
    %158 = math.tanh %157 : vector<2x128xf32>
    %159 = arith.mulf %154, %158 : vector<2x128xf32>
    %160 = vector.extract_strided_slice %159 {offsets = [0, 0], sizes = [1, 64], strides = [1, 1]} : vector<2x128xf32> to vector<1x64xf32>
    %c3_58 = arith.constant 3 : index
    %c0_59 = arith.constant 0 : index
    %161 = vector.load %arg10[%c3_58, %c0_59] : memref<8x256xf32, #tpu.memory_space<vmem>>, vector<1x64xf32>
    tpu.vector_store %arg10[%c3_58, %c0_59], %160 {strides = array<i32>} : memref<8x256xf32, #tpu.memory_space<vmem>>, vector<1x64xf32>,
    %162 = vector.extract_strided_slice %159 {offsets = [0, 64], sizes = [1, 64], strides = [1, 1]} : vector<2x128xf32> to vector<1x64xf32>
    %c4_60 = arith.constant 4 : index
    %c64_61 = arith.constant 64 : index
    %163 = vector.load %arg10[%c4_60, %c64_61] : memref<8x256xf32, #tpu.memory_space<vmem>>, vector<1x64xf32>
    tpu.vector_store %arg10[%c4_60, %c64_61], %162 {strides = array<i32>} : memref<8x256xf32, #tpu.memory_space<vmem>>, vector<1x64xf32>,
    %164 = vector.extract_strided_slice %159 {offsets = [1, 0], sizes = [1, 64], strides = [1, 1]} : vector<2x128xf32> to vector<1x64xf32>
    %c3_62 = arith.constant 3 : index
    %c128_63 = arith.constant 128 : index
    %165 = vector.load %arg10[%c3_62, %c128_63] : memref<8x256xf32, #tpu.memory_space<vmem>>, vector<1x64xf32>
    tpu.vector_store %arg10[%c3_62, %c128_63], %164 {strides = array<i32>} : memref<8x256xf32, #tpu.memory_space<vmem>>, vector<1x64xf32>,
    %166 = vector.extract_strided_slice %159 {offsets = [1, 64], sizes = [1, 64], strides = [1, 1]} : vector<2x128xf32> to vector<1x64xf32>
    %c4_64 = arith.constant 4 : index
    %c192_65 = arith.constant 192 : index
    %167 = vector.load %arg10[%c4_64, %c192_65] : memref<8x256xf32, #tpu.memory_space<vmem>>, vector<1x64xf32>
    tpu.vector_store %arg10[%c4_64, %c192_65], %166 {strides = array<i32>} : memref<8x256xf32, #tpu.memory_space<vmem>>, vector<1x64xf32>,
    %c4_66 = arith.constant 4 : index
    %c0_67 = arith.constant 0 : index
    %c0_68 = arith.constant 0 : index
    %168 = vector.load %arg0[%c4_66, %c0_67, %c0_68] : memref<8x2x32xf32, #tpu.memory_space<vmem>>, vector<1x2x32xf32>
    %169 = vector.shape_cast %168 : vector<1x2x32xf32> to vector<2x32xf32>
    %c3_69 = arith.constant 3 : index
    %c0_70 = arith.constant 0 : index
    %c0_71 = arith.constant 0 : index
    %170 = vector.load %arg0[%c3_69, %c0_70, %c0_71] : memref<8x2x32xf32, #tpu.memory_space<vmem>>, vector<1x2x32xf32>
    %171 = vector.shape_cast %170 : vector<1x2x32xf32> to vector<2x32xf32>
    %172 = tpu.concatenate %169, %171, %159 in 1 : vector<2x32xf32>, vector<2x32xf32>, vector<2x128xf32> -> vector<2x192xf32>
    %cst_72 = arith.constant dense<0.000000e+00> : vector<2x512xf32>
    %173 = tpu.matmul %172, %0, %cst_72 {dimension_numbers = #tpu.dot_dimension_numbers<[1], [0], [0], [1], [0, 0, 1, 1], [], []>} : vector<2x192xf32>, vector<192x512xf32>, vector<2x512xf32> -> vector<2x512xf32>
    %174 = vector.broadcast %1 : vector<1x512xf32> to vector<2x512xf32>
    %175 = arith.addf %173, %174 : vector<2x512xf32>
    %176 = vector.extract_strided_slice %175 {offsets = [0, 0], sizes = [2, 128], strides = [1, 1]} : vector<2x512xf32> to vector<2x128xf32>
    %177 = arith.negf %176 : vector<2x128xf32>
    %178 = math.exp %177 : vector<2x128xf32>
    %cst_73 = arith.constant 1.000000e+00 : f32
    %179 = vector.broadcast %cst_73 : f32 to vector<2x128xf32>
    %180 = arith.addf %179, %178 : vector<2x128xf32>
    %181 = arith.divf %179, %180 : vector<2x128xf32>
    %182 = vector.extract_strided_slice %175 {offsets = [0, 128], sizes = [2, 128], strides = [1, 1]} : vector<2x512xf32> to vector<2x128xf32>
    %183 = arith.negf %182 : vector<2x128xf32>
    %184 = math.exp %183 : vector<2x128xf32>
    %cst_74 = arith.constant 1.000000e+00 : f32
    %185 = vector.broadcast %cst_74 : f32 to vector<2x128xf32>
    %186 = arith.addf %185, %184 : vector<2x128xf32>
    %187 = arith.divf %185, %186 : vector<2x128xf32>
    %188 = vector.extract_strided_slice %175 {offsets = [0, 256], sizes = [2, 128], strides = [1, 1]} : vector<2x512xf32> to vector<2x128xf32>
    %189 = math.tanh %188 : vector<2x128xf32>
    %190 = vector.extract_strided_slice %175 {offsets = [0, 384], sizes = [2, 128], strides = [1, 1]} : vector<2x512xf32> to vector<2x128xf32>
    %191 = arith.negf %190 : vector<2x128xf32>
    %192 = math.exp %191 : vector<2x128xf32>
    %cst_75 = arith.constant 1.000000e+00 : f32
    %193 = vector.broadcast %cst_75 : f32 to vector<2x128xf32>
    %194 = arith.addf %193, %192 : vector<2x128xf32>
    %195 = arith.divf %193, %194 : vector<2x128xf32>
    %196 = arith.mulf %187, %157 : vector<2x128xf32>
    %197 = arith.mulf %181, %189 : vector<2x128xf32>
    %198 = arith.addf %196, %197 : vector<2x128xf32>
    %199 = math.tanh %198 : vector<2x128xf32>
    %200 = arith.mulf %195, %199 : vector<2x128xf32>
    %201 = vector.extract_strided_slice %200 {offsets = [0, 0], sizes = [1, 64], strides = [1, 1]} : vector<2x128xf32> to vector<1x64xf32>
    %c4_76 = arith.constant 4 : index
    %c0_77 = arith.constant 0 : index
    %202 = vector.load %arg10[%c4_76, %c0_77] : memref<8x256xf32, #tpu.memory_space<vmem>>, vector<1x64xf32>
    tpu.vector_store %arg10[%c4_76, %c0_77], %201 {strides = array<i32>} : memref<8x256xf32, #tpu.memory_space<vmem>>, vector<1x64xf32>,
    %203 = vector.extract_strided_slice %200 {offsets = [0, 64], sizes = [1, 64], strides = [1, 1]} : vector<2x128xf32> to vector<1x64xf32>
    %c3_78 = arith.constant 3 : index
    %c64_79 = arith.constant 64 : index
    %204 = vector.load %arg10[%c3_78, %c64_79] : memref<8x256xf32, #tpu.memory_space<vmem>>, vector<1x64xf32>
    tpu.vector_store %arg10[%c3_78, %c64_79], %203 {strides = array<i32>} : memref<8x256xf32, #tpu.memory_space<vmem>>, vector<1x64xf32>,
    %205 = vector.extract_strided_slice %200 {offsets = [1, 0], sizes = [1, 64], strides = [1, 1]} : vector<2x128xf32> to vector<1x64xf32>
    %c4_80 = arith.constant 4 : index
    %c128_81 = arith.constant 128 : index
    %206 = vector.load %arg10[%c4_80, %c128_81] : memref<8x256xf32, #tpu.memory_space<vmem>>, vector<1x64xf32>
    tpu.vector_store %arg10[%c4_80, %c128_81], %205 {strides = array<i32>} : memref<8x256xf32, #tpu.memory_space<vmem>>, vector<1x64xf32>,
    %207 = vector.extract_strided_slice %200 {offsets = [1, 64], sizes = [1, 64], strides = [1, 1]} : vector<2x128xf32> to vector<1x64xf32>
    %c3_82 = arith.constant 3 : index
    %c192_83 = arith.constant 192 : index
    %208 = vector.load %arg10[%c3_82, %c192_83] : memref<8x256xf32, #tpu.memory_space<vmem>>, vector<1x64xf32>
    tpu.vector_store %arg10[%c3_82, %c192_83], %207 {strides = array<i32>} : memref<8x256xf32, #tpu.memory_space<vmem>>, vector<1x64xf32>,
    %c5_84 = arith.constant 5 : index
    %c0_85 = arith.constant 0 : index
    %c0_86 = arith.constant 0 : index
    %209 = vector.load %arg0[%c5_84, %c0_85, %c0_86] : memref<8x2x32xf32, #tpu.memory_space<vmem>>, vector<1x2x32xf32>
    %210 = vector.shape_cast %209 : vector<1x2x32xf32> to vector<2x32xf32>
    %c2_87 = arith.constant 2 : index
    %c0_88 = arith.constant 0 : index
    %c0_89 = arith.constant 0 : index
    %211 = vector.load %arg0[%c2_87, %c0_88, %c0_89] : memref<8x2x32xf32, #tpu.memory_space<vmem>>, vector<1x2x32xf32>
    %212 = vector.shape_cast %211 : vector<1x2x32xf32> to vector<2x32xf32>
    %213 = tpu.concatenate %210, %212, %200 in 1 : vector<2x32xf32>, vector<2x32xf32>, vector<2x128xf32> -> vector<2x192xf32>
    %cst_90 = arith.constant dense<0.000000e+00> : vector<2x512xf32>
    %214 = tpu.matmul %213, %0, %cst_90 {dimension_numbers = #tpu.dot_dimension_numbers<[1], [0], [0], [1], [0, 0, 1, 1], [], []>} : vector<2x192xf32>, vector<192x512xf32>, vector<2x512xf32> -> vector<2x512xf32>
    %215 = vector.broadcast %1 : vector<1x512xf32> to vector<2x512xf32>
    %216 = arith.addf %214, %215 : vector<2x512xf32>
    %217 = vector.extract_strided_slice %216 {offsets = [0, 0], sizes = [2, 128], strides = [1, 1]} : vector<2x512xf32> to vector<2x128xf32>
    %218 = arith.negf %217 : vector<2x128xf32>
    %219 = math.exp %218 : vector<2x128xf32>
    %cst_91 = arith.constant 1.000000e+00 : f32
    %220 = vector.broadcast %cst_91 : f32 to vector<2x128xf32>
    %221 = arith.addf %220, %219 : vector<2x128xf32>
    %222 = arith.divf %220, %221 : vector<2x128xf32>
    %223 = vector.extract_strided_slice %216 {offsets = [0, 128], sizes = [2, 128], strides = [1, 1]} : vector<2x512xf32> to vector<2x128xf32>
    %224 = arith.negf %223 : vector<2x128xf32>
    %225 = math.exp %224 : vector<2x128xf32>
    %cst_92 = arith.constant 1.000000e+00 : f32
    %226 = vector.broadcast %cst_92 : f32 to vector<2x128xf32>
    %227 = arith.addf %226, %225 : vector<2x128xf32>
    %228 = arith.divf %226, %227 : vector<2x128xf32>
    %229 = vector.extract_strided_slice %216 {offsets = [0, 256], sizes = [2, 128], strides = [1, 1]} : vector<2x512xf32> to vector<2x128xf32>
    %230 = math.tanh %229 : vector<2x128xf32>
    %231 = vector.extract_strided_slice %216 {offsets = [0, 384], sizes = [2, 128], strides = [1, 1]} : vector<2x512xf32> to vector<2x128xf32>
    %232 = arith.negf %231 : vector<2x128xf32>
    %233 = math.exp %232 : vector<2x128xf32>
    %cst_93 = arith.constant 1.000000e+00 : f32
    %234 = vector.broadcast %cst_93 : f32 to vector<2x128xf32>
    %235 = arith.addf %234, %233 : vector<2x128xf32>
    %236 = arith.divf %234, %235 : vector<2x128xf32>
    %237 = arith.mulf %228, %198 : vector<2x128xf32>
    %238 = arith.mulf %222, %230 : vector<2x128xf32>
    %239 = arith.addf %237, %238 : vector<2x128xf32>
    %240 = math.tanh %239 : vector<2x128xf32>
    %241 = arith.mulf %236, %240 : vector<2x128xf32>
    %242 = vector.extract_strided_slice %241 {offsets = [0, 0], sizes = [1, 64], strides = [1, 1]} : vector<2x128xf32> to vector<1x64xf32>
    %c5_94 = arith.constant 5 : index
    %c0_95 = arith.constant 0 : index
    %243 = vector.load %arg10[%c5_94, %c0_95] : memref<8x256xf32, #tpu.memory_space<vmem>>, vector<1x64xf32>
    tpu.vector_store %arg10[%c5_94, %c0_95], %242 {strides = array<i32>} : memref<8x256xf32, #tpu.memory_space<vmem>>, vector<1x64xf32>,
    %244 = vector.extract_strided_slice %241 {offsets = [0, 64], sizes = [1, 64], strides = [1, 1]} : vector<2x128xf32> to vector<1x64xf32>
    %c2_96 = arith.constant 2 : index
    %c64_97 = arith.constant 64 : index
    %245 = vector.load %arg10[%c2_96, %c64_97] : memref<8x256xf32, #tpu.memory_space<vmem>>, vector<1x64xf32>
    tpu.vector_store %arg10[%c2_96, %c64_97], %244 {strides = array<i32>} : memref<8x256xf32, #tpu.memory_space<vmem>>, vector<1x64xf32>,
    %246 = vector.extract_strided_slice %241 {offsets = [1, 0], sizes = [1, 64], strides = [1, 1]} : vector<2x128xf32> to vector<1x64xf32>
    %c5_98 = arith.constant 5 : index
    %c128_99 = arith.constant 128 : index
    %247 = vector.load %arg10[%c5_98, %c128_99] : memref<8x256xf32, #tpu.memory_space<vmem>>, vector<1x64xf32>
    tpu.vector_store %arg10[%c5_98, %c128_99], %246 {strides = array<i32>} : memref<8x256xf32, #tpu.memory_space<vmem>>, vector<1x64xf32>,
    %248 = vector.extract_strided_slice %241 {offsets = [1, 64], sizes = [1, 64], strides = [1, 1]} : vector<2x128xf32> to vector<1x64xf32>
    %c2_100 = arith.constant 2 : index
    %c192_101 = arith.constant 192 : index
    %249 = vector.load %arg10[%c2_100, %c192_101] : memref<8x256xf32, #tpu.memory_space<vmem>>, vector<1x64xf32>
    tpu.vector_store %arg10[%c2_100, %c192_101], %248 {strides = array<i32>} : memref<8x256xf32, #tpu.memory_space<vmem>>, vector<1x64xf32>,
    %c6_102 = arith.constant 6 : index
    %c0_103 = arith.constant 0 : index
    %c0_104 = arith.constant 0 : index
    %250 = vector.load %arg0[%c6_102, %c0_103, %c0_104] : memref<8x2x32xf32, #tpu.memory_space<vmem>>, vector<1x2x32xf32>
    %251 = vector.shape_cast %250 : vector<1x2x32xf32> to vector<2x32xf32>
    %c1_105 = arith.constant 1 : index
    %c0_106 = arith.constant 0 : index
    %c0_107 = arith.constant 0 : index
    %252 = vector.load %arg0[%c1_105, %c0_106, %c0_107] : memref<8x2x32xf32, #tpu.memory_space<vmem>>, vector<1x2x32xf32>
    %253 = vector.shape_cast %252 : vector<1x2x32xf32> to vector<2x32xf32>
    %254 = tpu.concatenate %251, %253, %241 in 1 : vector<2x32xf32>, vector<2x32xf32>, vector<2x128xf32> -> vector<2x192xf32>
    %cst_108 = arith.constant dense<0.000000e+00> : vector<2x512xf32>
    %255 = tpu.matmul %254, %0, %cst_108 {dimension_numbers = #tpu.dot_dimension_numbers<[1], [0], [0], [1], [0, 0, 1, 1], [], []>} : vector<2x192xf32>, vector<192x512xf32>, vector<2x512xf32> -> vector<2x512xf32>
    %256 = vector.broadcast %1 : vector<1x512xf32> to vector<2x512xf32>
    %257 = arith.addf %255, %256 : vector<2x512xf32>
    %258 = vector.extract_strided_slice %257 {offsets = [0, 0], sizes = [2, 128], strides = [1, 1]} : vector<2x512xf32> to vector<2x128xf32>
    %259 = arith.negf %258 : vector<2x128xf32>
    %260 = math.exp %259 : vector<2x128xf32>
    %cst_109 = arith.constant 1.000000e+00 : f32
    %261 = vector.broadcast %cst_109 : f32 to vector<2x128xf32>
    %262 = arith.addf %261, %260 : vector<2x128xf32>
    %263 = arith.divf %261, %262 : vector<2x128xf32>
    %264 = vector.extract_strided_slice %257 {offsets = [0, 128], sizes = [2, 128], strides = [1, 1]} : vector<2x512xf32> to vector<2x128xf32>
    %265 = arith.negf %264 : vector<2x128xf32>
    %266 = math.exp %265 : vector<2x128xf32>
    %cst_110 = arith.constant 1.000000e+00 : f32
    %267 = vector.broadcast %cst_110 : f32 to vector<2x128xf32>
    %268 = arith.addf %267, %266 : vector<2x128xf32>
    %269 = arith.divf %267, %268 : vector<2x128xf32>
    %270 = vector.extract_strided_slice %257 {offsets = [0, 256], sizes = [2, 128], strides = [1, 1]} : vector<2x512xf32> to vector<2x128xf32>
    %271 = math.tanh %270 : vector<2x128xf32>
    %272 = vector.extract_strided_slice %257 {offsets = [0, 384], sizes = [2, 128], strides = [1, 1]} : vector<2x512xf32> to vector<2x128xf32>
    %273 = arith.negf %272 : vector<2x128xf32>
    %274 = math.exp %273 : vector<2x128xf32>
    %cst_111 = arith.constant 1.000000e+00 : f32
    %275 = vector.broadcast %cst_111 : f32 to vector<2x128xf32>
    %276 = arith.addf %275, %274 : vector<2x128xf32>
    %277 = arith.divf %275, %276 : vector<2x128xf32>
    %278 = arith.mulf %269, %239 : vector<2x128xf32>
    %279 = arith.mulf %263, %271 : vector<2x128xf32>
    %280 = arith.addf %278, %279 : vector<2x128xf32>
    %281 = math.tanh %280 : vector<2x128xf32>
    %282 = arith.mulf %277, %281 : vector<2x128xf32>
    %283 = vector.extract_strided_slice %282 {offsets = [0, 0], sizes = [1, 64], strides = [1, 1]} : vector<2x128xf32> to vector<1x64xf32>
    %c6_112 = arith.constant 6 : index
    %c0_113 = arith.constant 0 : index
    %284 = vector.load %arg10[%c6_112, %c0_113] : memref<8x256xf32, #tpu.memory_space<vmem>>, vector<1x64xf32>
    tpu.vector_store %arg10[%c6_112, %c0_113], %283 {strides = array<i32>} : memref<8x256xf32, #tpu.memory_space<vmem>>, vector<1x64xf32>,
    %285 = vector.extract_strided_slice %282 {offsets = [0, 64], sizes = [1, 64], strides = [1, 1]} : vector<2x128xf32> to vector<1x64xf32>
    %c1_114 = arith.constant 1 : index
    %c64_115 = arith.constant 64 : index
    %286 = vector.load %arg10[%c1_114, %c64_115] : memref<8x256xf32, #tpu.memory_space<vmem>>, vector<1x64xf32>
    tpu.vector_store %arg10[%c1_114, %c64_115], %285 {strides = array<i32>} : memref<8x256xf32, #tpu.memory_space<vmem>>, vector<1x64xf32>,
    %287 = vector.extract_strided_slice %282 {offsets = [1, 0], sizes = [1, 64], strides = [1, 1]} : vector<2x128xf32> to vector<1x64xf32>
    %c6_116 = arith.constant 6 : index
    %c128_117 = arith.constant 128 : index
    %288 = vector.load %arg10[%c6_116, %c128_117] : memref<8x256xf32, #tpu.memory_space<vmem>>, vector<1x64xf32>
    tpu.vector_store %arg10[%c6_116, %c128_117], %287 {strides = array<i32>} : memref<8x256xf32, #tpu.memory_space<vmem>>, vector<1x64xf32>,
    %289 = vector.extract_strided_slice %282 {offsets = [1, 64], sizes = [1, 64], strides = [1, 1]} : vector<2x128xf32> to vector<1x64xf32>
    %c1_118 = arith.constant 1 : index
    %c192_119 = arith.constant 192 : index
    %290 = vector.load %arg10[%c1_118, %c192_119] : memref<8x256xf32, #tpu.memory_space<vmem>>, vector<1x64xf32>
    tpu.vector_store %arg10[%c1_118, %c192_119], %289 {strides = array<i32>} : memref<8x256xf32, #tpu.memory_space<vmem>>, vector<1x64xf32>,
    %c7_120 = arith.constant 7 : index
    %c0_121 = arith.constant 0 : index
    %c0_122 = arith.constant 0 : index
    %291 = vector.load %arg0[%c7_120, %c0_121, %c0_122] : memref<8x2x32xf32, #tpu.memory_space<vmem>>, vector<1x2x32xf32>
    %292 = vector.shape_cast %291 : vector<1x2x32xf32> to vector<2x32xf32>
    %c0_123 = arith.constant 0 : index
    %c0_124 = arith.constant 0 : index
    %c0_125 = arith.constant 0 : index
    %293 = vector.load %arg0[%c0_123, %c0_124, %c0_125] : memref<8x2x32xf32, #tpu.memory_space<vmem>>, vector<1x2x32xf32>
    %294 = vector.shape_cast %293 : vector<1x2x32xf32> to vector<2x32xf32>
    %295 = tpu.concatenate %292, %294, %282 in 1 : vector<2x32xf32>, vector<2x32xf32>, vector<2x128xf32> -> vector<2x192xf32>
    %cst_126 = arith.constant dense<0.000000e+00> : vector<2x512xf32>
    %296 = tpu.matmul %295, %0, %cst_126 {dimension_numbers = #tpu.dot_dimension_numbers<[1], [0], [0], [1], [0, 0, 1, 1], [], []>} : vector<2x192xf32>, vector<192x512xf32>, vector<2x512xf32> -> vector<2x512xf32>
    %297 = vector.broadcast %1 : vector<1x512xf32> to vector<2x512xf32>
    %298 = arith.addf %296, %297 : vector<2x512xf32>
    %299 = vector.extract_strided_slice %298 {offsets = [0, 0], sizes = [2, 128], strides = [1, 1]} : vector<2x512xf32> to vector<2x128xf32>
    %300 = arith.negf %299 : vector<2x128xf32>
    %301 = math.exp %300 : vector<2x128xf32>
    %cst_127 = arith.constant 1.000000e+00 : f32
    %302 = vector.broadcast %cst_127 : f32 to vector<2x128xf32>
    %303 = arith.addf %302, %301 : vector<2x128xf32>
    %304 = arith.divf %302, %303 : vector<2x128xf32>
    %305 = vector.extract_strided_slice %298 {offsets = [0, 128], sizes = [2, 128], strides = [1, 1]} : vector<2x512xf32> to vector<2x128xf32>
    %306 = arith.negf %305 : vector<2x128xf32>
    %307 = math.exp %306 : vector<2x128xf32>
    %cst_128 = arith.constant 1.000000e+00 : f32
    %308 = vector.broadcast %cst_128 : f32 to vector<2x128xf32>
    %309 = arith.addf %308, %307 : vector<2x128xf32>
    %310 = arith.divf %308, %309 : vector<2x128xf32>
    %311 = vector.extract_strided_slice %298 {offsets = [0, 256], sizes = [2, 128], strides = [1, 1]} : vector<2x512xf32> to vector<2x128xf32>
    %312 = math.tanh %311 : vector<2x128xf32>
    %313 = vector.extract_strided_slice %298 {offsets = [0, 384], sizes = [2, 128], strides = [1, 1]} : vector<2x512xf32> to vector<2x128xf32>
    %314 = arith.negf %313 : vector<2x128xf32>
    %315 = math.exp %314 : vector<2x128xf32>
    %cst_129 = arith.constant 1.000000e+00 : f32
    %316 = vector.broadcast %cst_129 : f32 to vector<2x128xf32>
    %317 = arith.addf %316, %315 : vector<2x128xf32>
    %318 = arith.divf %316, %317 : vector<2x128xf32>
    %319 = arith.mulf %310, %280 : vector<2x128xf32>
    %320 = arith.mulf %304, %312 : vector<2x128xf32>
    %321 = arith.addf %319, %320 : vector<2x128xf32>
    %322 = math.tanh %321 : vector<2x128xf32>
    %323 = arith.mulf %318, %322 : vector<2x128xf32>
    %324 = vector.extract_strided_slice %323 {offsets = [0, 0], sizes = [1, 64], strides = [1, 1]} : vector<2x128xf32> to vector<1x64xf32>
    %c7_130 = arith.constant 7 : index
    %c0_131 = arith.constant 0 : index
    %325 = vector.load %arg10[%c7_130, %c0_131] : memref<8x256xf32, #tpu.memory_space<vmem>>, vector<1x64xf32>
    tpu.vector_store %arg10[%c7_130, %c0_131], %324 {strides = array<i32>} : memref<8x256xf32, #tpu.memory_space<vmem>>, vector<1x64xf32>,
    %326 = vector.extract_strided_slice %323 {offsets = [0, 64], sizes = [1, 64], strides = [1, 1]} : vector<2x128xf32> to vector<1x64xf32>
    %c0_132 = arith.constant 0 : index
    %c64_133 = arith.constant 64 : index
    %327 = vector.load %arg10[%c0_132, %c64_133] : memref<8x256xf32, #tpu.memory_space<vmem>>, vector<1x64xf32>
    tpu.vector_store %arg10[%c0_132, %c64_133], %326 {strides = array<i32>} : memref<8x256xf32, #tpu.memory_space<vmem>>, vector<1x64xf32>,
    %328 = vector.extract_strided_slice %323 {offsets = [1, 0], sizes = [1, 64], strides = [1, 1]} : vector<2x128xf32> to vector<1x64xf32>
    %c7_134 = arith.constant 7 : index
    %c128_135 = arith.constant 128 : index
    %329 = vector.load %arg10[%c7_134, %c128_135] : memref<8x256xf32, #tpu.memory_space<vmem>>, vector<1x64xf32>
    tpu.vector_store %arg10[%c7_134, %c128_135], %328 {strides = array<i32>} : memref<8x256xf32, #tpu.memory_space<vmem>>, vector<1x64xf32>,
    %330 = vector.extract_strided_slice %323 {offsets = [1, 64], sizes = [1, 64], strides = [1, 1]} : vector<2x128xf32> to vector<1x64xf32>
    %c0_136 = arith.constant 0 : index
    %c192_137 = arith.constant 192 : index
    %331 = vector.load %arg10[%c0_136, %c192_137] : memref<8x256xf32, #tpu.memory_space<vmem>>, vector<1x64xf32>
    tpu.vector_store %arg10[%c0_136, %c192_137], %330 {strides = array<i32>} : memref<8x256xf32, #tpu.memory_space<vmem>>, vector<1x64xf32>,
    %c0_138 = arith.constant 0 : index
    %c0_139 = arith.constant 0 : index
    %332 = vector.load %arg10[%c0_138, %c0_139] : memref<8x256xf32, #tpu.memory_space<vmem>>, vector<8x256xf32>
    %c0_140 = arith.constant 0 : index
    %c0_141 = arith.constant 0 : index
    %333 = vector.load %arg6[%c0_140, %c0_141] : memref<128x128xf32, #tpu.memory_space<vmem>>, vector<128x128xf32>
    %c0_142 = arith.constant 0 : index
    %c0_143 = arith.constant 0 : index
    %334 = vector.load %arg7[%c0_142, %c0_143] : memref<1x128xf32, #tpu.memory_space<vmem>>, vector<1x128xf32>
    %335 = vector.extract_strided_slice %332 {offsets = [0, 0], sizes = [8, 128], strides = [1, 1]} : vector<8x256xf32> to vector<8x128xf32>
    %cst_144 = arith.constant dense<0.000000e+00> : vector<8x128xf32>
    %336 = tpu.matmul %335, %333, %cst_144 {dimension_numbers = #tpu.dot_dimension_numbers<[1], [0], [0], [1], [0, 0, 1, 1], [], []>} : vector<8x128xf32>, vector<128x128xf32>, vector<8x128xf32> -> vector<8x128xf32>
    %337 = vector.broadcast %334 : vector<1x128xf32> to vector<8x128xf32>
    %338 = arith.addf %336, %337 : vector<8x128xf32>
    %339 = vector.extract_strided_slice %332 {offsets = [0, 128], sizes = [8, 128], strides = [1, 1]} : vector<8x256xf32> to vector<8x128xf32>
    %cst_145 = arith.constant dense<0.000000e+00> : vector<8x128xf32>
    %340 = tpu.matmul %339, %333, %cst_145 {dimension_numbers = #tpu.dot_dimension_numbers<[1], [0], [0], [1], [0, 0, 1, 1], [], []>} : vector<8x128xf32>, vector<128x128xf32>, vector<8x128xf32> -> vector<8x128xf32>
    %341 = vector.broadcast %334 : vector<1x128xf32> to vector<8x128xf32>
    %342 = arith.addf %340, %341 : vector<8x128xf32>
    %343 = tpu.concatenate %338, %342 in 1 : vector<8x128xf32>, vector<8x128xf32> -> vector<8x256xf32>
    %c0_146 = arith.constant 0 : index
    %c0_147 = arith.constant 0 : index
    %344 = vector.load %arg4[%c0_146, %c0_147] : memref<160x512xf32, #tpu.memory_space<vmem>>, vector<160x512xf32>
    %c0_148 = arith.constant 0 : index
    %c0_149 = arith.constant 0 : index
    %345 = vector.load %arg5[%c0_148, %c0_149] : memref<1x512xf32, #tpu.memory_space<vmem>>, vector<1x512xf32>
    %c0_150 = arith.constant 0 : index
    %c0_151 = arith.constant 0 : index
    %346 = vector.load %arg8[%c0_150, %c0_151] : memref<256x128xf32, #tpu.memory_space<vmem>>, vector<256x128xf32>
    %c0_152 = arith.constant 0 : index
    %c0_153 = arith.constant 0 : index
    %347 = vector.load %arg9[%c0_152, %c0_153] : memref<1x128xf32, #tpu.memory_space<vmem>>, vector<1x128xf32>
    %c0_154 = arith.constant 0 : index
    %c0_155 = arith.constant 0 : index
    %c0_156 = arith.constant 0 : index
    %348 = vector.load %arg1[%c0_154, %c0_155, %c0_156] : memref<5x2x32xf32, #tpu.memory_space<vmem>>, vector<1x2x32xf32>
    %349 = vector.shape_cast %348 : vector<1x2x32xf32> to vector<2x32xf32>
    %350 = tpu.concatenate %349, %323 in 1 : vector<2x32xf32>, vector<2x128xf32> -> vector<2x160xf32>
    %cst_157 = arith.constant dense<0.000000e+00> : vector<2x512xf32>
    %351 = tpu.matmul %350, %344, %cst_157 {dimension_numbers = #tpu.dot_dimension_numbers<[1], [0], [0], [1], [0, 0, 1, 1], [], []>} : vector<2x160xf32>, vector<160x512xf32>, vector<2x512xf32> -> vector<2x512xf32>
    %352 = vector.broadcast %345 : vector<1x512xf32> to vector<2x512xf32>
    %353 = arith.addf %351, %352 : vector<2x512xf32>
    %354 = vector.extract_strided_slice %353 {offsets = [0, 0], sizes = [2, 128], strides = [1, 1]} : vector<2x512xf32> to vector<2x128xf32>
    %355 = arith.negf %354 : vector<2x128xf32>
    %356 = math.exp %355 : vector<2x128xf32>
    %cst_158 = arith.constant 1.000000e+00 : f32
    %357 = vector.broadcast %cst_158 : f32 to vector<2x128xf32>
    %358 = arith.addf %357, %356 : vector<2x128xf32>
    %359 = arith.divf %357, %358 : vector<2x128xf32>
    %360 = vector.extract_strided_slice %353 {offsets = [0, 128], sizes = [2, 128], strides = [1, 1]} : vector<2x512xf32> to vector<2x128xf32>
    %361 = arith.negf %360 : vector<2x128xf32>
    %362 = math.exp %361 : vector<2x128xf32>
    %cst_159 = arith.constant 1.000000e+00 : f32
    %363 = vector.broadcast %cst_159 : f32 to vector<2x128xf32>
    %364 = arith.addf %363, %362 : vector<2x128xf32>
    %365 = arith.divf %363, %364 : vector<2x128xf32>
    %366 = vector.extract_strided_slice %353 {offsets = [0, 256], sizes = [2, 128], strides = [1, 1]} : vector<2x512xf32> to vector<2x128xf32>
    %367 = math.tanh %366 : vector<2x128xf32>
    %368 = vector.extract_strided_slice %353 {offsets = [0, 384], sizes = [2, 128], strides = [1, 1]} : vector<2x512xf32> to vector<2x128xf32>
    %369 = arith.negf %368 : vector<2x128xf32>
    %370 = math.exp %369 : vector<2x128xf32>
    %cst_160 = arith.constant 1.000000e+00 : f32
    %371 = vector.broadcast %cst_160 : f32 to vector<2x128xf32>
    %372 = arith.addf %371, %370 : vector<2x128xf32>
    %373 = arith.divf %371, %372 : vector<2x128xf32>
    %374 = arith.mulf %365, %321 : vector<2x128xf32>
    %375 = arith.mulf %359, %367 : vector<2x128xf32>
    %376 = arith.addf %374, %375 : vector<2x128xf32>
    %377 = math.tanh %376 : vector<2x128xf32>
    %378 = arith.mulf %373, %377 : vector<2x128xf32>
    %379 = vector.extract_strided_slice %378 {offsets = [0, 0], sizes = [1, 128], strides = [1, 1]} : vector<2x128xf32> to vector<1x128xf32>
    %380 = vector.extract_strided_slice %378 {offsets = [1, 0], sizes = [1, 128], strides = [1, 1]} : vector<2x128xf32> to vector<1x128xf32>
    %381 = tpu.concatenate %379, %380 in 1 : vector<1x128xf32>, vector<1x128xf32> -> vector<1x256xf32>
    %cst_161 = arith.constant dense<0.000000e+00> : vector<1x8xf32>
    %382 = tpu.matmul %381, %343, %cst_161 {dimension_numbers = #tpu.dot_dimension_numbers<[1], [1], [0], [0], [0, 0, 1, 0], [], []>} : vector<1x256xf32>, vector<8x256xf32>, vector<1x8xf32> -> vector<1x8xf32>
    %cst_162 = arith.constant dense<0xFF800000> : vector<1xf32>
    %383 = vector.multi_reduction <maximumf>, %382, %cst_162 [1] : vector<1x8xf32> to vector<1xf32>
    %384 = vector.shape_cast %383 : vector<1xf32> to vector<1x1xf32>
    %385 = vector.broadcast %384 : vector<1x1xf32> to vector<1x8xf32>
    %386 = arith.subf %382, %385 : vector<1x8xf32>
    %387 = math.exp %386 : vector<1x8xf32>
    %cst_163 = arith.constant dense<0.000000e+00> : vector<1xf32>
    %388 = vector.multi_reduction <add>, %387, %cst_163 [1] : vector<1x8xf32> to vector<1xf32>
    %389 = vector.shape_cast %388 : vector<1xf32> to vector<1x1xf32>
    %390 = tpu.reciprocal %389 {approx = true} : vector<1x1xf32> -> vector<1x1xf32>
    %391 = vector.broadcast %390 : vector<1x1xf32> to vector<1x8xf32>
    %392 = arith.mulf %387, %391 : vector<1x8xf32>
    %cst_164 = arith.constant dense<0.000000e+00> : vector<1x256xf32>
    %393 = tpu.matmul %392, %332, %cst_164 {dimension_numbers = #tpu.dot_dimension_numbers<[1], [0], [0], [1], [0, 0, 1, 1], [], []>} : vector<1x8xf32>, vector<8x256xf32>, vector<1x256xf32> -> vector<1x256xf32>
    %394 = vector.extract_strided_slice %393 {offsets = [0, 0], sizes = [1, 128], strides = [1, 1]} : vector<1x256xf32> to vector<1x128xf32>
    %395 = vector.extract_strided_slice %393 {offsets = [0, 128], sizes = [1, 128], strides = [1, 1]} : vector<1x256xf32> to vector<1x128xf32>
    %396 = tpu.concatenate %394, %395 in 0 : vector<1x128xf32>, vector<1x128xf32> -> vector<2x128xf32>
    %397 = tpu.concatenate %378, %396 in 1 : vector<2x128xf32>, vector<2x128xf32> -> vector<2x256xf32>
    %cst_165 = arith.constant dense<0.000000e+00> : vector<2x128xf32>
    %398 = tpu.matmul %397, %346, %cst_165 {dimension_numbers = #tpu.dot_dimension_numbers<[1], [0], [0], [1], [0, 0, 1, 1], [], []>} : vector<2x256xf32>, vector<256x128xf32>, vector<2x128xf32> -> vector<2x128xf32>
    %399 = vector.broadcast %347 : vector<1x128xf32> to vector<2x128xf32>
    %400 = arith.addf %398, %399 : vector<2x128xf32>
    %c0_166 = arith.constant 0 : index
    %c0_167 = arith.constant 0 : index
    %c0_168 = arith.constant 0 : index
    %401 = vector.load %arg11[%c0_166, %c0_167, %c0_168] : memref<5x2x128xf32, #tpu.memory_space<vmem>>, vector<1x2x128xf32>
    %402 = vector.shape_cast %401 : vector<1x2x128xf32> to vector<2x128xf32>
    %403 = vector.shape_cast %400 : vector<2x128xf32> to vector<1x2x128xf32>
    tpu.vector_store %arg11[%c0_166, %c0_167, %c0_168], %403 {strides = array<i32>} : memref<5x2x128xf32, #tpu.memory_space<vmem>>, vector<1x2x128xf32>,
    %c1_169 = arith.constant 1 : index
    %c0_170 = arith.constant 0 : index
    %c0_171 = arith.constant 0 : index
    %404 = vector.load %arg1[%c1_169, %c0_170, %c0_171] : memref<5x2x32xf32, #tpu.memory_space<vmem>>, vector<1x2x32xf32>
    %405 = vector.shape_cast %404 : vector<1x2x32xf32> to vector<2x32xf32>
    %406 = tpu.concatenate %405, %378 in 1 : vector<2x32xf32>, vector<2x128xf32> -> vector<2x160xf32>
    %cst_172 = arith.constant dense<0.000000e+00> : vector<2x512xf32>
    %407 = tpu.matmul %406, %344, %cst_172 {dimension_numbers = #tpu.dot_dimension_numbers<[1], [0], [0], [1], [0, 0, 1, 1], [], []>} : vector<2x160xf32>, vector<160x512xf32>, vector<2x512xf32> -> vector<2x512xf32>
    %408 = vector.broadcast %345 : vector<1x512xf32> to vector<2x512xf32>
    %409 = arith.addf %407, %408 : vector<2x512xf32>
    %410 = vector.extract_strided_slice %409 {offsets = [0, 0], sizes = [2, 128], strides = [1, 1]} : vector<2x512xf32> to vector<2x128xf32>
    %411 = arith.negf %410 : vector<2x128xf32>
    %412 = math.exp %411 : vector<2x128xf32>
    %cst_173 = arith.constant 1.000000e+00 : f32
    %413 = vector.broadcast %cst_173 : f32 to vector<2x128xf32>
    %414 = arith.addf %413, %412 : vector<2x128xf32>
    %415 = arith.divf %413, %414 : vector<2x128xf32>
    %416 = vector.extract_strided_slice %409 {offsets = [0, 128], sizes = [2, 128], strides = [1, 1]} : vector<2x512xf32> to vector<2x128xf32>
    %417 = arith.negf %416 : vector<2x128xf32>
    %418 = math.exp %417 : vector<2x128xf32>
    %cst_174 = arith.constant 1.000000e+00 : f32
    %419 = vector.broadcast %cst_174 : f32 to vector<2x128xf32>
    %420 = arith.addf %419, %418 : vector<2x128xf32>
    %421 = arith.divf %419, %420 : vector<2x128xf32>
    %422 = vector.extract_strided_slice %409 {offsets = [0, 256], sizes = [2, 128], strides = [1, 1]} : vector<2x512xf32> to vector<2x128xf32>
    %423 = math.tanh %422 : vector<2x128xf32>
    %424 = vector.extract_strided_slice %409 {offsets = [0, 384], sizes = [2, 128], strides = [1, 1]} : vector<2x512xf32> to vector<2x128xf32>
    %425 = arith.negf %424 : vector<2x128xf32>
    %426 = math.exp %425 : vector<2x128xf32>
    %cst_175 = arith.constant 1.000000e+00 : f32
    %427 = vector.broadcast %cst_175 : f32 to vector<2x128xf32>
    %428 = arith.addf %427, %426 : vector<2x128xf32>
    %429 = arith.divf %427, %428 : vector<2x128xf32>
    %430 = arith.mulf %421, %376 : vector<2x128xf32>
    %431 = arith.mulf %415, %423 : vector<2x128xf32>
    %432 = arith.addf %430, %431 : vector<2x128xf32>
    %433 = math.tanh %432 : vector<2x128xf32>
    %434 = arith.mulf %429, %433 : vector<2x128xf32>
    %435 = vector.extract_strided_slice %434 {offsets = [0, 0], sizes = [1, 128], strides = [1, 1]} : vector<2x128xf32> to vector<1x128xf32>
    %436 = vector.extract_strided_slice %434 {offsets = [1, 0], sizes = [1, 128], strides = [1, 1]} : vector<2x128xf32> to vector<1x128xf32>
    %437 = tpu.concatenate %435, %436 in 1 : vector<1x128xf32>, vector<1x128xf32> -> vector<1x256xf32>
    %cst_176 = arith.constant dense<0.000000e+00> : vector<1x8xf32>
    %438 = tpu.matmul %437, %343, %cst_176 {dimension_numbers = #tpu.dot_dimension_numbers<[1], [1], [0], [0], [0, 0, 1, 0], [], []>} : vector<1x256xf32>, vector<8x256xf32>, vector<1x8xf32> -> vector<1x8xf32>
    %cst_177 = arith.constant dense<0xFF800000> : vector<1xf32>
    %439 = vector.multi_reduction <maximumf>, %438, %cst_177 [1] : vector<1x8xf32> to vector<1xf32>
    %440 = vector.shape_cast %439 : vector<1xf32> to vector<1x1xf32>
    %441 = vector.broadcast %440 : vector<1x1xf32> to vector<1x8xf32>
    %442 = arith.subf %438, %441 : vector<1x8xf32>
    %443 = math.exp %442 : vector<1x8xf32>
    %cst_178 = arith.constant dense<0.000000e+00> : vector<1xf32>
    %444 = vector.multi_reduction <add>, %443, %cst_178 [1] : vector<1x8xf32> to vector<1xf32>
    %445 = vector.shape_cast %444 : vector<1xf32> to vector<1x1xf32>
    %446 = tpu.reciprocal %445 {approx = true} : vector<1x1xf32> -> vector<1x1xf32>
    %447 = vector.broadcast %446 : vector<1x1xf32> to vector<1x8xf32>
    %448 = arith.mulf %443, %447 : vector<1x8xf32>
    %cst_179 = arith.constant dense<0.000000e+00> : vector<1x256xf32>
    %449 = tpu.matmul %448, %332, %cst_179 {dimension_numbers = #tpu.dot_dimension_numbers<[1], [0], [0], [1], [0, 0, 1, 1], [], []>} : vector<1x8xf32>, vector<8x256xf32>, vector<1x256xf32> -> vector<1x256xf32>
    %450 = vector.extract_strided_slice %449 {offsets = [0, 0], sizes = [1, 128], strides = [1, 1]} : vector<1x256xf32> to vector<1x128xf32>
    %451 = vector.extract_strided_slice %449 {offsets = [0, 128], sizes = [1, 128], strides = [1, 1]} : vector<1x256xf32> to vector<1x128xf32>
    %452 = tpu.concatenate %450, %451 in 0 : vector<1x128xf32>, vector<1x128xf32> -> vector<2x128xf32>
    %453 = tpu.concatenate %434, %452 in 1 : vector<2x128xf32>, vector<2x128xf32> -> vector<2x256xf32>
    %cst_180 = arith.constant dense<0.000000e+00> : vector<2x128xf32>
    %454 = tpu.matmul %453, %346, %cst_180 {dimension_numbers = #tpu.dot_dimension_numbers<[1], [0], [0], [1], [0, 0, 1, 1], [], []>} : vector<2x256xf32>, vector<256x128xf32>, vector<2x128xf32> -> vector<2x128xf32>
    %455 = vector.broadcast %347 : vector<1x128xf32> to vector<2x128xf32>
    %456 = arith.addf %454, %455 : vector<2x128xf32>
    %c1_181 = arith.constant 1 : index
    %c0_182 = arith.constant 0 : index
    %c0_183 = arith.constant 0 : index
    %457 = vector.load %arg11[%c1_181, %c0_182, %c0_183] : memref<5x2x128xf32, #tpu.memory_space<vmem>>, vector<1x2x128xf32>
    %458 = vector.shape_cast %457 : vector<1x2x128xf32> to vector<2x128xf32>
    %459 = vector.shape_cast %456 : vector<2x128xf32> to vector<1x2x128xf32>
    tpu.vector_store %arg11[%c1_181, %c0_182, %c0_183], %459 {strides = array<i32>} : memref<5x2x128xf32, #tpu.memory_space<vmem>>, vector<1x2x128xf32>,
    %c2_184 = arith.constant 2 : index
    %c0_185 = arith.constant 0 : index
    %c0_186 = arith.constant 0 : index
    %460 = vector.load %arg1[%c2_184, %c0_185, %c0_186] : memref<5x2x32xf32, #tpu.memory_space<vmem>>, vector<1x2x32xf32>
    %461 = vector.shape_cast %460 : vector<1x2x32xf32> to vector<2x32xf32>
    %462 = tpu.concatenate %461, %434 in 1 : vector<2x32xf32>, vector<2x128xf32> -> vector<2x160xf32>
    %cst_187 = arith.constant dense<0.000000e+00> : vector<2x512xf32>
    %463 = tpu.matmul %462, %344, %cst_187 {dimension_numbers = #tpu.dot_dimension_numbers<[1], [0], [0], [1], [0, 0, 1, 1], [], []>} : vector<2x160xf32>, vector<160x512xf32>, vector<2x512xf32> -> vector<2x512xf32>
    %464 = vector.broadcast %345 : vector<1x512xf32> to vector<2x512xf32>
    %465 = arith.addf %463, %464 : vector<2x512xf32>
    %466 = vector.extract_strided_slice %465 {offsets = [0, 0], sizes = [2, 128], strides = [1, 1]} : vector<2x512xf32> to vector<2x128xf32>
    %467 = arith.negf %466 : vector<2x128xf32>
    %468 = math.exp %467 : vector<2x128xf32>
    %cst_188 = arith.constant 1.000000e+00 : f32
    %469 = vector.broadcast %cst_188 : f32 to vector<2x128xf32>
    %470 = arith.addf %469, %468 : vector<2x128xf32>
    %471 = arith.divf %469, %470 : vector<2x128xf32>
    %472 = vector.extract_strided_slice %465 {offsets = [0, 128], sizes = [2, 128], strides = [1, 1]} : vector<2x512xf32> to vector<2x128xf32>
    %473 = arith.negf %472 : vector<2x128xf32>
    %474 = math.exp %473 : vector<2x128xf32>
    %cst_189 = arith.constant 1.000000e+00 : f32
    %475 = vector.broadcast %cst_189 : f32 to vector<2x128xf32>
    %476 = arith.addf %475, %474 : vector<2x128xf32>
    %477 = arith.divf %475, %476 : vector<2x128xf32>
    %478 = vector.extract_strided_slice %465 {offsets = [0, 256], sizes = [2, 128], strides = [1, 1]} : vector<2x512xf32> to vector<2x128xf32>
    %479 = math.tanh %478 : vector<2x128xf32>
    %480 = vector.extract_strided_slice %465 {offsets = [0, 384], sizes = [2, 128], strides = [1, 1]} : vector<2x512xf32> to vector<2x128xf32>
    %481 = arith.negf %480 : vector<2x128xf32>
    %482 = math.exp %481 : vector<2x128xf32>
    %cst_190 = arith.constant 1.000000e+00 : f32
    %483 = vector.broadcast %cst_190 : f32 to vector<2x128xf32>
    %484 = arith.addf %483, %482 : vector<2x128xf32>
    %485 = arith.divf %483, %484 : vector<2x128xf32>
    %486 = arith.mulf %477, %432 : vector<2x128xf32>
    %487 = arith.mulf %471, %479 : vector<2x128xf32>
    %488 = arith.addf %486, %487 : vector<2x128xf32>
    %489 = math.tanh %488 : vector<2x128xf32>
    %490 = arith.mulf %485, %489 : vector<2x128xf32>
    %491 = vector.extract_strided_slice %490 {offsets = [0, 0], sizes = [1, 128], strides = [1, 1]} : vector<2x128xf32> to vector<1x128xf32>
    %492 = vector.extract_strided_slice %490 {offsets = [1, 0], sizes = [1, 128], strides = [1, 1]} : vector<2x128xf32> to vector<1x128xf32>
    %493 = tpu.concatenate %491, %492 in 1 : vector<1x128xf32>, vector<1x128xf32> -> vector<1x256xf32>
    %cst_191 = arith.constant dense<0.000000e+00> : vector<1x8xf32>
    %494 = tpu.matmul %493, %343, %cst_191 {dimension_numbers = #tpu.dot_dimension_numbers<[1], [1], [0], [0], [0, 0, 1, 0], [], []>} : vector<1x256xf32>, vector<8x256xf32>, vector<1x8xf32> -> vector<1x8xf32>
    %cst_192 = arith.constant dense<0xFF800000> : vector<1xf32>
    %495 = vector.multi_reduction <maximumf>, %494, %cst_192 [1] : vector<1x8xf32> to vector<1xf32>
    %496 = vector.shape_cast %495 : vector<1xf32> to vector<1x1xf32>
    %497 = vector.broadcast %496 : vector<1x1xf32> to vector<1x8xf32>
    %498 = arith.subf %494, %497 : vector<1x8xf32>
    %499 = math.exp %498 : vector<1x8xf32>
    %cst_193 = arith.constant dense<0.000000e+00> : vector<1xf32>
    %500 = vector.multi_reduction <add>, %499, %cst_193 [1] : vector<1x8xf32> to vector<1xf32>
    %501 = vector.shape_cast %500 : vector<1xf32> to vector<1x1xf32>
    %502 = tpu.reciprocal %501 {approx = true} : vector<1x1xf32> -> vector<1x1xf32>
    %503 = vector.broadcast %502 : vector<1x1xf32> to vector<1x8xf32>
    %504 = arith.mulf %499, %503 : vector<1x8xf32>
    %cst_194 = arith.constant dense<0.000000e+00> : vector<1x256xf32>
    %505 = tpu.matmul %504, %332, %cst_194 {dimension_numbers = #tpu.dot_dimension_numbers<[1], [0], [0], [1], [0, 0, 1, 1], [], []>} : vector<1x8xf32>, vector<8x256xf32>, vector<1x256xf32> -> vector<1x256xf32>
    %506 = vector.extract_strided_slice %505 {offsets = [0, 0], sizes = [1, 128], strides = [1, 1]} : vector<1x256xf32> to vector<1x128xf32>
    %507 = vector.extract_strided_slice %505 {offsets = [0, 128], sizes = [1, 128], strides = [1, 1]} : vector<1x256xf32> to vector<1x128xf32>
    %508 = tpu.concatenate %506, %507 in 0 : vector<1x128xf32>, vector<1x128xf32> -> vector<2x128xf32>
    %509 = tpu.concatenate %490, %508 in 1 : vector<2x128xf32>, vector<2x128xf32> -> vector<2x256xf32>
    %cst_195 = arith.constant dense<0.000000e+00> : vector<2x128xf32>
    %510 = tpu.matmul %509, %346, %cst_195 {dimension_numbers = #tpu.dot_dimension_numbers<[1], [0], [0], [1], [0, 0, 1, 1], [], []>} : vector<2x256xf32>, vector<256x128xf32>, vector<2x128xf32> -> vector<2x128xf32>
    %511 = vector.broadcast %347 : vector<1x128xf32> to vector<2x128xf32>
    %512 = arith.addf %510, %511 : vector<2x128xf32>
    %c2_196 = arith.constant 2 : index
    %c0_197 = arith.constant 0 : index
    %c0_198 = arith.constant 0 : index
    %513 = vector.load %arg11[%c2_196, %c0_197, %c0_198] : memref<5x2x128xf32, #tpu.memory_space<vmem>>, vector<1x2x128xf32>
    %514 = vector.shape_cast %513 : vector<1x2x128xf32> to vector<2x128xf32>
    %515 = vector.shape_cast %512 : vector<2x128xf32> to vector<1x2x128xf32>
    tpu.vector_store %arg11[%c2_196, %c0_197, %c0_198], %515 {strides = array<i32>} : memref<5x2x128xf32, #tpu.memory_space<vmem>>, vector<1x2x128xf32>,
    %c3_199 = arith.constant 3 : index
    %c0_200 = arith.constant 0 : index
    %c0_201 = arith.constant 0 : index
    %516 = vector.load %arg1[%c3_199, %c0_200, %c0_201] : memref<5x2x32xf32, #tpu.memory_space<vmem>>, vector<1x2x32xf32>
    %517 = vector.shape_cast %516 : vector<1x2x32xf32> to vector<2x32xf32>
    %518 = tpu.concatenate %517, %490 in 1 : vector<2x32xf32>, vector<2x128xf32> -> vector<2x160xf32>
    %cst_202 = arith.constant dense<0.000000e+00> : vector<2x512xf32>
    %519 = tpu.matmul %518, %344, %cst_202 {dimension_numbers = #tpu.dot_dimension_numbers<[1], [0], [0], [1], [0, 0, 1, 1], [], []>} : vector<2x160xf32>, vector<160x512xf32>, vector<2x512xf32> -> vector<2x512xf32>
    %520 = vector.broadcast %345 : vector<1x512xf32> to vector<2x512xf32>
    %521 = arith.addf %519, %520 : vector<2x512xf32>
    %522 = vector.extract_strided_slice %521 {offsets = [0, 0], sizes = [2, 128], strides = [1, 1]} : vector<2x512xf32> to vector<2x128xf32>
    %523 = arith.negf %522 : vector<2x128xf32>
    %524 = math.exp %523 : vector<2x128xf32>
    %cst_203 = arith.constant 1.000000e+00 : f32
    %525 = vector.broadcast %cst_203 : f32 to vector<2x128xf32>
    %526 = arith.addf %525, %524 : vector<2x128xf32>
    %527 = arith.divf %525, %526 : vector<2x128xf32>
    %528 = vector.extract_strided_slice %521 {offsets = [0, 128], sizes = [2, 128], strides = [1, 1]} : vector<2x512xf32> to vector<2x128xf32>
    %529 = arith.negf %528 : vector<2x128xf32>
    %530 = math.exp %529 : vector<2x128xf32>
    %cst_204 = arith.constant 1.000000e+00 : f32
    %531 = vector.broadcast %cst_204 : f32 to vector<2x128xf32>
    %532 = arith.addf %531, %530 : vector<2x128xf32>
    %533 = arith.divf %531, %532 : vector<2x128xf32>
    %534 = vector.extract_strided_slice %521 {offsets = [0, 256], sizes = [2, 128], strides = [1, 1]} : vector<2x512xf32> to vector<2x128xf32>
    %535 = math.tanh %534 : vector<2x128xf32>
    %536 = vector.extract_strided_slice %521 {offsets = [0, 384], sizes = [2, 128], strides = [1, 1]} : vector<2x512xf32> to vector<2x128xf32>
    %537 = arith.negf %536 : vector<2x128xf32>
    %538 = math.exp %537 : vector<2x128xf32>
    %cst_205 = arith.constant 1.000000e+00 : f32
    %539 = vector.broadcast %cst_205 : f32 to vector<2x128xf32>
    %540 = arith.addf %539, %538 : vector<2x128xf32>
    %541 = arith.divf %539, %540 : vector<2x128xf32>
    %542 = arith.mulf %533, %488 : vector<2x128xf32>
    %543 = arith.mulf %527, %535 : vector<2x128xf32>
    %544 = arith.addf %542, %543 : vector<2x128xf32>
    %545 = math.tanh %544 : vector<2x128xf32>
    %546 = arith.mulf %541, %545 : vector<2x128xf32>
    %547 = vector.extract_strided_slice %546 {offsets = [0, 0], sizes = [1, 128], strides = [1, 1]} : vector<2x128xf32> to vector<1x128xf32>
    %548 = vector.extract_strided_slice %546 {offsets = [1, 0], sizes = [1, 128], strides = [1, 1]} : vector<2x128xf32> to vector<1x128xf32>
    %549 = tpu.concatenate %547, %548 in 1 : vector<1x128xf32>, vector<1x128xf32> -> vector<1x256xf32>
    %cst_206 = arith.constant dense<0.000000e+00> : vector<1x8xf32>
    %550 = tpu.matmul %549, %343, %cst_206 {dimension_numbers = #tpu.dot_dimension_numbers<[1], [1], [0], [0], [0, 0, 1, 0], [], []>} : vector<1x256xf32>, vector<8x256xf32>, vector<1x8xf32> -> vector<1x8xf32>
    %cst_207 = arith.constant dense<0xFF800000> : vector<1xf32>
    %551 = vector.multi_reduction <maximumf>, %550, %cst_207 [1] : vector<1x8xf32> to vector<1xf32>
    %552 = vector.shape_cast %551 : vector<1xf32> to vector<1x1xf32>
    %553 = vector.broadcast %552 : vector<1x1xf32> to vector<1x8xf32>
    %554 = arith.subf %550, %553 : vector<1x8xf32>
    %555 = math.exp %554 : vector<1x8xf32>
    %cst_208 = arith.constant dense<0.000000e+00> : vector<1xf32>
    %556 = vector.multi_reduction <add>, %555, %cst_208 [1] : vector<1x8xf32> to vector<1xf32>
    %557 = vector.shape_cast %556 : vector<1xf32> to vector<1x1xf32>
    %558 = tpu.reciprocal %557 {approx = true} : vector<1x1xf32> -> vector<1x1xf32>
    %559 = vector.broadcast %558 : vector<1x1xf32> to vector<1x8xf32>
    %560 = arith.mulf %555, %559 : vector<1x8xf32>
    %cst_209 = arith.constant dense<0.000000e+00> : vector<1x256xf32>
    %561 = tpu.matmul %560, %332, %cst_209 {dimension_numbers = #tpu.dot_dimension_numbers<[1], [0], [0], [1], [0, 0, 1, 1], [], []>} : vector<1x8xf32>, vector<8x256xf32>, vector<1x256xf32> -> vector<1x256xf32>
    %562 = vector.extract_strided_slice %561 {offsets = [0, 0], sizes = [1, 128], strides = [1, 1]} : vector<1x256xf32> to vector<1x128xf32>
    %563 = vector.extract_strided_slice %561 {offsets = [0, 128], sizes = [1, 128], strides = [1, 1]} : vector<1x256xf32> to vector<1x128xf32>
    %564 = tpu.concatenate %562, %563 in 0 : vector<1x128xf32>, vector<1x128xf32> -> vector<2x128xf32>
    %565 = tpu.concatenate %546, %564 in 1 : vector<2x128xf32>, vector<2x128xf32> -> vector<2x256xf32>
    %cst_210 = arith.constant dense<0.000000e+00> : vector<2x128xf32>
    %566 = tpu.matmul %565, %346, %cst_210 {dimension_numbers = #tpu.dot_dimension_numbers<[1], [0], [0], [1], [0, 0, 1, 1], [], []>} : vector<2x256xf32>, vector<256x128xf32>, vector<2x128xf32> -> vector<2x128xf32>
    %567 = vector.broadcast %347 : vector<1x128xf32> to vector<2x128xf32>
    %568 = arith.addf %566, %567 : vector<2x128xf32>
    %c3_211 = arith.constant 3 : index
    %c0_212 = arith.constant 0 : index
    %c0_213 = arith.constant 0 : index
    %569 = vector.load %arg11[%c3_211, %c0_212, %c0_213] : memref<5x2x128xf32, #tpu.memory_space<vmem>>, vector<1x2x128xf32>
    %570 = vector.shape_cast %569 : vector<1x2x128xf32> to vector<2x128xf32>
    %571 = vector.shape_cast %568 : vector<2x128xf32> to vector<1x2x128xf32>
    tpu.vector_store %arg11[%c3_211, %c0_212, %c0_213], %571 {strides = array<i32>} : memref<5x2x128xf32, #tpu.memory_space<vmem>>, vector<1x2x128xf32>,
    %c4_214 = arith.constant 4 : index
    %c0_215 = arith.constant 0 : index
    %c0_216 = arith.constant 0 : index
    %572 = vector.load %arg1[%c4_214, %c0_215, %c0_216] : memref<5x2x32xf32, #tpu.memory_space<vmem>>, vector<1x2x32xf32>
    %573 = vector.shape_cast %572 : vector<1x2x32xf32> to vector<2x32xf32>
    %574 = tpu.concatenate %573, %546 in 1 : vector<2x32xf32>, vector<2x128xf32> -> vector<2x160xf32>
    %cst_217 = arith.constant dense<0.000000e+00> : vector<2x512xf32>
    %575 = tpu.matmul %574, %344, %cst_217 {dimension_numbers = #tpu.dot_dimension_numbers<[1], [0], [0], [1], [0, 0, 1, 1], [], []>} : vector<2x160xf32>, vector<160x512xf32>, vector<2x512xf32> -> vector<2x512xf32>
    %576 = vector.broadcast %345 : vector<1x512xf32> to vector<2x512xf32>
    %577 = arith.addf %575, %576 : vector<2x512xf32>
    %578 = vector.extract_strided_slice %577 {offsets = [0, 0], sizes = [2, 128], strides = [1, 1]} : vector<2x512xf32> to vector<2x128xf32>
    %579 = arith.negf %578 : vector<2x128xf32>
    %580 = math.exp %579 : vector<2x128xf32>
    %cst_218 = arith.constant 1.000000e+00 : f32
    %581 = vector.broadcast %cst_218 : f32 to vector<2x128xf32>
    %582 = arith.addf %581, %580 : vector<2x128xf32>
    %583 = arith.divf %581, %582 : vector<2x128xf32>
    %584 = vector.extract_strided_slice %577 {offsets = [0, 128], sizes = [2, 128], strides = [1, 1]} : vector<2x512xf32> to vector<2x128xf32>
    %585 = arith.negf %584 : vector<2x128xf32>
    %586 = math.exp %585 : vector<2x128xf32>
    %cst_219 = arith.constant 1.000000e+00 : f32
    %587 = vector.broadcast %cst_219 : f32 to vector<2x128xf32>
    %588 = arith.addf %587, %586 : vector<2x128xf32>
    %589 = arith.divf %587, %588 : vector<2x128xf32>
    %590 = vector.extract_strided_slice %577 {offsets = [0, 256], sizes = [2, 128], strides = [1, 1]} : vector<2x512xf32> to vector<2x128xf32>
    %591 = math.tanh %590 : vector<2x128xf32>
    %592 = vector.extract_strided_slice %577 {offsets = [0, 384], sizes = [2, 128], strides = [1, 1]} : vector<2x512xf32> to vector<2x128xf32>
    %593 = arith.negf %592 : vector<2x128xf32>
    %594 = math.exp %593 : vector<2x128xf32>
    %cst_220 = arith.constant 1.000000e+00 : f32
    %595 = vector.broadcast %cst_220 : f32 to vector<2x128xf32>
    %596 = arith.addf %595, %594 : vector<2x128xf32>
    %597 = arith.divf %595, %596 : vector<2x128xf32>
    %598 = arith.mulf %589, %544 : vector<2x128xf32>
    %599 = arith.mulf %583, %591 : vector<2x128xf32>
    %600 = arith.addf %598, %599 : vector<2x128xf32>
    %601 = math.tanh %600 : vector<2x128xf32>
    %602 = arith.mulf %597, %601 : vector<2x128xf32>
    %603 = vector.extract_strided_slice %602 {offsets = [0, 0], sizes = [1, 128], strides = [1, 1]} : vector<2x128xf32> to vector<1x128xf32>
    %604 = vector.extract_strided_slice %602 {offsets = [1, 0], sizes = [1, 128], strides = [1, 1]} : vector<2x128xf32> to vector<1x128xf32>
    %605 = tpu.concatenate %603, %604 in 1 : vector<1x128xf32>, vector<1x128xf32> -> vector<1x256xf32>
    %cst_221 = arith.constant dense<0.000000e+00> : vector<1x8xf32>
    %606 = tpu.matmul %605, %343, %cst_221 {dimension_numbers = #tpu.dot_dimension_numbers<[1], [1], [0], [0], [0, 0, 1, 0], [], []>} : vector<1x256xf32>, vector<8x256xf32>, vector<1x8xf32> -> vector<1x8xf32>
    %cst_222 = arith.constant dense<0xFF800000> : vector<1xf32>
    %607 = vector.multi_reduction <maximumf>, %606, %cst_222 [1] : vector<1x8xf32> to vector<1xf32>
    %608 = vector.shape_cast %607 : vector<1xf32> to vector<1x1xf32>
    %609 = vector.broadcast %608 : vector<1x1xf32> to vector<1x8xf32>
    %610 = arith.subf %606, %609 : vector<1x8xf32>
    %611 = math.exp %610 : vector<1x8xf32>
    %cst_223 = arith.constant dense<0.000000e+00> : vector<1xf32>
    %612 = vector.multi_reduction <add>, %611, %cst_223 [1] : vector<1x8xf32> to vector<1xf32>
    %613 = vector.shape_cast %612 : vector<1xf32> to vector<1x1xf32>
    %614 = tpu.reciprocal %613 {approx = true} : vector<1x1xf32> -> vector<1x1xf32>
    %615 = vector.broadcast %614 : vector<1x1xf32> to vector<1x8xf32>
    %616 = arith.mulf %611, %615 : vector<1x8xf32>
    %cst_224 = arith.constant dense<0.000000e+00> : vector<1x256xf32>
    %617 = tpu.matmul %616, %332, %cst_224 {dimension_numbers = #tpu.dot_dimension_numbers<[1], [0], [0], [1], [0, 0, 1, 1], [], []>} : vector<1x8xf32>, vector<8x256xf32>, vector<1x256xf32> -> vector<1x256xf32>
    %618 = vector.extract_strided_slice %617 {offsets = [0, 0], sizes = [1, 128], strides = [1, 1]} : vector<1x256xf32> to vector<1x128xf32>
    %619 = vector.extract_strided_slice %617 {offsets = [0, 128], sizes = [1, 128], strides = [1, 1]} : vector<1x256xf32> to vector<1x128xf32>
    %620 = tpu.concatenate %618, %619 in 0 : vector<1x128xf32>, vector<1x128xf32> -> vector<2x128xf32>
    %621 = tpu.concatenate %602, %620 in 1 : vector<2x128xf32>, vector<2x128xf32> -> vector<2x256xf32>
    %cst_225 = arith.constant dense<0.000000e+00> : vector<2x128xf32>
    %622 = tpu.matmul %621, %346, %cst_225 {dimension_numbers = #tpu.dot_dimension_numbers<[1], [0], [0], [1], [0, 0, 1, 1], [], []>} : vector<2x256xf32>, vector<256x128xf32>, vector<2x128xf32> -> vector<2x128xf32>
    %623 = vector.broadcast %347 : vector<1x128xf32> to vector<2x128xf32>
    %624 = arith.addf %622, %623 : vector<2x128xf32>
    %c4_226 = arith.constant 4 : index
    %c0_227 = arith.constant 0 : index
    %c0_228 = arith.constant 0 : index
    %625 = vector.load %arg11[%c4_226, %c0_227, %c0_228] : memref<5x2x128xf32, #tpu.memory_space<vmem>>, vector<1x2x128xf32>
    %626 = vector.shape_cast %625 : vector<1x2x128xf32> to vector<2x128xf32>
    %627 = vector.shape_cast %624 : vector<2x128xf32> to vector<1x2x128xf32>
    tpu.vector_store %arg11[%c4_226, %c0_227, %c0_228], %627 {strides = array<i32>} : memref<5x2x128xf32, #tpu.memory_space<vmem>>, vector<1x2x128xf32>,
    %c0_229 = arith.constant 0 : index
    %c0_230 = arith.constant 0 : index
    %628 = vector.load %arg12[%c0_229, %c0_230] : memref<2x128xf32, #tpu.memory_space<vmem>>, vector<2x128xf32>
    tpu.vector_store %arg12[%c0_229, %c0_230], %602 {strides = array<i32>} : memref<2x128xf32, #tpu.memory_space<vmem>>, vector<2x128xf32>,
    %c0_231 = arith.constant 0 : index
    %c0_232 = arith.constant 0 : index
    %629 = vector.load %arg13[%c0_231, %c0_232] : memref<2x128xf32, #tpu.memory_space<vmem>>, vector<2x128xf32>
    tpu.vector_store %arg13[%c0_231, %c0_232], %600 {strides = array<i32>} : memref<2x128xf32, #tpu.memory_space<vmem>>, vector<2x128xf32>,
    return
  }
}

</mosaic_0001>

<bundles_post_ra>
// kernel: net_forward.1
= control target key start
LH: loop header
LB: loop body
LE: loop exit
PB: predicated region body
PF: predicated region fallthrough
CT: control target
= control target key end

     0   :  { %19 = vsyncpa [#allocation3], 0  ;;  %s8177_s0 = inlined_call_operand.vmem [shape: f32[8,2,32], index: 0, kind: input, shape index: {}]   ;;  %s8178_s1 = inlined_call_operand.vmem [shape: f32[5,2,32], index: 1, kind: input, shape index: {}]   ;;  %s8179_s2 = inlined_call_operand.hbm [shape: f32[192,512], index: 2, kind: input, shape index: {}]   ;;  %s8180_s3 = inlined_call_operand.vmem [shape: f32[1,512], index: 3, kind: input, shape index: {}]   ;;  %s8181_s4 = inlined_call_operand.hbm [shape: f32[160,512], index: 4, kind: input, shape index: {}]   ;;  %s8182_s5 = inlined_call_operand.vmem [shape: f32[1,512], index: 5, kind: input, shape index: {}]   ;;  %s8183_s6 = inlined_call_operand.vmem [shape: f32[128,128], index: 6, kind: input, shape index: {}]   ;;  %s8184_s7 = inlined_call_operand.vmem [shape: f32[1,128], index: 7, kind: input, shape index: {}]   ;;  %s8185_s8 = inlined_call_operand.vmem [shape: f32[256,128], index: 8, kind: input, shape index: {}]   ;;  %s8186_s9 = inlined_call_operand.vmem [shape: f32[1,128], index: 9, kind: input, shape index: {}]   ;;  %s8187_s10 = inlined_call_operand.hbm [shape: f32[8,256], index: 10, kind: output, shape index: {0}]   ;;  %s8188_s11 = inlined_call_operand.vmem [shape: f32[5,2,128], index: 11, kind: output, shape index: {1}]   ;;  %s8189_s12 = inlined_call_operand.hbm [shape: f32[2,128], index: 12, kind: output, shape index: {2}]   ;;  %s8190_s13 = inlined_call_operand.hbm [shape: f32[2,128], index: 13, kind: output, shape index: {3}]  }
   0x1   :  { %20 = vsyncpa [#allocation6], 0 }
   0x2   :  { %21 = vsyncpa [#allocation4], 0 }
   0x3   :  { %22 = vsyncpa [#allocation9], 0  ;;  %s31_s27 = sshll.u32 %s8179_s2, 4  ;;  %s5043_s28 = smov [#allocation2]   ;;  %s32_s27 = int_to_ptr.hbm [resolvable:$true] %s31_s27 }
   0x4   :  { %s33_s29 = sshll.u32 %s5043_s28, 4  ;;  %s46_s15 = sshll.u32 %s8181_s4, 4  ;;  %s34_s29 = int_to_ptr.vmem [resolvable:$true] %s33_s29  ;;  %s47_s15 = int_to_ptr.hbm [resolvable:$true] %s46_s15 }
   0x5   :  { %s5044_s16 = smov 512   ;;  %s5045_s17 = smov 32  }
   0x6   :  { %39 = dma.hbm_to_vmem [thread:$0]  %s32_s27, 12288, %s34_s29, [#allocation3], %s5044_s16, %s5044_s16, %s5045_s17  }
   0x7   :  { %s5046_s18 = smov [#allocation5]  }
   0x8   :  { %s48_s19 = sshll.u32 %s5046_s18, 4  ;;  %s49_s19 = int_to_ptr.vmem [resolvable:$true] %s48_s19 }
   0x9   :  { %54 = dma.hbm_to_vmem [thread:$0]  %s47_s15, 10240, %s49_s19, [#allocation6], %s5044_s16, %s5044_s16, %s5045_s17  }
   0xa   :  { %5035 = dma.done.wait [#allocation3], 12288  }
   0xb   :  { %5036 = vsyncadd [#allocation3], 4294955008 }
   0xc   :  { %5037 = dma.done.wait [#allocation6], 10240  }
   0xd   :  { %5038 = vsyncadd [#allocation6], 4294957056  ;;  %v4246_v0 = vld [vmem:[%s8177_s0 + $0xe] sm:$0x3]  ;;  %v5133_v1 = vld [vmem:[#allocation2 + $0x1e0] sm:$0xff]  ;;  %v8191_v47 = vmov 0.0  }
   0xe   :  { %v5135_v2 = vld [vmem:[#allocation2 + $0x1c0] sm:$0xff]  ;;  %174 = vrot.lane.b32.xlu0 %v4246_v0, %s5045_s17  ;;  %193 = vmatpush.msra.mxu0 %v5133_v1  ;;  %v5155_v9 = vld [vmem:[#allocation2 + $0x1e8] sm:$0xff]  ;;  %v5177_v17 = vld [vmem:[#allocation2 + $0x1f0] sm:$0xff]  ;;  %vm177_vm0 = vcmask 261120   ;;  %vm179_vm1 = vcmask 523264   ;;  %vm416_vm14 = vcmask 516096  }
   0xf   :  { %v5139_v3 = vld [vmem:[#allocation2 + $0x2e0] sm:$0xff]  ;;  %233 = vmatpush.msra.mxu2 %v5155_v9  ;;  %v5161_v11 = vld [vmem:[#allocation2 + $0x1c8] sm:$0xff]  ;;  %v5183_v19 = vld [vmem:[#allocation2 + $0x1d0] sm:$0xff]  ;;  %273 = vmatpush.msra.mxu1 %v5177_v17  ;;  %vm418_vm15 = vcmask 1040896   ;;  %s4213_s4 = sshll.u32 %s8189_s12, 4  ;;  %s5050_s23 = smov [#allocation7]   ;;  %s4214_s4 = int_to_ptr.hbm [resolvable:$true] %s4213_s4 }
  0x10   :  { %v5141_v4 = vld [vmem:[#allocation2 + $0x1a0] sm:$0xff]  ;;  %221 = vmatpush.msra.mxu3 %v5139_v3  ;;  %194 = vmatpush.msra.mxu0 %v5135_v2  ;;  %v5166_v13 = vld [vmem:[#allocation2 + $0x1a8] sm:$0xff]  ;;  %v5195_v23 = vld [vmem:[#allocation2 + $0x1b0] sm:$0xff]  ;;  %s4198_s24 = sshll.u32 %s5050_s23, 4  ;;  %s5051_s25 = smov [#allocation10]   ;;  %s4199_s24 = int_to_ptr.vmem [resolvable:$true] %s4198_s24 }
  0x11   :  { %v5144_v5 = vld [vmem:[#allocation2 + $0x2c0] sm:$0xff]  ;;  %234 = vmatpush.msra.mxu2 %v5161_v11  ;;  %v5175_v16 = vld [vmem:[#allocation2 + $0x188] sm:$0xff]  ;;  %274 = vmatpush.msra.mxu1 %v5183_v19  ;;  %v5213_v29 = vld [vmem:[#allocation2 + $0x190] sm:$0xff]  ;;  %s4224_s28 = sshll.u32 %s8190_s13, 4  ;;  %s4225_s28 = int_to_ptr.hbm [resolvable:$true] %s4224_s28 }
  0x12   :  { %v5147_v6 = vld [vmem:[#allocation2 + $0x2a0] sm:$0xff]  ;;  %222 = vmatpush.msra.mxu3 %v5144_v5  ;;  %195 = vmatpush.msra.mxu0 %v5141_v4  ;;  %v5189_v21 = vld [vmem:[#allocation2 + $0x168] sm:$0xff]  ;;  %v5225_v33 = vld [vmem:[#allocation2 + $0x170] sm:$0xff] }
  0x13   :  { %v5149_v7 = vld [vmem:[#allocation2 + $0x180] sm:$0xff]  ;;  %235 = vmatpush.msra.mxu2 %v5166_v13  ;;  %v5201_v25 = vld [vmem:[#allocation2 + $0x148] sm:$0xff]  ;;  %275 = vmatpush.msra.mxu1 %v5195_v23  ;;  %8628 = vst [vmem:[#allocation22_spill] sm:$0xff] %v5225_v33  ;;  %v5237_v37 = vld [vmem:[#allocation2 + $0x150] sm:$0xff] }
  0x14   :  { %v5153_v8 = vld [vmem:[#allocation2 + $0x280] sm:$0xff]  ;;  %223 = vmatpush.msra.mxu3 %v5147_v6  ;;  %196 = vmatpush.msra.mxu0 %v5149_v7  ;;  %8622 = vst [vmem:[#allocation16_spill] sm:$0xff] %v5201_v25  ;;  %v5206_v27 = vld [vmem:[#allocation2 + $0x2e8] sm:$0xff]  ;;  %v5257_v43 = vld [vmem:[#allocation2 + $0x130] sm:$0xff] }
  0x15   :  { %v5157_v10 = vld [vmem:[#allocation2 + $0x160] sm:$0xff]  ;;  %236 = vmatpush.msra.mxu2 %v5175_v16  ;;  %8624 = vst [vmem:[#allocation18_spill] sm:$0xff] %v5206_v27  ;;  %v5211_v28 = vld [vmem:[#allocation2 + $0x128] sm:$0xff]  ;;  %276 = vmatpush.msra.mxu1 %v5213_v29  ;;  %v5269_v48 = vld [vmem:[#allocation2 + $0x110] sm:$0xff] }
  0x16   :  { %v5164_v12 = vld [vmem:[#allocation2 + $0x260] sm:$0xff]  ;;  %224 = vmatpush.msra.mxu3 %v5153_v8  ;;  %197 = vmatpush.msra.mxu0 %v5157_v10  ;;  %8625 = vst [vmem:[#allocation19_spill] sm:$0xff] %v5211_v28  ;;  %v5218_v31 = vld [vmem:[#allocation2 + $0x2c8] sm:$0xff]  ;;  %v5281_v52 = vld [vmem:[#allocation2 + $0xf0] sm:$0xff] }
  0x17   :  { %v5168_v14 = vld [vmem:[#allocation2 + $0x140] sm:$0xff]  ;;  %237 = vmatpush.msra.mxu2 %v5189_v21  ;;  %8626 = vst [vmem:[#allocation20_spill] sm:$0xff] %v5218_v31  ;;  %v5223_v32 = vld [vmem:[#allocation2 + $0x108] sm:$0xff]  ;;  %277 = vmatpush.msra.mxu1 %v5225_v33  ;;  %v5292_v56 = vld [vmem:[#allocation2 + $0x1f8] sm:$0xff] }
  0x18   :  { %v5173_v15 = vld [vmem:[#allocation2 + $0x240] sm:$0xff]  ;;  %225 = vmatpush.msra.mxu3 %v5164_v12  ;;  %198 = vmatpush.msra.mxu0 %v5168_v14  ;;  %8627 = vst [vmem:[#allocation21_spill] sm:$0xff] %v5223_v32  ;;  %v5229_v35 = vld [vmem:[#allocation2 + $0x2a8] sm:$0xff]  ;;  %v5295_v57 = vld [vmem:[#allocation2 + $0x2f0] sm:$0xff] }
  0x19   :  { %v5179_v18 = vld [vmem:[#allocation2 + $0x120] sm:$0xff]  ;;  %238 = vmatpush.msra.mxu2 %v5201_v25  ;;  %8629 = vst [vmem:[#allocation23_spill] sm:$0xff] %v5229_v35  ;;  %v5235_v36 = vld [vmem:[#allocation2 + $0xe8] sm:$0xff]  ;;  %278 = vmatpush.msra.mxu1 %v5237_v37  ;;  %v5299_v58 = vld [vmem:[#allocation2 + $0xd0] sm:$0xff] }
  0x1a   :  { %v5186_v20 = vld [vmem:[#allocation2 + $0x220] sm:$0xff]  ;;  %226 = vmatpush.msra.mxu3 %v5173_v15  ;;  %199 = vmatpush.msra.mxu0 %v5179_v18  ;;  %8630 = vst [vmem:[#allocation24_spill] sm:$0xff] %v5235_v36  ;;  %v5241_v39 = vld [vmem:[#allocation2 + $0x288] sm:$0xff]  ;;  %v5304_v60 = vld [vmem:[#allocation2 + $0x1d8] sm:$0xff] }
  0x1b   :  { %v5191_v22 = vld [vmem:[#allocation2 + $0x100] sm:$0xff]  ;;  %239 = vmatpush.msra.mxu2 %v5211_v28  ;;  %8631 = vst [vmem:[#allocation25_spill] sm:$0xff] %v5237_v37  ;;  %v5247_v40 = vld [vmem:[#allocation2 + $0xc8] sm:$0xff]  ;;  %279 = vmatpush.msra.mxu1 %v5257_v43  ;;  %v5307_v61 = vld [vmem:[#allocation2 + $0x2d0] sm:$0xff] }
  0x1c   :  { %8621 = vst [vmem:[#allocation15_spill] sm:$0xff] %v5191_v22  ;;  %v5198_v24 = vld [vmem:[#allocation2 + $0x200] sm:$0xff]  ;;  %227 = vmatpush.msra.mxu3 %v5186_v20  ;;  %200 = vmatpush.msra.mxu0 %v5191_v22  ;;  %v5251_v42 = vld [vmem:[#allocation2 + $0x268] sm:$0xff]  ;;  %v5311_v62 = vld [vmem:[#allocation2 + $0xb0] sm:$0xff] }
  0x1d   :  { %v5203_v26 = vld [vmem:[#allocation2 + $0xe0] sm:$0xff]  ;;  %8633 = vst [vmem:[#allocation27_spill] sm:$0xff] %v5241_v39  ;;  %240 = vmatpush.msra.mxu2 %v5223_v32  ;;  %v5259_v44 = vld [vmem:[#allocation2 + $0xa8] sm:$0xff]  ;;  %280 = vmatpush.msra.mxu1 %v5269_v48  ;;  %v5313_v63 = vld [vmem:[#allocation2 + $0x1b8] sm:$0xff] }
  0x1e   :  { %8623 = vst [vmem:[#allocation17_spill] sm:$0xff] %v5203_v26  ;;  %v5215_v30 = vld [vmem:[#allocation2 + $0xc0] sm:$0xff]  ;;  %228 = vmatpush.msra.mxu3 %v5198_v24  ;;  %201 = vmatpush.msra.mxu0 %v5203_v26  ;;  %v5263_v46 = vld [vmem:[#allocation2 + $0x248] sm:$0xff]  ;;  %v5315_v0 = vld [vmem:[#allocation2 + $0x2b0] sm:$0xff] }
  0x1f   :  { %v5227_v34 = vld [vmem:[#allocation2 + $0xa0] sm:$0xff]  ;;  %8634 = vst [vmem:[#allocation28_spill] sm:$0xff] %v5247_v40  ;;  %241 = vmatpush.msra.mxu2 %v5235_v36  ;;  %229 = vmatmul.f32.vlgmr.msra.gmra.mxu3 %v8191_v47  ;;  %v5271_v49 = vld [vmem:[#allocation2 + $0x88] sm:$0xff] }
  0x20   :  { %261 = vmatpush.msrb.mxu3 %v5206_v27  ;;  %202 = vmatpush.msra.mxu0 %v5215_v30  ;;  %v5239_v38 = vld [vmem:[#allocation2 + $0x80] sm:$0xff]  ;;  %8636 = vst [vmem:[#allocation30_spill] sm:$0xff] %v5251_v42  ;;  %v5275_v51 = vld [vmem:[#allocation2 + $0x228] sm:$0xff]  ;;  %v5339_v27 = vld [vmem:[#allocation2 + $0x270] sm:$0xff] }
  0x21   :  { %8632 = vst [vmem:[#allocation26_spill] sm:$0xff] %v5239_v38  ;;  %v5249_v41 = vld [vmem:[#allocation2 + $0x60] sm:$0xff]  ;;  %242 = vmatpush.msra.mxu2 %v5247_v40  ;;  %v5283_v53 = vld [vmem:[#allocation2 + $0x68] sm:$0xff]  ;;  %281 = vmatpush.msra.mxu1 %v5281_v52 }
  0x22   :  { %262 = vmatpush.msrb.mxu3 %v5218_v31  ;;  %203 = vmatpush.msra.mxu0 %v5227_v34  ;;  %8635 = vst [vmem:[#allocation29_spill] sm:$0xff] %v5249_v41  ;;  %v5261_v45 = vld [vmem:[#allocation2 + $0x40] sm:$0xff]  ;;  %v5287_v55 = vld [vmem:[#allocation2 + $0x208] sm:$0xff]  ;;  %v5337_v31 = vld [vmem:[#allocation2 + $0x178] sm:$0xff] }
  0x23   :  { %8637 = vst [vmem:[#allocation31_spill] sm:$0xff] %v5257_v43  ;;  %v5273_v50 = vld [vmem:[#allocation2 + $0x20] sm:$0xff]  ;;  %243 = vmatpush.msra.mxu2 %v5259_v44  ;;  %v5301_v59 = vld [vmem:[#allocation2 + $0x48] sm:$0xff]  ;;  %282 = vmatpush.msra.mxu1 %v5299_v58 }
  0x24   :  { %263 = vmatpush.msrb.mxu3 %v5229_v35  ;;  %204 = vmatpush.msra.mxu0 %v5239_v38  ;;  %8638 = vst [vmem:[#allocation32_spill] sm:$0xff] %v5259_v44  ;;  %v5285_v54 = vld [vmem:[#allocation2] sm:$0xff]  ;;  %v5321_v47 = vld [vmem:[#allocation2 + $0x28] sm:$0xff]  ;;  %v5335_v35 = vld [vmem:[#allocation2 + $0x70] sm:$0xff] }
  0x25   :  { %8639 = vst [vmem:[#allocation33_spill] sm:$0xff] %v5261_v45  ;;  %244 = vmatpush.msra.mxu2 %v5271_v49  ;;  %283 = vmatpush.msra.mxu1 %v5311_v62  ;;  %v5363_v44 = vld [vmem:[#allocation2 + $0x230] sm:$0xff] }
  0x26   :  { %264 = vmatpush.msrb.mxu3 %v5241_v39  ;;  %8640 = vst [vmem:[#allocation34_spill] sm:$0xff] %v5263_v46  ;;  %205 = vmatpush.msra.mxu0 %v5249_v41  ;;  %v5333_v39 = vld [vmem:[#allocation2 + $0x8] sm:$0xff] }
  0x27   :  { %8641 = vst [vmem:[#allocation35_spill] sm:$0xff] %v5269_v48  ;;  %245 = vmatpush.msra.mxu2 %v5283_v53 }
  0x28   :  { %265 = vmatpush.msrb.mxu3 %v5251_v42  ;;  %8642 = vst [vmem:[#allocation36_spill] sm:$0xff] %v5271_v49  ;;  %206 = vmatpush.msra.mxu0 %v5261_v45  ;;  %v8658_v42 = vmov 0.0   ;;  %v5351_v49 = vld [vmem:[#allocation2 + $0x250] sm:$0xff] }
  0x29   :  { %8643 = vst [vmem:[#allocation37_spill] sm:$0xff] %v5273_v50  ;;  %246 = vmatpush.msra.mxu2 %v5301_v59 }
  0x2a   :  { %8644 = vst [vmem:[#allocation38_spill] sm:$0xff] %v5275_v51  ;;  %266 = vmatpush.msrb.mxu3 %v5263_v46  ;;  %207 = vmatpush.msra.mxu0 %v5273_v50  ;;  %v5327_v46 = vld [vmem:[#allocation2 + $0x290] sm:$0xff] }
  0x2b   :  { %8645 = vst [vmem:[#allocation39_spill] sm:$0xff] %v5281_v52  ;;  %247 = vmatpush.msra.mxu2 %v5321_v47  ;;  %v5373_v52 = vld [vmem:[#allocation2 + $0x210] sm:$0xff] }
  0x2c   :  { %8646 = vst [vmem:[#allocation40_spill] sm:$0xff] %v5283_v53  ;;  %267 = vmatpush.msrb.mxu3 %v5275_v51  ;;  %208 = vmatpush.msra.mxu0 %v5285_v54  ;;  %v5325_v51 = vld [vmem:[#allocation2 + $0x198] sm:$0xff]  ;;  %v5347_v53 = vld [vmem:[#allocation2 + $0x50] sm:$0xff] }
  0x2d   :  { %8647 = vst [vmem:[#allocation41_spill] sm:$0xff] %v5285_v54  ;;  %248 = vmatpush.msra.mxu2 %v5333_v39 }
  0x2e   :  { %8648 = vst [vmem:[#allocation42_spill] sm:$0xff] %v5287_v55  ;;  %268 = vmatpush.msrb.mxu3 %v5287_v55  ;;  %313 = vmatpush.msrb.mxu0 %v5292_v56  ;;  %v5323_v55 = vld [vmem:[#allocation2 + $0x90] sm:$0xff] }
  0x2f   :  { %8649 = vst [vmem:[#allocation43_spill] sm:$0xff] %v5295_v57  ;;  %269 = vmatmul.f32.vlgmr.msrb.gmra.mxu3 %v8658_v42  ;;  %284 = vmatpush.msra.mxu1 %v5323_v55 }
  0x30   :  { %8650 = vst [vmem:[#allocation44_spill] sm:$0xff] %v5299_v58  ;;  %301 = vmatpush.msra.mxu3 %v5295_v57  ;;  %314 = vmatpush.msrb.mxu0 %v5304_v60  ;;  %v5361_v58 = vld [vmem:[#allocation2 + $0x138] sm:$0xff] }
  0x31   :  { %8651 = vst [vmem:[#allocation45_spill] sm:$0xff] %v5301_v59  ;;  %v5345_v59 = vld [vmem:[#allocation2 + $0x2f8] sm:$0xff]  ;;  %285 = vmatpush.msra.mxu1 %v5335_v35 }
  0x32   :  { %8652 = vst [vmem:[#allocation46_spill] sm:$0xff] %v5307_v61  ;;  %302 = vmatpush.msra.mxu3 %v5307_v61  ;;  %315 = vmatpush.msrb.mxu0 %v5313_v63 }
  0x33   :  { %8653 = vst [vmem:[#allocation47_spill] sm:$0xff] %v5311_v62  ;;  %v5349_v62 = vld [vmem:[#allocation2 + $0x158] sm:$0xff]  ;;  %341 = vmatpush.msrb.mxu2 %v5345_v59  ;;  %286 = vmatpush.msra.mxu1 %v5347_v53 }
  0x34   :  { %8654 = vst [vmem:[#allocation48_spill] sm:$0xff] %v5315_v0  ;;  %303 = vmatpush.msra.mxu3 %v5315_v0  ;;  %316 = vmatpush.msrb.mxu0 %v5325_v51 }
  0x35   :  { %8655 = vst [vmem:[#allocation49_spill] sm:$0xff] %v5321_v47  ;;  %v5357_v47 = vld [vmem:[#allocation2 + $0x2d8] sm:$0xff] }
  0x36   :  { %8656 = vst [vmem:[#allocation50_spill] sm:$0xff] %v5323_v55  ;;  %304 = vmatpush.msra.mxu3 %v5327_v46  ;;  %317 = vmatpush.msrb.mxu0 %v5337_v31  ;;  %v5359_v55 = vld [vmem:[#allocation2 + $0x30] sm:$0xff] }
  0x37   :  { %8657 = vst [vmem:[#allocation51_spill] sm:$0xff] %v5327_v46  ;;  %342 = vmatpush.msrb.mxu2 %v5357_v47  ;;  %287 = vmatpush.msra.mxu1 %v5359_v55 }
  0x38   :  { %8659 = vst [vmem:[#allocation52_spill] sm:$0xff] %v5333_v39  ;;  %305 = vmatpush.msra.mxu3 %v5339_v27  ;;  %318 = vmatpush.msrb.mxu0 %v5349_v62  ;;  %v5369_v39 = vld [vmem:[#allocation2 + $0x2b8] sm:$0xff] }
  0x39   :  { %8660 = vst [vmem:[#allocation53_spill] sm:$0xff] %v5335_v35  ;;  %v5371_v35 = vld [vmem:[#allocation2 + $0x118] sm:$0xff]  ;;  %343 = vmatpush.msrb.mxu2 %v5369_v39 }
  0x3a   :  { %8661 = vst [vmem:[#allocation54_spill] sm:$0xff] %v5339_v27  ;;  %306 = vmatpush.msra.mxu3 %v5351_v49  ;;  %319 = vmatpush.msrb.mxu0 %v5361_v58 }
  0x3b   :  { %8662 = vst [vmem:[#allocation55_spill] sm:$0xff] %v5345_v59  ;;  %v5379_v59 = vld [vmem:[#allocation2 + $0xf8] sm:$0xff] }
  0x3c   :  { %8663 = vst [vmem:[#allocation56_spill] sm:$0xff] %v5347_v53  ;;  %307 = vmatpush.msra.mxu3 %v5363_v44  ;;  %320 = vmatpush.msrb.mxu0 %v5371_v35  ;;  %v5384_v53 = vld [vmem:[#allocation2 + $0xd8] sm:$0xff] }
  0x3d   :  { %8664 = vst [vmem:[#allocation57_spill] sm:$0xff] %v5351_v49 }
  0x3e   :  { %8665 = vst [vmem:[#allocation58_spill] sm:$0xff] %v5357_v47  ;;  %308 = vmatpush.msra.mxu3 %v5373_v52  ;;  %321 = vmatpush.msrb.mxu0 %v5379_v59  ;;  %v5389_v47 = vld [vmem:[#allocation2 + $0xb8] sm:$0xff] }
  0x3f   :  { %8666 = vst [vmem:[#allocation59_spill] sm:$0xff] %v5359_v55  ;;  %309 = vmatmul.f32.vlgmr.msra.gmra.mxu3 %v8658_v42 }
  0x40   :  { %8667 = vst [vmem:[#allocation60_spill] sm:$0xff] %v5363_v44  ;;  %440 = vmatpush.msrb.mxu3 %v5133_v1  ;;  %322 = vmatpush.msrb.mxu0 %v5384_v53 }
  0x41   :  { %8668 = vst [vmem:[#allocation61_spill] sm:$0xff] %v5373_v52 }
  0x42   :  { %8669 = vst [vmem:[#allocation62_spill] sm:$0xff] %v5379_v59  ;;  %441 = vmatpush.msrb.mxu3 %v5135_v2  ;;  %323 = vmatpush.msrb.mxu0 %v5389_v47 }
  0x43   :  { %8670 = vst [vmem:[#allocation63_spill] sm:$0xff] %v5384_v53 }
  0x44   :  { %8671 = vst [vmem:[#allocation64_spill] sm:$0xff] %v5389_v47  ;;  %442 = vmatpush.msrb.mxu3 %v5141_v4 }
  0x46   :  { %443 = vmatpush.msrb.mxu3 %v5149_v7 }
  0x48   :  { %444 = vmatpush.msrb.mxu3 %v5157_v10 }
  0x4a   :  { %445 = vmatpush.msrb.mxu3 %v5168_v14 }
  0x4c   :  { %446 = vmatpush.msrb.mxu3 %v5179_v18 }
  0x4e   :  { %447 = vmatpush.msrb.mxu3 %v5191_v22  ;;  %v5410_v22 = vld [vmem:[#allocation2 + $0x10] sm:$0xff] }
  0x4f   :  { %8672 = vst [vmem:[#allocation65_spill] sm:$0xff] %v5410_v22  ;;  %288 = vmatpush.msra.mxu1 %v5410_v22 }
  0x50   :  { %448 = vmatpush.msrb.mxu3 %v5203_v26  ;;  %v5412_v26 = vld [vmem:[#allocation2 + $0x98] sm:$0xff] }
  0x51   :  { %8673 = vst [vmem:[#allocation66_spill] sm:$0xff] %v5412_v26  ;;  %324 = vmatpush.msrb.mxu0 %v5412_v26  ;;  %468 = vmatpush.msrb.mxu1 %v5139_v3 }
  0x52   :  { %449 = vmatpush.msrb.mxu3 %v5215_v30 }
  0x53   :  { %469 = vmatpush.msrb.mxu1 %v5144_v5 }
  0x54   :  { %450 = vmatpush.msrb.mxu3 %v5227_v34 }
  0x55   :  { %470 = vmatpush.msrb.mxu1 %v5147_v6 }
  0x56   :  { %451 = vmatpush.msrb.mxu3 %v5239_v38  ;;  %v5440_v38 = vld [vmem:[#allocation2 + $0x18] sm:$0xff] }
  0x57   :  { %8677 = vst [vmem:[#allocation70_spill] sm:$0xff] %v5440_v38  ;;  %471 = vmatpush.msrb.mxu1 %v5153_v8 }
  0x58   :  { %452 = vmatpush.msrb.mxu3 %v5249_v41  ;;  %v5417_v41 = vld [vmem:[#allocation2 + $0x298] sm:$0xff] }
  0x59   :  { %344 = vmatpush.msrb.mxu2 %v5417_v41  ;;  %472 = vmatpush.msrb.mxu1 %v5164_v12 }
  0x5a   :  { %453 = vmatpush.msrb.mxu3 %v5261_v45  ;;  %v5434_v45 = vld [vmem:[#allocation2 + $0x238] sm:$0xff] }
  0x5b   :  { %473 = vmatpush.msrb.mxu1 %v5173_v15 }
  0x5c   :  { %454 = vmatpush.msrb.mxu3 %v5273_v50  ;;  %v5432_v50 = vld [vmem:[#allocation2 + $0x38] sm:$0xff] }
  0x5d   :  { %8676 = vst [vmem:[#allocation69_spill] sm:$0xff] %v5432_v50  ;;  %474 = vmatpush.msrb.mxu1 %v5186_v20 }
  0x5e   :  { %455 = vmatpush.msrb.mxu3 %v5285_v54  ;;  %v5421_v54 = vld [vmem:[#allocation2 + $0x78] sm:$0xff] }
  0x5f   :  { %8674 = vst [vmem:[#allocation67_spill] sm:$0xff] %v5421_v54  ;;  %325 = vmatpush.msrb.mxu0 %v5421_v54  ;;  %475 = vmatpush.msrb.mxu1 %v5198_v24 }
  0x60   :  { %548 = vmatpush.msra.mxu3 %v5295_v57  ;;  %v5423_v57 = vld [vmem:[#allocation2 + $0x278] sm:$0xff] }
  0x61   :  { %345 = vmatpush.msrb.mxu2 %v5423_v57 }
  0x62   :  { %549 = vmatpush.msra.mxu3 %v5307_v61  ;;  %v5425_v61 = vld [vmem:[#allocation2 + $0x58] sm:$0xff] }
  0x63   :  { %8675 = vst [vmem:[#allocation68_spill] sm:$0xff] %v5425_v61  ;;  %326 = vmatpush.msrb.mxu0 %v5425_v61 }
  0x64   :  { %550 = vmatpush.msra.mxu3 %v5315_v0  ;;  %v5430_v0 = vld [vmem:[#allocation2 + $0x258] sm:$0xff] }
  0x65   :  { %346 = vmatpush.msrb.mxu2 %v5430_v0  ;;  %327 = vmatpush.msrb.mxu0 %v5432_v50 }
  0x66   :  { %551 = vmatpush.msra.mxu3 %v5327_v46  ;;  %v5442_v46 = vld [vmem:[#allocation2 + $0x218] sm:$0xff] }
  0x67   :  { %347 = vmatpush.msrb.mxu2 %v5434_v45  ;;  %328 = vmatpush.msrb.mxu0 %v5440_v38 }
  0x68   :  { %552 = vmatpush.msra.mxu3 %v5339_v27 }
  0x69   :  { %348 = vmatpush.msrb.mxu2 %v5442_v46 }
  0x6a   :  { %553 = vmatpush.msra.mxu3 %v5351_v49  ;;  %v170_v49 = vld [vmem:[%s8177_s0] sm:$0x3] }
  0x6c   :  { %554 = vmatpush.msra.mxu3 %v5363_v44 }
  0x6e   :  { %555 = vmatpush.msra.mxu3 %v5373_v52  ;;  %v8682_v52 = vld [vmem:[#allocation47_spill] sm:$0xff] }
  0x80   :  { %v175_v44 = vpop.permute.xlu0 %174 }
  0x81   :  { %v178_v27 = vsel %vm177_vm0, %v170_v49, %v175_v44  ;;  %v8680_v44 = vld [vmem:[#allocation44_spill] sm:$0xff] }
  0x82   :  { %4247 = vmatmul.msk.f32.vlgmr.msra.gmra.mxu0 %vm179_vm1, %v178_v27  ;;  %4248 = vmatmul.msk.f32.vlgmr.msra.gmra.mxu2 %vm179_vm1, %v178_v27  ;;  %v8681_v49 = vld [vmem:[#allocation36_spill] sm:$0xff] }
  0x83   :  { %4249 = vmatmul.msk.f32.vlgmr.msra.gmra.mxu1 %vm179_vm1, %v178_v27  ;;  %480 = vmatpush.msra.mxu2 %v5155_v9 }
  0x84   :  { %560 = vmatpush.msra.mxu0 %v5292_v56  ;;  %520 = vmatpush.msra.mxu1 %v5177_v17 }
  0x85   :  { %481 = vmatpush.msra.mxu2 %v5161_v11 }
  0x86   :  { %561 = vmatpush.msra.mxu0 %v5304_v60  ;;  %521 = vmatpush.msra.mxu1 %v5183_v19 }
  0x87   :  { %482 = vmatpush.msra.mxu2 %v5166_v13 }
  0x88   :  { %562 = vmatpush.msra.mxu0 %v5313_v63  ;;  %522 = vmatpush.msra.mxu1 %v5195_v23 }
  0x89   :  { %483 = vmatpush.msra.mxu2 %v5175_v16 }
  0x8a   :  { %4250 = vmatmul.msk.f32.vlgmr.msrb.gmra.mxu0 %vm179_vm1, %v178_v27  ;;  %349 = vmatmul.f32.vlgmr.msrb.gmra.mxu2 %v8658_v42  ;;  %v8678_v27 = vld [vmem:[#allocation39_spill] sm:$0xff]  ;;  %v8679_v42 = vld [vmem:[#allocation32_spill] sm:$0xff] }
  0x8b   :  { %484 = vmatpush.msra.mxu2 %v5189_v21  ;;  %563 = vmatpush.msra.mxu0 %v5325_v51 }
  0x8c   :  { %523 = vmatpush.msra.mxu1 %v5213_v29 }
  0x8d   :  { %485 = vmatpush.msra.mxu2 %v5201_v25  ;;  %564 = vmatpush.msra.mxu0 %v5337_v31 }
  0x8e   :  { %524 = vmatpush.msra.mxu1 %v5225_v33 }
  0x8f   :  { %486 = vmatpush.msra.mxu2 %v5211_v28  ;;  %565 = vmatpush.msra.mxu0 %v5349_v62 }
  0x90   :  { %525 = vmatpush.msra.mxu1 %v5237_v37 }
  0x91   :  { %487 = vmatpush.msra.mxu2 %v5223_v32  ;;  %566 = vmatpush.msra.mxu0 %v5361_v58 }
  0x92   :  { %526 = vmatpush.msra.mxu1 %v5257_v43 }
  0x93   :  { %488 = vmatpush.msra.mxu2 %v5235_v36  ;;  %567 = vmatpush.msra.mxu0 %v5371_v35  ;;  %v8683_v36 = vld [vmem:[#allocation40_spill] sm:$0xff] }
  0x94   :  { %527 = vmatpush.msra.mxu1 %v5269_v48  ;;  %v8685_v48 = vld [vmem:[#allocation45_spill] sm:$0xff] }
  0x95   :  { %489 = vmatpush.msra.mxu2 %v5247_v40  ;;  %568 = vmatpush.msra.mxu0 %v5379_v59  ;;  %v8684_v40 = vld [vmem:[#allocation50_spill] sm:$0xff] }
  0x96   :  { %528 = vmatpush.msra.mxu1 %v8678_v27  ;;  %v8687_v27 = vld [vmem:[#allocation49_spill] sm:$0xff] }
  0x97   :  { %490 = vmatpush.msra.mxu2 %v8679_v42  ;;  %569 = vmatpush.msra.mxu0 %v5384_v53  ;;  %v8686_v42 = vld [vmem:[#allocation53_spill] sm:$0xff] }
  0x98   :  { %529 = vmatpush.msra.mxu1 %v8680_v44  ;;  %v8689_v44 = vld [vmem:[#allocation52_spill] sm:$0xff] }
  0x99   :  { %491 = vmatpush.msra.mxu2 %v8681_v49  ;;  %570 = vmatpush.msra.mxu0 %v5389_v47  ;;  %v8688_v49 = vld [vmem:[#allocation56_spill] sm:$0xff] }
  0x9a   :  { %530 = vmatpush.msra.mxu1 %v8682_v52 }
  0x9b   :  { %492 = vmatpush.msra.mxu2 %v8683_v36  ;;  %571 = vmatpush.msra.mxu0 %v5412_v26  ;;  %v8690_v36 = vld [vmem:[#allocation18_spill] sm:$0xff] }
  0x9c   :  { %531 = vmatpush.msra.mxu1 %v8684_v40 }
  0x9d   :  { %493 = vmatpush.msra.mxu2 %v8685_v48  ;;  %572 = vmatpush.msra.mxu0 %v5421_v54  ;;  %v8691_v48 = vld [vmem:[#allocation20_spill] sm:$0xff] }
  0x9e   :  { %532 = vmatpush.msra.mxu1 %v8686_v42  ;;  %v8696_v42 = vld [vmem:[#allocation38_spill] sm:$0xff] }
  0x9f   :  { %494 = vmatpush.msra.mxu2 %v8687_v27  ;;  %573 = vmatpush.msra.mxu0 %v5425_v61  ;;  %v8692_v27 = vld [vmem:[#allocation23_spill] sm:$0xff] }
  0xa0   :  { %533 = vmatpush.msra.mxu1 %v8688_v49  ;;  %v8693_v49 = vld [vmem:[#allocation27_spill] sm:$0xff] }
  0xa1   :  { %495 = vmatpush.msra.mxu2 %v8689_v44  ;;  %574 = vmatpush.msra.mxu0 %v5432_v50  ;;  %v8694_v44 = vld [vmem:[#allocation30_spill] sm:$0xff] }
  0xa2   :  { %534 = vmatpush.msra.mxu1 %v5359_v55  ;;  %v8695_v55 = vld [vmem:[#allocation34_spill] sm:$0xff] }
  0xa3   :  { %508 = vmatpush.msrb.mxu2 %v8690_v36  ;;  %575 = vmatpush.msra.mxu0 %v5440_v38 }
  0xa4   :  { %535 = vmatpush.msra.mxu1 %v5410_v22 }
  0xa5   :  { %509 = vmatpush.msrb.mxu2 %v8691_v48  ;;  %753 = vmatpush.msrb.mxu0 %v8690_v36  ;;  %v8697_v36 = vld [vmem:[#allocation42_spill] sm:$0xff] }
  0xa7   :  { %510 = vmatpush.msrb.mxu2 %v8692_v27  ;;  %754 = vmatpush.msrb.mxu0 %v8691_v48  ;;  %v169_v48 = vld [vmem:[%s8180_s3] sm:$0xf]  ;;  %s5048_s3 = smov 64  }
  0xa8   :  { %v5536_v40 = vperm.slane %v169_v48, 1  ;;  %v5543_v54 = vperm.slane %v169_v48, 3 }
  0xa9   :  { %511 = vmatpush.msrb.mxu2 %v8693_v49  ;;  %755 = vmatpush.msrb.mxu0 %v8692_v27  ;;  %v5533_v27 = vperm.slane %v169_v48, 0 }
  0xaa   :  { %8699 = vst [vmem:[#allocation20_spill] sm:$0xff] %v5536_v40 }
  0xab   :  { %512 = vmatpush.msrb.mxu2 %v8694_v44  ;;  %756 = vmatpush.msrb.mxu0 %v8693_v49  ;;  %8698 = vst [vmem:[#allocation18_spill] sm:$0xff] %v5533_v27  ;;  %v230_v49 = vpop.f32.mrf.mxu3 }
  0xac   :  { %8700 = vst [vmem:[#allocation23_spill] sm:$0xff] %v5543_v54 }
  0xad   :  { %513 = vmatpush.msrb.mxu2 %v8695_v55  ;;  %757 = vmatpush.msrb.mxu0 %v8694_v44 }
  0xaf   :  { %514 = vmatpush.msrb.mxu2 %v8696_v42  ;;  %758 = vmatpush.msrb.mxu0 %v8695_v55 }
  0xb1   :  { %515 = vmatpush.msrb.mxu2 %v8697_v36  ;;  %759 = vmatpush.msrb.mxu0 %v8696_v42  ;;  %v4255_v42 = vld [vmem:[%s8177_s0 + $0xc] sm:$0x3] }
  0xb2   :  { %430 = vrot.lane.b32.xlu0 %v4255_v42, %s5045_s17 }
  0xb3   :  { %760 = vmatpush.msrb.mxu0 %v8697_v36  ;;  %v270_v52 = vpop.f32.mrf.mxu3 }
  0xc2   :  { %v310_v28 = vpop.f32.mrf.mxu3 }
  0xff   :  { %v210_v22 = vpop.f32.mrf.mxu0 }
 0x100   :  { %v211_v44 = vadd.f32 %v210_v22, %v5533_v27  ;;  %v290_v42 = vpop.f32.mrf.mxu1 }
 0x102   :  { %v231_v38 = vadd.f32 %v230_v49, %v211_v44 }
 0x104   :  { %v4251_v55 = vmul.f32 -1.442695, %v231_v38 }
 0x105   :  { %v250_v50 = vpop.f32.mrf.mxu2 }
 0x106   :  { %4380 = vpow2.f32 %v4251_v55  ;;  %v251_v36 = vadd.f32 %v250_v50, %v5536_v40  ;;  %v5546_v55 = vperm.slane %v169_v48, 2 }
 0x107   :  { %v330_v26 = vpop.f32.mrf.mxu0 }
 0x108   :  { %v271_v61 = vadd.f32 %v270_v52, %v251_v36  ;;  %v331_v38 = vadd.f32 %v330_v26, %v5543_v54  ;;  %8701 = vst [vmem:[#allocation27_spill] sm:$0xff] %v5546_v55 }
 0x10a   :  { %v4252_v22 = vmul.f32 -1.442695, %v271_v61  ;;  %v291_v61 = vadd.f32 %v290_v42, %v5546_v55 }
 0x10c   :  { %v4381_v49 = vpop.eup %4380  ;;  %4382 = vpow2.f32 %v4252_v22 }
 0x10d   :  { %v356_v44 = vadd.f32 1.0, %v4381_v49  ;;  %v350_v27 = vpop.f32.mrf.mxu2 }
 0x10e   :  { %v351_v32 = vadd.f32 %v350_v27, %v331_v38  ;;  %v311_v27 = vadd.f32 %v310_v28, %v291_v61 }
 0x10f   :  { %4384 = vrcp.f32 %v356_v44  ;;  %v368_v48 = vand.u32 2147483648, %v356_v44  ;;  %vm362_vm3 = vweird.f32 %v356_v44 }
 0x110   :  { %v4253_v43 = vmul.f32 -1.442695, %v351_v32 }
 0x112   :  { %v4383_v47 = vpop.eup %4382  ;;  %4386 = vpow2.f32 %v4253_v43 }
 0x113   :  { %v375_v50 = vadd.f32 1.0, %v4383_v47  ;;  %v366_v47 = vand.u32 2147483647, %v356_v44 }
 0x115   :  { %v4385_v52 = vpop.eup %4384  ;;  %4388 = vrcp.f32 %v375_v50  ;;  %v387_v37 = vand.u32 2147483648, %v375_v50  ;;  %vm367_vm6 = vcmp.eq.f32.partialorder %v366_v47, 8.507059e+37  ;;  %vm381_vm7 = vweird.f32 %v375_v50 }
 0x116   :  { %v358_v36 = vmul.f32 %v4385_v52, %v356_v44  ;;  %vm363_vm2 = vweird.f32 %v4385_v52 }
 0x117   :  { %vm364_vm4 = vmor %vm362_vm3, %vm363_vm2 }
 0x118   :  { %v4387_v40 = vpop.eup %4386  ;;  %v359_v22 = vsub.f32 1.0, %v358_v36  ;;  %v385_v36 = vand.u32 2147483647, %v375_v50 }
 0x119   :  { %v395_v26 = vadd.f32 1.0, %v4387_v40  ;;  %v369_v40 = vor.u32 1.1754944e-38, %v368_v48 }
 0x11a   :  { %v360_v49 = vmul.f32 %v4385_v52, %v359_v22  ;;  %vm386_vm9 = vcmp.eq.f32.partialorder %v385_v36, 8.507059e+37 }
 0x11b   :  { %v4389_v54 = vpop.eup %4388  ;;  %4390 = vrcp.f32 %v395_v26  ;;  %v407_v48 = vand.u32 2147483648, %v395_v26  ;;  %vm401_vm11 = vweird.f32 %v395_v26 }
 0x11c   :  { %v361_v32 = vadd.f32 %v4385_v52, %v360_v49  ;;  %v377_v43 = vmul.f32 %v4389_v54, %v375_v50  ;;  %4392 = vtanh.f32 %v311_v27  ;;  %vm382_vm5 = vweird.f32 %v4389_v54 }
 0x11d   :  { %vm383_vm8 = vmor %vm381_vm7, %vm382_vm5  ;;  %v388_v49 = vor.u32 1.1754944e-38, %v387_v37  ;;  %v405_v50 = vand.u32 2147483647, %v395_v26  ;;  %v408_v37 = vor.u32 1.1754944e-38, %v407_v48  ;;  %v8746_v48 = vld [vmem:[#allocation52_spill] sm:$0xff] }
 0x11e   :  { %v378_v38 = vsub.f32 1.0, %v377_v43  ;;  %v365_v53 = vsel %vm364_vm4, %v4385_v52, %v361_v32 }
 0x11f   :  { %v370_v61 = vsel %vm367_vm6, %v369_v40, %v365_v53  ;;  %vm406_vm13 = vcmp.eq.f32.partialorder %v405_v50, 8.507059e+37  ;;  %v8702_v40 = vld [vmem:[#allocation55_spill] sm:$0xff]  ;;  %v8747_v50 = vld [vmem:[#allocation60_spill] sm:$0xff] }
 0x120   :  { %v379_v42 = vmul.f32 %v4389_v54, %v378_v38 }
 0x121   :  { %v4391_v55 = vpop.eup %4390 }
 0x122   :  { %v380_v22 = vadd.f32 %v4389_v54, %v379_v42  ;;  %v397_v28 = vmul.f32 %v4391_v55, %v395_v26  ;;  %v4393_v43 = vpop.eup %4392  ;;  %vm402_vm10 = vweird.f32 %v4391_v55 }
 0x123   :  { %v412_v27 = vmul.f32 %v4393_v43, %v370_v61  ;;  %vm403_vm12 = vmor %vm401_vm11, %vm402_vm10  ;;  %v8739_v61 = vld [vmem:[#allocation53_spill] sm:$0xff]  ;;  %v8742_v43 = vld [vmem:[#allocation56_spill] sm:$0xff] }
 0x124   :  { %v398_v25 = vsub.f32 1.0, %v397_v28  ;;  %v384_v44 = vsel %vm383_vm8, %v4389_v54, %v380_v22  ;;  %v8703_v22 = vld [vmem:[#allocation58_spill] sm:$0xff]  ;;  %v8738_v28 = vld [vmem:[#allocation51_spill] sm:$0xff] }
 0x125   :  { %v389_v33 = vsel %vm386_vm9, %v388_v49, %v384_v44  ;;  %v8740_v49 = vld [vmem:[#allocation45_spill] sm:$0xff]  ;;  %v8741_v44 = vld [vmem:[#allocation54_spill] sm:$0xff] }
 0x126   :  { %v399_v59 = vmul.f32 %v4391_v55, %v398_v25  ;;  %v411_v52 = vmul.f32 0.0, %v389_v33  ;;  %v4254_v33 = vld [vmem:[%s8177_s0 + $0x2] sm:$0x3] }
 0x128   :  { %v5549_v32 = vadd.f32 %v412_v27, %v411_v52  ;;  %v400_v38 = vadd.f32 %v4391_v55, %v399_v59  ;;  %v431_v59 = vpop.permute.xlu0 %430  ;;  %v8743_v27 = vld [vmem:[#allocation49_spill] sm:$0xff] }
 0x129   :  { %v8744_v52 = vld [vmem:[#allocation57_spill] sm:$0xff] }
 0x12a   :  { %4394 = vtanh.f32 %v5549_v32  ;;  %v404_v53 = vsel %vm403_vm12, %v4391_v55, %v400_v38  ;;  %v436_v55 = vsel %vm177_vm0, %v4254_v33, %v431_v59  ;;  %v8745_v38 = vld [vmem:[#allocation59_spill] sm:$0xff] }
 0x12b   :  { %v409_v54 = vsel %vm406_vm13, %v408_v37, %v404_v53  ;;  %v8748_v53 = vld [vmem:[#allocation65_spill] sm:$0xff] }
 0x12c   :  { %v8749_v37 = vld [vmem:[#allocation61_spill] sm:$0xff] }
 0x130   :  { %v4395_v47 = vpop.eup %4394 }
 0x131   :  { %v415_v42 = vmul.f32 %v4395_v47, %v409_v54  ;;  %v4264_v47 = vld [vmem:[%s8177_s0 + $0xa] sm:$0x3] }
 0x133   :  { %433 = vrot.lane.b32.xlu1 %v415_v42, %s5048_s3  ;;  %417 = vst.msk [vmem:[#allocation7] sm:$0x1] %vm416_vm14, %v415_v42  ;;  %v421_v25 = vrot.slane %v415_v42, 1 }
 0x134   :  { %419 = vst.msk [vmem:[#allocation7 + $0x7] sm:$0x1] %vm418_vm15, %v415_v42 }
 0x135   :  { %423 = vst.msk [vmem:[#allocation7 + $0x8] sm:$0x1] %vm416_vm14, %v421_v25 }
 0x136   :  { %424 = vst.msk [vmem:[#allocation7 + $0xf] sm:$0x1] %vm418_vm15, %v421_v25  ;;  %v8750_v25 = vld [vmem:[#allocation18_spill] sm:$0xff] }
 0x13b   :  { %675 = vrot.lane.b32.xlu1 %v4264_v47, %s5045_s17 }
 0x1a5   :  { %v434_v26 = vpop.permute.xlu1 %433 }
 0x1a6   :  { %4256 = vmatmul.msk.f32.vlgmr.msrb.gmra.mxu1 %vm179_vm1, %v434_v26  ;;  %v437_v36 = vsel %vm179_vm1, %v436_v55, %v434_v26 }
 0x1a7   :  { %456 = vmatmul.f32.vlgmr.msrb.gmra.mxu3 %v437_v36  ;;  %496 = vmatmul.f32.vlgmr.msra.gmra.mxu2 %v437_v36 }
 0x1a8   :  { %576 = vmatmul.f32.vlgmr.msra.gmra.mxu0 %v437_v36  ;;  %588 = vmatpush.msra.mxu2 %v8702_v40 }
 0x1a9   :  { %713 = vmatpush.msrb.mxu1 %v5139_v3  ;;  %685 = vmatpush.msrb.mxu3 %v5133_v1  ;;  %v8704_v1 = vld [vmem:[#allocation15_spill] sm:$0xff]  ;;  %v8706_v3 = vld [vmem:[#allocation62_spill] sm:$0xff] }
 0x1aa   :  { %589 = vmatpush.msra.mxu2 %v8703_v22  ;;  %805 = vmatpush.msra.mxu0 %v5292_v56  ;;  %v8733_v56 = vld [vmem:[#allocation36_spill] sm:$0xff] }
 0x1ab   :  { %714 = vmatpush.msrb.mxu1 %v5144_v5  ;;  %686 = vmatpush.msrb.mxu3 %v5135_v2  ;;  %v8705_v2 = vld [vmem:[#allocation17_spill] sm:$0xff]  ;;  %v8708_v5 = vld [vmem:[#allocation22_spill] sm:$0xff] }
 0x1ac   :  { %590 = vmatpush.msra.mxu2 %v5369_v39  ;;  %806 = vmatpush.msra.mxu0 %v5304_v60  ;;  %v8735_v60 = vld [vmem:[#allocation50_spill] sm:$0xff] }
 0x1ad   :  { %715 = vmatpush.msrb.mxu1 %v5147_v6  ;;  %687 = vmatpush.msrb.mxu3 %v5141_v4  ;;  %v8707_v4 = vld [vmem:[#allocation26_spill] sm:$0xff]  ;;  %v8709_v6 = vld [vmem:[#allocation16_spill] sm:$0xff] }
 0x1ae   :  { %536 = vmatmul.f32.vlgmr.msra.gmra.mxu1 %v437_v36  ;;  %591 = vmatpush.msra.mxu2 %v5417_v41 }
 0x1af   :  { %4257 = vmatmul.msk.f32.vlgmr.msrb.gmra.mxu2 %vm179_vm1, %v434_v26  ;;  %4258 = vmatmul.msk.f32.vlgmr.msra.gmra.mxu3 %vm179_vm1, %v434_v26 }
 0x1b0   :  { %592 = vmatpush.msra.mxu2 %v5423_v57  ;;  %716 = vmatpush.msrb.mxu1 %v5153_v8  ;;  %v8711_v8 = vld [vmem:[#allocation29_spill] sm:$0xff] }
 0x1b1   :  { %688 = vmatpush.msrb.mxu3 %v5149_v7  ;;  %807 = vmatpush.msra.mxu0 %v5313_v63  ;;  %v8710_v7 = vld [vmem:[#allocation63_spill] sm:$0xff]  ;;  %v8737_v63 = vld [vmem:[#allocation40_spill] sm:$0xff] }
 0x1b2   :  { %593 = vmatpush.msra.mxu2 %v5430_v0  ;;  %717 = vmatpush.msrb.mxu1 %v5164_v12  ;;  %v8715_v12 = vld [vmem:[#allocation33_spill] sm:$0xff] }
 0x1b3   :  { %689 = vmatpush.msrb.mxu3 %v5157_v10  ;;  %808 = vmatpush.msra.mxu0 %v5325_v51  ;;  %v8713_v10 = vld [vmem:[#allocation19_spill] sm:$0xff]  ;;  %v8732_v51 = vld [vmem:[#allocation69_spill] sm:$0xff] }
 0x1b4   :  { %594 = vmatpush.msra.mxu2 %v5434_v45  ;;  %718 = vmatpush.msrb.mxu1 %v5173_v15  ;;  %v8718_v15 = vld [vmem:[#allocation66_spill] sm:$0xff] }
 0x1b5   :  { %690 = vmatpush.msrb.mxu3 %v5168_v14  ;;  %809 = vmatpush.msra.mxu0 %v5337_v31  ;;  %v8717_v14 = vld [vmem:[#allocation21_spill] sm:$0xff]  ;;  %v8729_v31 = vld [vmem:[#allocation32_spill] sm:$0xff] }
 0x1b6   :  { %595 = vmatpush.msra.mxu2 %v5442_v46  ;;  %719 = vmatpush.msrb.mxu1 %v5186_v20  ;;  %v8723_v20 = vld [vmem:[#allocation41_spill] sm:$0xff] }
 0x1b7   :  { %4259 = vmatmul.msk.f32.vlgmr.msra.gmra.mxu2 %vm179_vm1, %v434_v26  ;;  %691 = vmatpush.msrb.mxu3 %v5179_v18  ;;  %v8721_v18 = vld [vmem:[#allocation24_spill] sm:$0xff] }
 0x1b8   :  { %725 = vmatpush.msrb.mxu2 %v5155_v9  ;;  %720 = vmatpush.msrb.mxu1 %v5198_v24  ;;  %v8712_v9 = vld [vmem:[#allocation25_spill] sm:$0xff]  ;;  %v8726_v24 = vld [vmem:[#allocation43_spill] sm:$0xff]  ;;  %v8751_v26 = vld [vmem:[#allocation20_spill] sm:$0xff] }
 0x1b9   :  { %692 = vmatpush.msrb.mxu3 %v8704_v1  ;;  %810 = vmatpush.msra.mxu0 %v5349_v62  ;;  %v8736_v62 = vld [vmem:[#allocation70_spill] sm:$0xff] }
 0x1ba   :  { %765 = vmatpush.msra.mxu1 %v5177_v17  ;;  %726 = vmatpush.msrb.mxu2 %v5161_v11  ;;  %v8714_v11 = vld [vmem:[#allocation64_spill] sm:$0xff]  ;;  %v8720_v17 = vld [vmem:[#allocation35_spill] sm:$0xff] }
 0x1bb   :  { %693 = vmatpush.msrb.mxu3 %v8705_v2  ;;  %811 = vmatpush.msra.mxu0 %v5361_v58  ;;  %v8734_v58 = vld [vmem:[#allocation48_spill] sm:$0xff] }
 0x1bc   :  { %766 = vmatpush.msra.mxu1 %v5183_v19  ;;  %727 = vmatpush.msrb.mxu2 %v5166_v13  ;;  %v8716_v13 = vld [vmem:[#allocation31_spill] sm:$0xff] }
 0x1bd   :  { %694 = vmatpush.msrb.mxu3 %v5215_v30  ;;  %812 = vmatpush.msra.mxu0 %v5371_v35  ;;  %v8722_v19 = vld [vmem:[#allocation67_spill] sm:$0xff]  ;;  %v8728_v30 = vld [vmem:[#allocation68_spill] sm:$0xff] }
 0x1be   :  { %767 = vmatpush.msra.mxu1 %v5195_v23  ;;  %728 = vmatpush.msrb.mxu2 %v5175_v16  ;;  %v8719_v16 = vld [vmem:[#allocation37_spill] sm:$0xff]  ;;  %v8725_v23 = vld [vmem:[#allocation28_spill] sm:$0xff]  ;;  %v8731_v35 = vld [vmem:[#allocation47_spill] sm:$0xff] }
 0x1bf   :  { %695 = vmatpush.msrb.mxu3 %v5227_v34  ;;  %813 = vmatpush.msra.mxu0 %v8706_v3  ;;  %v8730_v34 = vld [vmem:[#allocation46_spill] sm:$0xff] }
 0x1c0   :  { %768 = vmatpush.msra.mxu1 %v5213_v29  ;;  %729 = vmatpush.msrb.mxu2 %v5189_v21  ;;  %v8724_v21 = vld [vmem:[#allocation39_spill] sm:$0xff]  ;;  %v8727_v29 = vld [vmem:[#allocation44_spill] sm:$0xff] }
 0x1c1   :  { %696 = vmatpush.msrb.mxu3 %v8707_v4  ;;  %814 = vmatpush.msra.mxu0 %v8710_v7 }
 0x1c2   :  { %769 = vmatpush.msra.mxu1 %v8708_v5  ;;  %730 = vmatpush.msrb.mxu2 %v8709_v6  ;;  %v8752_v6 = vld [vmem:[#allocation23_spill] sm:$0xff] }
 0x1c3   :  { %697 = vmatpush.msrb.mxu3 %v8711_v8  ;;  %815 = vmatpush.msra.mxu0 %v8714_v11 }
 0x1c4   :  { %770 = vmatpush.msra.mxu1 %v8712_v9  ;;  %731 = vmatpush.msrb.mxu2 %v8713_v10 }
 0x1c5   :  { %698 = vmatpush.msrb.mxu3 %v8715_v12  ;;  %816 = vmatpush.msra.mxu0 %v8718_v15 }
 0x1c6   :  { %771 = vmatpush.msra.mxu1 %v8716_v13  ;;  %732 = vmatpush.msrb.mxu2 %v8717_v14 }
 0x1c7   :  { %699 = vmatpush.msrb.mxu3 %v8719_v16  ;;  %817 = vmatpush.msra.mxu0 %v8722_v19 }
 0x1c8   :  { %772 = vmatpush.msra.mxu1 %v8720_v17  ;;  %733 = vmatpush.msrb.mxu2 %v8721_v18 }
 0x1c9   :  { %700 = vmatpush.msrb.mxu3 %v8723_v20  ;;  %818 = vmatpush.msra.mxu0 %v8728_v30 }
 0x1ca   :  { %773 = vmatpush.msra.mxu1 %v8724_v21  ;;  %734 = vmatpush.msrb.mxu2 %v8725_v23  ;;  %v8753_v23 = vld [vmem:[#allocation27_spill] sm:$0xff] }
 0x1cb   :  { %793 = vmatpush.msra.mxu3 %v8726_v24  ;;  %819 = vmatpush.msra.mxu0 %v8732_v51 }
 0x1cc   :  { %774 = vmatpush.msra.mxu1 %v8727_v29  ;;  %735 = vmatpush.msrb.mxu2 %v8729_v31 }
 0x1cd   :  { %794 = vmatpush.msra.mxu3 %v8730_v34  ;;  %820 = vmatpush.msra.mxu0 %v8736_v62 }
 0x1ce   :  { %775 = vmatpush.msra.mxu1 %v8731_v35  ;;  %736 = vmatpush.msrb.mxu2 %v8733_v56 }
 0x1cf   :  { %795 = vmatpush.msra.mxu3 %v8734_v58 }
 0x1d0   :  { %776 = vmatpush.msra.mxu1 %v8735_v60  ;;  %737 = vmatpush.msrb.mxu2 %v8737_v63 }
 0x1d1   :  { %796 = vmatpush.msra.mxu3 %v8738_v28 }
 0x1d2   :  { %777 = vmatpush.msra.mxu1 %v8739_v61  ;;  %738 = vmatpush.msrb.mxu2 %v8740_v49 }
 0x1d3   :  { %797 = vmatpush.msra.mxu3 %v8741_v44 }
 0x1d4   :  { %778 = vmatpush.msra.mxu1 %v8742_v43  ;;  %739 = vmatpush.msrb.mxu2 %v8743_v27 }
 0x1d5   :  { %798 = vmatpush.msra.mxu3 %v8744_v52 }
 0x1d6   :  { %779 = vmatpush.msra.mxu1 %v8745_v38  ;;  %740 = vmatpush.msrb.mxu2 %v8746_v48 }
 0x1d7   :  { %799 = vmatpush.msra.mxu3 %v8747_v50 }
 0x1d8   :  { %833 = vmatpush.msra.mxu2 %v8702_v40  ;;  %780 = vmatpush.msra.mxu1 %v8748_v53 }
 0x1d9   :  { %800 = vmatpush.msra.mxu3 %v8749_v37 }
 0x1da   :  { %834 = vmatpush.msra.mxu2 %v8703_v22 }
 0x1dc   :  { %835 = vmatpush.msra.mxu2 %v5369_v39 }
 0x1de   :  { %836 = vmatpush.msra.mxu2 %v5417_v41 }
 0x1e0   :  { %837 = vmatpush.msra.mxu2 %v5423_v57 }
 0x1e2   :  { %838 = vmatpush.msra.mxu2 %v5430_v0 }
 0x1e4   :  { %839 = vmatpush.msra.mxu2 %v5434_v45 }
 0x1e6   :  { %840 = vmatpush.msra.mxu2 %v5442_v46 }
 0x223   :  { %v477_v33 = vpop.f32.mrf.mxu1 }
 0x225   :  { %v577_v2 = vpop.f32.mrf.mxu0 }
 0x226   :  { %v578_v8 = vadd.f32 %v577_v2, %v8752_v6 }
 0x22a   :  { %v457_v54 = vpop.f32.mrf.mxu3  ;;  %v497_v42 = vpop.f32.mrf.mxu2 }
 0x22b   :  { %v458_v39 = vadd.f32 %v457_v54, %v8750_v25  ;;  %v498_v36 = vadd.f32 %v497_v42, %v8751_v26  ;;  %v537_v18 = vpop.f32.mrf.mxu1 }
 0x22c   :  { %v538_v24 = vadd.f32 %v537_v18, %v8753_v23  ;;  %v5686_v18 = vld [vmem:[#allocation2 + $0x2e0] sm:$0xff] }
 0x22d   :  { %v478_v59 = vadd.f32 %v477_v33, %v458_v39 }
 0x22f   :  { %v4260_v55 = vmul.f32 -1.442695, %v478_v59 }
 0x231   :  { %4396 = vpow2.f32 %v4260_v55 }
 0x232   :  { %v517_v40 = vpop.f32.mrf.mxu2  ;;  %v557_v21 = vpop.f32.mrf.mxu3 }
 0x233   :  { %v518_v22 = vadd.f32 %v517_v40, %v498_v36  ;;  %v558_v35 = vadd.f32 %v557_v21, %v538_v24  ;;  %v5692_v21 = vld [vmem:[#allocation2 + $0x1e0] sm:$0xff]  ;;  %v5695_v24 = vld [vmem:[#allocation2 + $0x1e8] sm:$0xff] }
 0x235   :  { %v4261_v1 = vmul.f32 -1.442695, %v518_v22 }
 0x237   :  { %v4397_v4 = vpop.eup %4396  ;;  %4398 = vpow2.f32 %v4261_v1 }
 0x238   :  { %v603_v5 = vadd.f32 1.0, %v4397_v4 }
 0x23a   :  { %4400 = vrcp.f32 %v603_v5  ;;  %v597_v9 = vpop.f32.mrf.mxu2  ;;  %v615_v63 = vand.u32 2147483648, %v603_v5  ;;  %vm609_vm3 = vweird.f32 %v603_v5  ;;  %v613_v61 = vand.u32 2147483647, %v603_v5 }
 0x23b   :  { %v598_v10 = vadd.f32 %v597_v9, %v578_v8 }
 0x23c   :  { %v616_v52 = vor.u32 1.1754944e-38, %v615_v63  ;;  %vm614_vm7 = vcmp.eq.f32.partialorder %v613_v61, 8.507059e+37  ;;  %v5719_v63 = vld [vmem:[#allocation2 + $0x1a8] sm:$0xff] }
 0x23d   :  { %v4399_v12 = vpop.eup %4398  ;;  %v4262_v13 = vmul.f32 -1.442695, %v598_v10  ;;  %v5727_v61 = vld [vmem:[#allocation2 + $0x288] sm:$0xff] }
 0x23e   :  { %v622_v14 = vadd.f32 1.0, %v4399_v12  ;;  %v4263_v12 = vld [vmem:[%s8177_s0 + $0x4] sm:$0x3] }
 0x23f   :  { %4402 = vpow2.f32 %v4262_v13  ;;  %v676_v13 = vpop.permute.xlu1 %675 }
 0x240   :  { %v4401_v16 = vpop.eup %4400  ;;  %4404 = vrcp.f32 %v622_v14  ;;  %v634_v49 = vand.u32 2147483648, %v622_v14  ;;  %v632_v27 = vand.u32 2147483647, %v622_v14  ;;  %vm628_vm6 = vweird.f32 %v622_v14 }
 0x241   :  { %v605_v17 = vmul.f32 %v4401_v16, %v603_v5  ;;  %vm610_vm2 = vweird.f32 %v4401_v16 }
 0x242   :  { %vm611_vm4 = vmor %vm609_vm3, %vm610_vm2  ;;  %v635_v50 = vor.u32 1.1754944e-38, %v634_v49  ;;  %vm633_vm9 = vcmp.eq.f32.partialorder %v632_v27, 8.507059e+37  ;;  %v5730_v49 = vld [vmem:[#allocation2 + $0x180] sm:$0xff]  ;;  %v5739_v27 = vld [vmem:[#allocation2 + $0x268] sm:$0xff] }
 0x243   :  { %v606_v20 = vsub.f32 1.0, %v605_v17 }
 0x245   :  { %v4403_v29 = vpop.eup %4402  ;;  %v607_v31 = vmul.f32 %v4401_v16, %v606_v20  ;;  %v5689_v20 = vld [vmem:[#allocation2 + $0x2e8] sm:$0xff] }
 0x246   :  { %v4405_v34 = vpop.eup %4404  ;;  %v642_v56 = vadd.f32 1.0, %v4403_v29  ;;  %v5698_v29 = vld [vmem:[#allocation2 + $0x2c0] sm:$0xff] }
 0x247   :  { %v624_v58 = vmul.f32 %v4405_v34, %v622_v14  ;;  %v608_v60 = vadd.f32 %v4401_v16, %v607_v31  ;;  %vm629_vm5 = vweird.f32 %v4405_v34  ;;  %v681_v14 = vsel %vm177_vm0, %v4263_v12, %v676_v13  ;;  %v5701_v31 = vld [vmem:[#allocation2 + $0x2c8] sm:$0xff]  ;;  %v5808_v12 = vld [vmem:[#allocation2 + $0x1b0] sm:$0xff]  ;;  %v5811_v13 = vld [vmem:[#allocation2 + $0x1b8] sm:$0xff] }
 0x248   :  { %4406 = vrcp.f32 %v642_v56  ;;  %vm630_vm8 = vmor %vm628_vm6, %vm629_vm5  ;;  %v654_v1 = vand.u32 2147483648, %v642_v56  ;;  %vm648_vm11 = vweird.f32 %v642_v56  ;;  %v652_v2 = vand.u32 2147483647, %v642_v56  ;;  %8756 = vst [vmem:[#allocation38_spill] sm:$0xff] %v5808_v12 }
 0x249   :  { %v625_v28 = vsub.f32 1.0, %v624_v58  ;;  %4408 = vtanh.f32 %v558_v35  ;;  %v612_v43 = vsel %vm611_vm4, %v4401_v16, %v608_v60  ;;  %v5707_v35 = vld [vmem:[#allocation2 + $0x1c8] sm:$0xff]  ;;  %v5716_v60 = vld [vmem:[#allocation2 + $0x1a0] sm:$0xff]  ;;  %8757 = vst [vmem:[#allocation42_spill] sm:$0xff] %v5811_v13 }
 0x24a   :  { %v617_v37 = vsel %vm614_vm7, %v616_v52, %v612_v43  ;;  %v655_v5 = vor.u32 1.1754944e-38, %v654_v1  ;;  %vm653_vm13 = vcmp.eq.f32.partialorder %v652_v2, 8.507059e+37  ;;  %v5713_v58 = vld [vmem:[#allocation2 + $0x2a8] sm:$0xff]  ;;  %v5736_v43 = vld [vmem:[#allocation2 + $0x260] sm:$0xff]  ;;  %v5784_v1 = vld [vmem:[#allocation2 + $0x1f0] sm:$0xff] }
 0x24b   :  { %v626_v44 = vmul.f32 %v4405_v34, %v625_v28  ;;  %v5724_v28 = vld [vmem:[#allocation2 + $0x280] sm:$0xff]  ;;  %v5787_v2 = vld [vmem:[#allocation2 + $0x1f8] sm:$0xff] }
 0x24c   :  { %v5742_v52 = vld [vmem:[#allocation2 + $0x160] sm:$0xff] }
 0x24d   :  { %v627_v38 = vadd.f32 %v4405_v34, %v626_v44  ;;  %v5733_v44 = vld [vmem:[#allocation2 + $0x188] sm:$0xff] }
 0x24e   :  { %v4407_v48 = vpop.eup %4406 }
 0x24f   :  { %v631_v47 = vsel %vm630_vm8, %v4405_v34, %v627_v38  ;;  %v644_v54 = vmul.f32 %v4407_v48, %v642_v56  ;;  %v4409_v42 = vpop.eup %4408  ;;  %vm649_vm10 = vweird.f32 %v4407_v48  ;;  %v5704_v34 = vld [vmem:[#allocation2 + $0x1c0] sm:$0xff]  ;;  %v5745_v38 = vld [vmem:[#allocation2 + $0x168] sm:$0xff] }
 0x250   :  { %v636_v39 = vsel %vm633_vm9, %v635_v50, %v631_v47  ;;  %v659_v59 = vmul.f32 %v4409_v42, %v617_v37  ;;  %vm650_vm12 = vmor %vm648_vm11, %vm649_vm10  ;;  %v5710_v56 = vld [vmem:[#allocation2 + $0x2a0] sm:$0xff]  ;;  %v5751_v50 = vld [vmem:[#allocation2 + $0x248] sm:$0xff] }
 0x251   :  { %v658_v33 = vmul.f32 %v636_v39, %v5549_v32  ;;  %v645_v55 = vsub.f32 1.0, %v644_v54  ;;  %v5754_v37 = vld [vmem:[#allocation2 + $0x140] sm:$0xff]  ;;  %v5757_v47 = vld [vmem:[#allocation2 + $0x148] sm:$0xff] }
 0x252   :  { %v5760_v54 = vld [vmem:[#allocation2 + $0x220] sm:$0xff]  ;;  %v5763_v42 = vld [vmem:[#allocation2 + $0x228] sm:$0xff] }
 0x253   :  { %v5671_v36 = vadd.f32 %v659_v59, %v658_v33  ;;  %v646_v40 = vmul.f32 %v4407_v48, %v645_v55  ;;  %v5766_v39 = vld [vmem:[#allocation2 + $0x120] sm:$0xff]  ;;  %v5769_v33 = vld [vmem:[#allocation2 + $0x128] sm:$0xff] }
 0x254   :  { %v5772_v59 = vld [vmem:[#allocation2 + $0x200] sm:$0xff]  ;;  %v5775_v55 = vld [vmem:[#allocation2 + $0x208] sm:$0xff] }
 0x255   :  { %4410 = vtanh.f32 %v5671_v36  ;;  %v647_v22 = vadd.f32 %v4407_v48, %v646_v40  ;;  %v5778_v40 = vld [vmem:[#allocation2 + $0x100] sm:$0xff] }
 0x257   :  { %v651_v4 = vsel %vm650_vm12, %v4407_v48, %v647_v22  ;;  %v5748_v48 = vld [vmem:[#allocation2 + $0x240] sm:$0xff]  ;;  %v5781_v22 = vld [vmem:[#allocation2 + $0x108] sm:$0xff] }
 0x258   :  { %v656_v9 = vsel %vm653_vm13, %v655_v5, %v651_v4  ;;  %v5790_v4 = vld [vmem:[#allocation2 + $0xe0] sm:$0xff]  ;;  %v5793_v5 = vld [vmem:[#allocation2 + $0xe8] sm:$0xff] }
 0x25b   :  { %v4411_v8 = vpop.eup %4410 }
 0x25c   :  { %v662_v10 = vmul.f32 %v4411_v8, %v656_v9  ;;  %v5796_v8 = vld [vmem:[#allocation2 + $0x1d0] sm:$0xff]  ;;  %v5799_v9 = vld [vmem:[#allocation2 + $0x1d8] sm:$0xff] }
 0x25e   :  { %678 = vrot.lane.b32.xlu2 %v662_v10, %s5048_s3  ;;  %663 = vst.msk [vmem:[#allocation7 + $0x1] sm:$0x1] %vm416_vm14, %v662_v10  ;;  %v666_v32 = vrot.slane %v662_v10, 1 }
 0x25f   :  { %664 = vst.msk [vmem:[#allocation7 + $0x6] sm:$0x1] %vm418_vm15, %v662_v10  ;;  %v5802_v10 = vld [vmem:[#allocation2 + $0xc0] sm:$0xff] }
 0x260   :  { %668 = vst.msk [vmem:[#allocation7 + $0x9] sm:$0x1] %vm416_vm14, %v666_v32 }
 0x261   :  { %669 = vst.msk [vmem:[#allocation7 + $0xe] sm:$0x1] %vm418_vm15, %v666_v32  ;;  %v5805_v32 = vld [vmem:[#allocation2 + $0xc8] sm:$0xff] }
 0x262   :  { %8754 = vst [vmem:[#allocation30_spill] sm:$0xff] %v5802_v10 }
 0x263   :  { %8755 = vst [vmem:[#allocation34_spill] sm:$0xff] %v5805_v32 }
 0x2b8   :  { %v679_v16 = vpop.permute.xlu2 %678 }
 0x2b9   :  { %4265 = vmatmul.msk.f32.vlgmr.msrb.gmra.mxu1 %vm179_vm1, %v679_v16  ;;  %4266 = vmatmul.msk.f32.vlgmr.msrb.gmra.mxu0 %vm179_vm1, %v679_v16  ;;  %v682_v17 = vsel %vm179_vm1, %v681_v14, %v679_v16  ;;  %v5814_v14 = vld [vmem:[#allocation2 + $0xa0] sm:$0xff] }
 0x2ba   :  { %701 = vmatmul.f32.vlgmr.msrb.gmra.mxu3 %v682_v17  ;;  %741 = vmatmul.f32.vlgmr.msrb.gmra.mxu2 %v682_v17  ;;  %8758 = vst [vmem:[#allocation55_spill] sm:$0xff] %v5814_v14 }
 0x2bb   :  { %958 = vmatpush.msrb.mxu1 %v5686_v18  ;;  %998 = vmatpush.msrb.mxu0 %v5689_v20 }
 0x2bc   :  { %930 = vmatpush.msrb.mxu3 %v5692_v21  ;;  %970 = vmatpush.msrb.mxu2 %v5695_v24 }
 0x2bd   :  { %959 = vmatpush.msrb.mxu1 %v5698_v29  ;;  %999 = vmatpush.msrb.mxu0 %v5701_v31 }
 0x2be   :  { %931 = vmatpush.msrb.mxu3 %v5704_v34  ;;  %971 = vmatpush.msrb.mxu2 %v5707_v35 }
 0x2bf   :  { %960 = vmatpush.msrb.mxu1 %v5710_v56  ;;  %1000 = vmatpush.msrb.mxu0 %v5713_v58 }
 0x2c0   :  { %932 = vmatpush.msrb.mxu3 %v5716_v60  ;;  %972 = vmatpush.msrb.mxu2 %v5719_v63 }
 0x2c1   :  { %781 = vmatmul.f32.vlgmr.msra.gmra.mxu1 %v682_v17  ;;  %821 = vmatmul.f32.vlgmr.msra.gmra.mxu0 %v682_v17  ;;  %v5820_v17 = vld [vmem:[#allocation2 + $0x190] sm:$0xff] }
 0x2c2   :  { %4267 = vmatmul.msk.f32.vlgmr.msra.gmra.mxu3 %vm179_vm1, %v679_v16  ;;  %4268 = vmatmul.msk.f32.vlgmr.msra.gmra.mxu2 %vm179_vm1, %v679_v16  ;;  %v5817_v16 = vld [vmem:[#allocation2 + $0xa8] sm:$0xff]  ;;  %8760 = vst [vmem:[#allocation15_spill] sm:$0xff] %v5820_v17 }
 0x2c3   :  { %961 = vmatpush.msrb.mxu1 %v5724_v28  ;;  %1001 = vmatpush.msrb.mxu0 %v5727_v61  ;;  %8759 = vst [vmem:[#allocation58_spill] sm:$0xff] %v5817_v16 }
 0x2c4   :  { %933 = vmatpush.msrb.mxu3 %v5730_v49  ;;  %973 = vmatpush.msrb.mxu2 %v5733_v44 }
 0x2c5   :  { %962 = vmatpush.msrb.mxu1 %v5736_v43  ;;  %1002 = vmatpush.msrb.mxu0 %v5739_v27 }
 0x2c6   :  { %934 = vmatpush.msrb.mxu3 %v5742_v52  ;;  %974 = vmatpush.msrb.mxu2 %v5745_v38 }
 0x2c7   :  { %963 = vmatpush.msrb.mxu1 %v5748_v48  ;;  %1003 = vmatpush.msrb.mxu0 %v5751_v50 }
 0x2c8   :  { %935 = vmatpush.msrb.mxu3 %v5754_v37  ;;  %975 = vmatpush.msrb.mxu2 %v5757_v47 }
 0x2c9   :  { %964 = vmatpush.msrb.mxu1 %v5760_v54  ;;  %1004 = vmatpush.msrb.mxu0 %v5763_v42 }
 0x2ca   :  { %936 = vmatpush.msrb.mxu3 %v5766_v39  ;;  %976 = vmatpush.msrb.mxu2 %v5769_v33 }
 0x2cb   :  { %965 = vmatpush.msrb.mxu1 %v5772_v59  ;;  %1005 = vmatpush.msrb.mxu0 %v5775_v55 }
 0x2cc   :  { %937 = vmatpush.msrb.mxu3 %v5778_v40  ;;  %977 = vmatpush.msrb.mxu2 %v5781_v22 }
 0x2cd   :  { %1010 = vmatpush.msra.mxu1 %v5784_v1  ;;  %1050 = vmatpush.msra.mxu0 %v5787_v2 }
 0x2ce   :  { %938 = vmatpush.msrb.mxu3 %v5790_v4  ;;  %978 = vmatpush.msrb.mxu2 %v5793_v5 }
 0x2cf   :  { %1011 = vmatpush.msra.mxu1 %v5796_v8  ;;  %1051 = vmatpush.msra.mxu0 %v5799_v9 }
 0x2d0   :  { %939 = vmatpush.msrb.mxu3 %v5802_v10  ;;  %979 = vmatpush.msrb.mxu2 %v5805_v32  ;;  %v5823_v32 = vld [vmem:[#allocation2 + $0x198] sm:$0xff] }
 0x2d1   :  { %1012 = vmatpush.msra.mxu1 %v5808_v12  ;;  %1052 = vmatpush.msra.mxu0 %v5811_v13  ;;  %8761 = vst [vmem:[#allocation17_spill] sm:$0xff] %v5823_v32  ;;  %v5826_v12 = vld [vmem:[#allocation2 + $0x80] sm:$0xff]  ;;  %v5829_v13 = vld [vmem:[#allocation2 + $0x88] sm:$0xff] }
 0x2d2   :  { %940 = vmatpush.msrb.mxu3 %v5814_v14  ;;  %980 = vmatpush.msrb.mxu2 %v5817_v16  ;;  %8762 = vst [vmem:[#allocation62_spill] sm:$0xff] %v5826_v12  ;;  %v5832_v14 = vld [vmem:[#allocation2 + $0x170] sm:$0xff]  ;;  %v5835_v16 = vld [vmem:[#allocation2 + $0x178] sm:$0xff] }
 0x2d3   :  { %1013 = vmatpush.msra.mxu1 %v5820_v17  ;;  %1053 = vmatpush.msra.mxu0 %v5823_v32  ;;  %8763 = vst [vmem:[#allocation26_spill] sm:$0xff] %v5829_v13  ;;  %v5838_v17 = vld [vmem:[#allocation2 + $0x60] sm:$0xff]  ;;  %v5841_v32 = vld [vmem:[#allocation2 + $0x68] sm:$0xff] }
 0x2d4   :  { %941 = vmatpush.msrb.mxu3 %v5826_v12  ;;  %981 = vmatpush.msrb.mxu2 %v5829_v13  ;;  %8764 = vst [vmem:[#allocation22_spill] sm:$0xff] %v5832_v14  ;;  %v5844_v12 = vld [vmem:[#allocation2 + $0x150] sm:$0xff]  ;;  %v5847_v13 = vld [vmem:[#allocation2 + $0x158] sm:$0xff] }
 0x2d5   :  { %1014 = vmatpush.msra.mxu1 %v5832_v14  ;;  %8765 = vst [vmem:[#allocation16_spill] sm:$0xff] %v5835_v16  ;;  %1054 = vmatpush.msra.mxu0 %v5835_v16  ;;  %v5850_v14 = vld [vmem:[#allocation2 + $0x40] sm:$0xff]  ;;  %v5853_v16 = vld [vmem:[#allocation2 + $0x48] sm:$0xff] }
 0x2d6   :  { %8766 = vst [vmem:[#allocation63_spill] sm:$0xff] %v5838_v17  ;;  %942 = vmatpush.msrb.mxu3 %v5838_v17  ;;  %982 = vmatpush.msrb.mxu2 %v5841_v32  ;;  %v5856_v17 = vld [vmem:[#allocation2 + $0x130] sm:$0xff] }
 0x2d7   :  { %8767 = vst [vmem:[#allocation29_spill] sm:$0xff] %v5841_v32  ;;  %1015 = vmatpush.msra.mxu1 %v5844_v12  ;;  %1055 = vmatpush.msra.mxu0 %v5847_v13  ;;  %v5859_v32 = vld [vmem:[#allocation2 + $0x138] sm:$0xff] }
 0x2d8   :  { %8768 = vst [vmem:[#allocation25_spill] sm:$0xff] %v5844_v12  ;;  %943 = vmatpush.msrb.mxu3 %v5850_v14  ;;  %983 = vmatpush.msrb.mxu2 %v5853_v16  ;;  %v5862_v12 = vld [vmem:[#allocation2 + $0x20] sm:$0xff] }
 0x2d9   :  { %8769 = vst [vmem:[#allocation19_spill] sm:$0xff] %v5847_v13  ;;  %1016 = vmatpush.msra.mxu1 %v5856_v17  ;;  %1056 = vmatpush.msra.mxu0 %v5859_v32  ;;  %v5865_v13 = vld [vmem:[#allocation2 + $0x28] sm:$0xff] }
 0x2da   :  { %8770 = vst [vmem:[#allocation64_spill] sm:$0xff] %v5850_v14  ;;  %944 = vmatpush.msrb.mxu3 %v5862_v12  ;;  %984 = vmatpush.msrb.mxu2 %v5865_v13  ;;  %v5868_v14 = vld [vmem:[#allocation2 + $0x110] sm:$0xff] }
 0x2db   :  { %8771 = vst [vmem:[#allocation33_spill] sm:$0xff] %v5853_v16  ;;  %1017 = vmatpush.msra.mxu1 %v5868_v14  ;;  %v5871_v16 = vld [vmem:[#allocation2 + $0x118] sm:$0xff] }
 0x2dc   :  { %8772 = vst [vmem:[#allocation31_spill] sm:$0xff] %v5856_v17  ;;  %1057 = vmatpush.msra.mxu0 %v5871_v16  ;;  %v5874_v17 = vld [vmem:[#allocation2] sm:$0xff] }
 0x2dd   :  { %8773 = vst [vmem:[#allocation21_spill] sm:$0xff] %v5859_v32  ;;  %945 = vmatpush.msrb.mxu3 %v5874_v17  ;;  %v5877_v32 = vld [vmem:[#allocation2 + $0x8] sm:$0xff] }
 0x2de   :  { %8774 = vst [vmem:[#allocation66_spill] sm:$0xff] %v5862_v12  ;;  %985 = vmatpush.msrb.mxu2 %v5877_v32  ;;  %v5880_v12 = vld [vmem:[#allocation2 + $0xf0] sm:$0xff]  ;;  %1058 = vmatpush.msra.mxu0 %v8706_v3 }
 0x2df   :  { %8775 = vst [vmem:[#allocation37_spill] sm:$0xff] %v5865_v13  ;;  %1018 = vmatpush.msra.mxu1 %v5880_v12  ;;  %v5884_v13 = vld [vmem:[#allocation2 + $0x2f0] sm:$0xff] }
 0x2e0   :  { %8776 = vst [vmem:[#allocation35_spill] sm:$0xff] %v5868_v14  ;;  %1038 = vmatpush.msra.mxu3 %v5884_v13  ;;  %v5887_v14 = vld [vmem:[#allocation2 + $0x2f8] sm:$0xff]  ;;  %1059 = vmatpush.msra.mxu0 %v8710_v7  ;;  %v5900_v3 = vld [vmem:[#allocation2 + $0xb0] sm:$0xff] }
 0x2e1   :  { %8777 = vst [vmem:[#allocation24_spill] sm:$0xff] %v5871_v16  ;;  %1078 = vmatpush.msra.mxu2 %v5887_v14  ;;  %v5890_v16 = vld [vmem:[#allocation2 + $0xd0] sm:$0xff] }
 0x2e2   :  { %8778 = vst [vmem:[#allocation67_spill] sm:$0xff] %v5874_v17  ;;  %1019 = vmatpush.msra.mxu1 %v5890_v16  ;;  %1060 = vmatpush.msra.mxu0 %v8714_v11  ;;  %v5910_v7 = vld [vmem:[#allocation2 + $0x90] sm:$0xff] }
 0x2e3   :  { %8779 = vst [vmem:[#allocation41_spill] sm:$0xff] %v5877_v32  ;;  %v5894_v32 = vld [vmem:[#allocation2 + $0x2d0] sm:$0xff] }
 0x2e4   :  { %8780 = vst [vmem:[#allocation39_spill] sm:$0xff] %v5880_v12  ;;  %1039 = vmatpush.msra.mxu3 %v5894_v32  ;;  %v5897_v12 = vld [vmem:[#allocation2 + $0x2d8] sm:$0xff]  ;;  %1020 = vmatpush.msra.mxu1 %v5900_v3  ;;  %v5918_v11 = vld [vmem:[#allocation2 + $0x70] sm:$0xff] }
 0x2e5   :  { %8781 = vst [vmem:[#allocation28_spill] sm:$0xff] %v5884_v13  ;;  %1079 = vmatpush.msra.mxu2 %v5897_v12  ;;  %1061 = vmatpush.msra.mxu0 %v8718_v15  ;;  %v5930_v15 = vld [vmem:[#allocation2 + $0x250] sm:$0xff] }
 0x2e6   :  { %8782 = vst [vmem:[#allocation43_spill] sm:$0xff] %v5887_v14  ;;  %v5904_v14 = vld [vmem:[#allocation2 + $0x2b0] sm:$0xff]  ;;  %1021 = vmatpush.msra.mxu1 %v5910_v7 }
 0x2e7   :  { %8783 = vst [vmem:[#allocation44_spill] sm:$0xff] %v5890_v16  ;;  %1040 = vmatpush.msra.mxu3 %v5904_v14  ;;  %v5907_v16 = vld [vmem:[#allocation2 + $0x2b8] sm:$0xff]  ;;  %1062 = vmatpush.msra.mxu0 %v8722_v19  ;;  %v5938_v19 = vld [vmem:[#allocation2 + $0x230] sm:$0xff] }
 0x2e8   :  { %8784 = vst [vmem:[#allocation68_spill] sm:$0xff] %v5894_v32  ;;  %1080 = vmatpush.msra.mxu2 %v5907_v16  ;;  %1022 = vmatpush.msra.mxu1 %v5918_v11 }
 0x2e9   :  { %8785 = vst [vmem:[#allocation32_spill] sm:$0xff] %v5897_v12  ;;  %v5914_v12 = vld [vmem:[#allocation2 + $0x290] sm:$0xff]  ;;  %1063 = vmatpush.msra.mxu0 %v8728_v30 }
 0x2ea   :  { %8786 = vst [vmem:[#allocation46_spill] sm:$0xff] %v5900_v3  ;;  %1041 = vmatpush.msra.mxu3 %v5914_v12  ;;  %1081 = vmatpush.msra.mxu2 %v5417_v41  ;;  %v5934_v41 = vld [vmem:[#allocation2 + $0x30] sm:$0xff] }
 0x2eb   :  { %8787 = vst [vmem:[#allocation47_spill] sm:$0xff] %v5904_v14  ;;  %v5922_v14 = vld [vmem:[#allocation2 + $0x270] sm:$0xff]  ;;  %1064 = vmatpush.msra.mxu0 %v8732_v51 }
 0x2ec   :  { %8788 = vst [vmem:[#allocation69_spill] sm:$0xff] %v5907_v16  ;;  %1042 = vmatpush.msra.mxu3 %v5922_v14  ;;  %1082 = vmatpush.msra.mxu2 %v5423_v57  ;;  %v5944_v57 = vld [vmem:[#allocation2 + $0x210] sm:$0xff] }
 0x2ed   :  { %8789 = vst [vmem:[#allocation36_spill] sm:$0xff] %v5910_v7  ;;  %v5926_v7 = vld [vmem:[#allocation2 + $0x50] sm:$0xff]  ;;  %1065 = vmatpush.msra.mxu0 %v8736_v62 }
 0x2ee   :  { %8790 = vst [vmem:[#allocation48_spill] sm:$0xff] %v5914_v12  ;;  %1023 = vmatpush.msra.mxu1 %v5926_v7  ;;  %1043 = vmatpush.msra.mxu3 %v5930_v15 }
 0x2ef   :  { %8791 = vst [vmem:[#allocation50_spill] sm:$0xff] %v5918_v11  ;;  %1083 = vmatpush.msra.mxu2 %v5430_v0 }
 0x2f0   :  { %8792 = vst [vmem:[#allocation70_spill] sm:$0xff] %v5922_v14  ;;  %1024 = vmatpush.msra.mxu1 %v5934_v41  ;;  %1044 = vmatpush.msra.mxu3 %v5938_v19 }
 0x2f1   :  { %8793 = vst [vmem:[#allocation40_spill] sm:$0xff] %v5926_v7  ;;  %1084 = vmatpush.msra.mxu2 %v5434_v45 }
 0x2f2   :  { %8794 = vst [vmem:[#allocation51_spill] sm:$0xff] %v5930_v15  ;;  %1025 = vmatpush.msra.mxu1 %v8748_v53  ;;  %1045 = vmatpush.msra.mxu3 %v5944_v57 }
 0x2f3   :  { %8795 = vst [vmem:[#allocation53_spill] sm:$0xff] %v5934_v41  ;;  %1085 = vmatpush.msra.mxu2 %v5442_v46 }
 0x2f4   :  { %8796 = vst [vmem:[#allocation45_spill] sm:$0xff] %v5938_v19 }
 0x2f5   :  { %8797 = vst [vmem:[#allocation54_spill] sm:$0xff] %v5944_v57 }
 0x336   :  { %v762_v0 = vpop.f32.mrf.mxu0  ;;  %v722_v19 = vpop.f32.mrf.mxu1 }
 0x33d   :  { %v702_v30 = vpop.f32.mrf.mxu3  ;;  %v742_v41 = vpop.f32.mrf.mxu2 }
 0x33e   :  { %v703_v51 = vadd.f32 %v702_v30, %v8750_v25  ;;  %v743_v15 = vadd.f32 %v742_v41, %v8751_v26  ;;  %v822_v14 = vpop.f32.mrf.mxu0  ;;  %v782_v41 = vpop.f32.mrf.mxu1 }
 0x33f   :  { %v823_v62 = vadd.f32 %v822_v14, %v8752_v6  ;;  %v783_v14 = vadd.f32 %v782_v41, %v8753_v23 }
 0x340   :  { %v723_v7 = vadd.f32 %v722_v19, %v703_v51  ;;  %v763_v45 = vadd.f32 %v762_v0, %v743_v15 }
 0x342   :  { %v4269_v53 = vmul.f32 -1.442695, %v723_v7  ;;  %v4270_v11 = vmul.f32 -1.442695, %v763_v45  ;;  %v4273_v7 = vld [vmem:[%s8177_s0 + $0x8] sm:$0x3] }
 0x343   :  { %920 = vrot.lane.b32.xlu2 %v4273_v7, %s5045_s17 }
 0x344   :  { %4412 = vpow2.f32 %v4269_v53 }
 0x345   :  { %4414 = vpow2.f32 %v4270_v11  ;;  %v842_v57 = vpop.f32.mrf.mxu2  ;;  %v802_v19 = vpop.f32.mrf.mxu3 }
 0x346   :  { %v843_v12 = vadd.f32 %v842_v57, %v823_v62  ;;  %v803_v57 = vadd.f32 %v802_v19, %v783_v14 }
 0x348   :  { %v4271_v46 = vmul.f32 -1.442695, %v843_v12 }
 0x34a   :  { %v4413_v16 = vpop.eup %4412  ;;  %4416 = vpow2.f32 %v4271_v46 }
 0x34b   :  { %v4415_v3 = vpop.eup %4414  ;;  %v848_v32 = vadd.f32 1.0, %v4413_v16 }
 0x34c   :  { %v867_v30 = vadd.f32 1.0, %v4415_v3 }
 0x34d   :  { %4418 = vrcp.f32 %v848_v32  ;;  %v860_v53 = vand.u32 2147483648, %v848_v32  ;;  %v858_v6 = vand.u32 2147483647, %v848_v32  ;;  %vm854_vm4 = vweird.f32 %v848_v32 }
 0x34e   :  { %4420 = vrcp.f32 %v867_v30  ;;  %v879_v62 = vand.u32 2147483648, %v867_v30  ;;  %v877_v7 = vand.u32 2147483647, %v867_v30  ;;  %vm873_vm5 = vweird.f32 %v867_v30 }
 0x34f   :  { %v861_v19 = vor.u32 1.1754944e-38, %v860_v53  ;;  %vm859_vm7 = vcmp.eq.f32.partialorder %v858_v6, 8.507059e+37 }
 0x350   :  { %v4417_v15 = vpop.eup %4416  ;;  %vm878_vm9 = vcmp.eq.f32.partialorder %v877_v7, 8.507059e+37  ;;  %v8798_v7 = vld [vmem:[#allocation30_spill] sm:$0xff] }
 0x351   :  { %v887_v11 = vadd.f32 1.0, %v4417_v15 }
 0x353   :  { %v4419_v12 = vpop.eup %4418  ;;  %4422 = vrcp.f32 %v887_v11  ;;  %vm893_vm11 = vweird.f32 %v887_v11  ;;  %v897_v6 = vand.u32 2147483647, %v887_v11 }
 0x354   :  { %v4421_v0 = vpop.eup %4420  ;;  %v850_v16 = vmul.f32 %v4419_v12, %v848_v32  ;;  %4424 = vtanh.f32 %v803_v57  ;;  %vm855_vm2 = vweird.f32 %v4419_v12 }
 0x355   :  { %v869_v3 = vmul.f32 %v4421_v0, %v867_v30  ;;  %vm874_vm3 = vweird.f32 %v4421_v0  ;;  %vm856_vm6 = vmor %vm854_vm4, %vm855_vm2  ;;  %vm898_vm13 = vcmp.eq.f32.partialorder %v897_v6, 8.507059e+37  ;;  %v8811_v6 = vld [vmem:[#allocation29_spill] sm:$0xff] }
 0x356   :  { %v851_v51 = vsub.f32 1.0, %v850_v16  ;;  %vm875_vm8 = vmor %vm873_vm5, %vm874_vm3  ;;  %v880_v16 = vor.u32 1.1754944e-38, %v879_v62 }
 0x357   :  { %v870_v45 = vsub.f32 1.0, %v869_v3 }
 0x358   :  { %v852_v46 = vmul.f32 %v4419_v12, %v851_v51 }
 0x359   :  { %v4423_v26 = vpop.eup %4422  ;;  %v871_v25 = vmul.f32 %v4421_v0, %v870_v45 }
 0x35a   :  { %v853_v41 = vadd.f32 %v4419_v12, %v852_v46  ;;  %v889_v15 = vmul.f32 %v4423_v26, %v887_v11  ;;  %v4425_v3 = vpop.eup %4424  ;;  %vm894_vm10 = vweird.f32 %v4423_v26 }
 0x35b   :  { %v872_v14 = vadd.f32 %v4421_v0, %v871_v25  ;;  %v899_v25 = vand.u32 2147483648, %v887_v11  ;;  %vm895_vm12 = vmor %vm893_vm11, %vm894_vm10 }
 0x35c   :  { %v857_v23 = vsel %vm856_vm6, %v4419_v12, %v853_v41  ;;  %v890_v57 = vsub.f32 1.0, %v889_v15  ;;  %v8799_v41 = vld [vmem:[#allocation34_spill] sm:$0xff] }
 0x35d   :  { %v862_v51 = vsel %vm859_vm7, %v861_v19, %v857_v23  ;;  %v876_v13 = vsel %vm875_vm8, %v4421_v0, %v872_v14  ;;  %v900_v53 = vor.u32 1.1754944e-38, %v899_v25  ;;  %v8800_v15 = vld [vmem:[#allocation38_spill] sm:$0xff]  ;;  %v8802_v14 = vld [vmem:[#allocation55_spill] sm:$0xff] }
 0x35e   :  { %v881_v17 = vsel %vm878_vm9, %v880_v16, %v876_v13  ;;  %v904_v45 = vmul.f32 %v4425_v3, %v862_v51  ;;  %v891_v10 = vmul.f32 %v4423_v26, %v890_v57  ;;  %v8801_v19 = vld [vmem:[#allocation42_spill] sm:$0xff]  ;;  %v8804_v57 = vld [vmem:[#allocation15_spill] sm:$0xff]  ;;  %v8805_v3 = vld [vmem:[#allocation17_spill] sm:$0xff] }
 0x35f   :  { %v903_v46 = vmul.f32 %v881_v17, %v5671_v36  ;;  %v8803_v16 = vld [vmem:[#allocation58_spill] sm:$0xff]  ;;  %v8810_v25 = vld [vmem:[#allocation63_spill] sm:$0xff] }
 0x360   :  { %v892_v30 = vadd.f32 %v4423_v26, %v891_v10  ;;  %v8806_v51 = vld [vmem:[#allocation62_spill] sm:$0xff] }
 0x361   :  { %v5957_v32 = vadd.f32 %v904_v45, %v903_v46  ;;  %v8807_v45 = vld [vmem:[#allocation26_spill] sm:$0xff] }
 0x362   :  { %v896_v12 = vsel %vm895_vm12, %v4423_v26, %v892_v30  ;;  %v4272_v26 = vld [vmem:[%s8177_s0 + $0x6] sm:$0x3]  ;;  %v8808_v46 = vld [vmem:[#allocation22_spill] sm:$0xff]  ;;  %v8809_v30 = vld [vmem:[#allocation16_spill] sm:$0xff] }
 0x363   :  { %4426 = vtanh.f32 %v5957_v32  ;;  %v901_v0 = vsel %vm898_vm13, %v900_v53, %v896_v12  ;;  %v8812_v12 = vld [vmem:[#allocation25_spill] sm:$0xff]  ;;  %v8813_v53 = vld [vmem:[#allocation19_spill] sm:$0xff] }
 0x369   :  { %v4427_v23 = vpop.eup %4426 }
 0x36a   :  { %v907_v13 = vmul.f32 %v4427_v23, %v901_v0  ;;  %v8814_v23 = vld [vmem:[#allocation64_spill] sm:$0xff]  ;;  %v8815_v0 = vld [vmem:[#allocation33_spill] sm:$0xff] }
 0x36c   :  { %923 = vrot.lane.b32.xlu0 %v907_v13, %s5048_s3  ;;  %908 = vst.msk [vmem:[#allocation7 + $0x2] sm:$0x1] %vm416_vm14, %v907_v13  ;;  %v911_v36 = vrot.slane %v907_v13, 1 }
 0x36d   :  { %909 = vst.msk [vmem:[#allocation7 + $0x5] sm:$0x1] %vm418_vm15, %v907_v13  ;;  %v8816_v13 = vld [vmem:[#allocation31_spill] sm:$0xff] }
 0x36e   :  { %913 = vst.msk [vmem:[#allocation7 + $0xa] sm:$0x1] %vm416_vm14, %v911_v36 }
 0x36f   :  { %914 = vst.msk [vmem:[#allocation7 + $0xd] sm:$0x1] %vm418_vm15, %v911_v36  ;;  %v8817_v36 = vld [vmem:[#allocation21_spill] sm:$0xff] }
 0x39d   :  { %v921_v10 = vpop.permute.xlu2 %920 }
 0x39e   :  { %v926_v17 = vsel %vm177_vm0, %v4272_v26, %v921_v10  ;;  %v8818_v26 = vld [vmem:[#allocation66_spill] sm:$0xff]  ;;  %v8819_v10 = vld [vmem:[#allocation37_spill] sm:$0xff] }
 0x3de   :  { %v924_v11 = vpop.permute.xlu0 %923 }
 0x3df   :  { %4274 = vmatmul.msk.f32.vlgmr.msrb.gmra.mxu1 %vm179_vm1, %v924_v11  ;;  %4275 = vmatmul.msk.f32.vlgmr.msrb.gmra.mxu0 %vm179_vm1, %v924_v11  ;;  %v927_v62 = vsel %vm179_vm1, %v926_v17, %v924_v11  ;;  %v8820_v17 = vld [vmem:[#allocation35_spill] sm:$0xff] }
 0x3e0   :  { %946 = vmatmul.f32.vlgmr.msrb.gmra.mxu3 %v927_v62  ;;  %986 = vmatmul.f32.vlgmr.msrb.gmra.mxu2 %v927_v62 }
 0x3e1   :  { %1201 = vmatpush.msrb.mxu1 %v5686_v18  ;;  %1241 = vmatpush.msrb.mxu0 %v5689_v20 }
 0x3e2   :  { %1173 = vmatpush.msrb.mxu3 %v5692_v21  ;;  %1213 = vmatpush.msrb.mxu2 %v5695_v24 }
 0x3e3   :  { %1202 = vmatpush.msrb.mxu1 %v5698_v29  ;;  %1242 = vmatpush.msrb.mxu0 %v5701_v31 }
 0x3e4   :  { %1174 = vmatpush.msrb.mxu3 %v5704_v34  ;;  %1214 = vmatpush.msrb.mxu2 %v5707_v35 }
 0x3e5   :  { %1203 = vmatpush.msrb.mxu1 %v5710_v56  ;;  %1243 = vmatpush.msrb.mxu0 %v5713_v58 }
 0x3e6   :  { %1175 = vmatpush.msrb.mxu3 %v5716_v60  ;;  %1215 = vmatpush.msrb.mxu2 %v5719_v63 }
 0x3e7   :  { %1026 = vmatmul.f32.vlgmr.msra.gmra.mxu1 %v927_v62  ;;  %1066 = vmatmul.f32.vlgmr.msra.gmra.mxu0 %v927_v62  ;;  %v8822_v62 = vld [vmem:[#allocation67_spill] sm:$0xff] }
 0x3e8   :  { %4276 = vmatmul.msk.f32.vlgmr.msra.gmra.mxu3 %vm179_vm1, %v924_v11  ;;  %4277 = vmatmul.msk.f32.vlgmr.msra.gmra.mxu2 %vm179_vm1, %v924_v11  ;;  %v8821_v11 = vld [vmem:[#allocation24_spill] sm:$0xff] }
 0x3e9   :  { %1204 = vmatpush.msrb.mxu1 %v5724_v28  ;;  %1244 = vmatpush.msrb.mxu0 %v5727_v61 }
 0x3ea   :  { %1176 = vmatpush.msrb.mxu3 %v5730_v49  ;;  %1216 = vmatpush.msrb.mxu2 %v5733_v44 }
 0x3eb   :  { %1205 = vmatpush.msrb.mxu1 %v5736_v43  ;;  %1245 = vmatpush.msrb.mxu0 %v5739_v27 }
 0x3ec   :  { %1177 = vmatpush.msrb.mxu3 %v5742_v52  ;;  %1217 = vmatpush.msrb.mxu2 %v5745_v38 }
 0x3ed   :  { %1206 = vmatpush.msrb.mxu1 %v5748_v48  ;;  %1246 = vmatpush.msrb.mxu0 %v5751_v50 }
 0x3ee   :  { %1178 = vmatpush.msrb.mxu3 %v5754_v37  ;;  %1218 = vmatpush.msrb.mxu2 %v5757_v47 }
 0x3ef   :  { %1207 = vmatpush.msrb.mxu1 %v5760_v54  ;;  %1247 = vmatpush.msrb.mxu0 %v5763_v42 }
 0x3f0   :  { %1179 = vmatpush.msrb.mxu3 %v5766_v39  ;;  %1219 = vmatpush.msrb.mxu2 %v5769_v33 }
 0x3f1   :  { %1208 = vmatpush.msrb.mxu1 %v5772_v59  ;;  %1248 = vmatpush.msrb.mxu0 %v5775_v55 }
 0x3f2   :  { %1180 = vmatpush.msrb.mxu3 %v5778_v40  ;;  %1220 = vmatpush.msrb.mxu2 %v5781_v22 }
 0x3f3   :  { %1253 = vmatpush.msra.mxu1 %v5784_v1  ;;  %1293 = vmatpush.msra.mxu0 %v5787_v2 }
 0x3f4   :  { %1181 = vmatpush.msrb.mxu3 %v5790_v4  ;;  %1221 = vmatpush.msrb.mxu2 %v5793_v5 }
 0x3f5   :  { %1254 = vmatpush.msra.mxu1 %v5796_v8  ;;  %1294 = vmatpush.msra.mxu0 %v5799_v9 }
 0x3f6   :  { %1182 = vmatpush.msrb.mxu3 %v8798_v7  ;;  %1222 = vmatpush.msrb.mxu2 %v8799_v41 }
 0x3f7   :  { %1255 = vmatpush.msra.mxu1 %v8800_v15  ;;  %1295 = vmatpush.msra.mxu0 %v8801_v19 }
 0x3f8   :  { %1183 = vmatpush.msrb.mxu3 %v8802_v14  ;;  %1223 = vmatpush.msrb.mxu2 %v8803_v16 }
 0x3f9   :  { %1256 = vmatpush.msra.mxu1 %v8804_v57  ;;  %1296 = vmatpush.msra.mxu0 %v8805_v3 }
 0x3fa   :  { %1184 = vmatpush.msrb.mxu3 %v8806_v51  ;;  %1224 = vmatpush.msrb.mxu2 %v8807_v45 }
 0x3fb   :  { %1257 = vmatpush.msra.mxu1 %v8808_v46  ;;  %1297 = vmatpush.msra.mxu0 %v8809_v30 }
 0x3fc   :  { %1185 = vmatpush.msrb.mxu3 %v8810_v25  ;;  %1225 = vmatpush.msrb.mxu2 %v8811_v6 }
 0x3fd   :  { %1258 = vmatpush.msra.mxu1 %v8812_v12  ;;  %1298 = vmatpush.msra.mxu0 %v8813_v53  ;;  %v8823_v12 = vld [vmem:[#allocation41_spill] sm:$0xff]  ;;  %v8824_v53 = vld [vmem:[#allocation39_spill] sm:$0xff] }
 0x3fe   :  { %1186 = vmatpush.msrb.mxu3 %v8814_v23  ;;  %1226 = vmatpush.msrb.mxu2 %v8815_v0  ;;  %v6039_v23 = vld [vmem:[#allocation2 + $0xf8] sm:$0xff] }
 0x3ff   :  { %1259 = vmatpush.msra.mxu1 %v8816_v13  ;;  %1299 = vmatpush.msra.mxu0 %v8817_v36  ;;  %8825 = vst [vmem:[#allocation56_spill] sm:$0xff] %v6039_v23  ;;  %v8826_v13 = vld [vmem:[#allocation28_spill] sm:$0xff]  ;;  %v8827_v36 = vld [vmem:[#allocation43_spill] sm:$0xff] }
 0x400   :  { %1187 = vmatpush.msrb.mxu3 %v8818_v26  ;;  %1227 = vmatpush.msrb.mxu2 %v8819_v10  ;;  %v8828_v26 = vld [vmem:[#allocation44_spill] sm:$0xff] }
 0x401   :  { %1260 = vmatpush.msra.mxu1 %v8820_v17  ;;  %1300 = vmatpush.msra.mxu0 %v8821_v11  ;;  %v6045_v10 = vld [vmem:[#allocation2 + $0xd8] sm:$0xff] }
 0x402   :  { %1188 = vmatpush.msrb.mxu3 %v8822_v62  ;;  %1228 = vmatpush.msrb.mxu2 %v8823_v12  ;;  %8829 = vst [vmem:[#allocation49_spill] sm:$0xff] %v6045_v10  ;;  %v8830_v11 = vld [vmem:[#allocation68_spill] sm:$0xff]  ;;  %v8832_v12 = vld [vmem:[#allocation46_spill] sm:$0xff] }
 0x403   :  { %1261 = vmatpush.msra.mxu1 %v8824_v53  ;;  %1301 = vmatpush.msra.mxu0 %v6039_v23  ;;  %v8831_v62 = vld [vmem:[#allocation32_spill] sm:$0xff]  ;;  %v8834_v23 = vld [vmem:[#allocation47_spill] sm:$0xff] }
 0x404   :  { %1281 = vmatpush.msra.mxu3 %v8826_v13  ;;  %1321 = vmatpush.msra.mxu2 %v8827_v36  ;;  %v6051_v53 = vld [vmem:[#allocation2 + $0xb8] sm:$0xff]  ;;  %v8835_v13 = vld [vmem:[#allocation69_spill] sm:$0xff] }
 0x405   :  { %1262 = vmatpush.msra.mxu1 %v8828_v26  ;;  %1302 = vmatpush.msra.mxu0 %v6045_v10  ;;  %8833 = vst [vmem:[#allocation57_spill] sm:$0xff] %v6051_v53  ;;  %v8836_v36 = vld [vmem:[#allocation36_spill] sm:$0xff] }
 0x406   :  { %1282 = vmatpush.msra.mxu3 %v8830_v11  ;;  %1322 = vmatpush.msra.mxu2 %v8831_v62  ;;  %v6057_v26 = vld [vmem:[#allocation2 + $0x98] sm:$0xff] }
 0x407   :  { %1263 = vmatpush.msra.mxu1 %v8832_v12  ;;  %1303 = vmatpush.msra.mxu0 %v6051_v53  ;;  %8837 = vst [vmem:[#allocation59_spill] sm:$0xff] %v6057_v26  ;;  %v8838_v10 = vld [vmem:[#allocation48_spill] sm:$0xff]  ;;  %v8840_v12 = vld [vmem:[#allocation50_spill] sm:$0xff] }
 0x408   :  { %1283 = vmatpush.msra.mxu3 %v8834_v23  ;;  %1323 = vmatpush.msra.mxu2 %v8835_v13  ;;  %v6061_v11 = vld [vmem:[#allocation2 + $0x298] sm:$0xff]  ;;  %v8842_v23 = vld [vmem:[#allocation70_spill] sm:$0xff] }
 0x409   :  { %1264 = vmatpush.msra.mxu1 %v8836_v36  ;;  %1304 = vmatpush.msra.mxu0 %v6057_v26  ;;  %8839 = vst [vmem:[#allocation52_spill] sm:$0xff] %v6061_v11  ;;  %v6065_v62 = vld [vmem:[#allocation2 + $0x78] sm:$0xff] }
 0x40a   :  { %1284 = vmatpush.msra.mxu3 %v8838_v10  ;;  %1324 = vmatpush.msra.mxu2 %v6061_v11  ;;  %8841 = vst [vmem:[#allocation60_spill] sm:$0xff] %v6065_v62  ;;  %v6069_v13 = vld [vmem:[#allocation2 + $0x278] sm:$0xff] }
 0x40b   :  { %1265 = vmatpush.msra.mxu1 %v8840_v12  ;;  %1305 = vmatpush.msra.mxu0 %v6065_v62  ;;  %8843 = vst [vmem:[#allocation65_spill] sm:$0xff] %v6069_v13  ;;  %v8844_v36 = vld [vmem:[#allocation40_spill] sm:$0xff]  ;;  %v8846_v10 = vld [vmem:[#allocation51_spill] sm:$0xff]  ;;  %v8848_v12 = vld [vmem:[#allocation53_spill] sm:$0xff] }
 0x40c   :  { %1285 = vmatpush.msra.mxu3 %v8842_v23  ;;  %1325 = vmatpush.msra.mxu2 %v6069_v13  ;;  %v6073_v26 = vld [vmem:[#allocation2 + $0x58] sm:$0xff]  ;;  %v8850_v23 = vld [vmem:[#allocation45_spill] sm:$0xff] }
 0x40d   :  { %1266 = vmatpush.msra.mxu1 %v8844_v36  ;;  %8845 = vst [vmem:[#allocation61_spill] sm:$0xff] %v6073_v26  ;;  %1306 = vmatpush.msra.mxu0 %v6073_v26  ;;  %v6077_v11 = vld [vmem:[#allocation2 + $0x258] sm:$0xff]  ;;  %v6088_v36 = vld [vmem:[#allocation2 + $0x10] sm:$0xff] }
 0x40e   :  { %1286 = vmatpush.msra.mxu3 %v8846_v10  ;;  %8847 = vst [vmem:[#allocation71_spill] sm:$0xff] %v6077_v11  ;;  %1326 = vmatpush.msra.mxu2 %v6077_v11  ;;  %v6081_v62 = vld [vmem:[#allocation2 + $0x38] sm:$0xff]  ;;  %v8854_v11 = vld [vmem:[#allocation54_spill] sm:$0xff] }
 0x40f   :  { %1267 = vmatpush.msra.mxu1 %v8848_v12  ;;  %8849 = vst [vmem:[#allocation72_spill] sm:$0xff] %v6081_v62  ;;  %1307 = vmatpush.msra.mxu0 %v6081_v62  ;;  %v6085_v13 = vld [vmem:[#allocation2 + $0x238] sm:$0xff] }
 0x410   :  { %1287 = vmatpush.msra.mxu3 %v8850_v23  ;;  %8851 = vst [vmem:[#allocation73_spill] sm:$0xff] %v6085_v13  ;;  %1327 = vmatpush.msra.mxu2 %v6085_v13  ;;  %v6091_v10 = vld [vmem:[#allocation2 + $0x18] sm:$0xff]  ;;  %v4282_v23 = vld [vmem:[%s8177_s0 + $0x6] sm:$0x3] }
 0x411   :  { %8852 = vst [vmem:[#allocation74_spill] sm:$0xff] %v6088_v36  ;;  %1268 = vmatpush.msra.mxu1 %v6088_v36  ;;  %1308 = vmatpush.msra.mxu0 %v6091_v10  ;;  %v6095_v12 = vld [vmem:[#allocation2 + $0x218] sm:$0xff]  ;;  %v8856_v36 = vld [vmem:[#allocation18_spill] sm:$0xff] }
 0x412   :  { %8853 = vst [vmem:[#allocation75_spill] sm:$0xff] %v6091_v10  ;;  %1288 = vmatpush.msra.mxu3 %v8854_v11  ;;  %1328 = vmatpush.msra.mxu2 %v6095_v12  ;;  %v8857_v17 = vld [vmem:[#allocation20_spill] sm:$0xff] }
 0x413   :  { %8855 = vst [vmem:[#allocation76_spill] sm:$0xff] %v6095_v12  ;;  %1163 = vrot.lane.b32.xlu1 %v4282_v23, %s5045_s17  ;;  %v8858_v12 = vld [vmem:[#allocation23_spill] sm:$0xff] }
 0x45c   :  { %v1007_v13 = vpop.f32.mrf.mxu0  ;;  %v967_v10 = vpop.f32.mrf.mxu1 }
 0x463   :  { %v947_v62 = vpop.f32.mrf.mxu3  ;;  %v987_v26 = vpop.f32.mrf.mxu2 }
 0x464   :  { %v948_v53 = vadd.f32 %v947_v62, %v8856_v36  ;;  %v988_v0 = vadd.f32 %v987_v26, %v8857_v17  ;;  %v1067_v25 = vpop.f32.mrf.mxu0  ;;  %v1027_v26 = vpop.f32.mrf.mxu1 }
 0x465   :  { %v1068_v45 = vadd.f32 %v1067_v25, %v8858_v12 }
 0x466   :  { %v968_v6 = vadd.f32 %v967_v10, %v948_v53  ;;  %v1008_v11 = vadd.f32 %v1007_v13, %v988_v0  ;;  %v8859_v13 = vld [vmem:[#allocation27_spill] sm:$0xff] }
 0x468   :  { %v4278_v30 = vmul.f32 -1.442695, %v968_v6  ;;  %v4279_v46 = vmul.f32 -1.442695, %v1008_v11  ;;  %v1028_v6 = vadd.f32 %v1027_v26, %v8859_v13 }
 0x46a   :  { %4428 = vpow2.f32 %v4278_v30 }
 0x46b   :  { %4430 = vpow2.f32 %v4279_v46  ;;  %v1087_v51 = vpop.f32.mrf.mxu2  ;;  %v1047_v0 = vpop.f32.mrf.mxu3 }
 0x46c   :  { %v1088_v3 = vadd.f32 %v1087_v51, %v1068_v45  ;;  %v1048_v11 = vadd.f32 %v1047_v0, %v1028_v6 }
 0x46e   :  { %v4280_v23 = vmul.f32 -1.442695, %v1088_v3 }
 0x470   :  { %v4429_v57 = vpop.eup %4428  ;;  %4432 = vpow2.f32 %v4280_v23 }
 0x471   :  { %v4431_v16 = vpop.eup %4430  ;;  %v1093_v14 = vadd.f32 1.0, %v4429_v57 }
 0x472   :  { %v1112_v62 = vadd.f32 1.0, %v4431_v16 }
 0x473   :  { %4434 = vrcp.f32 %v1093_v14  ;;  %v1105_v23 = vand.u32 2147483648, %v1093_v14  ;;  %v1103_v12 = vand.u32 2147483647, %v1093_v14  ;;  %vm1099_vm4 = vweird.f32 %v1093_v14 }
 0x474   :  { %4436 = vrcp.f32 %v1112_v62  ;;  %v1124_v57 = vand.u32 2147483648, %v1112_v62  ;;  %v1122_v19 = vand.u32 2147483647, %v1112_v62  ;;  %vm1118_vm5 = vweird.f32 %v1112_v62 }
 0x475   :  { %v1106_v0 = vor.u32 1.1754944e-38, %v1105_v23  ;;  %vm1104_vm7 = vcmp.eq.f32.partialorder %v1103_v12, 8.507059e+37 }
 0x476   :  { %v4433_v53 = vpop.eup %4432  ;;  %vm1123_vm9 = vcmp.eq.f32.partialorder %v1122_v19, 8.507059e+37 }
 0x477   :  { %v1132_v10 = vadd.f32 1.0, %v4433_v53 }
 0x479   :  { %v4435_v30 = vpop.eup %4434  ;;  %4438 = vrcp.f32 %v1132_v10  ;;  %vm1138_vm11 = vweird.f32 %v1132_v10  ;;  %v1142_v12 = vand.u32 2147483647, %v1132_v10 }
 0x47a   :  { %v4437_v46 = vpop.eup %4436  ;;  %v1095_v25 = vmul.f32 %v4435_v30, %v1093_v14  ;;  %4440 = vtanh.f32 %v1048_v11  ;;  %vm1100_vm2 = vweird.f32 %v4435_v30 }
 0x47b   :  { %v1114_v51 = vmul.f32 %v4437_v46, %v1112_v62  ;;  %vm1119_vm3 = vweird.f32 %v4437_v46  ;;  %vm1101_vm6 = vmor %vm1099_vm4, %vm1100_vm2  ;;  %vm1143_vm13 = vcmp.eq.f32.partialorder %v1142_v12, 8.507059e+37  ;;  %v8911_v12 = vld [vmem:[#allocation72_spill] sm:$0xff] }
 0x47c   :  { %v1096_v3 = vsub.f32 1.0, %v1095_v25  ;;  %vm1120_vm8 = vmor %vm1118_vm5, %vm1119_vm3  ;;  %v1125_v25 = vor.u32 1.1754944e-38, %v1124_v57  ;;  %v8898_v57 = vld [vmem:[#allocation36_spill] sm:$0xff] }
 0x47d   :  { %v1115_v45 = vsub.f32 1.0, %v1114_v51 }
 0x47e   :  { %v1097_v16 = vmul.f32 %v4435_v30, %v1096_v3 }
 0x47f   :  { %v4439_v17 = vpop.eup %4438  ;;  %v1116_v36 = vmul.f32 %v4437_v46, %v1115_v45 }
 0x480   :  { %v1098_v26 = vadd.f32 %v4435_v30, %v1097_v16  ;;  %v1134_v53 = vmul.f32 %v4439_v17, %v1132_v10  ;;  %v4441_v51 = vpop.eup %4440  ;;  %vm1139_vm10 = vweird.f32 %v4439_v17 }
 0x481   :  { %v1117_v6 = vadd.f32 %v4437_v46, %v1116_v36  ;;  %v1144_v36 = vand.u32 2147483648, %v1132_v10  ;;  %vm1140_vm12 = vmor %vm1138_vm11, %vm1139_vm10 }
 0x482   :  { %v1102_v13 = vsel %vm1101_vm6, %v4435_v30, %v1098_v26  ;;  %v1135_v11 = vsub.f32 1.0, %v1134_v53  ;;  %v8899_v26 = vld [vmem:[#allocation59_spill] sm:$0xff]  ;;  %v8900_v53 = vld [vmem:[#allocation48_spill] sm:$0xff] }
 0x483   :  { %v1107_v3 = vsel %vm1104_vm7, %v1106_v0, %v1102_v13  ;;  %v1121_v15 = vsel %vm1120_vm8, %v4437_v46, %v1117_v6  ;;  %v1145_v23 = vor.u32 1.1754944e-38, %v1144_v36  ;;  %v8901_v0 = vld [vmem:[#allocation52_spill] sm:$0xff]  ;;  %v8902_v6 = vld [vmem:[#allocation50_spill] sm:$0xff]  ;;  %v8910_v36 = vld [vmem:[#allocation53_spill] sm:$0xff] }
 0x484   :  { %v1126_v41 = vsel %vm1123_vm9, %v1125_v25, %v1121_v15  ;;  %v1149_v45 = vmul.f32 %v4441_v51, %v1107_v3  ;;  %v1136_v7 = vmul.f32 %v4439_v17, %v1135_v11  ;;  %v8903_v25 = vld [vmem:[#allocation60_spill] sm:$0xff]  ;;  %v8904_v11 = vld [vmem:[#allocation70_spill] sm:$0xff]  ;;  %v8905_v51 = vld [vmem:[#allocation65_spill] sm:$0xff] }
 0x485   :  { %v1148_v16 = vmul.f32 %v1126_v41, %v5957_v32  ;;  %v1164_v41 = vpop.permute.xlu1 %1163  ;;  %v8906_v3 = vld [vmem:[#allocation40_spill] sm:$0xff] }
 0x486   :  { %v1137_v62 = vadd.f32 %v4439_v17, %v1136_v7  ;;  %v4281_v7 = vld [vmem:[%s8177_s0 + $0x8] sm:$0x3] }
 0x487   :  { %v6107_v14 = vadd.f32 %v1149_v45, %v1148_v16  ;;  %v8907_v45 = vld [vmem:[#allocation61_spill] sm:$0xff]  ;;  %v8908_v16 = vld [vmem:[#allocation51_spill] sm:$0xff] }
 0x488   :  { %v1141_v30 = vsel %vm1140_vm12, %v4439_v17, %v1137_v62  ;;  %v1169_v17 = vsel %vm177_vm0, %v4281_v7, %v1164_v41  ;;  %v8909_v62 = vld [vmem:[#allocation71_spill] sm:$0xff] }
 0x489   :  { %4442 = vtanh.f32 %v6107_v14  ;;  %v1146_v19 = vsel %vm1143_vm13, %v1145_v23, %v1141_v30  ;;  %v8912_v30 = vld [vmem:[#allocation45_spill] sm:$0xff] }
 0x48a   :  { %v8913_v23 = vld [vmem:[#allocation73_spill] sm:$0xff] }
 0x48f   :  { %v4443_v13 = vpop.eup %4442 }
 0x490   :  { %v1152_v15 = vmul.f32 %v4443_v13, %v1146_v19  ;;  %v8914_v13 = vld [vmem:[#allocation74_spill] sm:$0xff]  ;;  %v8915_v19 = vld [vmem:[#allocation75_spill] sm:$0xff] }
 0x492   :  { %1166 = vrot.lane.b32.xlu2 %v1152_v15, %s5048_s3  ;;  %1153 = vst.msk [vmem:[#allocation7 + $0x3] sm:$0x1] %vm416_vm14, %v1152_v15  ;;  %v1156_v32 = vrot.slane %v1152_v15, 1 }
 0x493   :  { %1154 = vst.msk [vmem:[#allocation7 + $0x4] sm:$0x1] %vm418_vm15, %v1152_v15  ;;  %v8916_v15 = vld [vmem:[#allocation54_spill] sm:$0xff] }
 0x494   :  { %1158 = vst.msk [vmem:[#allocation7 + $0xb] sm:$0x1] %vm416_vm14, %v1156_v32 }
 0x495   :  { %1159 = vst.msk [vmem:[#allocation7 + $0xc] sm:$0x1] %vm418_vm15, %v1156_v32  ;;  %v8917_v32 = vld [vmem:[#allocation76_spill] sm:$0xff] }
 0x4ec   :  { %v1167_v10 = vpop.permute.xlu2 %1166 }
 0x4ed   :  { %4283 = vmatmul.msk.f32.vlgmr.msrb.gmra.mxu1 %vm179_vm1, %v1167_v10  ;;  %4284 = vmatmul.msk.f32.vlgmr.msrb.gmra.mxu0 %vm179_vm1, %v1167_v10  ;;  %v1170_v46 = vsel %vm179_vm1, %v1169_v17, %v1167_v10 }
 0x4ee   :  { %1189 = vmatmul.f32.vlgmr.msrb.gmra.mxu3 %v1170_v46  ;;  %1229 = vmatmul.f32.vlgmr.msrb.gmra.mxu2 %v1170_v46 }
 0x4ef   :  { %1444 = vmatpush.msrb.mxu1 %v5686_v18  ;;  %1484 = vmatpush.msrb.mxu0 %v5689_v20  ;;  %v8860_v18 = vld [vmem:[#allocation30_spill] sm:$0xff] }
 0x4f0   :  { %1416 = vmatpush.msrb.mxu3 %v5692_v21  ;;  %1456 = vmatpush.msrb.mxu2 %v5695_v24  ;;  %v8861_v20 = vld [vmem:[#allocation34_spill] sm:$0xff] }
 0x4f1   :  { %1445 = vmatpush.msrb.mxu1 %v5698_v29  ;;  %1485 = vmatpush.msrb.mxu0 %v5701_v31  ;;  %v8862_v21 = vld [vmem:[#allocation38_spill] sm:$0xff]  ;;  %v8864_v29 = vld [vmem:[#allocation55_spill] sm:$0xff] }
 0x4f2   :  { %1417 = vmatpush.msrb.mxu3 %v5704_v34  ;;  %1457 = vmatpush.msrb.mxu2 %v5707_v35  ;;  %v8863_v24 = vld [vmem:[#allocation42_spill] sm:$0xff]  ;;  %v8866_v34 = vld [vmem:[#allocation15_spill] sm:$0xff]  ;;  %v8867_v35 = vld [vmem:[#allocation17_spill] sm:$0xff] }
 0x4f3   :  { %1446 = vmatpush.msrb.mxu1 %v5710_v56  ;;  %1486 = vmatpush.msrb.mxu0 %v5713_v58  ;;  %v8865_v31 = vld [vmem:[#allocation58_spill] sm:$0xff] }
 0x4f4   :  { %1418 = vmatpush.msrb.mxu3 %v5716_v60  ;;  %1458 = vmatpush.msrb.mxu2 %v5719_v63  ;;  %v8868_v56 = vld [vmem:[#allocation62_spill] sm:$0xff]  ;;  %v8871_v63 = vld [vmem:[#allocation16_spill] sm:$0xff] }
 0x4f5   :  { %1269 = vmatmul.f32.vlgmr.msra.gmra.mxu1 %v1170_v46  ;;  %1309 = vmatmul.f32.vlgmr.msra.gmra.mxu0 %v1170_v46  ;;  %v8869_v58 = vld [vmem:[#allocation26_spill] sm:$0xff] }
 0x4f6   :  { %4285 = vmatmul.msk.f32.vlgmr.msra.gmra.mxu3 %vm179_vm1, %v1167_v10  ;;  %4286 = vmatmul.msk.f32.vlgmr.msra.gmra.mxu2 %vm179_vm1, %v1167_v10  ;;  %v8870_v60 = vld [vmem:[#allocation22_spill] sm:$0xff] }
 0x4f7   :  { %1447 = vmatpush.msrb.mxu1 %v5724_v28  ;;  %1487 = vmatpush.msrb.mxu0 %v5727_v61  ;;  %v8872_v28 = vld [vmem:[#allocation63_spill] sm:$0xff]  ;;  %v8873_v61 = vld [vmem:[#allocation29_spill] sm:$0xff]  ;;  %v8918_v10 = vld [vmem:[#allocation18_spill] sm:$0xff] }
 0x4f8   :  { %1419 = vmatpush.msrb.mxu3 %v5730_v49  ;;  %1459 = vmatpush.msrb.mxu2 %v5733_v44  ;;  %v8874_v49 = vld [vmem:[#allocation25_spill] sm:$0xff]  ;;  %v8875_v44 = vld [vmem:[#allocation19_spill] sm:$0xff] }
 0x4f9   :  { %1448 = vmatpush.msrb.mxu1 %v5736_v43  ;;  %1488 = vmatpush.msrb.mxu0 %v5739_v27  ;;  %v8876_v43 = vld [vmem:[#allocation64_spill] sm:$0xff]  ;;  %v8877_v27 = vld [vmem:[#allocation33_spill] sm:$0xff] }
 0x4fa   :  { %1420 = vmatpush.msrb.mxu3 %v5742_v52  ;;  %1460 = vmatpush.msrb.mxu2 %v5745_v38  ;;  %v8878_v52 = vld [vmem:[#allocation31_spill] sm:$0xff]  ;;  %v8879_v38 = vld [vmem:[#allocation21_spill] sm:$0xff] }
 0x4fb   :  { %1449 = vmatpush.msrb.mxu1 %v5748_v48  ;;  %1489 = vmatpush.msrb.mxu0 %v5751_v50  ;;  %v8880_v48 = vld [vmem:[#allocation66_spill] sm:$0xff]  ;;  %v8881_v50 = vld [vmem:[#allocation37_spill] sm:$0xff] }
 0x4fc   :  { %1421 = vmatpush.msrb.mxu3 %v5754_v37  ;;  %1461 = vmatpush.msrb.mxu2 %v5757_v47  ;;  %v8882_v37 = vld [vmem:[#allocation35_spill] sm:$0xff]  ;;  %v8883_v47 = vld [vmem:[#allocation24_spill] sm:$0xff] }
 0x4fd   :  { %1450 = vmatpush.msrb.mxu1 %v5760_v54  ;;  %1490 = vmatpush.msrb.mxu0 %v5763_v42  ;;  %v8884_v54 = vld [vmem:[#allocation67_spill] sm:$0xff]  ;;  %v8885_v42 = vld [vmem:[#allocation41_spill] sm:$0xff] }
 0x4fe   :  { %1422 = vmatpush.msrb.mxu3 %v5766_v39  ;;  %1462 = vmatpush.msrb.mxu2 %v5769_v33  ;;  %v8886_v39 = vld [vmem:[#allocation39_spill] sm:$0xff]  ;;  %v8887_v33 = vld [vmem:[#allocation56_spill] sm:$0xff] }
 0x4ff   :  { %1451 = vmatpush.msrb.mxu1 %v5772_v59  ;;  %1491 = vmatpush.msrb.mxu0 %v5775_v55  ;;  %v8888_v59 = vld [vmem:[#allocation28_spill] sm:$0xff]  ;;  %v8889_v55 = vld [vmem:[#allocation43_spill] sm:$0xff] }
 0x500   :  { %1423 = vmatpush.msrb.mxu3 %v5778_v40  ;;  %1463 = vmatpush.msrb.mxu2 %v5781_v22  ;;  %v8890_v40 = vld [vmem:[#allocation44_spill] sm:$0xff]  ;;  %v8891_v22 = vld [vmem:[#allocation49_spill] sm:$0xff] }
 0x501   :  { %1496 = vmatpush.msra.mxu1 %v5784_v1  ;;  %1536 = vmatpush.msra.mxu0 %v5787_v2  ;;  %v8892_v1 = vld [vmem:[#allocation68_spill] sm:$0xff] }
 0x502   :  { %1424 = vmatpush.msrb.mxu3 %v5790_v4  ;;  %1464 = vmatpush.msrb.mxu2 %v5793_v5  ;;  %v8893_v2 = vld [vmem:[#allocation32_spill] sm:$0xff]  ;;  %v8894_v4 = vld [vmem:[#allocation46_spill] sm:$0xff]  ;;  %v8895_v5 = vld [vmem:[#allocation57_spill] sm:$0xff] }
 0x503   :  { %1497 = vmatpush.msra.mxu1 %v5796_v8  ;;  %1537 = vmatpush.msra.mxu0 %v5799_v9  ;;  %v8896_v8 = vld [vmem:[#allocation47_spill] sm:$0xff]  ;;  %v8897_v9 = vld [vmem:[#allocation69_spill] sm:$0xff] }
 0x504   :  { %1425 = vmatpush.msrb.mxu3 %v8860_v18  ;;  %1465 = vmatpush.msrb.mxu2 %v8861_v20  ;;  %v8919_v18 = vld [vmem:[#allocation20_spill] sm:$0xff] }
 0x505   :  { %1498 = vmatpush.msra.mxu1 %v8862_v21  ;;  %1538 = vmatpush.msra.mxu0 %v8863_v24 }
 0x506   :  { %1426 = vmatpush.msrb.mxu3 %v8864_v29  ;;  %1466 = vmatpush.msrb.mxu2 %v8865_v31 }
 0x507   :  { %1499 = vmatpush.msra.mxu1 %v8866_v34  ;;  %1539 = vmatpush.msra.mxu0 %v8867_v35 }
 0x508   :  { %1427 = vmatpush.msrb.mxu3 %v8868_v56  ;;  %1467 = vmatpush.msrb.mxu2 %v8869_v58  ;;  %v4291_v56 = vld [vmem:[%s8177_s0 + $0x4] sm:$0x3]  ;;  %v8920_v58 = vld [vmem:[#allocation23_spill] sm:$0xff] }
 0x509   :  { %1500 = vmatpush.msra.mxu1 %v8870_v60  ;;  %1540 = vmatpush.msra.mxu0 %v8871_v63 }
 0x50a   :  { %1428 = vmatpush.msrb.mxu3 %v8872_v28  ;;  %1468 = vmatpush.msrb.mxu2 %v8873_v61 }
 0x50b   :  { %1501 = vmatpush.msra.mxu1 %v8874_v49  ;;  %1541 = vmatpush.msra.mxu0 %v8875_v44 }
 0x50c   :  { %1429 = vmatpush.msrb.mxu3 %v8876_v43  ;;  %1469 = vmatpush.msrb.mxu2 %v8877_v27 }
 0x50d   :  { %1502 = vmatpush.msra.mxu1 %v8878_v52  ;;  %1542 = vmatpush.msra.mxu0 %v8879_v38 }
 0x50e   :  { %1430 = vmatpush.msrb.mxu3 %v8880_v48  ;;  %1470 = vmatpush.msrb.mxu2 %v8881_v50  ;;  %v8921_v50 = vld [vmem:[#allocation27_spill] sm:$0xff] }
 0x50f   :  { %1503 = vmatpush.msra.mxu1 %v8882_v37  ;;  %1543 = vmatpush.msra.mxu0 %v8883_v47 }
 0x510   :  { %1431 = vmatpush.msrb.mxu3 %v8884_v54  ;;  %1471 = vmatpush.msrb.mxu2 %v8885_v42 }
 0x511   :  { %1504 = vmatpush.msra.mxu1 %v8886_v39  ;;  %1544 = vmatpush.msra.mxu0 %v8887_v33 }
 0x512   :  { %1524 = vmatpush.msra.mxu3 %v8888_v59  ;;  %1564 = vmatpush.msra.mxu2 %v8889_v55 }
 0x513   :  { %1505 = vmatpush.msra.mxu1 %v8890_v40  ;;  %1545 = vmatpush.msra.mxu0 %v8891_v22 }
 0x514   :  { %1525 = vmatpush.msra.mxu3 %v8892_v1  ;;  %1565 = vmatpush.msra.mxu2 %v8893_v2 }
 0x515   :  { %1506 = vmatpush.msra.mxu1 %v8894_v4  ;;  %1546 = vmatpush.msra.mxu0 %v8895_v5 }
 0x516   :  { %1526 = vmatpush.msra.mxu3 %v8896_v8  ;;  %1566 = vmatpush.msra.mxu2 %v8897_v9 }
 0x517   :  { %1507 = vmatpush.msra.mxu1 %v8898_v57  ;;  %1547 = vmatpush.msra.mxu0 %v8899_v26 }
 0x518   :  { %1527 = vmatpush.msra.mxu3 %v8900_v53  ;;  %1567 = vmatpush.msra.mxu2 %v8901_v0 }
 0x519   :  { %1508 = vmatpush.msra.mxu1 %v8902_v6  ;;  %1548 = vmatpush.msra.mxu0 %v8903_v25 }
 0x51a   :  { %1528 = vmatpush.msra.mxu3 %v8904_v11  ;;  %1568 = vmatpush.msra.mxu2 %v8905_v51 }
 0x51b   :  { %1509 = vmatpush.msra.mxu1 %v8906_v3  ;;  %1549 = vmatpush.msra.mxu0 %v8907_v45 }
 0x51c   :  { %1529 = vmatpush.msra.mxu3 %v8908_v16  ;;  %1569 = vmatpush.msra.mxu2 %v8909_v62 }
 0x51d   :  { %1510 = vmatpush.msra.mxu1 %v8910_v36  ;;  %1550 = vmatpush.msra.mxu0 %v8911_v12 }
 0x51e   :  { %1530 = vmatpush.msra.mxu3 %v8912_v30  ;;  %1570 = vmatpush.msra.mxu2 %v8913_v23 }
 0x51f   :  { %1511 = vmatpush.msra.mxu1 %v8914_v13  ;;  %1551 = vmatpush.msra.mxu0 %v8915_v19 }
 0x520   :  { %1531 = vmatpush.msra.mxu3 %v8916_v15  ;;  %1571 = vmatpush.msra.mxu2 %v8917_v32 }
 0x521   :  { %1406 = vrot.lane.b32.xlu0 %v4291_v56, %s5045_s17 }
 0x56a   :  { %v1250_v7 = vpop.f32.mrf.mxu0  ;;  %v1210_v21 = vpop.f32.mrf.mxu1 }
 0x571   :  { %v1190_v41 = vpop.f32.mrf.mxu3  ;;  %v1230_v17 = vpop.f32.mrf.mxu2 }
 0x572   :  { %v1191_v46 = vadd.f32 %v1190_v41, %v8918_v10  ;;  %v1231_v20 = vadd.f32 %v1230_v17, %v8919_v18  ;;  %v1310_v31 = vpop.f32.mrf.mxu0  ;;  %v1270_v52 = vpop.f32.mrf.mxu1 }
 0x573   :  { %v1311_v60 = vadd.f32 %v1310_v31, %v8920_v58  ;;  %v1271_v37 = vadd.f32 %v1270_v52, %v8921_v50 }
 0x574   :  { %v1211_v24 = vadd.f32 %v1210_v21, %v1191_v46  ;;  %v1251_v29 = vadd.f32 %v1250_v7, %v1231_v20 }
 0x576   :  { %v4287_v34 = vmul.f32 -1.442695, %v1211_v24  ;;  %v4288_v35 = vmul.f32 -1.442695, %v1251_v29 }
 0x578   :  { %4444 = vpow2.f32 %v4287_v34 }
 0x579   :  { %4446 = vpow2.f32 %v4288_v35  ;;  %v1330_v63 = vpop.f32.mrf.mxu2  ;;  %v1290_v48 = vpop.f32.mrf.mxu3 }
 0x57a   :  { %v1331_v28 = vadd.f32 %v1330_v63, %v1311_v60  ;;  %v1291_v42 = vadd.f32 %v1290_v48, %v1271_v37  ;;  %v6244_v48 = vld [vmem:[#allocation2 + $0x2e0] sm:$0xff]  ;;  %v6247_v37 = vld [vmem:[#allocation2 + $0x2e8] sm:$0xff] }
 0x57c   :  { %v4289_v61 = vmul.f32 -1.442695, %v1331_v28 }
 0x57e   :  { %v4445_v49 = vpop.eup %4444  ;;  %4448 = vpow2.f32 %v4289_v61 }
 0x57f   :  { %v4447_v44 = vpop.eup %4446  ;;  %v1336_v43 = vadd.f32 1.0, %v4445_v49 }
 0x580   :  { %v1355_v27 = vadd.f32 1.0, %v4447_v44  ;;  %v4290_v44 = vld [vmem:[%s8177_s0 + $0xa] sm:$0x3] }
 0x581   :  { %4450 = vrcp.f32 %v1336_v43  ;;  %v1348_v2 = vand.u32 2147483648, %v1336_v43  ;;  %v1346_v9 = vand.u32 2147483647, %v1336_v43  ;;  %vm1342_vm4 = vweird.f32 %v1336_v43 }
 0x582   :  { %4452 = vrcp.f32 %v1355_v27  ;;  %v1367_v4 = vand.u32 2147483648, %v1355_v27  ;;  %v1365_v6 = vand.u32 2147483647, %v1355_v27  ;;  %vm1361_vm5 = vweird.f32 %v1355_v27 }
 0x583   :  { %v1349_v16 = vor.u32 1.1754944e-38, %v1348_v2  ;;  %vm1347_vm7 = vcmp.eq.f32.partialorder %v1346_v9, 8.507059e+37  ;;  %v6274_v2 = vld [vmem:[#allocation2 + $0x1a0] sm:$0xff]  ;;  %v6285_v9 = vld [vmem:[#allocation2 + $0x288] sm:$0xff] }
 0x584   :  { %v4449_v38 = vpop.eup %4448  ;;  %v1368_v15 = vor.u32 1.1754944e-38, %v1367_v4  ;;  %vm1366_vm9 = vcmp.eq.f32.partialorder %v1365_v6, 8.507059e+37  ;;  %v6277_v4 = vld [vmem:[#allocation2 + $0x1a8] sm:$0xff]  ;;  %v6294_v6 = vld [vmem:[#allocation2 + $0x260] sm:$0xff] }
 0x585   :  { %v1375_v47 = vadd.f32 1.0, %v4449_v38 }
 0x587   :  { %v4451_v54 = vpop.eup %4450  ;;  %4454 = vrcp.f32 %v1375_v47  ;;  %v1387_v35 = vand.u32 2147483648, %v1375_v47  ;;  %vm1381_vm11 = vweird.f32 %v1375_v47  ;;  %v1385_v56 = vand.u32 2147483647, %v1375_v47 }
 0x588   :  { %v4453_v39 = vpop.eup %4452  ;;  %v1338_v59 = vmul.f32 %v4451_v54, %v1336_v43  ;;  %4456 = vtanh.f32 %v1291_v42  ;;  %vm1343_vm2 = vweird.f32 %v4451_v54  ;;  %v6256_v42 = vld [vmem:[#allocation2 + $0x2c0] sm:$0xff] }
 0x589   :  { %v1357_v55 = vmul.f32 %v4453_v39, %v1355_v27  ;;  %vm1362_vm3 = vweird.f32 %v4453_v39  ;;  %vm1344_vm6 = vmor %vm1342_vm4, %vm1343_vm2  ;;  %v1388_v63 = vor.u32 1.1754944e-38, %v1387_v35  ;;  %vm1386_vm13 = vcmp.eq.f32.partialorder %v1385_v56, 8.507059e+37  ;;  %v6342_v35 = vld [vmem:[#allocation2 + $0x1f0] sm:$0xff]  ;;  %v6345_v56 = vld [vmem:[#allocation2 + $0x1f8] sm:$0xff] }
 0x58a   :  { %v1339_v40 = vsub.f32 1.0, %v1338_v59  ;;  %vm1363_vm8 = vmor %vm1361_vm5, %vm1362_vm3  ;;  %v6262_v59 = vld [vmem:[#allocation2 + $0x1c0] sm:$0xff] }
 0x58b   :  { %v1358_v1 = vsub.f32 1.0, %v1357_v55  ;;  %v6265_v55 = vld [vmem:[#allocation2 + $0x1c8] sm:$0xff] }
 0x58c   :  { %v1340_v8 = vmul.f32 %v4451_v54, %v1339_v40  ;;  %v6268_v40 = vld [vmem:[#allocation2 + $0x2a0] sm:$0xff] }
 0x58d   :  { %v4455_v57 = vpop.eup %4454  ;;  %v1359_v53 = vmul.f32 %v4453_v39, %v1358_v1  ;;  %v6271_v1 = vld [vmem:[#allocation2 + $0x2a8] sm:$0xff] }
 0x58e   :  { %v1341_v11 = vadd.f32 %v4451_v54, %v1340_v8  ;;  %v1377_v3 = vmul.f32 %v4455_v57, %v1375_v47  ;;  %v4457_v41 = vpop.eup %4456  ;;  %vm1382_vm10 = vweird.f32 %v4455_v57  ;;  %v6250_v47 = vld [vmem:[#allocation2 + $0x1e0] sm:$0xff] }
 0x58f   :  { %v1360_v36 = vadd.f32 %v4453_v39, %v1359_v53  ;;  %vm1383_vm12 = vmor %vm1381_vm11, %vm1382_vm10  ;;  %v6282_v8 = vld [vmem:[#allocation2 + $0x280] sm:$0xff]  ;;  %v6291_v53 = vld [vmem:[#allocation2 + $0x188] sm:$0xff] }
 0x590   :  { %v1345_v30 = vsel %vm1344_vm6, %v4451_v54, %v1341_v11  ;;  %v1378_v7 = vsub.f32 1.0, %v1377_v3  ;;  %v6253_v54 = vld [vmem:[#allocation2 + $0x1e8] sm:$0xff]  ;;  %v6300_v3 = vld [vmem:[#allocation2 + $0x160] sm:$0xff] }
 0x591   :  { %v1350_v17 = vsel %vm1347_vm7, %v1349_v16, %v1345_v30  ;;  %v1364_v46 = vsel %vm1363_vm8, %v4453_v39, %v1360_v36  ;;  %v6259_v39 = vld [vmem:[#allocation2 + $0x2c8] sm:$0xff]  ;;  %v6306_v36 = vld [vmem:[#allocation2 + $0x240] sm:$0xff] }
 0x592   :  { %v1369_v20 = vsel %vm1366_vm9, %v1368_v15, %v1364_v46  ;;  %v1392_v21 = vmul.f32 %v4457_v41, %v1350_v17  ;;  %v1379_v24 = vmul.f32 %v4455_v57, %v1378_v7  ;;  %v6297_v11 = vld [vmem:[#allocation2 + $0x268] sm:$0xff]  ;;  %v6312_v15 = vld [vmem:[#allocation2 + $0x140] sm:$0xff] }
 0x593   :  { %v1391_v29 = vmul.f32 %v1369_v20, %v6107_v14  ;;  %v1407_v43 = vpop.permute.xlu0 %1406  ;;  %v6303_v16 = vld [vmem:[#allocation2 + $0x168] sm:$0xff]  ;;  %v6318_v41 = vld [vmem:[#allocation2 + $0x220] sm:$0xff] }
 0x594   :  { %v1380_v34 = vadd.f32 %v4455_v57, %v1379_v24  ;;  %v1412_v27 = vsel %vm177_vm0, %v4290_v44, %v1407_v43  ;;  %v6309_v30 = vld [vmem:[#allocation2 + $0x248] sm:$0xff]  ;;  %v6324_v46 = vld [vmem:[#allocation2 + $0x120] sm:$0xff]  ;;  %v6366_v44 = vld [vmem:[#allocation2 + $0x1b0] sm:$0xff] }
 0x595   :  { %v6229_v31 = vadd.f32 %v1392_v21, %v1391_v29  ;;  %v6315_v7 = vld [vmem:[#allocation2 + $0x148] sm:$0xff]  ;;  %v6330_v21 = vld [vmem:[#allocation2 + $0x200] sm:$0xff]  ;;  %8925 = vst [vmem:[#allocation42_spill] sm:$0xff] %v6366_v44  ;;  %v6369_v43 = vld [vmem:[#allocation2 + $0x1b8] sm:$0xff] }
 0x596   :  { %v1384_v60 = vsel %vm1383_vm12, %v4455_v57, %v1380_v34  ;;  %v6288_v57 = vld [vmem:[#allocation2 + $0x180] sm:$0xff]  ;;  %v6321_v17 = vld [vmem:[#allocation2 + $0x228] sm:$0xff]  ;;  %8926 = vst [vmem:[#allocation55_spill] sm:$0xff] %v6369_v43 }
 0x597   :  { %4458 = vtanh.f32 %v6229_v31  ;;  %v1389_v61 = vsel %vm1386_vm13, %v1388_v63, %v1384_v60  ;;  %v6327_v20 = vld [vmem:[#allocation2 + $0x128] sm:$0xff]  ;;  %v6336_v29 = vld [vmem:[#allocation2 + $0x100] sm:$0xff] }
 0x598   :  { %v6333_v24 = vld [vmem:[#allocation2 + $0x208] sm:$0xff]  ;;  %v6348_v60 = vld [vmem:[#allocation2 + $0xe0] sm:$0xff] }
 0x599   :  { %v6339_v34 = vld [vmem:[#allocation2 + $0x108] sm:$0xff] }
 0x59a   :  { %v6351_v63 = vld [vmem:[#allocation2 + $0xe8] sm:$0xff] }
 0x59d   :  { %v4459_v28 = vpop.eup %4458 }
 0x59e   :  { %v1395_v49 = vmul.f32 %v4459_v28, %v1389_v61  ;;  %v6354_v28 = vld [vmem:[#allocation2 + $0x1d0] sm:$0xff]  ;;  %v6357_v61 = vld [vmem:[#allocation2 + $0x1d8] sm:$0xff] }
 0x59f   :  { %8922 = vst [vmem:[#allocation30_spill] sm:$0xff] %v6357_v61 }
 0x5a0   :  { %1409 = vrot.lane.b32.xlu1 %v1395_v49, %s5048_s3  ;;  %1396 = vst.msk [vmem:[#allocation7 + $0x4] sm:$0x1] %vm416_vm14, %v1395_v49  ;;  %v1399_v14 = vrot.slane %v1395_v49, 1 }
 0x5a1   :  { %1397 = vst.msk [vmem:[#allocation7 + $0x3] sm:$0x1] %vm418_vm15, %v1395_v49  ;;  %v6360_v49 = vld [vmem:[#allocation2 + $0xc0] sm:$0xff] }
 0x5a2   :  { %1401 = vst.msk [vmem:[#allocation7 + $0xc] sm:$0x1] %vm416_vm14, %v1399_v14 }
 0x5a3   :  { %1402 = vst.msk [vmem:[#allocation7 + $0xb] sm:$0x1] %vm418_vm15, %v1399_v14  ;;  %v6363_v14 = vld [vmem:[#allocation2 + $0xc8] sm:$0xff] }
 0x5a4   :  { %8923 = vst [vmem:[#allocation34_spill] sm:$0xff] %v6360_v49 }
 0x5a5   :  { %8924 = vst [vmem:[#allocation38_spill] sm:$0xff] %v6363_v14 }
 0x612   :  { %v1410_v52 = vpop.permute.xlu1 %1409 }
 0x613   :  { %4292 = vmatmul.msk.f32.vlgmr.msrb.gmra.mxu1 %vm179_vm1, %v1410_v52  ;;  %4293 = vmatmul.msk.f32.vlgmr.msrb.gmra.mxu0 %vm179_vm1, %v1410_v52  ;;  %v1413_v38 = vsel %vm179_vm1, %v1412_v27, %v1410_v52  ;;  %v6372_v27 = vld [vmem:[#allocation2 + $0xa0] sm:$0xff] }
 0x614   :  { %1432 = vmatmul.f32.vlgmr.msrb.gmra.mxu3 %v1413_v38  ;;  %1472 = vmatmul.f32.vlgmr.msrb.gmra.mxu2 %v1413_v38  ;;  %8927 = vst [vmem:[#allocation58_spill] sm:$0xff] %v6372_v27 }
 0x615   :  { %1687 = vmatpush.msrb.mxu1 %v6244_v48  ;;  %1727 = vmatpush.msrb.mxu0 %v6247_v37 }
 0x616   :  { %1659 = vmatpush.msrb.mxu3 %v6250_v47  ;;  %1699 = vmatpush.msrb.mxu2 %v6253_v54 }
 0x617   :  { %1688 = vmatpush.msrb.mxu1 %v6256_v42  ;;  %1728 = vmatpush.msrb.mxu0 %v6259_v39 }
 0x618   :  { %1660 = vmatpush.msrb.mxu3 %v6262_v59  ;;  %1700 = vmatpush.msrb.mxu2 %v6265_v55 }
 0x619   :  { %1689 = vmatpush.msrb.mxu1 %v6268_v40  ;;  %1729 = vmatpush.msrb.mxu0 %v6271_v1 }
 0x61a   :  { %1661 = vmatpush.msrb.mxu3 %v6274_v2  ;;  %1701 = vmatpush.msrb.mxu2 %v6277_v4 }
 0x61b   :  { %1512 = vmatmul.f32.vlgmr.msra.gmra.mxu1 %v1413_v38  ;;  %1552 = vmatmul.f32.vlgmr.msra.gmra.mxu0 %v1413_v38  ;;  %v6378_v38 = vld [vmem:[#allocation2 + $0x190] sm:$0xff] }
 0x61c   :  { %4294 = vmatmul.msk.f32.vlgmr.msra.gmra.mxu3 %vm179_vm1, %v1410_v52  ;;  %4295 = vmatmul.msk.f32.vlgmr.msra.gmra.mxu2 %vm179_vm1, %v1410_v52  ;;  %v6375_v52 = vld [vmem:[#allocation2 + $0xa8] sm:$0xff]  ;;  %8929 = vst [vmem:[#allocation17_spill] sm:$0xff] %v6378_v38 }
 0x61d   :  { %1690 = vmatpush.msrb.mxu1 %v6282_v8  ;;  %1730 = vmatpush.msrb.mxu0 %v6285_v9  ;;  %8928 = vst [vmem:[#allocation15_spill] sm:$0xff] %v6375_v52 }
 0x61e   :  { %1662 = vmatpush.msrb.mxu3 %v6288_v57  ;;  %1702 = vmatpush.msrb.mxu2 %v6291_v53 }
 0x61f   :  { %1691 = vmatpush.msrb.mxu1 %v6294_v6  ;;  %1731 = vmatpush.msrb.mxu0 %v6297_v11 }
 0x620   :  { %1663 = vmatpush.msrb.mxu3 %v6300_v3  ;;  %1703 = vmatpush.msrb.mxu2 %v6303_v16 }
 0x621   :  { %1692 = vmatpush.msrb.mxu1 %v6306_v36  ;;  %1732 = vmatpush.msrb.mxu0 %v6309_v30 }
 0x622   :  { %1664 = vmatpush.msrb.mxu3 %v6312_v15  ;;  %1704 = vmatpush.msrb.mxu2 %v6315_v7 }
 0x623   :  { %1693 = vmatpush.msrb.mxu1 %v6318_v41  ;;  %1733 = vmatpush.msrb.mxu0 %v6321_v17 }
 0x624   :  { %1665 = vmatpush.msrb.mxu3 %v6324_v46  ;;  %1705 = vmatpush.msrb.mxu2 %v6327_v20 }
 0x625   :  { %1694 = vmatpush.msrb.mxu1 %v6330_v21  ;;  %1734 = vmatpush.msrb.mxu0 %v6333_v24 }
 0x626   :  { %1666 = vmatpush.msrb.mxu3 %v6336_v29  ;;  %1706 = vmatpush.msrb.mxu2 %v6339_v34 }
 0x627   :  { %1739 = vmatpush.msra.mxu1 %v6342_v35  ;;  %1779 = vmatpush.msra.mxu0 %v6345_v56 }
 0x628   :  { %1667 = vmatpush.msrb.mxu3 %v6348_v60  ;;  %1707 = vmatpush.msrb.mxu2 %v6351_v63 }
 0x629   :  { %1740 = vmatpush.msra.mxu1 %v6354_v28  ;;  %1780 = vmatpush.msra.mxu0 %v6357_v61 }
 0x62a   :  { %1668 = vmatpush.msrb.mxu3 %v6360_v49  ;;  %1708 = vmatpush.msrb.mxu2 %v6363_v14  ;;  %v6381_v14 = vld [vmem:[#allocation2 + $0x198] sm:$0xff] }
 0x62b   :  { %1741 = vmatpush.msra.mxu1 %v6366_v44  ;;  %1781 = vmatpush.msra.mxu0 %v6369_v43  ;;  %8930 = vst [vmem:[#allocation62_spill] sm:$0xff] %v6381_v14  ;;  %v6384_v44 = vld [vmem:[#allocation2 + $0x80] sm:$0xff]  ;;  %v6387_v43 = vld [vmem:[#allocation2 + $0x88] sm:$0xff] }
 0x62c   :  { %1669 = vmatpush.msrb.mxu3 %v6372_v27  ;;  %1709 = vmatpush.msrb.mxu2 %v6375_v52  ;;  %8931 = vst [vmem:[#allocation26_spill] sm:$0xff] %v6384_v44  ;;  %v6390_v27 = vld [vmem:[#allocation2 + $0x170] sm:$0xff]  ;;  %v6393_v52 = vld [vmem:[#allocation2 + $0x178] sm:$0xff] }
 0x62d   :  { %1742 = vmatpush.msra.mxu1 %v6378_v38  ;;  %1782 = vmatpush.msra.mxu0 %v6381_v14  ;;  %8932 = vst [vmem:[#allocation22_spill] sm:$0xff] %v6387_v43  ;;  %v6396_v38 = vld [vmem:[#allocation2 + $0x60] sm:$0xff]  ;;  %v6399_v14 = vld [vmem:[#allocation2 + $0x68] sm:$0xff] }
 0x62e   :  { %1670 = vmatpush.msrb.mxu3 %v6384_v44  ;;  %1710 = vmatpush.msrb.mxu2 %v6387_v43  ;;  %8933 = vst [vmem:[#allocation16_spill] sm:$0xff] %v6390_v27  ;;  %v6402_v44 = vld [vmem:[#allocation2 + $0x150] sm:$0xff]  ;;  %v6405_v43 = vld [vmem:[#allocation2 + $0x158] sm:$0xff] }
 0x62f   :  { %1743 = vmatpush.msra.mxu1 %v6390_v27  ;;  %8934 = vst [vmem:[#allocation63_spill] sm:$0xff] %v6393_v52  ;;  %1783 = vmatpush.msra.mxu0 %v6393_v52  ;;  %v6408_v27 = vld [vmem:[#allocation2 + $0x40] sm:$0xff]  ;;  %v6411_v52 = vld [vmem:[#allocation2 + $0x48] sm:$0xff] }
 0x630   :  { %8935 = vst [vmem:[#allocation29_spill] sm:$0xff] %v6396_v38  ;;  %1671 = vmatpush.msrb.mxu3 %v6396_v38  ;;  %1711 = vmatpush.msrb.mxu2 %v6399_v14  ;;  %v6414_v38 = vld [vmem:[#allocation2 + $0x130] sm:$0xff] }
 0x631   :  { %8936 = vst [vmem:[#allocation25_spill] sm:$0xff] %v6399_v14  ;;  %1744 = vmatpush.msra.mxu1 %v6402_v44  ;;  %1784 = vmatpush.msra.mxu0 %v6405_v43  ;;  %v6417_v14 = vld [vmem:[#allocation2 + $0x138] sm:$0xff] }
 0x632   :  { %8937 = vst [vmem:[#allocation19_spill] sm:$0xff] %v6402_v44  ;;  %1672 = vmatpush.msrb.mxu3 %v6408_v27  ;;  %1712 = vmatpush.msrb.mxu2 %v6411_v52  ;;  %v6420_v44 = vld [vmem:[#allocation2 + $0x20] sm:$0xff] }
 0x633   :  { %8938 = vst [vmem:[#allocation64_spill] sm:$0xff] %v6405_v43  ;;  %1745 = vmatpush.msra.mxu1 %v6414_v38  ;;  %1785 = vmatpush.msra.mxu0 %v6417_v14  ;;  %v6423_v43 = vld [vmem:[#allocation2 + $0x28] sm:$0xff] }
 0x634   :  { %8939 = vst [vmem:[#allocation33_spill] sm:$0xff] %v6408_v27  ;;  %1673 = vmatpush.msrb.mxu3 %v6420_v44  ;;  %1713 = vmatpush.msrb.mxu2 %v6423_v43  ;;  %v6426_v27 = vld [vmem:[#allocation2 + $0x110] sm:$0xff] }
 0x635   :  { %8940 = vst [vmem:[#allocation31_spill] sm:$0xff] %v6411_v52  ;;  %1746 = vmatpush.msra.mxu1 %v6426_v27  ;;  %v6429_v52 = vld [vmem:[#allocation2 + $0x118] sm:$0xff] }
 0x636   :  { %8941 = vst [vmem:[#allocation21_spill] sm:$0xff] %v6414_v38  ;;  %1786 = vmatpush.msra.mxu0 %v6429_v52  ;;  %v6432_v38 = vld [vmem:[#allocation2] sm:$0xff] }
 0x637   :  { %8942 = vst [vmem:[#allocation66_spill] sm:$0xff] %v6417_v14  ;;  %1674 = vmatpush.msrb.mxu3 %v6432_v38  ;;  %v6435_v14 = vld [vmem:[#allocation2 + $0x8] sm:$0xff] }
 0x638   :  { %8943 = vst [vmem:[#allocation37_spill] sm:$0xff] %v6420_v44  ;;  %1714 = vmatpush.msrb.mxu2 %v6435_v14  ;;  %v6438_v44 = vld [vmem:[#allocation2 + $0xf0] sm:$0xff]  ;;  %1787 = vmatpush.msra.mxu0 %v8887_v33 }
 0x639   :  { %8944 = vst [vmem:[#allocation35_spill] sm:$0xff] %v6423_v43  ;;  %1747 = vmatpush.msra.mxu1 %v6438_v44  ;;  %v6442_v43 = vld [vmem:[#allocation2 + $0x2f0] sm:$0xff] }
 0x63a   :  { %8945 = vst [vmem:[#allocation24_spill] sm:$0xff] %v6426_v27  ;;  %1767 = vmatpush.msra.mxu3 %v6442_v43  ;;  %v6445_v27 = vld [vmem:[#allocation2 + $0x2f8] sm:$0xff]  ;;  %1788 = vmatpush.msra.mxu0 %v8891_v22  ;;  %v6458_v33 = vld [vmem:[#allocation2 + $0xb0] sm:$0xff] }
 0x63b   :  { %8946 = vst [vmem:[#allocation67_spill] sm:$0xff] %v6429_v52  ;;  %1807 = vmatpush.msra.mxu2 %v6445_v27  ;;  %v6448_v52 = vld [vmem:[#allocation2 + $0xd0] sm:$0xff] }
 0x63c   :  { %8947 = vst [vmem:[#allocation41_spill] sm:$0xff] %v6432_v38  ;;  %1748 = vmatpush.msra.mxu1 %v6448_v52  ;;  %1789 = vmatpush.msra.mxu0 %v8895_v5  ;;  %v6468_v22 = vld [vmem:[#allocation2 + $0x90] sm:$0xff] }
 0x63d   :  { %8948 = vst [vmem:[#allocation39_spill] sm:$0xff] %v6435_v14  ;;  %v6452_v14 = vld [vmem:[#allocation2 + $0x2d0] sm:$0xff] }
 0x63e   :  { %8949 = vst [vmem:[#allocation56_spill] sm:$0xff] %v6438_v44  ;;  %1768 = vmatpush.msra.mxu3 %v6452_v14  ;;  %v6455_v44 = vld [vmem:[#allocation2 + $0x2d8] sm:$0xff]  ;;  %1749 = vmatpush.msra.mxu1 %v6458_v33  ;;  %v6476_v5 = vld [vmem:[#allocation2 + $0x70] sm:$0xff] }
 0x63f   :  { %8950 = vst [vmem:[#allocation28_spill] sm:$0xff] %v6442_v43  ;;  %1808 = vmatpush.msra.mxu2 %v6455_v44  ;;  %1790 = vmatpush.msra.mxu0 %v8899_v26  ;;  %v6488_v26 = vld [vmem:[#allocation2 + $0x250] sm:$0xff] }
 0x640   :  { %8951 = vst [vmem:[#allocation43_spill] sm:$0xff] %v6445_v27  ;;  %v6462_v27 = vld [vmem:[#allocation2 + $0x2b0] sm:$0xff]  ;;  %1750 = vmatpush.msra.mxu1 %v6468_v22 }
 0x641   :  { %8952 = vst [vmem:[#allocation44_spill] sm:$0xff] %v6448_v52  ;;  %1769 = vmatpush.msra.mxu3 %v6462_v27  ;;  %v6465_v52 = vld [vmem:[#allocation2 + $0x2b8] sm:$0xff]  ;;  %1791 = vmatpush.msra.mxu0 %v8903_v25  ;;  %v6496_v25 = vld [vmem:[#allocation2 + $0x230] sm:$0xff] }
 0x642   :  { %8953 = vst [vmem:[#allocation49_spill] sm:$0xff] %v6452_v14  ;;  %1809 = vmatpush.msra.mxu2 %v6465_v52  ;;  %1751 = vmatpush.msra.mxu1 %v6476_v5 }
 0x643   :  { %8954 = vst [vmem:[#allocation68_spill] sm:$0xff] %v6455_v44  ;;  %v6472_v44 = vld [vmem:[#allocation2 + $0x290] sm:$0xff]  ;;  %1792 = vmatpush.msra.mxu0 %v8907_v45 }
 0x644   :  { %8955 = vst [vmem:[#allocation32_spill] sm:$0xff] %v6458_v33  ;;  %1770 = vmatpush.msra.mxu3 %v6472_v44  ;;  %1810 = vmatpush.msra.mxu2 %v8901_v0  ;;  %v6492_v0 = vld [vmem:[#allocation2 + $0x30] sm:$0xff] }
 0x645   :  { %8956 = vst [vmem:[#allocation46_spill] sm:$0xff] %v6462_v27  ;;  %v6480_v27 = vld [vmem:[#allocation2 + $0x270] sm:$0xff]  ;;  %1793 = vmatpush.msra.mxu0 %v8911_v12 }
 0x646   :  { %8957 = vst [vmem:[#allocation57_spill] sm:$0xff] %v6465_v52  ;;  %1771 = vmatpush.msra.mxu3 %v6480_v27  ;;  %1811 = vmatpush.msra.mxu2 %v8905_v51  ;;  %v6502_v51 = vld [vmem:[#allocation2 + $0x210] sm:$0xff] }
 0x647   :  { %8958 = vst [vmem:[#allocation47_spill] sm:$0xff] %v6468_v22  ;;  %v6484_v22 = vld [vmem:[#allocation2 + $0x50] sm:$0xff]  ;;  %1794 = vmatpush.msra.mxu0 %v8915_v19 }
 0x648   :  { %8959 = vst [vmem:[#allocation69_spill] sm:$0xff] %v6472_v44  ;;  %1752 = vmatpush.msra.mxu1 %v6484_v22  ;;  %1772 = vmatpush.msra.mxu3 %v6488_v26 }
 0x649   :  { %8960 = vst [vmem:[#allocation36_spill] sm:$0xff] %v6476_v5  ;;  %1812 = vmatpush.msra.mxu2 %v8909_v62 }
 0x64a   :  { %8961 = vst [vmem:[#allocation59_spill] sm:$0xff] %v6480_v27  ;;  %1753 = vmatpush.msra.mxu1 %v6492_v0  ;;  %1773 = vmatpush.msra.mxu3 %v6496_v25 }
 0x64b   :  { %8962 = vst [vmem:[#allocation48_spill] sm:$0xff] %v6484_v22  ;;  %1813 = vmatpush.msra.mxu2 %v8913_v23 }
 0x64c   :  { %8963 = vst [vmem:[#allocation52_spill] sm:$0xff] %v6488_v26  ;;  %1754 = vmatpush.msra.mxu1 %v8914_v13  ;;  %1774 = vmatpush.msra.mxu3 %v6502_v51 }
 0x64d   :  { %8964 = vst [vmem:[#allocation50_spill] sm:$0xff] %v6492_v0  ;;  %1814 = vmatpush.msra.mxu2 %v8917_v32 }
 0x64e   :  { %8965 = vst [vmem:[#allocation60_spill] sm:$0xff] %v6496_v25 }
 0x64f   :  { %8966 = vst [vmem:[#allocation70_spill] sm:$0xff] %v6502_v51 }
 0x690   :  { %v1493_v45 = vpop.f32.mrf.mxu0  ;;  %v1453_v25 = vpop.f32.mrf.mxu1 }
 0x697   :  { %v1433_v62 = vpop.f32.mrf.mxu3  ;;  %v1473_v0 = vpop.f32.mrf.mxu2 }
 0x698   :  { %v1434_v12 = vadd.f32 %v1433_v62, %v8918_v10  ;;  %v1474_v26 = vadd.f32 %v1473_v0, %v8919_v18  ;;  %v1553_v27 = vpop.f32.mrf.mxu0  ;;  %v1513_v0 = vpop.f32.mrf.mxu1 }
 0x699   :  { %v1554_v19 = vadd.f32 %v1553_v27, %v8920_v58  ;;  %v1514_v27 = vadd.f32 %v1513_v0, %v8921_v50 }
 0x69a   :  { %v1454_v22 = vadd.f32 %v1453_v25, %v1434_v12  ;;  %v1494_v23 = vadd.f32 %v1493_v45, %v1474_v26 }
 0x69c   :  { %v4296_v13 = vmul.f32 -1.442695, %v1454_v22  ;;  %v4297_v5 = vmul.f32 -1.442695, %v1494_v23  ;;  %v4300_v22 = vld [vmem:[%s8177_s0 + $0x2] sm:$0x3] }
 0x69d   :  { %1649 = vrot.lane.b32.xlu2 %v4300_v22, %s5045_s17 }
 0x69e   :  { %4460 = vpow2.f32 %v4296_v13 }
 0x69f   :  { %4462 = vpow2.f32 %v4297_v5  ;;  %v1573_v51 = vpop.f32.mrf.mxu2  ;;  %v1533_v25 = vpop.f32.mrf.mxu3 }
 0x6a0   :  { %v1574_v44 = vadd.f32 %v1573_v51, %v1554_v19  ;;  %v1534_v51 = vadd.f32 %v1533_v25, %v1514_v27 }
 0x6a2   :  { %v4298_v32 = vmul.f32 -1.442695, %v1574_v44 }
 0x6a4   :  { %v4461_v52 = vpop.eup %4460  ;;  %4464 = vpow2.f32 %v4298_v32 }
 0x6a5   :  { %v4463_v33 = vpop.eup %4462  ;;  %v1579_v14 = vadd.f32 1.0, %v4461_v52 }
 0x6a6   :  { %v1598_v62 = vadd.f32 1.0, %v4463_v33 }
 0x6a7   :  { %4466 = vrcp.f32 %v1579_v14  ;;  %v1591_v13 = vand.u32 2147483648, %v1579_v14  ;;  %v1589_v32 = vand.u32 2147483647, %v1579_v14  ;;  %vm1585_vm4 = vweird.f32 %v1579_v14 }
 0x6a8   :  { %4468 = vrcp.f32 %v1598_v62  ;;  %v1610_v58 = vand.u32 2147483648, %v1598_v62  ;;  %v1608_v22 = vand.u32 2147483647, %v1598_v62  ;;  %vm1604_vm6 = vweird.f32 %v1598_v62 }
 0x6a9   :  { %v1592_v25 = vor.u32 1.1754944e-38, %v1591_v13  ;;  %vm1590_vm7 = vcmp.eq.f32.partialorder %v1589_v32, 8.507059e+37  ;;  %v9001_v13 = vld [vmem:[#allocation46_spill] sm:$0xff]  ;;  %v9002_v32 = vld [vmem:[#allocation57_spill] sm:$0xff] }
 0x6aa   :  { %v4465_v26 = vpop.eup %4464  ;;  %vm1609_vm9 = vcmp.eq.f32.partialorder %v1608_v22, 8.507059e+37  ;;  %v9003_v22 = vld [vmem:[#allocation47_spill] sm:$0xff] }
 0x6ab   :  { %v1618_v5 = vadd.f32 1.0, %v4465_v26 }
 0x6ad   :  { %v4467_v44 = vpop.eup %4466  ;;  %4470 = vrcp.f32 %v1618_v5  ;;  %vm1624_vm11 = vweird.f32 %v1618_v5 }
 0x6ae   :  { %v4469_v45 = vpop.eup %4468  ;;  %v1581_v52 = vmul.f32 %v4467_v44, %v1579_v14  ;;  %4472 = vtanh.f32 %v1534_v51  ;;  %vm1586_vm2 = vweird.f32 %v4467_v44 }
 0x6af   :  { %v1600_v33 = vmul.f32 %v4469_v45, %v1598_v62  ;;  %vm1605_vm3 = vweird.f32 %v4469_v45  ;;  %vm1587_vm5 = vmor %vm1585_vm4, %vm1586_vm2  ;;  %v1628_v62 = vand.u32 2147483647, %v1618_v5 }
 0x6b0   :  { %v1582_v12 = vsub.f32 1.0, %v1581_v52  ;;  %vm1606_vm8 = vmor %vm1604_vm6, %vm1605_vm3  ;;  %v1611_v52 = vor.u32 1.1754944e-38, %v1610_v58 }
 0x6b1   :  { %v1601_v23 = vsub.f32 1.0, %v1600_v33  ;;  %vm1629_vm13 = vcmp.eq.f32.partialorder %v1628_v62, 8.507059e+37  ;;  %v9009_v62 = vld [vmem:[#allocation50_spill] sm:$0xff] }
 0x6b2   :  { %v1583_v19 = vmul.f32 %v4467_v44, %v1582_v12 }
 0x6b3   :  { %v4471_v18 = vpop.eup %4470  ;;  %v1602_v10 = vmul.f32 %v4469_v45, %v1601_v23 }
 0x6b4   :  { %v1584_v0 = vadd.f32 %v4467_v44, %v1583_v19  ;;  %v1620_v26 = vmul.f32 %v4471_v18, %v1618_v5  ;;  %v4473_v33 = vpop.eup %4472  ;;  %vm1625_vm10 = vweird.f32 %v4471_v18 }
 0x6b5   :  { %v1603_v27 = vadd.f32 %v4469_v45, %v1602_v10  ;;  %v1630_v10 = vand.u32 2147483648, %v1618_v5  ;;  %vm1626_vm12 = vmor %vm1624_vm11, %vm1625_vm10 }
 0x6b6   :  { %v1588_v50 = vsel %vm1587_vm5, %v4467_v44, %v1584_v0  ;;  %v1621_v51 = vsub.f32 1.0, %v1620_v26  ;;  %v4789_v0 = vld [vmem:[#allocation2 + $0x98] sm:$0xff]  ;;  %v9004_v26 = vld [vmem:[#allocation69_spill] sm:$0xff] }
 0x6b7   :  { %v1593_v12 = vsel %vm1590_vm7, %v1592_v25, %v1588_v50  ;;  %v1607_v43 = vsel %vm1606_vm8, %v4469_v45, %v1603_v27  ;;  %v1631_v44 = vor.u32 1.1754944e-38, %v1630_v10  ;;  %v4790_v25 = vld [vmem:[#allocation2 + $0x298] sm:$0xff] }
 0x6b8   :  { %v1612_v38 = vsel %vm1609_vm9, %v1611_v52, %v1607_v43  ;;  %v1635_v23 = vmul.f32 %v4473_v33, %v1593_v12  ;;  %v1622_v49 = vmul.f32 %v4471_v18, %v1621_v51  ;;  %v9005_v27 = vld [vmem:[#allocation36_spill] sm:$0xff]  ;;  %v9006_v51 = vld [vmem:[#allocation59_spill] sm:$0xff] }
 0x6b9   :  { %v1634_v19 = vmul.f32 %v1612_v38, %v6229_v31  ;;  %v4791_v52 = vld [vmem:[#allocation2 + $0x78] sm:$0xff] }
 0x6ba   :  { %v1623_v61 = vadd.f32 %v4471_v18, %v1622_v49  ;;  %v4792_v33 = vld [vmem:[#allocation2 + $0x278] sm:$0xff] }
 0x6bb   :  { %v6515_v14 = vadd.f32 %v1635_v23, %v1634_v19  ;;  %v9007_v12 = vld [vmem:[#allocation48_spill] sm:$0xff] }
 0x6bc   :  { %v1627_v58 = vsel %vm1626_vm12, %v4471_v18, %v1623_v61  ;;  %v4299_v18 = vld [vmem:[%s8177_s0 + $0xc] sm:$0x3]  ;;  %v4793_v23 = vld [vmem:[#allocation2 + $0x58] sm:$0xff] }
 0x6bd   :  { %4474 = vtanh.f32 %v6515_v14  ;;  %v1632_v45 = vsel %vm1629_vm13, %v1631_v44, %v1627_v58  ;;  %v9008_v19 = vld [vmem:[#allocation52_spill] sm:$0xff] }
 0x6be   :  { %v4794_v10 = vld [vmem:[#allocation2 + $0x258] sm:$0xff] }
 0x6bf   :  { %v4795_v58 = vld [vmem:[#allocation2 + $0x38] sm:$0xff] }
 0x6c0   :  { %v9010_v44 = vld [vmem:[#allocation60_spill] sm:$0xff] }
 0x6c3   :  { %v4475_v50 = vpop.eup %4474 }
 0x6c4   :  { %v1638_v43 = vmul.f32 %v4475_v50, %v1632_v45  ;;  %v4796_v50 = vld [vmem:[#allocation2 + $0x238] sm:$0xff]  ;;  %v4797_v45 = vld [vmem:[#allocation2 + $0x10] sm:$0xff] }
 0x6c6   :  { %1652 = vrot.lane.b32.xlu0 %v1638_v43, %s5048_s3  ;;  %1639 = vst.msk [vmem:[#allocation7 + $0x5] sm:$0x1] %vm416_vm14, %v1638_v43  ;;  %v1642_v31 = vrot.slane %v1638_v43, 1 }
 0x6c7   :  { %1640 = vst.msk [vmem:[#allocation7 + $0x2] sm:$0x1] %vm418_vm15, %v1638_v43  ;;  %v4798_v43 = vld [vmem:[#allocation2 + $0x18] sm:$0xff] }
 0x6c8   :  { %1644 = vst.msk [vmem:[#allocation7 + $0xd] sm:$0x1] %vm416_vm14, %v1642_v31 }
 0x6c9   :  { %1645 = vst.msk [vmem:[#allocation7 + $0xa] sm:$0x1] %vm418_vm15, %v1642_v31  ;;  %v9011_v31 = vld [vmem:[#allocation70_spill] sm:$0xff] }
 0x6f7   :  { %v1650_v61 = vpop.permute.xlu2 %1649 }
 0x6f8   :  { %v1655_v49 = vsel %vm177_vm0, %v4299_v18, %v1650_v61  ;;  %v4799_v18 = vld [vmem:[#allocation2 + $0x218] sm:$0xff]  ;;  %v1890_v61 = vld [vmem:[%s8177_s0] sm:$0x3] }
 0x6f9   :  { %1892 = vrot.lane.b32.xlu1 %v1890_v61, %s5045_s17 }
 0x738   :  { %v1653_v38 = vpop.permute.xlu0 %1652 }
 0x739   :  { %4301 = vmatmul.msk.f32.vlgmr.msrb.gmra.mxu1 %vm179_vm1, %v1653_v38  ;;  %4302 = vmatmul.msk.f32.vlgmr.msrb.gmra.mxu0 %vm179_vm1, %v1653_v38  ;;  %v1656_v5 = vsel %vm179_vm1, %v1655_v49, %v1653_v38 }
 0x73a   :  { %1675 = vmatmul.f32.vlgmr.msrb.gmra.mxu3 %v1656_v5  ;;  %1715 = vmatmul.f32.vlgmr.msrb.gmra.mxu2 %v1656_v5 }
 0x73b   :  { %1930 = vmatpush.msrb.mxu1 %v6244_v48  ;;  %1970 = vmatpush.msrb.mxu0 %v6247_v37  ;;  %v8967_v48 = vld [vmem:[#allocation30_spill] sm:$0xff] }
 0x73c   :  { %1902 = vmatpush.msrb.mxu3 %v6250_v47  ;;  %1942 = vmatpush.msrb.mxu2 %v6253_v54  ;;  %v8968_v37 = vld [vmem:[#allocation34_spill] sm:$0xff] }
 0x73d   :  { %1931 = vmatpush.msrb.mxu1 %v6256_v42  ;;  %1971 = vmatpush.msrb.mxu0 %v6259_v39  ;;  %v8969_v47 = vld [vmem:[#allocation38_spill] sm:$0xff]  ;;  %v8971_v42 = vld [vmem:[#allocation55_spill] sm:$0xff] }
 0x73e   :  { %1903 = vmatpush.msrb.mxu3 %v6262_v59  ;;  %1943 = vmatpush.msrb.mxu2 %v6265_v55  ;;  %v8970_v54 = vld [vmem:[#allocation42_spill] sm:$0xff]  ;;  %v8973_v59 = vld [vmem:[#allocation15_spill] sm:$0xff]  ;;  %v8974_v55 = vld [vmem:[#allocation17_spill] sm:$0xff] }
 0x73f   :  { %1932 = vmatpush.msrb.mxu1 %v6268_v40  ;;  %1972 = vmatpush.msrb.mxu0 %v6271_v1  ;;  %v8972_v39 = vld [vmem:[#allocation58_spill] sm:$0xff] }
 0x740   :  { %1904 = vmatpush.msrb.mxu3 %v6274_v2  ;;  %1944 = vmatpush.msrb.mxu2 %v6277_v4  ;;  %v8975_v40 = vld [vmem:[#allocation62_spill] sm:$0xff]  ;;  %v8978_v4 = vld [vmem:[#allocation16_spill] sm:$0xff] }
 0x741   :  { %1755 = vmatmul.f32.vlgmr.msra.gmra.mxu1 %v1656_v5  ;;  %1795 = vmatmul.f32.vlgmr.msra.gmra.mxu0 %v1656_v5  ;;  %v8976_v1 = vld [vmem:[#allocation26_spill] sm:$0xff] }
 0x742   :  { %4303 = vmatmul.msk.f32.vlgmr.msra.gmra.mxu3 %vm179_vm1, %v1653_v38  ;;  %4304 = vmatmul.msk.f32.vlgmr.msra.gmra.mxu2 %vm179_vm1, %v1653_v38  ;;  %v8977_v2 = vld [vmem:[#allocation22_spill] sm:$0xff] }
 0x743   :  { %1933 = vmatpush.msrb.mxu1 %v6282_v8  ;;  %1973 = vmatpush.msrb.mxu0 %v6285_v9  ;;  %v8979_v8 = vld [vmem:[#allocation63_spill] sm:$0xff]  ;;  %v8980_v9 = vld [vmem:[#allocation29_spill] sm:$0xff] }
 0x744   :  { %1905 = vmatpush.msrb.mxu3 %v6288_v57  ;;  %1945 = vmatpush.msrb.mxu2 %v6291_v53  ;;  %v8981_v57 = vld [vmem:[#allocation25_spill] sm:$0xff]  ;;  %v8982_v53 = vld [vmem:[#allocation19_spill] sm:$0xff] }
 0x745   :  { %1934 = vmatpush.msrb.mxu1 %v6294_v6  ;;  %1974 = vmatpush.msrb.mxu0 %v6297_v11  ;;  %v8983_v6 = vld [vmem:[#allocation64_spill] sm:$0xff]  ;;  %v8984_v11 = vld [vmem:[#allocation33_spill] sm:$0xff] }
 0x746   :  { %1906 = vmatpush.msrb.mxu3 %v6300_v3  ;;  %1946 = vmatpush.msrb.mxu2 %v6303_v16  ;;  %v8985_v3 = vld [vmem:[#allocation31_spill] sm:$0xff]  ;;  %v8986_v16 = vld [vmem:[#allocation21_spill] sm:$0xff] }
 0x747   :  { %1935 = vmatpush.msrb.mxu1 %v6306_v36  ;;  %1975 = vmatpush.msrb.mxu0 %v6309_v30  ;;  %v8987_v36 = vld [vmem:[#allocation66_spill] sm:$0xff]  ;;  %v8988_v30 = vld [vmem:[#allocation37_spill] sm:$0xff] }
 0x748   :  { %1907 = vmatpush.msrb.mxu3 %v6312_v15  ;;  %1947 = vmatpush.msrb.mxu2 %v6315_v7  ;;  %v8989_v15 = vld [vmem:[#allocation35_spill] sm:$0xff]  ;;  %v8990_v7 = vld [vmem:[#allocation24_spill] sm:$0xff] }
 0x749   :  { %1936 = vmatpush.msrb.mxu1 %v6318_v41  ;;  %1976 = vmatpush.msrb.mxu0 %v6321_v17  ;;  %v8991_v41 = vld [vmem:[#allocation67_spill] sm:$0xff]  ;;  %v8992_v17 = vld [vmem:[#allocation41_spill] sm:$0xff] }
 0x74a   :  { %1908 = vmatpush.msrb.mxu3 %v6324_v46  ;;  %1948 = vmatpush.msrb.mxu2 %v6327_v20  ;;  %v8993_v46 = vld [vmem:[#allocation39_spill] sm:$0xff]  ;;  %v8994_v20 = vld [vmem:[#allocation56_spill] sm:$0xff] }
 0x74b   :  { %1937 = vmatpush.msrb.mxu1 %v6330_v21  ;;  %1977 = vmatpush.msrb.mxu0 %v6333_v24  ;;  %v4786_v21 = vld [vmem:[#allocation2 + $0xf8] sm:$0xff] }
 0x74c   :  { %1909 = vmatpush.msrb.mxu3 %v6336_v29  ;;  %1949 = vmatpush.msrb.mxu2 %v6339_v34  ;;  %v8995_v24 = vld [vmem:[#allocation28_spill] sm:$0xff]  ;;  %v8996_v29 = vld [vmem:[#allocation43_spill] sm:$0xff] }
 0x74d   :  { %1982 = vmatpush.msra.mxu1 %v6342_v35  ;;  %2022 = vmatpush.msra.mxu0 %v6345_v56  ;;  %v8997_v34 = vld [vmem:[#allocation44_spill] sm:$0xff]  ;;  %v8998_v56 = vld [vmem:[#allocation49_spill] sm:$0xff] }
 0x74e   :  { %1910 = vmatpush.msrb.mxu3 %v6348_v60  ;;  %1950 = vmatpush.msrb.mxu2 %v6351_v63  ;;  %v4787_v35 = vld [vmem:[#allocation2 + $0xd8] sm:$0xff] }
 0x74f   :  { %1983 = vmatpush.msra.mxu1 %v6354_v28  ;;  %2023 = vmatpush.msra.mxu0 %v8967_v48  ;;  %v8999_v60 = vld [vmem:[#allocation68_spill] sm:$0xff]  ;;  %v9012_v48 = vld [vmem:[#allocation18_spill] sm:$0xff] }
 0x750   :  { %1911 = vmatpush.msrb.mxu3 %v8968_v37  ;;  %1951 = vmatpush.msrb.mxu2 %v8969_v47  ;;  %v9000_v63 = vld [vmem:[#allocation32_spill] sm:$0xff] }
 0x751   :  { %1984 = vmatpush.msra.mxu1 %v8970_v54  ;;  %2024 = vmatpush.msra.mxu0 %v8971_v42  ;;  %v4788_v28 = vld [vmem:[#allocation2 + $0xb8] sm:$0xff] }
 0x752   :  { %1912 = vmatpush.msrb.mxu3 %v8972_v39  ;;  %1952 = vmatpush.msrb.mxu2 %v8973_v59  ;;  %v9013_v47 = vld [vmem:[#allocation20_spill] sm:$0xff] }
 0x753   :  { %1985 = vmatpush.msra.mxu1 %v8974_v55  ;;  %2025 = vmatpush.msra.mxu0 %v8975_v40 }
 0x754   :  { %1913 = vmatpush.msrb.mxu3 %v8976_v1  ;;  %1953 = vmatpush.msrb.mxu2 %v8977_v2  ;;  %v9014_v2 = vld [vmem:[#allocation23_spill] sm:$0xff] }
 0x755   :  { %1986 = vmatpush.msra.mxu1 %v8978_v4  ;;  %2026 = vmatpush.msra.mxu0 %v8979_v8 }
 0x756   :  { %1914 = vmatpush.msrb.mxu3 %v8980_v9  ;;  %1954 = vmatpush.msrb.mxu2 %v8981_v57 }
 0x757   :  { %1987 = vmatpush.msra.mxu1 %v8982_v53  ;;  %2027 = vmatpush.msra.mxu0 %v8983_v6 }
 0x758   :  { %1915 = vmatpush.msrb.mxu3 %v8984_v11  ;;  %1955 = vmatpush.msrb.mxu2 %v8985_v3 }
 0x759   :  { %1988 = vmatpush.msra.mxu1 %v8986_v16  ;;  %2028 = vmatpush.msra.mxu0 %v8987_v36 }
 0x75a   :  { %1916 = vmatpush.msrb.mxu3 %v8988_v30  ;;  %1956 = vmatpush.msrb.mxu2 %v8989_v15  ;;  %v9015_v15 = vld [vmem:[#allocation27_spill] sm:$0xff] }
 0x75b   :  { %1989 = vmatpush.msra.mxu1 %v8990_v7  ;;  %2029 = vmatpush.msra.mxu0 %v8991_v41 }
 0x75c   :  { %1917 = vmatpush.msrb.mxu3 %v8992_v17  ;;  %1957 = vmatpush.msrb.mxu2 %v8993_v46 }
 0x75d   :  { %1990 = vmatpush.msra.mxu1 %v8994_v20  ;;  %2030 = vmatpush.msra.mxu0 %v4786_v21 }
 0x75e   :  { %2010 = vmatpush.msra.mxu3 %v8995_v24  ;;  %2050 = vmatpush.msra.mxu2 %v8996_v29 }
 0x75f   :  { %1991 = vmatpush.msra.mxu1 %v8997_v34  ;;  %2031 = vmatpush.msra.mxu0 %v4787_v35 }
 0x760   :  { %2011 = vmatpush.msra.mxu3 %v8998_v56  ;;  %2051 = vmatpush.msra.mxu2 %v8999_v60 }
 0x761   :  { %1992 = vmatpush.msra.mxu1 %v9000_v63  ;;  %2032 = vmatpush.msra.mxu0 %v4788_v28 }
 0x762   :  { %2012 = vmatpush.msra.mxu3 %v9001_v13  ;;  %2052 = vmatpush.msra.mxu2 %v9002_v32 }
 0x763   :  { %1993 = vmatpush.msra.mxu1 %v9003_v22  ;;  %2033 = vmatpush.msra.mxu0 %v4789_v0 }
 0x764   :  { %2013 = vmatpush.msra.mxu3 %v9004_v26  ;;  %2053 = vmatpush.msra.mxu2 %v4790_v25 }
 0x765   :  { %1994 = vmatpush.msra.mxu1 %v9005_v27  ;;  %2034 = vmatpush.msra.mxu0 %v4791_v52 }
 0x766   :  { %2014 = vmatpush.msra.mxu3 %v9006_v51  ;;  %2054 = vmatpush.msra.mxu2 %v4792_v33 }
 0x767   :  { %1995 = vmatpush.msra.mxu1 %v9007_v12  ;;  %2035 = vmatpush.msra.mxu0 %v4793_v23 }
 0x768   :  { %2015 = vmatpush.msra.mxu3 %v9008_v19  ;;  %2055 = vmatpush.msra.mxu2 %v4794_v10 }
 0x769   :  { %1996 = vmatpush.msra.mxu1 %v9009_v62  ;;  %2036 = vmatpush.msra.mxu0 %v4795_v58 }
 0x76a   :  { %2016 = vmatpush.msra.mxu3 %v9010_v44  ;;  %2056 = vmatpush.msra.mxu2 %v4796_v50 }
 0x76b   :  { %1997 = vmatpush.msra.mxu1 %v4797_v45  ;;  %2037 = vmatpush.msra.mxu0 %v4798_v43 }
 0x76c   :  { %2017 = vmatpush.msra.mxu3 %v9011_v31  ;;  %2057 = vmatpush.msra.mxu2 %v4799_v18 }
 0x7b6   :  { %v1736_v49 = vpop.f32.mrf.mxu0  ;;  %v1696_v42 = vpop.f32.mrf.mxu1 }
 0x7bd   :  { %v1676_v38 = vpop.f32.mrf.mxu3  ;;  %v1716_v5 = vpop.f32.mrf.mxu2 }
 0x7be   :  { %v1677_v37 = vadd.f32 %v1676_v38, %v9012_v48  ;;  %v1717_v54 = vadd.f32 %v1716_v5, %v9013_v47  ;;  %v1796_v55 = vpop.f32.mrf.mxu0  ;;  %v1756_v16 = vpop.f32.mrf.mxu1  ;;  %v4308_v5 = vld [vmem:[%s8177_s0 + $0xe] sm:$0x3] }
 0x7bf   :  { %v1797_v4 = vadd.f32 %v1796_v55, %v9014_v2  ;;  %v1757_v7 = vadd.f32 %v1756_v16, %v9015_v15  ;;  %v2148_v55 = vld [vmem:[%s8183_s6 + $0x70] sm:$0xff] }
 0x7c0   :  { %v1697_v39 = vadd.f32 %v1696_v42, %v1677_v37  ;;  %v1737_v59 = vadd.f32 %v1736_v49, %v1717_v54  ;;  %v1893_v37 = vpop.permute.xlu1 %1892 }
 0x7c1   :  { %v1898_v54 = vsel %vm177_vm0, %v4308_v5, %v1893_v37 }
 0x7c2   :  { %v4305_v40 = vmul.f32 -1.442695, %v1697_v39  ;;  %v4306_v1 = vmul.f32 -1.442695, %v1737_v59  ;;  %v2149_v59 = vld [vmem:[%s8183_s6 + $0x78] sm:$0xff] }
 0x7c4   :  { %4476 = vpow2.f32 %v4305_v40 }
 0x7c5   :  { %4478 = vpow2.f32 %v4306_v1  ;;  %v1816_v8 = vpop.f32.mrf.mxu2  ;;  %v1776_v30 = vpop.f32.mrf.mxu3  ;;  %v2147_v1 = vld [vmem:[%s8183_s6 + $0x68] sm:$0xff] }
 0x7c6   :  { %v1817_v9 = vadd.f32 %v1816_v8, %v1797_v4  ;;  %v1777_v46 = vadd.f32 %v1776_v30, %v1757_v7  ;;  %v2146_v4 = vld [vmem:[%s8183_s6 + $0x60] sm:$0xff]  ;;  %v2145_v8 = vld [vmem:[%s8183_s6 + $0x58] sm:$0xff]  ;;  %v2143_v30 = vld [vmem:[%s8183_s6 + $0x48] sm:$0xff] }
 0x7c8   :  { %v4307_v57 = vmul.f32 -1.442695, %v1817_v9 }
 0x7ca   :  { %v4477_v53 = vpop.eup %4476  ;;  %4480 = vpow2.f32 %v4307_v57 }
 0x7cb   :  { %v4479_v6 = vpop.eup %4478  ;;  %v1822_v11 = vadd.f32 1.0, %v4477_v53 }
 0x7cc   :  { %v1841_v3 = vadd.f32 1.0, %v4479_v6 }
 0x7cd   :  { %4482 = vrcp.f32 %v1822_v11  ;;  %v1834_v35 = vand.u32 2147483648, %v1822_v11  ;;  %v1832_v60 = vand.u32 2147483647, %v1822_v11  ;;  %vm1828_vm4 = vweird.f32 %v1822_v11 }
 0x7ce   :  { %4484 = vrcp.f32 %v1841_v3  ;;  %v1853_v63 = vand.u32 2147483648, %v1841_v3  ;;  %v1851_v32 = vand.u32 2147483647, %v1841_v3  ;;  %vm1847_vm6 = vweird.f32 %v1841_v3 }
 0x7cf   :  { %v1835_v26 = vor.u32 1.1754944e-38, %v1834_v35  ;;  %vm1833_vm7 = vcmp.eq.f32.partialorder %v1832_v60, 8.507059e+37 }
 0x7d0   :  { %v4481_v36 = vpop.eup %4480  ;;  %v1854_v52 = vor.u32 1.1754944e-38, %v1853_v63  ;;  %vm1852_vm9 = vcmp.eq.f32.partialorder %v1851_v32, 8.507059e+37  ;;  %v2136_v32 = vld [vmem:[%s8183_s6 + $0x10] sm:$0xff] }
 0x7d1   :  { %v1861_v41 = vadd.f32 1.0, %v4481_v36 }
 0x7d3   :  { %v4483_v17 = vpop.eup %4482  ;;  %4486 = vrcp.f32 %v1861_v41  ;;  %v1873_v45 = vand.u32 2147483648, %v1861_v41  ;;  %vm1867_vm11 = vweird.f32 %v1861_v41  ;;  %v1871_v43 = vand.u32 2147483647, %v1861_v41 }
 0x7d4   :  { %v4485_v20 = vpop.eup %4484  ;;  %v1824_v21 = vmul.f32 %v4483_v17, %v1822_v11  ;;  %4488 = vtanh.f32 %v1777_v46  ;;  %vm1829_vm2 = vweird.f32 %v4483_v17  ;;  %v2144_v11 = vld [vmem:[%s8183_s6 + $0x50] sm:$0xff] }
 0x7d5   :  { %v1843_v24 = vmul.f32 %v4485_v20, %v1841_v3  ;;  %vm1848_vm3 = vweird.f32 %v4485_v20  ;;  %vm1830_vm5 = vmor %vm1828_vm4, %vm1829_vm2  ;;  %v1874_v18 = vor.u32 1.1754944e-38, %v1873_v45  ;;  %vm1872_vm13 = vcmp.eq.f32.partialorder %v1871_v43, 8.507059e+37 }
 0x7d6   :  { %v1825_v29 = vsub.f32 1.0, %v1824_v21  ;;  %vm1849_vm8 = vmor %vm1847_vm6, %vm1848_vm3 }
 0x7d7   :  { %v1844_v34 = vsub.f32 1.0, %v1843_v24 }
 0x7d8   :  { %v1826_v56 = vmul.f32 %v4483_v17, %v1825_v29  ;;  %v2139_v29 = vld [vmem:[%s8183_s6 + $0x28] sm:$0xff] }
 0x7d9   :  { %v4487_v28 = vpop.eup %4486  ;;  %v1845_v13 = vmul.f32 %v4485_v20, %v1844_v34 }
 0x7da   :  { %v1827_v22 = vadd.f32 %v4483_v17, %v1826_v56  ;;  %v1863_v0 = vmul.f32 %v4487_v28, %v1861_v41  ;;  %v4489_v33 = vpop.eup %4488  ;;  %vm1868_vm10 = vweird.f32 %v4487_v28 }
 0x7db   :  { %v1846_v25 = vadd.f32 %v4485_v20, %v1845_v13  ;;  %vm1869_vm12 = vmor %vm1867_vm11, %vm1868_vm10 }
 0x7dc   :  { %v1831_v27 = vsel %vm1830_vm5, %v4483_v17, %v1827_v22  ;;  %v1864_v51 = vsub.f32 1.0, %v1863_v0  ;;  %v2141_v17 = vld [vmem:[%s8183_s6 + $0x38] sm:$0xff]  ;;  %v2135_v22 = vld [vmem:[%s8183_s6 + $0x8] sm:$0xff] }
 0x7dd   :  { %v1836_v12 = vsel %vm1833_vm7, %v1835_v26, %v1831_v27  ;;  %v1850_v23 = vsel %vm1849_vm8, %v4485_v20, %v1846_v25  ;;  %v2140_v20 = vld [vmem:[%s8183_s6 + $0x30] sm:$0xff] }
 0x7de   :  { %v1855_v19 = vsel %vm1852_vm9, %v1854_v52, %v1850_v23  ;;  %v1878_v10 = vmul.f32 %v4489_v33, %v1836_v12  ;;  %v1865_v62 = vmul.f32 %v4487_v28, %v1864_v51  ;;  %v2134_v52 = vld [vmem:[%s8183_s6] sm:$0xff] }
 0x7df   :  { %v1877_v58 = vmul.f32 %v1855_v19, %v6515_v14 }
 0x7e0   :  { %v1866_v50 = vadd.f32 %v4487_v28, %v1865_v62 }
 0x7e1   :  { %v6623_v44 = vadd.f32 %v1878_v10, %v1877_v58  ;;  %v6699_v58 = vld [vmem:[#allocation5 + $0x1e0] sm:$0xff] }
 0x7e2   :  { %v1870_v31 = vsel %vm1869_vm12, %v4487_v28, %v1866_v50  ;;  %v2137_v28 = vld [vmem:[%s8183_s6 + $0x18] sm:$0xff]  ;;  %v6701_v50 = vld [vmem:[#allocation5 + $0x1c0] sm:$0xff] }
 0x7e3   :  { %4490 = vtanh.f32 %v6623_v44  ;;  %v1875_v49 = vsel %vm1872_vm13, %v1874_v18, %v1870_v31 }
 0x7e9   :  { %v4491_v61 = vpop.eup %4490 }
 0x7ea   :  { %v1881_v38 = vmul.f32 %v4491_v61, %v1875_v49 }
 0x7ec   :  { %1895 = vrot.lane.b32.xlu2 %v1881_v38, %s5048_s3  ;;  %1882 = vst.msk [vmem:[#allocation7 + $0x6] sm:$0x1] %vm416_vm14, %v1881_v38  ;;  %v1885_v14 = vrot.slane %v1881_v38, 1 }
 0x7ed   :  { %1883 = vst.msk [vmem:[#allocation7 + $0x1] sm:$0x1] %vm418_vm15, %v1881_v38  ;;  %v6708_v38 = vld [vmem:[#allocation5 + $0x1a0] sm:$0xff] }
 0x7ee   :  { %1887 = vst.msk [vmem:[#allocation7 + $0xe] sm:$0x1] %vm416_vm14, %v1885_v14 }
 0x7ef   :  { %1888 = vst.msk [vmem:[#allocation7 + $0x9] sm:$0x1] %vm418_vm15, %v1885_v14 }
 0x846   :  { %v1896_v42 = vpop.permute.xlu2 %1895 }
 0x847   :  { %4309 = vmatmul.msk.f32.vlgmr.msrb.gmra.mxu1 %vm179_vm1, %v1896_v42  ;;  %4310 = vmatmul.msk.f32.vlgmr.msrb.gmra.mxu0 %vm179_vm1, %v1896_v42  ;;  %v1899_v39 = vsel %vm179_vm1, %v1898_v54, %v1896_v42 }
 0x848   :  { %1918 = vmatmul.f32.vlgmr.msrb.gmra.mxu3 %v1899_v39  ;;  %1958 = vmatmul.f32.vlgmr.msrb.gmra.mxu2 %v1899_v39 }
 0x849   :  { %2154 = vmatpush.msrb.mxu3 %v2149_v59  ;;  %2174 = vmatpush.msrb.mxu1 %v2149_v59 }
 0x84a   :  { %2324 = vmatpush.msrb.mxu2 %v6699_v58 }
 0x84b   :  { %2155 = vmatpush.msrb.mxu3 %v2148_v55  ;;  %2175 = vmatpush.msrb.mxu1 %v2148_v55 }
 0x84c   :  { %2325 = vmatpush.msrb.mxu2 %v6701_v50 }
 0x84d   :  { %2156 = vmatpush.msrb.mxu3 %v2147_v1  ;;  %2176 = vmatpush.msrb.mxu1 %v2147_v1  ;;  %v6721_v1 = vld [vmem:[#allocation5 + $0x1c8] sm:$0xff] }
 0x84e   :  { %2326 = vmatpush.msrb.mxu2 %v6708_v38 }
 0x84f   :  { %1998 = vmatmul.f32.vlgmr.msra.gmra.mxu1 %v1899_v39  ;;  %2038 = vmatmul.f32.vlgmr.msra.gmra.mxu0 %v1899_v39  ;;  %v6716_v39 = vld [vmem:[#allocation5 + $0x1e8] sm:$0xff] }
 0x850   :  { %4311 = vmatmul.msk.f32.vlgmr.msra.gmra.mxu3 %vm179_vm1, %v1896_v42  ;;  %4312 = vmatmul.msk.f32.vlgmr.msra.gmra.mxu2 %vm179_vm1, %v1896_v42  ;;  %v6714_v42 = vld [vmem:[#allocation5 + $0x180] sm:$0xff] }
 0x851   :  { %2157 = vmatpush.msrb.mxu3 %v2146_v4  ;;  %2177 = vmatpush.msrb.mxu1 %v2146_v4 }
 0x852   :  { %2327 = vmatpush.msrb.mxu2 %v6714_v42 }
 0x853   :  { %2158 = vmatpush.msrb.mxu3 %v2145_v8  ;;  %2178 = vmatpush.msrb.mxu1 %v2145_v8 }
 0x855   :  { %2159 = vmatpush.msrb.mxu3 %v2144_v11  ;;  %2179 = vmatpush.msrb.mxu1 %v2144_v11 }
 0x857   :  { %2160 = vmatpush.msrb.mxu3 %v2143_v30  ;;  %2180 = vmatpush.msrb.mxu1 %v2143_v30  ;;  %v6733_v30 = vld [vmem:[#allocation5 + $0x188] sm:$0xff] }
 0x8c4   :  { %v1979_v40 = vpop.f32.mrf.mxu0  ;;  %v1939_v3 = vpop.f32.mrf.mxu1 }
 0x8cb   :  { %v1919_v9 = vpop.f32.mrf.mxu3  ;;  %v1959_v57 = vpop.f32.mrf.mxu2 }
 0x8cc   :  { %v1920_v53 = vadd.f32 %v1919_v9, %v9012_v48  ;;  %v1960_v6 = vadd.f32 %v1959_v57, %v9013_v47  ;;  %v2039_v7 = vpop.f32.mrf.mxu0  ;;  %v2142_v47 = vld [vmem:[%s8183_s6 + $0x40] sm:$0xff]  ;;  %v1999_v13 = vpop.f32.mrf.mxu1 }
 0x8cd   :  { %2161 = vmatpush.msrb.mxu3 %v2142_v47  ;;  %2181 = vmatpush.msrb.mxu1 %v2142_v47  ;;  %v2040_v46 = vadd.f32 %v2039_v7, %v9014_v2  ;;  %v2138_v2 = vld [vmem:[%s8183_s6 + $0x20] sm:$0xff]  ;;  %v2000_v25 = vadd.f32 %v1999_v13, %v9015_v15  ;;  %v6743_v47 = vld [vmem:[#allocation5 + $0x168] sm:$0xff]  ;;  %s4222_s6 = sshll.u32 %s5051_s25, 4  ;;  %s4223_s6 = int_to_ptr.vmem [resolvable:$true] %s4222_s6 }
 0x8ce   :  { %v1940_v16 = vadd.f32 %v1939_v3, %v1920_v53  ;;  %v1980_v36 = vadd.f32 %v1979_v40, %v1960_v6  ;;  %v6723_v57 = vld [vmem:[#allocation5 + $0x160] sm:$0xff]  ;;  %v6725_v53 = vld [vmem:[#allocation5 + $0x1a8] sm:$0xff] }
 0x8cf   :  { %2162 = vmatpush.msrb.mxu3 %v2141_v17  ;;  %2182 = vmatpush.msrb.mxu1 %v2141_v17  ;;  %v6737_v7 = vld [vmem:[#allocation5 + $0x260] sm:$0xff] }
 0x8d0   :  { %v4313_v41 = vmul.f32 -1.442695, %v1940_v16  ;;  %v4314_v48 = vmul.f32 -1.442695, %v1980_v36  ;;  %v6731_v36 = vld [vmem:[#allocation5 + $0x140] sm:$0xff]  ;;  %2328 = vmatpush.msrb.mxu2 %v6723_v57  ;;  %2356 = vmatpush.msrb.mxu0 %v6737_v7 }
 0x8d1   :  { %2163 = vmatpush.msrb.mxu3 %v2140_v20  ;;  %2183 = vmatpush.msrb.mxu1 %v2140_v20  ;;  %v6746_v17 = vld [vmem:[#allocation5 + $0x240] sm:$0xff] }
 0x8d2   :  { %4492 = vpow2.f32 %v4313_v41  ;;  %2329 = vmatpush.msrb.mxu2 %v6731_v36  ;;  %2357 = vmatpush.msrb.mxu0 %v6746_v17 }
 0x8d3   :  { %4494 = vpow2.f32 %v4314_v48  ;;  %v2059_v21 = vpop.f32.mrf.mxu2  ;;  %2164 = vmatpush.msrb.mxu3 %v2139_v29  ;;  %2184 = vmatpush.msrb.mxu1 %v2139_v29  ;;  %v2019_v26 = vpop.f32.mrf.mxu3  ;;  %v6741_v48 = vld [vmem:[#allocation5 + $0x120] sm:$0xff] }
 0x8d4   :  { %v2060_v24 = vadd.f32 %v2059_v21, %v2040_v46  ;;  %v2020_v33 = vadd.f32 %v2019_v26, %v2000_v25  ;;  %v6752_v46 = vld [vmem:[#allocation5 + $0x220] sm:$0xff]  ;;  %2330 = vmatpush.msrb.mxu2 %v6741_v48  ;;  %v6797_v26 = vld [vmem:[#allocation5 + $0x248] sm:$0xff] }
 0x8d5   :  { %2165 = vmatpush.msrb.mxu3 %v2138_v2  ;;  %2185 = vmatpush.msrb.mxu1 %v2138_v2  ;;  %v6756_v21 = vld [vmem:[#allocation5 + $0x100] sm:$0xff] }
 0x8d6   :  { %v4315_v34 = vmul.f32 -1.442695, %v2060_v24  ;;  %v6758_v24 = vld [vmem:[#allocation5 + $0x148] sm:$0xff]  ;;  %v6767_v2 = vld [vmem:[#allocation5 + $0x200] sm:$0xff]  ;;  %2358 = vmatpush.msrb.mxu0 %v6752_v46  ;;  %2331 = vmatpush.msrb.mxu2 %v6756_v21 }
 0x8d7   :  { %2166 = vmatpush.msrb.mxu3 %v2137_v28  ;;  %2186 = vmatpush.msrb.mxu1 %v2137_v28  ;;  %9016 = vst [vmem:[#allocation65_spill] sm:$0xff] %v6758_v24  ;;  %v6785_v28 = vld [vmem:[#allocation5 + $0x268] sm:$0xff] }
 0x8d8   :  { %v4493_v35 = vpop.eup %4492  ;;  %4496 = vpow2.f32 %v4315_v34  ;;  %v6764_v34 = vld [vmem:[#allocation5 + $0xe0] sm:$0xff]  ;;  %2359 = vmatpush.msrb.mxu0 %v6767_v2 }
 0x8d9   :  { %v4495_v56 = vpop.eup %4494  ;;  %v2065_v60 = vadd.f32 1.0, %v4493_v35  ;;  %2167 = vmatpush.msrb.mxu3 %v2136_v32  ;;  %2187 = vmatpush.msrb.mxu1 %v2136_v32  ;;  %v6787_v32 = vld [vmem:[#allocation5 + $0xc0] sm:$0xff]  ;;  %v6899_v35 = vld [vmem:[#allocation5 + $0x8] sm:$0xff] }
 0x8da   :  { %v6679_v63 = vadd.f32 1.0, %v4495_v56  ;;  %v6775_v56 = vld [vmem:[#allocation5 + $0x128] sm:$0xff]  ;;  %2332 = vmatpush.msrb.mxu2 %v6764_v34  ;;  %2396 = vmatpush.msra.mxu0 %v6785_v28  ;;  %9028 = vst [vmem:[#allocation75_spill] sm:$0xff] %v6899_v35 }
 0x8db   :  { %4498 = vrcp.f32 %v2065_v60  ;;  %2168 = vmatpush.msrb.mxu3 %v2135_v22  ;;  %2188 = vmatpush.msrb.mxu1 %v2135_v22  ;;  %v2077_v62 = vand.u32 2147483648, %v2065_v60  ;;  %v2075_v31 = vand.u32 2147483647, %v2065_v60  ;;  %vm2071_vm3 = vweird.f32 %v2065_v60  ;;  %9019 = vst [vmem:[#allocation40_spill] sm:$0xff] %v6775_v56  ;;  %v6789_v22 = vld [vmem:[#allocation5 + $0x108] sm:$0xff] }
 0x8dc   :  { %4500 = vrcp.f32 %v6679_v63  ;;  %v2096_v45 = vand.u32 2147483648, %v6679_v63  ;;  %v2094_v49 = vand.u32 2147483647, %v6679_v63  ;;  %vm2090_vm4 = vweird.f32 %v6679_v63  ;;  %9020 = vst [vmem:[#allocation61_spill] sm:$0xff] %v6789_v22  ;;  %2333 = vmatpush.msrb.mxu2 %v6787_v32  ;;  %2397 = vmatpush.msra.mxu0 %v6797_v26 }
 0x8dd   :  { %2169 = vmatpush.msrb.mxu3 %v2134_v52  ;;  %2189 = vmatpush.msrb.mxu1 %v2134_v52  ;;  %v2078_v37 = vor.u32 1.1754944e-38, %v2077_v62  ;;  %vm2076_vm6 = vcmp.eq.f32.partialorder %v2075_v31, 8.507059e+37  ;;  %v6799_v52 = vld [vmem:[#allocation5 + $0xa0] sm:$0xff]  ;;  %v6820_v62 = vld [vmem:[#allocation5 + $0xc8] sm:$0xff] }
 0x8de   :  { %v4497_v0 = vpop.eup %4496  ;;  %v2097_v55 = vor.u32 1.1754944e-38, %v2096_v45  ;;  %vm2095_vm8 = vcmp.eq.f32.partialorder %v2094_v49, 8.507059e+37  ;;  %2334 = vmatpush.msrb.mxu2 %v6799_v52  ;;  %9022 = vst [vmem:[#allocation71_spill] sm:$0xff] %v6820_v62  ;;  %v6822_v45 = vld [vmem:[#allocation5 + $0x208] sm:$0xff]  ;;  %v6842_v49 = vld [vmem:[#allocation5 + $0x20] sm:$0xff] }
 0x8df   :  { %v6692_v27 = vadd.f32 1.0, %v4497_v0  ;;  %2364 = vmatpush.msra.mxu3 %v6716_v39  ;;  %v6793_v0 = vld [vmem:[#allocation5 + $0x250] sm:$0xff]  ;;  %v6831_v31 = vld [vmem:[#allocation5 + $0xa8] sm:$0xff] }
 0x8e0   :  { %9023 = vst [vmem:[#allocation53_spill] sm:$0xff] %v6831_v31 }
 0x8e1   :  { %v4499_v51 = vpop.eup %4498  ;;  %4502 = vrcp.f32 %v6692_v27  ;;  %2365 = vmatpush.msra.mxu3 %v6721_v1  ;;  %v2116_v20 = vand.u32 2147483648, %v6692_v27  ;;  %vm2110_vm10 = vweird.f32 %v6692_v27  ;;  %v2114_v29 = vand.u32 2147483647, %v6692_v27 }
 0x8e2   :  { %v4501_v12 = vpop.eup %4500  ;;  %v2067_v23 = vmul.f32 %v4499_v51, %v2065_v60  ;;  %4504 = vtanh.f32 %v2020_v33  ;;  %vm2072_vm1 = vweird.f32 %v4499_v51  ;;  %v6778_v60 = vld [vmem:[#allocation5 + $0x270] sm:$0xff] }
 0x8e3   :  { %v2086_v19 = vmul.f32 %v4501_v12, %v6679_v63  ;;  %vm2091_vm2 = vweird.f32 %v4501_v12  ;;  %vm2073_vm5 = vmor %vm2071_vm3, %vm2072_vm1  ;;  %2366 = vmatpush.msra.mxu3 %v6725_v53  ;;  %v2117_v13 = vor.u32 1.1754944e-38, %v2116_v20  ;;  %2436 = vmatpush.msra.mxu1 %v6778_v60  ;;  %vm2115_vm12 = vcmp.eq.f32.partialorder %v2114_v29, 8.507059e+37  ;;  %v6892_v20 = vld [vmem:[#allocation5 + $0xd8] sm:$0xff] }
 0x8e4   :  { %v2068_v10 = vsub.f32 1.0, %v2067_v23  ;;  %vm2092_vm7 = vmor %vm2090_vm4, %vm2091_vm2  ;;  %v6809_v23 = vld [vmem:[#allocation5 + $0x228] sm:$0xff]  ;;  %v6895_v29 = vld [vmem:[#allocation5 + $0xb8] sm:$0xff] }
 0x8e5   :  { %v2087_v15 = vsub.f32 1.0, %v2086_v19  ;;  %2367 = vmatpush.msra.mxu3 %v6733_v30  ;;  %2437 = vmatpush.msra.mxu1 %v6793_v0  ;;  %v6811_v19 = vld [vmem:[#allocation5 + $0x80] sm:$0xff] }
 0x8e6   :  { %v2069_v43 = vmul.f32 %v4499_v51, %v2068_v10  ;;  %v6815_v10 = vld [vmem:[#allocation5 + $0x210] sm:$0xff]  ;;  %2398 = vmatpush.msra.mxu0 %v6809_v23  ;;  %2335 = vmatpush.msrb.mxu2 %v6811_v19 }
 0x8e7   :  { %v6705_v18 = vpop.eup %4502  ;;  %v2088_v61 = vmul.f32 %v4501_v12, %v2087_v15  ;;  %2368 = vmatpush.msra.mxu3 %v6743_v47 }
 0x8e8   :  { %v2070_v14 = vadd.f32 %v4499_v51, %v2069_v43  ;;  %v2106_v5 = vmul.f32 %v6705_v18, %v6692_v27  ;;  %v4505_v4 = vpop.eup %4504  ;;  %vm2111_vm9 = vweird.f32 %v6705_v18  ;;  %v6825_v43 = vld [vmem:[#allocation5 + $0x60] sm:$0xff]  ;;  %2399 = vmatpush.msra.mxu0 %v6822_v45 }
 0x8e9   :  { %v2089_v54 = vadd.f32 %v4501_v12, %v2088_v61  ;;  %vm6771_vm11 = vmor %vm2110_vm10, %vm2111_vm9  ;;  %2369 = vmatpush.msra.mxu3 %v6758_v24  ;;  %2336 = vmatpush.msrb.mxu2 %v6825_v43  ;;  %v6840_v61 = vld [vmem:[#allocation5 + $0x88] sm:$0xff]  ;;  %v6948_v24 = vld [vmem:[#allocation5 + $0x170] sm:$0xff]  ;;  %vm2590_vm10 = vcmask 57344  }
 0x8ea   :  { %v2074_v59 = vsel %vm2073_vm5, %v4499_v51, %v2070_v14  ;;  %v2107_v40 = vsub.f32 1.0, %v2106_v5  ;;  %v6803_v51 = vld [vmem:[#allocation5 + $0x230] sm:$0xff]  ;;  %9024 = vst [vmem:[#allocation72_spill] sm:$0xff] %v6840_v61  ;;  %v6846_v14 = vld [vmem:[#allocation5] sm:$0xff]  ;;  %v6849_v5 = vld [vmem:[#allocation5 + $0x68] sm:$0xff] }
 0x8eb   :  { %v2079_v8 = vsel %vm2076_vm6, %v2078_v37, %v2074_v59  ;;  %v2093_v9 = vsel %vm2092_vm7, %v4501_v12, %v2089_v54  ;;  %2370 = vmatpush.msra.mxu3 %v6775_v56  ;;  %v6807_v12 = vld [vmem:[#allocation5 + $0xe8] sm:$0xff]  ;;  %2438 = vmatpush.msra.mxu1 %v6803_v51  ;;  %9025 = vst [vmem:[#allocation45_spill] sm:$0xff] %v6849_v5  ;;  %v6854_v54 = vld [vmem:[#allocation5 + $0x1f8] sm:$0xff]  ;;  %v6944_v56 = vld [vmem:[#allocation5 + $0x190] sm:$0xff] }
 0x8ec   :  { %v2098_v6 = vsel %vm2095_vm8, %v2097_v55, %v2093_v9  ;;  %v2121_v11 = vmul.f32 %v4505_v4, %v2079_v8  ;;  %v2108_v3 = vmul.f32 %v6705_v18, %v2107_v40  ;;  %9021 = vst [vmem:[#allocation51_spill] sm:$0xff] %v6807_v12  ;;  %v6857_v59 = vld [vmem:[#allocation5 + $0x48] sm:$0xff]  ;;  %v6862_v40 = vld [vmem:[#allocation5 + $0x1d8] sm:$0xff] }
 0x8ed   :  { %v2120_v16 = vmul.f32 %v2098_v6, %v6623_v44  ;;  %2371 = vmatpush.msra.mxu3 %v6789_v22  ;;  %2439 = vmatpush.msra.mxu1 %v6815_v10  ;;  %9026 = vst [vmem:[#allocation73_spill] sm:$0xff] %v6857_v59  ;;  %v6867_v4 = vld [vmem:[#allocation5 + $0x28] sm:$0xff]  ;;  %v6869_v8 = vld [vmem:[#allocation5 + $0x1b8] sm:$0xff]  ;;  %v6940_v22 = vld [vmem:[#allocation5 + $0x1b0] sm:$0xff] }
 0x8ee   :  { %v2109_v44 = vadd.f32 %v6705_v18, %v2108_v3  ;;  %9027 = vst [vmem:[#allocation74_spill] sm:$0xff] %v6867_v4  ;;  %v6873_v9 = vld [vmem:[#allocation5 + $0x198] sm:$0xff] }
 0x8ef   :  { %v6739_v41 = vadd.f32 %v2121_v11, %v2120_v16  ;;  %2372 = vmatpush.msra.mxu3 %v6807_v12  ;;  %v6877_v6 = vld [vmem:[#allocation5 + $0x178] sm:$0xff]  ;;  %v6937_v12 = vld [vmem:[#allocation5 + $0x1d0] sm:$0xff] }
 0x8f0   :  { %v2113_v63 = vsel %vm6771_vm11, %v6705_v18, %v2109_v44  ;;  %v6835_v18 = vld [vmem:[#allocation5 + $0x40] sm:$0xff]  ;;  %v6880_v11 = vld [vmem:[#allocation5 + $0x158] sm:$0xff]  ;;  %vm2602_vm11 = vcmask 64512  }
 0x8f1   :  { %4506 = vtanh.f32 %v6739_v41  ;;  %v2118_v27 = vsel %vm2115_vm12, %v2117_v13, %v2113_v63  ;;  %2373 = vmatpush.msra.mxu3 %v6820_v62  ;;  %2337 = vmatpush.msrb.mxu2 %v6835_v18  ;;  %v6883_v3 = vld [vmem:[#allocation5 + $0x138] sm:$0xff]  ;;  %vm2649_vm12 = vcmask 1040384  }
 0x8f2   :  { %v6886_v16 = vld [vmem:[#allocation5 + $0x118] sm:$0xff] }
 0x8f3   :  { %2374 = vmatpush.msra.mxu3 %v6831_v31  ;;  %2338 = vmatpush.msrb.mxu2 %v6842_v49  ;;  %v6889_v44 = vld [vmem:[#allocation5 + $0xf8] sm:$0xff] }
 0x8f4   :  { %v6901_v63 = vld [vmem:[#allocation5 + $0x98] sm:$0xff] }
 0x8f5   :  { %2375 = vmatpush.msra.mxu3 %v6840_v61  ;;  %2339 = vmatpush.msrb.mxu2 %v6846_v14  ;;  %v6905_v13 = vld [vmem:[#allocation5 + $0x278] sm:$0xff]  ;;  %v6932_v61 = vld [vmem:[#allocation5 + $0x1f0] sm:$0xff] }
 0x8f7   :  { %v4507_v25 = vpop.eup %4506  ;;  %2376 = vmatpush.msra.mxu3 %v6849_v5  ;;  %2444 = vmatpush.msra.mxu2 %v6854_v54  ;;  %v2308_v5 = vld [vmem:[%s8178_s1] sm:$0x3] }
 0x8f8   :  { %v2124_v33 = vmul.f32 %v4507_v25, %v2118_v27  ;;  %v6908_v25 = vld [vmem:[#allocation5 + $0x78] sm:$0xff] }
 0x8f9   :  { %2377 = vmatpush.msra.mxu3 %v6857_v59  ;;  %2445 = vmatpush.msra.mxu2 %v6862_v40  ;;  %v6911_v27 = vld [vmem:[#allocation5 + $0x258] sm:$0xff] }
 0x8fa   :  { %2309 = vrot.lane.b32.xlu0 %v2124_v33, %s5045_s17  ;;  %2125 = vst.msk [vmem:[#allocation7 + $0x7] sm:$0x1] %vm416_vm14, %v2124_v33  ;;  %v2128_v15 = vrot.slane %v2124_v33, 1  ;;  %v6926_v59 = vld [vmem:[#allocation5 + $0x18] sm:$0xff] }
 0x8fb   :  { %2126 = vst.msk [vmem:[#allocation7] sm:$0x1] %vm418_vm15, %v2124_v33  ;;  %2378 = vmatpush.msra.mxu3 %v6867_v4  ;;  %2446 = vmatpush.msra.mxu2 %v6869_v8  ;;  %v6914_v33 = vld [vmem:[#allocation5 + $0x58] sm:$0xff] }
 0x8fc   :  { %2130 = vst.msk [vmem:[#allocation7 + $0xf] sm:$0x1] %vm416_vm14, %v2128_v15  ;;  %v6923_v4 = vld [vmem:[#allocation5 + $0x218] sm:$0xff] }
 0x8fd   :  { %2131 = vst.msk [vmem:[#allocation7 + $0x8] sm:$0x1] %vm418_vm15, %v2128_v15  ;;  %2447 = vmatpush.msra.mxu2 %v6873_v9  ;;  %2379 = vmatpush.msra.mxu3 %v6899_v35  ;;  %v6917_v15 = vld [vmem:[#allocation5 + $0x238] sm:$0xff] }
 0x8fe   :  { %v6920_v35 = vld [vmem:[#allocation5 + $0x38] sm:$0xff] }
 0x8ff   :  { %2448 = vmatpush.msra.mxu2 %v6877_v6 }
 0x901   :  { %2449 = vmatpush.msra.mxu2 %v6880_v11 }
 0x902   :  { %v6851_v37 = vld [vmem:[#allocation7] sm:$0xff] }
 0x903   :  { %2170 = vmatmul.f32.vlgmr.msrb.gmra.mxu3 %v6851_v37  ;;  %2450 = vmatpush.msra.mxu2 %v6883_v3 }
 0x904   :  { %v6859_v55 = vld [vmem:[#allocation7 + $0x8] sm:$0xff] }
 0x905   :  { %2190 = vmatmul.f32.vlgmr.msrb.gmra.mxu1 %v6859_v55  ;;  %2451 = vmatpush.msra.mxu2 %v6886_v16 }
 0x906   :  { %2476 = vmatpush.msrb.mxu1 %v6905_v13 }
 0x907   :  { %2452 = vmatpush.msra.mxu2 %v6889_v44 }
 0x908   :  { %2477 = vmatpush.msrb.mxu1 %v6911_v27 }
 0x909   :  { %2453 = vmatpush.msra.mxu2 %v6892_v20 }
 0x90a   :  { %2478 = vmatpush.msrb.mxu1 %v6917_v15 }
 0x90b   :  { %2454 = vmatpush.msra.mxu2 %v6895_v29 }
 0x90c   :  { %2479 = vmatpush.msrb.mxu1 %v6923_v4 }
 0x90d   :  { %2455 = vmatpush.msra.mxu2 %v6901_v63 }
 0x90f   :  { %2456 = vmatpush.msra.mxu2 %v6908_v25 }
 0x911   :  { %2457 = vmatpush.msra.mxu2 %v6914_v33 }
 0x913   :  { %2458 = vmatpush.msra.mxu2 %v6920_v35 }
 0x915   :  { %2459 = vmatpush.msra.mxu2 %v6926_v59 }
 0x96c   :  { %v2310_v31 = vpop.permute.xlu0 %2309 }
 0x96d   :  { %4316 = vmatmul.msk.f32.vlgmr.msrb.gmra.mxu0 %vm177_vm0, %v2310_v31  ;;  %4318 = vmatmul.msk.f32.vlgmr.msra.gmra.mxu1 %vm177_vm0, %v2310_v31  ;;  %v2312_v62 = vsel %vm177_vm0, %v2308_v5, %v2310_v31  ;;  %v6954_v5 = vld [vmem:[#allocation5 + $0x150] sm:$0xff] }
 0x96e   :  { %2404 = vmatpush.msrb.mxu0 %v6932_v61  ;;  %2340 = vmatmul.f32.vlgmr.msrb.gmra.mxu2 %v2312_v62  ;;  %9029 = vst [vmem:[#allocation54_spill] sm:$0xff] %v6954_v5 }
 0x96f   :  { %2380 = vmatmul.f32.vlgmr.msra.gmra.mxu3 %v2312_v62  ;;  %2703 = vmatpush.msrb.mxu2 %v6699_v58  ;;  %v6957_v58 = vld [vmem:[#allocation5 + $0x130] sm:$0xff] }
 0x970   :  { %2405 = vmatpush.msrb.mxu0 %v6937_v12  ;;  %9030 = vst [vmem:[#allocation76_spill] sm:$0xff] %v6957_v58 }
 0x971   :  { %2704 = vmatpush.msrb.mxu2 %v6701_v50  ;;  %v6961_v50 = vld [vmem:[#allocation5 + $0x110] sm:$0xff] }
 0x972   :  { %2406 = vmatpush.msrb.mxu0 %v6940_v22  ;;  %9031 = vst [vmem:[#allocation30_spill] sm:$0xff] %v6961_v50 }
 0x973   :  { %2705 = vmatpush.msrb.mxu2 %v6708_v38  ;;  %v6965_v38 = vld [vmem:[#allocation5 + $0xf0] sm:$0xff] }
 0x974   :  { %2407 = vmatpush.msrb.mxu0 %v6944_v56  ;;  %9032 = vst [vmem:[#allocation34_spill] sm:$0xff] %v6965_v38 }
 0x975   :  { %4317 = vmatmul.msk.f32.vlgmr.msra.gmra.mxu0 %vm177_vm0, %v2310_v31  ;;  %4319 = vmatmul.msk.f32.vlgmr.msrb.gmra.mxu1 %vm177_vm0, %v2310_v31  ;;  %v6969_v31 = vld [vmem:[#allocation5 + $0xd0] sm:$0xff] }
 0x976   :  { %2408 = vmatpush.msrb.mxu0 %v6948_v24  ;;  %2460 = vmatmul.f32.vlgmr.msra.gmra.mxu2 %v2312_v62  ;;  %9033 = vst [vmem:[#allocation38_spill] sm:$0xff] %v6969_v31 }
 0x977   :  { %2706 = vmatpush.msrb.mxu2 %v6714_v42  ;;  %v4378_v42 = vld [vmem:[%s8184_s7] ss:$0 sm:$0xff] }
 0x978   :  { %2409 = vmatpush.msrb.mxu0 %v6954_v5  ;;  %v6976_v5 = vld [vmem:[#allocation5 + $0xb0] sm:$0xff] }
 0x979   :  { %2707 = vmatpush.msrb.mxu2 %v6723_v57  ;;  %9034 = vst [vmem:[#allocation42_spill] sm:$0xff] %v6976_v5  ;;  %v6980_v57 = vld [vmem:[#allocation5 + $0x90] sm:$0xff] }
 0x97a   :  { %2410 = vmatpush.msrb.mxu0 %v6957_v58  ;;  %9035 = vst [vmem:[#allocation55_spill] sm:$0xff] %v6980_v57 }
 0x97b   :  { %2708 = vmatpush.msrb.mxu2 %v6731_v36 }
 0x97c   :  { %2411 = vmatpush.msrb.mxu0 %v6961_v50 }
 0x97d   :  { %2709 = vmatpush.msrb.mxu2 %v6741_v48 }
 0x97e   :  { %2412 = vmatpush.msrb.mxu0 %v6965_v38  ;;  %v6986_v38 = vld [vmem:[#allocation5 + $0x70] sm:$0xff] }
 0x97f   :  { %2710 = vmatpush.msrb.mxu2 %v6756_v21  ;;  %9037 = vst [vmem:[#allocation15_spill] sm:$0xff] %v6986_v38  ;;  %v6991_v21 = vld [vmem:[#allocation5 + $0x50] sm:$0xff] }
 0x980   :  { %2413 = vmatpush.msrb.mxu0 %v6969_v31  ;;  %9038 = vst [vmem:[#allocation17_spill] sm:$0xff] %v6991_v21 }
 0x981   :  { %2711 = vmatpush.msrb.mxu2 %v6764_v34 }
 0x982   :  { %v2191_v36 = vpop.f32.mrf.mxu1  ;;  %2414 = vmatpush.msrb.mxu0 %v6976_v5 }
 0x983   :  { %v6984_v48 = vadd.f32 %v4378_v42, %v2191_v36  ;;  %2712 = vmatpush.msrb.mxu2 %v6787_v32  ;;  %v6998_v36 = vld [vmem:[#allocation5 + $0x30] sm:$0xff] }
 0x984   :  { %2415 = vmatpush.msrb.mxu0 %v6980_v57  ;;  %9040 = vst [vmem:[#allocation26_spill] sm:$0xff] %v6998_v36  ;;  %v7003_v32 = vld [vmem:[#allocation5 + $0x10] sm:$0xff] }
 0x985   :  { %9036 = vst [vmem:[#allocation58_spill] sm:$0xff] %v6984_v48  ;;  %2585 = vmatpush.xpose.msrb.mxu3 %v6984_v48  ;;  %2713 = vmatpush.msrb.mxu2 %v6799_v52  ;;  %v7019_v52 = vld [vmem:[%s8185_s8 + $0x78] sm:$0xff] }
 0x986   :  { %v2171_v31 = vpop.f32.mrf.mxu3  ;;  %2416 = vmatpush.msrb.mxu0 %v6986_v38  ;;  %9041 = vst [vmem:[#allocation22_spill] sm:$0xff] %v7003_v32 }
 0x987   :  { %v6996_v34 = vadd.f32 %v4378_v42, %v2171_v31  ;;  %2714 = vmatpush.msrb.mxu2 %v6811_v19  ;;  %9042 = vst [vmem:[#allocation16_spill] sm:$0xff] %v7019_v52  ;;  %v7025_v19 = vld [vmem:[%s8185_s8 + $0x70] sm:$0xff] }
 0x988   :  { %2417 = vmatpush.msrb.mxu0 %v6991_v21  ;;  %9043 = vst [vmem:[#allocation63_spill] sm:$0xff] %v7025_v19 }
 0x989   :  { %2641 = vmatpush.msra.mxu3 %v6859_v55  ;;  %9039 = vst [vmem:[#allocation62_spill] sm:$0xff] %v6996_v34  ;;  %2565 = vmatpush.xpose.msra.mxu1 %v6996_v34 }
 0x98a   :  { %2715 = vmatpush.msrb.mxu2 %v6825_v43  ;;  %2418 = vmatpush.msrb.mxu0 %v6998_v36  ;;  %v7052_v43 = vld [vmem:[%s8185_s8 + $0x50] sm:$0xff] }
 0x98b   :  { %9047 = vst [vmem:[#allocation64_spill] sm:$0xff] %v7052_v43  ;;  %v7084_v36 = vld [vmem:[%s8185_s8 + $0x30] sm:$0xff] }
 0x98c   :  { %2716 = vmatpush.msrb.mxu2 %v6835_v18  ;;  %2419 = vmatpush.msrb.mxu0 %v7003_v32  ;;  %9053 = vst [vmem:[#allocation35_spill] sm:$0xff] %v7084_v36 }
 0x98d   :  { %2621 = vmatpush.msrb.mxu1 %v6851_v37  ;;  %2420 = vmatmul.f32.vlgmr.msrb.gmra.mxu0 %v2312_v62  ;;  %v7046_v62 = vld [vmem:[%s8185_s8 + $0x58] sm:$0xff] }
 0x98e   :  { %2717 = vmatpush.msrb.mxu2 %v6842_v49  ;;  %2654 = vmatpush.msra.mxu0 %v7019_v52  ;;  %9046 = vst [vmem:[#allocation19_spill] sm:$0xff] %v7046_v62 }
 0x990   :  { %2718 = vmatpush.msrb.mxu2 %v6846_v14  ;;  %2655 = vmatpush.msra.mxu0 %v7025_v19  ;;  %v7062_v14 = vld [vmem:[%s8185_s8 + $0x48] sm:$0xff] }
 0x991   :  { %9050 = vst [vmem:[#allocation21_spill] sm:$0xff] %v7062_v14 }
 0x992   :  { %2815 = vmatpush.msra.mxu2 %v6778_v60  ;;  %v7031_v60 = vld [vmem:[%s8185_s8 + $0x68] sm:$0xff] }
 0x993   :  { %9044 = vst [vmem:[#allocation29_spill] sm:$0xff] %v7031_v60  ;;  %2656 = vmatpush.msra.mxu0 %v7031_v60 }
 0x994   :  { %2816 = vmatpush.msra.mxu2 %v6793_v0  ;;  %v7037_v0 = vld [vmem:[%s8185_s8 + $0x60] sm:$0xff] }
 0x995   :  { %9045 = vst [vmem:[#allocation25_spill] sm:$0xff] %v7037_v0  ;;  %2657 = vmatpush.msra.mxu0 %v7037_v0 }
 0x996   :  { %2817 = vmatpush.msra.mxu2 %v6803_v51 }
 0x997   :  { %2658 = vmatpush.msra.mxu0 %v7046_v62  ;;  %v7070_v62 = vld [vmem:[%s8185_s8 + $0x40] sm:$0xff] }
 0x998   :  { %2818 = vmatpush.msra.mxu2 %v6815_v10  ;;  %v2274_v10 = vld [vmem:[%s8182_s5] sm:$0xf]  ;;  %9051 = vst [vmem:[#allocation66_spill] sm:$0xff] %v7070_v62  ;;  %s4200_s5 = sshll.u32 %s8187_s10, 4  ;;  %s4201_s5 = int_to_ptr.hbm [resolvable:$true] %s4200_s5 }
 0x999   :  { %v7054_v18 = vperm.slane %v2274_v10, 0  ;;  %2659 = vmatpush.msra.mxu0 %v7052_v43  ;;  %v7057_v49 = vperm.slane %v2274_v10, 1  ;;  %4203 = dma.vmem_to_hbm [thread:$0]  %s4199_s24, 256, %s4201_s5, [#allocation4]  }
 0x99b   :  { %9048 = vst [vmem:[#allocation33_spill] sm:$0xff] %v7054_v18  ;;  %2660 = vmatpush.msra.mxu0 %v7062_v14  ;;  %v7078_v14 = vld [vmem:[%s8185_s8 + $0x38] sm:$0xff] }
 0x99c   :  { %9049 = vst [vmem:[#allocation31_spill] sm:$0xff] %v7057_v49 }
 0x99d   :  { %2661 = vmatpush.msra.mxu0 %v7070_v62  ;;  %9052 = vst [vmem:[#allocation37_spill] sm:$0xff] %v7078_v14  ;;  %v7092_v62 = vld [vmem:[%s8185_s8 + $0x28] sm:$0xff] }
 0x99e   :  { %9055 = vst [vmem:[#allocation67_spill] sm:$0xff] %v7092_v62 }
 0x99f   :  { %2662 = vmatpush.msra.mxu0 %v7078_v14  ;;  %v7122_v14 = vld [vmem:[%s8185_s8] sm:$0xff] }
 0x9a0   :  { %9060 = vst [vmem:[#allocation43_spill] sm:$0xff] %v7122_v14 }
 0x9a1   :  { %2663 = vmatpush.msra.mxu0 %v7084_v36 }
 0x9a3   :  { %2664 = vmatpush.msra.mxu0 %v7092_v62 }
 0x9ea   :  { %v2361_v51 = vpop.f32.mrf.mxu0  ;;  %v7065_v31 = vpop.f32.mrf.mxu1 }
 0x9f1   :  { %v2341_v42 = vpop.f32.mrf.mxu2 }
 0x9f2   :  { %v2342_v0 = vadd.f32 %v2341_v42, %v7054_v18  ;;  %v2381_v43 = vpop.f32.mrf.mxu3  ;;  %v2401_v60 = vpop.f32.mrf.mxu0  ;;  %v7086_v18 = vperm.slane %v2274_v10, 3 }
 0x9f3   :  { %v2382_v19 = vadd.f32 %v2381_v43, %v7057_v49 }
 0x9f4   :  { %v2362_v52 = vadd.f32 %v2361_v51, %v2342_v0  ;;  %9054 = vst [vmem:[#allocation24_spill] sm:$0xff] %v7086_v18  ;;  %v2481_v0 = vpop.f32.mrf.mxu1  ;;  %v7110_v51 = vld [vmem:[%s8185_s8 + $0x10] sm:$0xff] }
 0x9f5   :  { %v2402_v32 = vadd.f32 %v2401_v60, %v2382_v19  ;;  %v7098_v60 = vld [vmem:[%s8185_s8 + $0x20] sm:$0xff]  ;;  %9058 = vst [vmem:[#allocation56_spill] sm:$0xff] %v7110_v51 }
 0x9f6   :  { %v4320_v42 = vmul.f32 -1.442695, %v2362_v52  ;;  %9056 = vst [vmem:[#allocation41_spill] sm:$0xff] %v7098_v60  ;;  %2665 = vmatpush.msra.mxu0 %v7098_v60 }
 0x9f7   :  { %v4321_v43 = vmul.f32 -1.442695, %v2402_v32  ;;  %v7105_v32 = vld [vmem:[%s8185_s8 + $0x18] sm:$0xff] }
 0x9f8   :  { %4508 = vpow2.f32 %v4320_v42  ;;  %9057 = vst [vmem:[#allocation39_spill] sm:$0xff] %v7105_v32  ;;  %2666 = vmatpush.msra.mxu0 %v7105_v32 }
 0x9f9   :  { %4510 = vpow2.f32 %v4321_v43  ;;  %v2461_v19 = vpop.f32.mrf.mxu2  ;;  %v7116_v43 = vld [vmem:[%s8185_s8 + $0x8] sm:$0xff] }
 0x9fa   :  { %v2462_v52 = vadd.f32 %v2461_v19, %v7086_v18  ;;  %9059 = vst [vmem:[#allocation28_spill] sm:$0xff] %v7116_v43  ;;  %2667 = vmatpush.msra.mxu0 %v7110_v51 }
 0x9fc   :  { %v2482_v42 = vadd.f32 %v2481_v0, %v2462_v52  ;;  %2668 = vmatpush.msra.mxu0 %v7116_v43 }
 0x9fe   :  { %v4509_v19 = vpop.eup %4508  ;;  %v4322_v60 = vmul.f32 -1.442695, %v2482_v42  ;;  %2669 = vmatpush.msra.mxu0 %v7122_v14 }
 0x9ff   :  { %v4511_v62 = vpop.eup %4510  ;;  %v2487_v36 = vadd.f32 1.0, %v4509_v19  ;;  %v7128_v19 = vperm.slane %v2274_v10, 2 }
 0xa00   :  { %v2506_v18 = vadd.f32 1.0, %v4511_v62  ;;  %4512 = vpow2.f32 %v4322_v60  ;;  %2775 = vmatpush.msrb.mxu0 %v6785_v28 }
 0xa01   :  { %4514 = vrcp.f32 %v2487_v36  ;;  %9061 = vst [vmem:[#allocation44_spill] sm:$0xff] %v7128_v19  ;;  %v2499_v5 = vand.u32 2147483648, %v2487_v36  ;;  %vm2493_vm2 = vweird.f32 %v2487_v36 }
 0xa02   :  { %4516 = vrcp.f32 %v2506_v18  ;;  %2776 = vmatpush.msrb.mxu0 %v6797_v26  ;;  %v2518_v21 = vand.u32 2147483648, %v2506_v18  ;;  %vm2512_vm13 = vweird.f32 %v2506_v18 }
 0xa04   :  { %2777 = vmatpush.msrb.mxu0 %v6809_v23 }
 0xa06   :  { %v4513_v52 = vpop.eup %4512  ;;  %2778 = vmatpush.msrb.mxu0 %v6822_v45 }
 0xa07   :  { %v4515_v0 = vpop.eup %4514  ;;  %v2526_v42 = vadd.f32 1.0, %v4513_v52  ;;  %v2516_v52 = vand.u32 2147483647, %v2506_v18 }
 0xa08   :  { %v4517_v51 = vpop.eup %4516  ;;  %v2489_v62 = vmul.f32 %v4515_v0, %v2487_v36  ;;  %vm2494_vm15 = vweird.f32 %v4515_v0 }
 0xa09   :  { %v2508_v60 = vmul.f32 %v4517_v51, %v2506_v18  ;;  %4518 = vrcp.f32 %v2526_v42  ;;  %vm2513_vm14 = vweird.f32 %v4517_v51  ;;  %vm2495_vm3 = vmor %vm2493_vm2, %vm2494_vm15  ;;  %vm2517_vm4 = vcmp.eq.f32.partialorder %v2516_v52, 8.507059e+37  ;;  %v7266_v52 = vld [vmem:[%s8185_s8 + $0xb8] sm:$0xff] }
 0xa0a   :  { %v2490_v43 = vsub.f32 1.0, %v2489_v62  ;;  %v2421_v32 = vpop.f32.mrf.mxu0  ;;  %vm2514_vm1 = vmor %vm2512_vm13, %vm2513_vm14  ;;  %v2497_v62 = vand.u32 2147483647, %v2487_v36  ;;  %vm2532_vm7 = vweird.f32 %v2526_v42 }
 0xa0b   :  { %v2509_v14 = vsub.f32 1.0, %v2508_v60  ;;  %v2422_v28 = vadd.f32 %v2421_v32, %v7128_v19  ;;  %v2519_v60 = vor.u32 1.1754944e-38, %v2518_v21  ;;  %v2500_v19 = vor.u32 1.1754944e-38, %v2499_v5 }
 0xa0c   :  { %v2491_v49 = vmul.f32 %v4515_v0, %v2490_v43  ;;  %vm2498_vm5 = vcmp.eq.f32.partialorder %v2497_v62, 8.507059e+37  ;;  %v2538_v21 = vand.u32 2147483648, %v2526_v42  ;;  %v7287_v62 = vld [vmem:[%s8185_s8 + $0xa0] sm:$0xff] }
 0xa0d   :  { %v2510_v26 = vmul.f32 %v4517_v51, %v2509_v14  ;;  %v2442_v10 = vadd.f32 %v7065_v31, %v2422_v28 }
 0xa0e   :  { %v2492_v38 = vadd.f32 %v4515_v0, %v2491_v49  ;;  %v2539_v5 = vor.u32 1.1754944e-38, %v2538_v21  ;;  %v9079_v21 = vld [vmem:[#allocation55_spill] sm:$0xff] }
 0xa0f   :  { %v4519_v23 = vpop.eup %4518  ;;  %v2511_v57 = vadd.f32 %v4517_v51, %v2510_v26  ;;  %4520 = vtanh.f32 %v2442_v10 }
 0xa10   :  { %v2528_v45 = vmul.f32 %v4519_v23, %v2526_v42  ;;  %v2496_v43 = vsel %vm2495_vm3, %v4515_v0, %v2492_v38  ;;  %vm2533_vm6 = vweird.f32 %v4519_v23 }
 0xa11   :  { %v2515_v32 = vsel %vm2514_vm1, %v4517_v51, %v2511_v57  ;;  %v2501_v28 = vsel %vm2498_vm5, %v2500_v19, %v2496_v43  ;;  %v2536_v57 = vand.u32 2147483647, %v2526_v42  ;;  %vm2534_vm8 = vmor %vm2532_vm7, %vm2533_vm6  ;;  %v7215_v42 = vld [vmem:[%s8185_s8 + $0xf0] sm:$0xff]  ;;  %v7222_v19 = vld [vmem:[%s8185_s8 + $0xe8] sm:$0xff] }
 0xa12   :  { %v2529_v14 = vsub.f32 1.0, %v2528_v45  ;;  %v2520_v31 = vsel %vm2517_vm4, %v2519_v60, %v2515_v32  ;;  %v7280_v45 = vld [vmem:[%s8185_s8 + $0xa8] sm:$0xff]  ;;  %v7294_v60 = vld [vmem:[%s8185_s8 + $0x98] sm:$0xff]  ;;  %v7301_v32 = vld [vmem:[%s8185_s8 + $0x90] sm:$0xff] }
 0xa13   :  { %v2542_v18 = vmul.f32 %v2520_v31, %v6739_v41  ;;  %vm2537_vm9 = vcmp.eq.f32.partialorder %v2536_v57, 8.507059e+37  ;;  %v7315_v43 = vld [vmem:[%s8185_s8 + $0x80] sm:$0xff]  ;;  %v9073_v31 = vld [vmem:[#allocation54_spill] sm:$0xff]  ;;  %v9080_v57 = vld [vmem:[#allocation15_spill] sm:$0xff] }
 0xa14   :  { %v2530_v50 = vmul.f32 %v4519_v23, %v2529_v14  ;;  %v7308_v14 = vld [vmem:[%s8185_s8 + $0x88] sm:$0xff] }
 0xa15   :  { %v4521_v49 = vpop.eup %4520 }
 0xa16   :  { %v2543_v26 = vmul.f32 %v4521_v49, %v2501_v28  ;;  %v2531_v58 = vadd.f32 %v4519_v23, %v2530_v50  ;;  %v7210_v50 = vld [vmem:[%s8185_s8 + $0xf8] sm:$0xff]  ;;  %v9075_v28 = vld [vmem:[#allocation30_spill] sm:$0xff] }
 0xa17   :  { %v9074_v49 = vld [vmem:[#allocation76_spill] sm:$0xff] }
 0xa18   :  { %v7135_v10 = vadd.f32 %v2543_v26, %v2542_v18  ;;  %v2535_v38 = vsel %vm2534_vm8, %v4519_v23, %v2531_v58  ;;  %v7273_v23 = vld [vmem:[%s8185_s8 + $0xb0] sm:$0xff] }
 0xa19   :  { %v2540_v51 = vsel %vm2537_vm9, %v2539_v5, %v2535_v38  ;;  %v9076_v18 = vld [vmem:[#allocation34_spill] sm:$0xff]  ;;  %v9081_v38 = vld [vmem:[#allocation17_spill] sm:$0xff] }
 0xa1a   :  { %4522 = vtanh.f32 %v7135_v10  ;;  %v9077_v26 = vld [vmem:[#allocation38_spill] sm:$0xff] }
 0xa1b   :  { %v9082_v5 = vld [vmem:[#allocation26_spill] sm:$0xff] }
 0xa20   :  { %v4523_v36 = vpop.eup %4522 }
 0xa21   :  { %v2546_v0 = vmul.f32 %v4523_v36, %v2540_v51  ;;  %v9083_v36 = vld [vmem:[#allocation22_spill] sm:$0xff] }
 0xa23   :  { %2697 = vrot.lane.b32.xlu0 %v2546_v0, %s5045_s17  ;;  %2566 = vmatmul.f32.vlgmr.msra.gmra.mxu1 %v2546_v0  ;;  %v2548_v41 = vrot.slane %v2546_v0, 1 }
 0xa24   :  { %2670 = vmatmul.f32.vlgmr.msra.gmra.mxu0 %v2546_v0  ;;  %2674 = vmatpush.msra.mxu1 %v7210_v50 }
 0xa25   :  { %2586 = vmatmul.f32.vlgmr.msrb.gmra.mxu3 %v2548_v41  ;;  %2823 = vmatpush.msra.mxu0 %v6854_v54  ;;  %v4325_v54 = vld [vmem:[%s8178_s1 + $0x2] sm:$0x3] }
 0xa26   :  { %2735 = vmatpush.msrb.mxu3 %v6737_v7  ;;  %2675 = vmatpush.msra.mxu1 %v7215_v42 }
 0xa27   :  { %2824 = vmatpush.msra.mxu0 %v6862_v40 }
 0xa28   :  { %2736 = vmatpush.msrb.mxu3 %v6746_v17  ;;  %2676 = vmatpush.msra.mxu1 %v7222_v19 }
 0xa29   :  { %2825 = vmatpush.msra.mxu0 %v6869_v8 }
 0xa2a   :  { %2737 = vmatpush.msrb.mxu3 %v6752_v46 }
 0xa2b   :  { %2826 = vmatpush.msra.mxu0 %v6873_v9  ;;  %v9064_v9 = vld [vmem:[#allocation61_spill] sm:$0xff] }
 0xa2c   :  { %2738 = vmatpush.msrb.mxu3 %v6767_v2 }
 0xa2d   :  { %2827 = vmatpush.msra.mxu0 %v6877_v6  ;;  %v9065_v6 = vld [vmem:[#allocation51_spill] sm:$0xff] }
 0xa2f   :  { %2828 = vmatpush.msra.mxu0 %v6880_v11  ;;  %v9066_v11 = vld [vmem:[#allocation71_spill] sm:$0xff] }
 0xa31   :  { %2829 = vmatpush.msra.mxu0 %v6883_v3  ;;  %v9067_v3 = vld [vmem:[#allocation53_spill] sm:$0xff] }
 0xa33   :  { %2830 = vmatpush.msra.mxu0 %v6886_v16  ;;  %v9068_v16 = vld [vmem:[#allocation72_spill] sm:$0xff] }
 0xa35   :  { %2831 = vmatpush.msra.mxu0 %v6889_v44  ;;  %v9070_v44 = vld [vmem:[#allocation73_spill] sm:$0xff] }
 0xa37   :  { %2832 = vmatpush.msra.mxu0 %v6892_v20  ;;  %v9071_v20 = vld [vmem:[#allocation74_spill] sm:$0xff] }
 0xa39   :  { %2833 = vmatpush.msra.mxu0 %v6895_v29  ;;  %v9072_v29 = vld [vmem:[#allocation75_spill] sm:$0xff] }
 0xa3b   :  { %2834 = vmatpush.msra.mxu0 %v6901_v63 }
 0xa3d   :  { %2835 = vmatpush.msra.mxu0 %v6908_v25 }
 0xa3f   :  { %2836 = vmatpush.msra.mxu0 %v6914_v33 }
 0xa41   :  { %2837 = vmatpush.msra.mxu0 %v6920_v35 }
 0xa43   :  { %2838 = vmatpush.msra.mxu0 %v6926_v59 }
 0xa95   :  { %v7162_v40 = vpop.permute.xlu0 %2697 }
 0xa96   :  { %4327 = vmatmul.msk.f32.vlgmr.msrb.gmra.mxu0 %vm177_vm0, %v7162_v40  ;;  %v7168_v8 = vsel %vm177_vm0, %v4325_v54, %v7162_v40 }
 0xa97   :  { %2719 = vmatmul.f32.vlgmr.msrb.gmra.mxu2 %v7168_v8  ;;  %3109 = vmatpush.msrb.mxu0 %v6737_v7 }
 0xa98   :  { %2855 = vmatpush.msrb.mxu2 %v6905_v13 }
 0xa99   :  { %3110 = vmatpush.msrb.mxu0 %v6746_v17 }
 0xa9a   :  { %2856 = vmatpush.msrb.mxu2 %v6911_v27 }
 0xa9b   :  { %3111 = vmatpush.msrb.mxu0 %v6752_v46 }
 0xa9c   :  { %2857 = vmatpush.msrb.mxu2 %v6917_v15 }
 0xa9d   :  { %3112 = vmatpush.msrb.mxu0 %v6767_v2  ;;  %v9062_v2 = vld [vmem:[#allocation65_spill] sm:$0xff] }
 0xa9e   :  { %2839 = vmatmul.f32.vlgmr.msra.gmra.mxu0 %v7168_v8  ;;  %2858 = vmatpush.msrb.mxu2 %v6923_v4  ;;  %v9063_v4 = vld [vmem:[#allocation40_spill] sm:$0xff] }
 0xa9f   :  { %4328 = vmatmul.msk.f32.vlgmr.msra.gmra.mxu2 %vm177_vm0, %v7162_v40  ;;  %3117 = vmatpush.msra.mxu0 %v6716_v39 }
 0xaa0   :  { %2964 = vmatpush.xpose.msra.mxu2 %v6984_v48  ;;  %v2567_v7 = vpop.f32.mrf.mxu1 }
 0xaa1   :  { %3118 = vmatpush.msra.mxu0 %v6721_v1 }
 0xaa3   :  { %3119 = vmatpush.msra.mxu0 %v6725_v53 }
 0xaa5   :  { %3120 = vmatpush.msra.mxu0 %v6733_v30 }
 0xaa7   :  { %4329 = vmatmul.msk.f32.vlgmr.msrb.gmra.mxu2 %vm177_vm0, %v7162_v40  ;;  %3121 = vmatpush.msra.mxu0 %v6743_v47 }
 0xaa8   :  { %3018 = vmatpush.msrb.mxu2 %v6859_v55  ;;  %v2587_v17 = vpop.f32.mrf.mxu3  ;;  %v9069_v55 = vld [vmem:[#allocation45_spill] sm:$0xff] }
 0xaa9   :  { %v2588_v46 = vadd.f32 %v2587_v17, %v2567_v7  ;;  %3122 = vmatpush.msra.mxu0 %v9062_v2  ;;  %v9085_v17 = vld [vmem:[#allocation33_spill] sm:$0xff] }
 0xaab   :  { %v2591_v59 = vsel %vm2590_vm10, %v2588_v46, -inf  ;;  %3123 = vmatpush.msra.mxu0 %v9063_v4 }
 0xaac   :  { %2592 = vmax.xlane.f32.xlu1 %v2591_v59 }
 0xaad   :  { %3124 = vmatpush.msra.mxu0 %v9064_v9 }
 0xaaf   :  { %3125 = vmatpush.msra.mxu0 %v9065_v6 }
 0xab1   :  { %3126 = vmatpush.msra.mxu0 %v9066_v11 }
 0xab3   :  { %3127 = vmatpush.msra.mxu0 %v9067_v3 }
 0xab5   :  { %3128 = vmatpush.msra.mxu0 %v9068_v16 }
 0xab7   :  { %3129 = vmatpush.msra.mxu0 %v9069_v55 }
 0xab9   :  { %3130 = vmatpush.msra.mxu0 %v9070_v44 }
 0xabb   :  { %3131 = vmatpush.msra.mxu0 %v9071_v20 }
 0xabd   :  { %3132 = vmatpush.msra.mxu0 %v9072_v29 }
 0xb1f   :  { %v2593_v35 = vpop.xlane.xlu1 %2592 }
 0xb20   :  { %v2594_v63 = vsub.f32 %v2588_v46, %v2593_v35 }
 0xb22   :  { %v2595_v13 = vmul.f32 1.442695, %v2594_v63 }
 0xb24   :  { %4524 = vpow2.f32 %v2595_v13 }
 0xb2a   :  { %v4525_v25 = vpop.eup %4524 }
 0xb2b   :  { %v2597_v27 = vsel %vm2590_vm10, %v4525_v25, 0.0 }
 0xb2c   :  { %2598 = vadd.xlane.f32.xlu2 %v2597_v27  ;;  %v7379_v27 = vld [vmem:[%s8186_s9] ss:$0 sm:$0xff] }
 0xb2d   :  { %9087 = vst [vmem:[#allocation49_spill] sm:$0xff] %v7379_v27 }
 0xb9f   :  { %v2599_v33 = vpop.xlane.xlu2 %2598 }
 0xba0   :  { %4526 = vrcp.f32 %v2599_v33 }
 0xba6   :  { %v4527_v15 = vpop.eup %4526 }
 0xba7   :  { %v2601_v58 = vmul.f32 %v4527_v15, %v4525_v25 }
 0xba9   :  { %4323 = vmatmul.msk.f32.vlgmr.msrb.gmra.mxu1 %vm2602_vm11, %v2601_v58  ;;  %4324 = vmatmul.msk.f32.vlgmr.msra.gmra.mxu3 %vm2602_vm11, %v2601_v58 }
 0xbaa   :  { %2743 = vmatpush.msra.mxu3 %v6716_v39  ;;  %v7229_v39 = vld [vmem:[%s8185_s8 + $0xe0] sm:$0xff] }
 0xbab   :  { %2677 = vmatpush.msra.mxu1 %v7229_v39 }
 0xbac   :  { %2744 = vmatpush.msra.mxu3 %v6721_v1  ;;  %v7238_v1 = vld [vmem:[%s8185_s8 + $0xd8] sm:$0xff] }
 0xbad   :  { %2678 = vmatpush.msra.mxu1 %v7238_v1 }
 0xbae   :  { %2745 = vmatpush.msra.mxu3 %v6725_v53  ;;  %v7245_v53 = vld [vmem:[%s8185_s8 + $0xd0] sm:$0xff] }
 0xbaf   :  { %2679 = vmatpush.msra.mxu1 %v7245_v53 }
 0xbb0   :  { %2746 = vmatpush.msra.mxu3 %v6733_v30  ;;  %v7252_v30 = vld [vmem:[%s8185_s8 + $0xc8] sm:$0xff] }
 0xbb1   :  { %4326 = vmatmul.msk.f32.vlgmr.msrb.gmra.mxu3 %vm177_vm0, %v7162_v40  ;;  %2680 = vmatpush.msra.mxu1 %v7252_v30 }
 0xbb2   :  { %2747 = vmatpush.msra.mxu3 %v6743_v47  ;;  %v7259_v47 = vld [vmem:[%s8185_s8 + $0xc0] sm:$0xff] }
 0xbb3   :  { %2681 = vmatpush.msra.mxu1 %v7259_v47 }
 0xbb4   :  { %2748 = vmatpush.msra.mxu3 %v9062_v2 }
 0xbb5   :  { %2682 = vmatpush.msra.mxu1 %v7266_v52 }
 0xbb6   :  { %2749 = vmatpush.msra.mxu3 %v9063_v4 }
 0xbb7   :  { %2683 = vmatpush.msra.mxu1 %v7273_v23 }
 0xbb8   :  { %2750 = vmatpush.msra.mxu3 %v9064_v9 }
 0xbb9   :  { %2684 = vmatpush.msra.mxu1 %v7280_v45 }
 0xbba   :  { %2751 = vmatpush.msra.mxu3 %v9065_v6 }
 0xbbb   :  { %2685 = vmatpush.msra.mxu1 %v7287_v62 }
 0xbbc   :  { %2752 = vmatpush.msra.mxu3 %v9066_v11 }
 0xbbd   :  { %2686 = vmatpush.msra.mxu1 %v7294_v60 }
 0xbbe   :  { %2753 = vmatpush.msra.mxu3 %v9067_v3  ;;  %v9086_v3 = vld [vmem:[#allocation24_spill] sm:$0xff] }
 0xbbf   :  { %2687 = vmatpush.msra.mxu1 %v7301_v32 }
 0xbc0   :  { %2754 = vmatpush.msra.mxu3 %v9068_v16 }
 0xbc1   :  { %2688 = vmatpush.msra.mxu1 %v7308_v14 }
 0xbc2   :  { %2755 = vmatpush.msra.mxu3 %v9069_v55 }
 0xbc3   :  { %2689 = vmatpush.msra.mxu1 %v7315_v43 }
 0xbc4   :  { %2756 = vmatpush.msra.mxu3 %v9070_v44 }
 0xbc5   :  { %2783 = vmatpush.msrb.mxu1 %v6932_v61 }
 0xbc6   :  { %2757 = vmatpush.msra.mxu3 %v9071_v20 }
 0xbc7   :  { %2784 = vmatpush.msrb.mxu1 %v6937_v12 }
 0xbc8   :  { %2758 = vmatpush.msra.mxu3 %v9072_v29 }
 0xbc9   :  { %2759 = vmatmul.f32.vlgmr.msra.gmra.mxu3 %v7168_v8  ;;  %2785 = vmatpush.msrb.mxu1 %v6940_v22 }
 0xbca   :  { %2944 = vmatpush.xpose.msrb.mxu3 %v6996_v34 }
 0xbcb   :  { %2786 = vmatpush.msrb.mxu1 %v6944_v56 }
 0xbcd   :  { %2787 = vmatpush.msrb.mxu1 %v6948_v24 }
 0xbce   :  { %2998 = vmatpush.msra.mxu3 %v6851_v37  ;;  %v9078_v37 = vld [vmem:[#allocation42_spill] sm:$0xff] }
 0xbcf   :  { %2788 = vmatpush.msrb.mxu1 %v9073_v31 }
 0xbd1   :  { %2789 = vmatpush.msrb.mxu1 %v9074_v49 }
 0xbd3   :  { %2790 = vmatpush.msrb.mxu1 %v9075_v28 }
 0xbd5   :  { %2791 = vmatpush.msrb.mxu1 %v9076_v18 }
 0xbd7   :  { %2792 = vmatpush.msrb.mxu1 %v9077_v26 }
 0xbd9   :  { %2793 = vmatpush.msrb.mxu1 %v9078_v37 }
 0xbdb   :  { %2794 = vmatpush.msrb.mxu1 %v9079_v21 }
 0xbdd   :  { %2795 = vmatpush.msrb.mxu1 %v9080_v57 }
 0xbdf   :  { %2796 = vmatpush.msrb.mxu1 %v9081_v38 }
 0xbe1   :  { %2797 = vmatpush.msrb.mxu1 %v9082_v5 }
 0xbe3   :  { %2798 = vmatpush.msrb.mxu1 %v9083_v36 }
 0xc26   :  { %v2623_v41 = vpop.f32.mrf.mxu1 }
 0xc2c   :  { %v2643_v51 = vpop.f32.mrf.mxu3 }
 0xc2d   :  { %v2647_v0 = vrot.slane %v2643_v51, 7 }
 0xc2f   :  { %v2650_v54 = vsel %vm2649_vm12, %v2623_v41, %v2647_v0 }
 0xc30   :  { %2690 = vmatmul.f32.vlgmr.msra.gmra.mxu1 %v2650_v54 }
 0xc31   :  { %3047 = vmatpush.msra.mxu1 %v7210_v50 }
 0xc33   :  { %3048 = vmatpush.msra.mxu1 %v7215_v42 }
 0xc35   :  { %3049 = vmatpush.msra.mxu1 %v7222_v19 }
 0xc37   :  { %3050 = vmatpush.msra.mxu1 %v7229_v39 }
 0xc38   :  { %2799 = vmatmul.f32.vlgmr.msrb.gmra.mxu1 %v7168_v8 }
 0xc39   :  { %3051 = vmatpush.msra.mxu1 %v7238_v1 }
 0xc3b   :  { %3052 = vmatpush.msra.mxu1 %v7245_v53 }
 0xc3d   :  { %3053 = vmatpush.msra.mxu1 %v7252_v30 }
 0xc3f   :  { %3054 = vmatpush.msra.mxu1 %v7259_v47 }
 0xc41   :  { %3055 = vmatpush.msra.mxu1 %v7266_v52 }
 0xc43   :  { %3056 = vmatpush.msra.mxu1 %v7273_v23 }
 0xc45   :  { %3057 = vmatpush.msra.mxu1 %v7280_v45 }
 0xc47   :  { %3058 = vmatpush.msra.mxu1 %v7287_v62 }
 0xc49   :  { %3059 = vmatpush.msra.mxu1 %v7294_v60 }
 0xc4b   :  { %3060 = vmatpush.msra.mxu1 %v7301_v32 }
 0xc4d   :  { %3061 = vmatpush.msra.mxu1 %v7308_v14 }
 0xc4f   :  { %3062 = vmatpush.msra.mxu1 %v7315_v43 }
 0xc51   :  { %3157 = vmatpush.msrb.mxu1 %v6932_v61  ;;  %v9084_v61 = vld [vmem:[#allocation31_spill] sm:$0xff] }
 0xc53   :  { %3158 = vmatpush.msrb.mxu1 %v6937_v12 }
 0xc55   :  { %3159 = vmatpush.msrb.mxu1 %v6940_v22  ;;  %v2720_v22 = vpop.f32.mrf.mxu2 }
 0xc56   :  { %v2721_v46 = vadd.f32 %v2720_v22, %v9085_v17 }
 0xc57   :  { %3160 = vmatpush.msrb.mxu1 %v6944_v56  ;;  %v2671_v56 = vpop.f32.mrf.mxu0 }
 0xc59   :  { %3161 = vmatpush.msrb.mxu1 %v6948_v24  ;;  %v2740_v24 = vpop.f32.mrf.mxu3 }
 0xc5a   :  { %v2741_v59 = vadd.f32 %v2740_v24, %v2721_v46 }
 0xc5b   :  { %3162 = vmatpush.msrb.mxu1 %v9073_v31  ;;  %v2672_v31 = vadd.f32 %v7379_v27, %v2671_v56 }
 0xc5c   :  { %v4330_v9 = vmul.f32 -1.442695, %v2741_v59 }
 0xc5d   :  { %3163 = vmatpush.msrb.mxu1 %v9074_v49  ;;  %v2820_v7 = vpop.f32.mrf.mxu2 }
 0xc5f   :  { %3164 = vmatpush.msrb.mxu1 %v9075_v28  ;;  %v2780_v8 = vpop.f32.mrf.mxu0 }
 0xc61   :  { %3165 = vmatpush.msrb.mxu1 %v9076_v18  ;;  %v2760_v12 = vpop.f32.mrf.mxu3 }
 0xc62   :  { %v2761_v40 = vadd.f32 %v2760_v12, %v9084_v61 }
 0xc63   :  { %3166 = vmatpush.msrb.mxu1 %v9077_v26 }
 0xc64   :  { %v2781_v2 = vadd.f32 %v2780_v8, %v2761_v40 }
 0xc65   :  { %3167 = vmatpush.msrb.mxu1 %v9078_v37  ;;  %v2860_v11 = vpop.f32.mrf.mxu2 }
 0xc66   :  { %v4331_v4 = vmul.f32 -1.442695, %v2781_v2 }
 0xc67   :  { %3168 = vmatpush.msrb.mxu1 %v9079_v21  ;;  %v2840_v6 = vpop.f32.mrf.mxu0 }
 0xc68   :  { %4528 = vpow2.f32 %v4331_v4  ;;  %v2841_v16 = vadd.f32 %v2840_v6, %v9086_v3 }
 0xc69   :  { %3169 = vmatpush.msrb.mxu1 %v9080_v57  ;;  %4530 = vpow2.f32 %v4330_v9 }
 0xc6a   :  { %v2861_v55 = vadd.f32 %v2860_v11, %v2841_v16 }
 0xc6b   :  { %3170 = vmatpush.msrb.mxu1 %v9081_v38 }
 0xc6c   :  { %v4332_v29 = vmul.f32 -1.442695, %v2861_v55 }
 0xc6d   :  { %3171 = vmatpush.msrb.mxu1 %v9082_v5 }
 0xc6e   :  { %v4529_v44 = vpop.eup %4528  ;;  %4532 = vpow2.f32 %v4332_v29 }
 0xc6f   :  { %3172 = vmatpush.msrb.mxu1 %v9083_v36  ;;  %v4531_v20 = vpop.eup %4530  ;;  %v2885_v35 = vadd.f32 1.0, %v4529_v44  ;;  %v9088_v36 = vld [vmem:[#allocation44_spill] sm:$0xff] }
 0xc70   :  { %v2866_v63 = vadd.f32 1.0, %v4531_v20 }
 0xc71   :  { %4534 = vrcp.f32 %v2885_v35  ;;  %v2897_v54 = vand.u32 2147483648, %v2885_v35  ;;  %vm2891_vm15 = vweird.f32 %v2885_v35  ;;  %v2895_v22 = vand.u32 2147483647, %v2885_v35 }
 0xc72   :  { %4536 = vrcp.f32 %v2866_v63  ;;  %v2878_v12 = vand.u32 2147483648, %v2866_v63  ;;  %vm2872_vm2 = vweird.f32 %v2866_v63  ;;  %v2876_v40 = vand.u32 2147483647, %v2866_v63 }
 0xc73   :  { %v2898_v2 = vor.u32 1.1754944e-38, %v2897_v54  ;;  %vm2896_vm4 = vcmp.eq.f32.partialorder %v2895_v22, 8.507059e+37  ;;  %v9096_v54 = vld [vmem:[#allocation66_spill] sm:$0xff]  ;;  %v7429_v22 = vld [vmem:[#allocation5 + $0xe0] sm:$0xff] }
 0xc74   :  { %v4533_v13 = vpop.eup %4532  ;;  %v2879_v4 = vor.u32 1.1754944e-38, %v2878_v12  ;;  %vm2877_vm5 = vcmp.eq.f32.partialorder %v2876_v40, 8.507059e+37  ;;  %v9098_v12 = vld [vmem:[#allocation35_spill] sm:$0xff]  ;;  %v7433_v40 = vld [vmem:[#allocation5 + $0xc0] sm:$0xff] }
 0xc75   :  { %v2905_v15 = vadd.f32 1.0, %v4533_v13 }
 0xc77   :  { %v4535_v25 = vpop.eup %4534  ;;  %4538 = vrcp.f32 %v2905_v15  ;;  %v2917_v29 = vand.u32 2147483648, %v2905_v15  ;;  %vm2911_vm7 = vweird.f32 %v2905_v15 }
 0xc78   :  { %v4537_v33 = vpop.eup %4536  ;;  %v2887_v58 = vmul.f32 %v4535_v25, %v2885_v35  ;;  %vm2892_vm14 = vweird.f32 %v4535_v25  ;;  %v2915_v35 = vand.u32 2147483647, %v2905_v15 }
 0xc79   :  { %v2868_v49 = vmul.f32 %v4537_v33, %v2866_v63  ;;  %vm2873_vm13 = vweird.f32 %v4537_v33  ;;  %vm2893_vm1 = vmor %vm2891_vm15, %vm2892_vm14  ;;  %v2918_v13 = vor.u32 1.1754944e-38, %v2917_v29 }
 0xc7a   :  { %v2888_v26 = vsub.f32 1.0, %v2887_v58  ;;  %vm2874_vm3 = vmor %vm2872_vm2, %vm2873_vm13  ;;  %vm2916_vm9 = vcmp.eq.f32.partialorder %v2915_v35, 8.507059e+37  ;;  %v4336_v35 = vld [vmem:[%s8178_s1 + $0x4] sm:$0x3] }
 0xc7b   :  { %v2869_v37 = vsub.f32 1.0, %v2868_v49  ;;  %v7397_v49 = vld [vmem:[#allocation5 + $0x1e0] sm:$0xff] }
 0xc7c   :  { %v2889_v21 = vmul.f32 %v4535_v25, %v2888_v26  ;;  %v7405_v26 = vld [vmem:[#allocation5 + $0x1a0] sm:$0xff] }
 0xc7d   :  { %v4539_v57 = vpop.eup %4538  ;;  %v2870_v38 = vmul.f32 %v4537_v33, %v2869_v37  ;;  %v9092_v37 = vld [vmem:[#allocation25_spill] sm:$0xff] }
 0xc7e   :  { %v2890_v0 = vadd.f32 %v4535_v25, %v2889_v21  ;;  %v2907_v41 = vmul.f32 %v4539_v57, %v2905_v15  ;;  %vm2912_vm6 = vweird.f32 %v4539_v57  ;;  %v9090_v15 = vld [vmem:[#allocation63_spill] sm:$0xff]  ;;  %v7409_v21 = vld [vmem:[#allocation5 + $0x180] sm:$0xff] }
 0xc7f   :  { %v2871_v56 = vadd.f32 %v4537_v33, %v2870_v38  ;;  %vm2913_vm8 = vmor %vm2911_vm7, %vm2912_vm6  ;;  %v7413_v38 = vld [vmem:[#allocation5 + $0x160] sm:$0xff] }
 0xc80   :  { %v2894_v8 = vsel %vm2893_vm1, %v4535_v25, %v2890_v0  ;;  %v2908_v46 = vsub.f32 1.0, %v2907_v41  ;;  %v9095_v0 = vld [vmem:[#allocation21_spill] sm:$0xff] }
 0xc81   :  { %v2875_v59 = vsel %vm2874_vm3, %v4537_v33, %v2871_v56  ;;  %v2899_v9 = vsel %vm2896_vm4, %v2898_v2, %v2894_v8  ;;  %v7421_v41 = vld [vmem:[#allocation5 + $0x120] sm:$0xff]  ;;  %v9099_v8 = vld [vmem:[#allocation67_spill] sm:$0xff] }
 0xc82   :  { %v2909_v11 = vmul.f32 %v4539_v57, %v2908_v46  ;;  %v2921_v16 = vmul.f32 %v2899_v9, %v7135_v10  ;;  %v9097_v56 = vld [vmem:[#allocation37_spill] sm:$0xff] }
 0xc83   :  { %v7437_v46 = vld [vmem:[#allocation5 + $0xa0] sm:$0xff] }
 0xc84   :  { %v2910_v20 = vadd.f32 %v4539_v57, %v2909_v11  ;;  %v9100_v2 = vld [vmem:[#allocation41_spill] sm:$0xff]  ;;  %v9104_v11 = vld [vmem:[#allocation28_spill] sm:$0xff] }
 0xc85   :  { %v7445_v9 = vld [vmem:[#allocation5 + $0x60] sm:$0xff] }
 0xc86   :  { %v2914_v63 = vsel %vm2913_vm8, %v4539_v57, %v2910_v20  ;;  %v9093_v57 = vld [vmem:[#allocation19_spill] sm:$0xff]  ;;  %v7457_v20 = vld [vmem:[#allocation5] sm:$0xff] }
 0xc87   :  { %v2919_v33 = vsel %vm2916_vm9, %v2918_v13, %v2914_v63  ;;  %9107 = vst [vmem:[#allocation46_spill] sm:$0xff] %v7457_v20  ;;  %v7473_v13 = vld [vmem:[#allocation7] sm:$0xff] }
 0xcad   :  { %v2691_v28 = vpop.f32.mrf.mxu1 }
 0xcae   :  { %v2692_v18 = vadd.f32 %v2691_v28, %v2672_v31  ;;  %v9089_v31 = vld [vmem:[#allocation16_spill] sm:$0xff] }
 0xcaf   :  { %v7401_v28 = vld [vmem:[#allocation5 + $0x1c0] sm:$0xff] }
 0xcb0   :  { %2694 = vst [vmem:[%s8188_s11] sm:$0x3] %v2692_v18  ;;  %v9091_v18 = vld [vmem:[#allocation29_spill] sm:$0xff] }
 0xcb5   :  { %v2800_v5 = vpop.f32.mrf.mxu1 }
 0xcb6   :  { %v2801_v51 = vadd.f32 %v2800_v5, %v9088_v36  ;;  %v9094_v5 = vld [vmem:[#allocation64_spill] sm:$0xff] }
 0xcb8   :  { %v2821_v24 = vadd.f32 %v2820_v7, %v2801_v51  ;;  %v2880_v7 = vsel %vm2877_vm5, %v2879_v4, %v2875_v59  ;;  %v7417_v51 = vld [vmem:[#allocation5 + $0x140] sm:$0xff]  ;;  %v9101_v4 = vld [vmem:[#allocation39_spill] sm:$0xff] }
 0xcb9   :  { %v7441_v59 = vld [vmem:[#allocation5 + $0x80] sm:$0xff] }
 0xcba   :  { %4540 = vtanh.f32 %v2821_v24  ;;  %v7425_v24 = vld [vmem:[#allocation5 + $0x100] sm:$0xff] }
 0xcc0   :  { %v4541_v6 = vpop.eup %4540 }
 0xcc1   :  { %v2922_v55 = vmul.f32 %v4541_v6, %v2880_v7  ;;  %v9102_v6 = vld [vmem:[#allocation56_spill] sm:$0xff] }
 0xcc2   :  { %v7449_v7 = vld [vmem:[#allocation5 + $0x40] sm:$0xff] }
 0xcc3   :  { %v7387_v44 = vadd.f32 %v2922_v55, %v2921_v16  ;;  %9103 = vst [vmem:[#allocation68_spill] sm:$0xff] %v7449_v7  ;;  %v7453_v16 = vld [vmem:[#allocation5 + $0x20] sm:$0xff]  ;;  %v9106_v55 = vld [vmem:[#allocation43_spill] sm:$0xff] }
 0xcc4   :  { %9105 = vst [vmem:[#allocation32_spill] sm:$0xff] %v7453_v16 }
 0xcc5   :  { %4542 = vtanh.f32 %v7387_v44 }
 0xccb   :  { %v4543_v25 = vpop.eup %4542 }
 0xccc   :  { %v7390_v58 = vmul.f32 %v4543_v25, %v2919_v33 }
 0xcce   :  { %3071 = vrot.lane.b32.xlu1 %v7390_v58, %s5045_s17  ;;  %2945 = vmatmul.f32.vlgmr.msrb.gmra.mxu3 %v7390_v58  ;;  %v2927_v10 = vrot.slane %v7390_v58, 1 }
 0xccf   :  { %3027 = vmatpush.msrb.mxu3 %v9089_v31 }
 0xcd0   :  { %2965 = vmatmul.f32.vlgmr.msra.gmra.mxu2 %v2927_v10 }
 0xcd1   :  { %3077 = vmatpush.msra.mxu2 %v7397_v49  ;;  %3028 = vmatpush.msrb.mxu3 %v9090_v15 }
 0xcd3   :  { %3078 = vmatpush.msra.mxu2 %v7401_v28  ;;  %3029 = vmatpush.msrb.mxu3 %v9091_v18 }
 0xcd5   :  { %3079 = vmatpush.msra.mxu2 %v7405_v26  ;;  %3030 = vmatpush.msrb.mxu3 %v9092_v37 }
 0xcd7   :  { %3080 = vmatpush.msra.mxu2 %v7409_v21  ;;  %3031 = vmatpush.msrb.mxu3 %v9093_v57 }
 0xcd9   :  { %3081 = vmatpush.msra.mxu2 %v7413_v38  ;;  %3032 = vmatpush.msrb.mxu3 %v9094_v5 }
 0xcdb   :  { %3082 = vmatpush.msra.mxu2 %v7417_v51  ;;  %3033 = vmatpush.msrb.mxu3 %v9095_v0 }
 0xcdd   :  { %3083 = vmatpush.msra.mxu2 %v7421_v41  ;;  %3034 = vmatpush.msrb.mxu3 %v9096_v54 }
 0xcdf   :  { %3084 = vmatpush.msra.mxu2 %v7425_v24  ;;  %3035 = vmatpush.msrb.mxu3 %v9097_v56 }
 0xce1   :  { %3085 = vmatpush.msra.mxu2 %v7429_v22  ;;  %3036 = vmatpush.msrb.mxu3 %v9098_v12  ;;  %v7480_v12 = vld [vmem:[#allocation5 + $0x268] sm:$0xff] }
 0xce3   :  { %3086 = vmatpush.msra.mxu2 %v7433_v40  ;;  %3037 = vmatpush.msrb.mxu3 %v9099_v8  ;;  %v7483_v8 = vld [vmem:[#allocation5 + $0x270] sm:$0xff] }
 0xce5   :  { %3087 = vmatpush.msra.mxu2 %v7437_v46  ;;  %3038 = vmatpush.msrb.mxu3 %v9100_v2  ;;  %v7486_v2 = vld [vmem:[#allocation5 + $0x248] sm:$0xff] }
 0xce7   :  { %3088 = vmatpush.msra.mxu2 %v7441_v59  ;;  %3039 = vmatpush.msrb.mxu3 %v9101_v4  ;;  %v7489_v4 = vld [vmem:[#allocation5 + $0x250] sm:$0xff] }
 0xce9   :  { %3089 = vmatpush.msra.mxu2 %v7445_v9  ;;  %3040 = vmatpush.msrb.mxu3 %v9102_v6  ;;  %v7492_v6 = vld [vmem:[#allocation5 + $0x228] sm:$0xff] }
 0xceb   :  { %3090 = vmatpush.msra.mxu2 %v7449_v7  ;;  %3041 = vmatpush.msrb.mxu3 %v9104_v11  ;;  %v7495_v11 = vld [vmem:[#allocation5 + $0x230] sm:$0xff] }
 0xced   :  { %3091 = vmatpush.msra.mxu2 %v7453_v16  ;;  %3042 = vmatpush.msrb.mxu3 %v9106_v55  ;;  %v7498_v55 = vld [vmem:[#allocation5 + $0x208] sm:$0xff] }
 0xcef   :  { %3092 = vmatpush.msra.mxu2 %v7457_v20 }
 0xd40   :  { %v7460_v29 = vpop.permute.xlu1 %3071 }
 0xd41   :  { %4337 = vmatmul.msk.f32.vlgmr.msrb.gmra.mxu0 %vm177_vm0, %v7460_v29  ;;  %v7470_v63 = vsel %vm177_vm0, %v4336_v35, %v7460_v29  ;;  %v7501_v35 = vld [vmem:[#allocation5 + $0x210] sm:$0xff] }
 0xd42   :  { %3318 = vmatpush.xpose.msrb.mxu0 %v6996_v34 }
 0xd49   :  { %3133 = vmatmul.f32.vlgmr.msra.gmra.mxu0 %v7470_v63 }
 0xd4a   :  { %3372 = vmatpush.msra.mxu0 %v7473_v13 }
 0xd51   :  { %v2946_v25 = vpop.f32.mrf.mxu3 }
 0xd53   :  { %v2966_v33 = vpop.f32.mrf.mxu2 }
 0xd54   :  { %v2967_v10 = vadd.f32 %v2966_v33, %v2946_v25  ;;  %v7506_v25 = vld [vmem:[#allocation5 + $0x1f8] sm:$0xff] }
 0xd55   :  { %v7509_v33 = vld [vmem:[#allocation5 + $0x278] sm:$0xff] }
 0xd56   :  { %v2969_v31 = vsel %vm2590_vm10, %v2967_v10, -inf }
 0xd57   :  { %2970 = vmax.xlane.f32.xlu0 %v2969_v31  ;;  %v7515_v31 = vld [vmem:[#allocation5 + $0x258] sm:$0xff] }
 0xd58   :  { %9109 = vst [vmem:[#allocation47_spill] sm:$0xff] %v7515_v31 }
 0xdca   :  { %v2971_v15 = vpop.xlane.xlu0 %2970 }
 0xdcb   :  { %v2972_v18 = vsub.f32 %v2967_v10, %v2971_v15  ;;  %v7512_v10 = vld [vmem:[#allocation5 + $0x1d8] sm:$0xff] }
 0xdcc   :  { %9108 = vst [vmem:[#allocation57_spill] sm:$0xff] %v7512_v10  ;;  %v7518_v15 = vld [vmem:[#allocation5 + $0x1b8] sm:$0xff] }
 0xdcd   :  { %v2973_v37 = vmul.f32 1.442695, %v2972_v18  ;;  %9110 = vst [vmem:[#allocation69_spill] sm:$0xff] %v7518_v15  ;;  %v7524_v18 = vld [vmem:[#allocation5 + $0x198] sm:$0xff] }
 0xdce   :  { %9112 = vst [vmem:[#allocation59_spill] sm:$0xff] %v7524_v18 }
 0xdcf   :  { %4544 = vpow2.f32 %v2973_v37  ;;  %v7527_v37 = vld [vmem:[#allocation5 + $0x218] sm:$0xff] }
 0xdd0   :  { %9113 = vst [vmem:[#allocation48_spill] sm:$0xff] %v7527_v37 }
 0xdd5   :  { %v4545_v57 = vpop.eup %4544 }
 0xdd6   :  { %v2975_v5 = vsel %vm2590_vm10, %v4545_v57, 0.0 }
 0xdd7   :  { %2976 = vadd.xlane.f32.xlu2 %v2975_v5  ;;  %v7538_v5 = vld [vmem:[#allocation5 + $0x158] sm:$0xff] }
 0xdd8   :  { %9115 = vst [vmem:[#allocation50_spill] sm:$0xff] %v7538_v5 }
 0xe4a   :  { %v2977_v0 = vpop.xlane.xlu2 %2976 }
 0xe4b   :  { %4546 = vrcp.f32 %v2977_v0  ;;  %v7541_v0 = vld [vmem:[#allocation5 + $0x138] sm:$0xff] }
 0xe4c   :  { %9116 = vst [vmem:[#allocation60_spill] sm:$0xff] %v7541_v0 }
 0xe51   :  { %v4547_v54 = vpop.eup %4546 }
 0xe52   :  { %v2979_v56 = vmul.f32 %v4547_v54, %v4545_v57  ;;  %v7534_v57 = vld [vmem:[#allocation5 + $0x178] sm:$0xff] }
 0xe53   :  { %9114 = vst [vmem:[#allocation52_spill] sm:$0xff] %v7534_v57  ;;  %v7544_v54 = vld [vmem:[#allocation5 + $0x118] sm:$0xff] }
 0xe54   :  { %4333 = vmatmul.msk.f32.vlgmr.msra.gmra.mxu3 %vm2602_vm11, %v2979_v56  ;;  %4334 = vmatmul.msk.f32.vlgmr.msrb.gmra.mxu2 %vm2602_vm11, %v2979_v56  ;;  %9117 = vst [vmem:[#allocation70_spill] sm:$0xff] %v7544_v54  ;;  %v7549_v56 = vld [vmem:[#allocation5 + $0xf8] sm:$0xff] }
 0xe55   :  { %3149 = vmatpush.msra.mxu3 %v7480_v12  ;;  %3189 = vmatpush.msrb.mxu2 %v7483_v8  ;;  %9118 = vst [vmem:[#allocation18_spill] sm:$0xff] %v7549_v56 }
 0xe57   :  { %3150 = vmatpush.msra.mxu3 %v7486_v2  ;;  %3190 = vmatpush.msrb.mxu2 %v7489_v4 }
 0xe59   :  { %3151 = vmatpush.msra.mxu3 %v7492_v6  ;;  %3191 = vmatpush.msrb.mxu2 %v7495_v11 }
 0xe5b   :  { %3152 = vmatpush.msra.mxu3 %v7498_v55  ;;  %3192 = vmatpush.msrb.mxu2 %v7501_v35 }
 0xe5c   :  { %3043 = vmatmul.f32.vlgmr.msrb.gmra.mxu3 %v7390_v58  ;;  %3093 = vmatmul.f32.vlgmr.msra.gmra.mxu2 %v7470_v63  ;;  %v7521_v58 = vld [vmem:[#allocation5 + $0x238] sm:$0xff] }
 0xe5d   :  { %3197 = vmatpush.msrb.mxu3 %v7506_v25  ;;  %3229 = vmatpush.msra.mxu2 %v7509_v33  ;;  %9111 = vst [vmem:[#allocation36_spill] sm:$0xff] %v7521_v58 }
 0xe5f   :  { %3198 = vmatpush.msrb.mxu3 %v7512_v10  ;;  %3230 = vmatpush.msra.mxu2 %v7515_v31 }
 0xe61   :  { %3199 = vmatpush.msrb.mxu3 %v7518_v15  ;;  %3231 = vmatpush.msra.mxu2 %v7521_v58 }
 0xe63   :  { %3200 = vmatpush.msrb.mxu3 %v7524_v18  ;;  %3232 = vmatpush.msra.mxu2 %v7527_v37 }
 0xe64   :  { %4338 = vmatmul.msk.f32.vlgmr.msra.gmra.mxu3 %vm177_vm0, %v7460_v29  ;;  %4339 = vmatmul.msk.f32.vlgmr.msrb.gmra.mxu2 %vm177_vm0, %v7460_v29 }
 0xe65   :  { %3201 = vmatpush.msrb.mxu3 %v7534_v57  ;;  %3338 = vmatpush.xpose.msrb.mxu2 %v6984_v48  ;;  %v7552_v48 = vld [vmem:[#allocation7 + $0x8] sm:$0xff] }
 0xe66   :  { %9119 = vst [vmem:[#allocation20_spill] sm:$0xff] %v7552_v48 }
 0xe67   :  { %3202 = vmatpush.msrb.mxu3 %v7538_v5  ;;  %v7555_v5 = vld [vmem:[#allocation5 + $0xd8] sm:$0xff] }
 0xe68   :  { %9120 = vst [vmem:[#allocation23_spill] sm:$0xff] %v7555_v5 }
 0xe69   :  { %3203 = vmatpush.msrb.mxu3 %v7541_v0  ;;  %v7558_v0 = vld [vmem:[#allocation5 + $0xb8] sm:$0xff] }
 0xe6a   :  { %9121 = vst [vmem:[#allocation27_spill] sm:$0xff] %v7558_v0 }
 0xe6b   :  { %3204 = vmatpush.msrb.mxu3 %v7544_v54  ;;  %v7561_v54 = vld [vmem:[#allocation5 + $0x98] sm:$0xff] }
 0xe6c   :  { %4340 = vmatmul.msk.f32.vlgmr.msra.gmra.mxu2 %vm177_vm0, %v7460_v29  ;;  %9122 = vst [vmem:[#allocation65_spill] sm:$0xff] %v7561_v54  ;;  %v7564_v29 = vld [vmem:[#allocation5 + $0x78] sm:$0xff] }
 0xe6d   :  { %3205 = vmatpush.msrb.mxu3 %v7549_v56  ;;  %3392 = vmatpush.msra.mxu2 %v7552_v48  ;;  %9123 = vst [vmem:[#allocation40_spill] sm:$0xff] %v7564_v29  ;;  %v7567_v56 = vld [vmem:[#allocation5 + $0x58] sm:$0xff] }
 0xe6e   :  { %9124 = vst [vmem:[#allocation61_spill] sm:$0xff] %v7567_v56  ;;  %v7570_v48 = vld [vmem:[#allocation5 + $0x38] sm:$0xff] }
 0xe6f   :  { %3206 = vmatpush.msrb.mxu3 %v7555_v5  ;;  %9125 = vst [vmem:[#allocation51_spill] sm:$0xff] %v7570_v48  ;;  %v7573_v5 = vld [vmem:[#allocation5 + $0x18] sm:$0xff] }
 0xe70   :  { %9126 = vst [vmem:[#allocation71_spill] sm:$0xff] %v7573_v5 }
 0xe71   :  { %3207 = vmatpush.msrb.mxu3 %v7558_v0  ;;  %v7577_v0 = vld [vmem:[#allocation5 + $0x260] sm:$0xff] }
 0xe72   :  { %9127 = vst [vmem:[#allocation53_spill] sm:$0xff] %v7577_v0 }
 0xe73   :  { %3208 = vmatpush.msrb.mxu3 %v7561_v54  ;;  %v7580_v54 = vld [vmem:[#allocation5 + $0x240] sm:$0xff] }
 0xe74   :  { %9128 = vst [vmem:[#allocation72_spill] sm:$0xff] %v7580_v54 }
 0xe75   :  { %3209 = vmatpush.msrb.mxu3 %v7564_v29  ;;  %v7583_v29 = vld [vmem:[#allocation5 + $0x220] sm:$0xff] }
 0xe76   :  { %9129 = vst [vmem:[#allocation45_spill] sm:$0xff] %v7583_v29 }
 0xe77   :  { %3210 = vmatpush.msrb.mxu3 %v7567_v56  ;;  %v7586_v56 = vld [vmem:[#allocation5 + $0x200] sm:$0xff] }
 0xe78   :  { %9130 = vst [vmem:[#allocation73_spill] sm:$0xff] %v7586_v56 }
 0xe79   :  { %3211 = vmatpush.msrb.mxu3 %v7570_v48  ;;  %v7589_v48 = vld [vmem:[#allocation5 + $0x1e8] sm:$0xff] }
 0xe7a   :  { %9131 = vst [vmem:[#allocation74_spill] sm:$0xff] %v7589_v48 }
 0xe7b   :  { %3212 = vmatpush.msrb.mxu3 %v7573_v5  ;;  %v7592_v5 = vld [vmem:[#allocation5 + $0x1c8] sm:$0xff] }
 0xe7c   :  { %3213 = vmatmul.f32.vlgmr.msrb.gmra.mxu3 %v7470_v63  ;;  %9132 = vst [vmem:[#allocation75_spill] sm:$0xff] %v7592_v5 }
 0xe7d   :  { %3483 = vmatpush.msra.mxu3 %v7577_v0  ;;  %v7595_v0 = vld [vmem:[#allocation5 + $0x1a8] sm:$0xff] }
 0xe7e   :  { %9133 = vst [vmem:[#allocation54_spill] sm:$0xff] %v7595_v0 }
 0xe7f   :  { %3484 = vmatpush.msra.mxu3 %v7580_v54  ;;  %v7598_v54 = vld [vmem:[#allocation5 + $0x188] sm:$0xff] }
 0xe80   :  { %9134 = vst [vmem:[#allocation76_spill] sm:$0xff] %v7598_v54 }
 0xe81   :  { %3485 = vmatpush.msra.mxu3 %v7583_v29  ;;  %v7601_v29 = vld [vmem:[#allocation5 + $0x168] sm:$0xff] }
 0xe82   :  { %9135 = vst [vmem:[#allocation30_spill] sm:$0xff] %v7601_v29 }
 0xe83   :  { %3486 = vmatpush.msra.mxu3 %v7586_v56  ;;  %v7604_v56 = vld [vmem:[#allocation5 + $0x148] sm:$0xff] }
 0xe84   :  { %9136 = vst [vmem:[#allocation34_spill] sm:$0xff] %v7604_v56 }
 0xe85   :  { %3491 = vmatpush.msrb.mxu3 %v7589_v48  ;;  %v7607_v48 = vld [vmem:[#allocation5 + $0x128] sm:$0xff] }
 0xe86   :  { %9137 = vst [vmem:[#allocation38_spill] sm:$0xff] %v7607_v48 }
 0xe87   :  { %3492 = vmatpush.msrb.mxu3 %v7592_v5  ;;  %v7610_v5 = vld [vmem:[#allocation5 + $0x108] sm:$0xff] }
 0xe88   :  { %9138 = vst [vmem:[#allocation42_spill] sm:$0xff] %v7610_v5 }
 0xe89   :  { %3493 = vmatpush.msrb.mxu3 %v7595_v0  ;;  %v7613_v0 = vld [vmem:[#allocation5 + $0xe8] sm:$0xff] }
 0xe8a   :  { %9139 = vst [vmem:[#allocation55_spill] sm:$0xff] %v7613_v0 }
 0xe8b   :  { %3494 = vmatpush.msrb.mxu3 %v7598_v54  ;;  %v7616_v54 = vld [vmem:[#allocation5 + $0xc8] sm:$0xff] }
 0xe8c   :  { %9140 = vst [vmem:[#allocation15_spill] sm:$0xff] %v7616_v54 }
 0xe8d   :  { %3495 = vmatpush.msrb.mxu3 %v7601_v29  ;;  %v7619_v29 = vld [vmem:[#allocation5 + $0xa8] sm:$0xff] }
 0xe8e   :  { %9141 = vst [vmem:[#allocation17_spill] sm:$0xff] %v7619_v29 }
 0xe8f   :  { %3496 = vmatpush.msrb.mxu3 %v7604_v56  ;;  %v7622_v56 = vld [vmem:[#allocation5 + $0x88] sm:$0xff] }
 0xe90   :  { %9142 = vst [vmem:[#allocation26_spill] sm:$0xff] %v7622_v56 }
 0xe91   :  { %3497 = vmatpush.msrb.mxu3 %v7607_v48  ;;  %v7625_v48 = vld [vmem:[#allocation5 + $0x68] sm:$0xff] }
 0xe93   :  { %3498 = vmatpush.msrb.mxu3 %v7610_v5  ;;  %v7628_v5 = vld [vmem:[#allocation5 + $0x48] sm:$0xff] }
 0xe95   :  { %3499 = vmatpush.msrb.mxu3 %v7613_v0  ;;  %v7631_v0 = vld [vmem:[#allocation5 + $0x28] sm:$0xff] }
 0xe97   :  { %3500 = vmatpush.msrb.mxu3 %v7616_v54  ;;  %v7634_v54 = vld [vmem:[#allocation5 + $0x8] sm:$0xff] }
 0xe99   :  { %3501 = vmatpush.msrb.mxu3 %v7619_v29 }
 0xe9b   :  { %3502 = vmatpush.msrb.mxu3 %v7622_v56 }
 0xe9d   :  { %3503 = vmatpush.msrb.mxu3 %v7625_v48 }
 0xe9f   :  { %3504 = vmatpush.msrb.mxu3 %v7628_v5 }
 0xea1   :  { %3505 = vmatpush.msrb.mxu3 %v7631_v0 }
 0xea3   :  { %3506 = vmatpush.msrb.mxu3 %v7634_v54 }
 0xed7   :  { %v3020_v29 = vpop.f32.mrf.mxu2  ;;  %v3000_v37 = vpop.f32.mrf.mxu3 }
 0xed8   :  { %v3024_v57 = vrot.slane %v3020_v29, 7 }
 0xeda   :  { %v3026_v56 = vsel %vm2649_vm12, %v3000_v37, %v3024_v57 }
 0xedb   :  { %3063 = vmatmul.f32.vlgmr.msra.gmra.mxu1 %v3026_v56 }
 0xedc   :  { %3421 = vmatpush.msra.mxu1 %v7210_v50  ;;  %v7655_v50 = vld [vmem:[#allocation5 + $0x1f0] sm:$0xff] }
 0xedd   :  { %9143 = vst [vmem:[#allocation22_spill] sm:$0xff] %v7655_v50 }
 0xede   :  { %3422 = vmatpush.msra.mxu1 %v7215_v42  ;;  %v7658_v42 = vld [vmem:[#allocation5 + $0x1d0] sm:$0xff] }
 0xedf   :  { %9144 = vst [vmem:[#allocation16_spill] sm:$0xff] %v7658_v42  ;;  %v3044_v37 = vpop.f32.mrf.mxu3  ;;  %v3094_v57 = vpop.f32.mrf.mxu2 }
 0xee0   :  { %3423 = vmatpush.msra.mxu1 %v7222_v19  ;;  %v7661_v19 = vld [vmem:[#allocation5 + $0x1b0] sm:$0xff] }
 0xee1   :  { %9145 = vst [vmem:[#allocation63_spill] sm:$0xff] %v7661_v19 }
 0xee2   :  { %3424 = vmatpush.msra.mxu1 %v7229_v39  ;;  %v7664_v39 = vld [vmem:[#allocation5 + $0x190] sm:$0xff] }
 0xee3   :  { %3173 = vmatmul.f32.vlgmr.msrb.gmra.mxu1 %v7470_v63  ;;  %9146 = vst [vmem:[#allocation29_spill] sm:$0xff] %v7664_v39  ;;  %v3114_v63 = vpop.f32.mrf.mxu0 }
 0xee4   :  { %3425 = vmatpush.msra.mxu1 %v7238_v1  ;;  %v7667_v1 = vld [vmem:[#allocation5 + $0x170] sm:$0xff] }
 0xee5   :  { %9147 = vst [vmem:[#allocation25_spill] sm:$0xff] %v7667_v1 }
 0xee6   :  { %3426 = vmatpush.msra.mxu1 %v7245_v53  ;;  %v7670_v53 = vld [vmem:[#allocation5 + $0x150] sm:$0xff] }
 0xee7   :  { %9148 = vst [vmem:[#allocation19_spill] sm:$0xff] %v7670_v53  ;;  %v3154_v29 = vpop.f32.mrf.mxu3 }
 0xee8   :  { %3427 = vmatpush.msra.mxu1 %v7252_v30  ;;  %v7673_v30 = vld [vmem:[#allocation5 + $0x130] sm:$0xff] }
 0xee9   :  { %9149 = vst [vmem:[#allocation64_spill] sm:$0xff] %v7673_v30 }
 0xeea   :  { %3428 = vmatpush.msra.mxu1 %v7259_v47  ;;  %v7676_v47 = vld [vmem:[#allocation5 + $0x110] sm:$0xff] }
 0xeeb   :  { %9150 = vst [vmem:[#allocation21_spill] sm:$0xff] %v7676_v47  ;;  %v3134_v56 = vpop.f32.mrf.mxu0 }
 0xeec   :  { %3429 = vmatpush.msra.mxu1 %v7266_v52  ;;  %v7679_v52 = vld [vmem:[#allocation5 + $0xf0] sm:$0xff] }
 0xeed   :  { %9151 = vst [vmem:[#allocation66_spill] sm:$0xff] %v7679_v52 }
 0xeee   :  { %3430 = vmatpush.msra.mxu1 %v7273_v23  ;;  %v7682_v23 = vld [vmem:[#allocation5 + $0xd0] sm:$0xff] }
 0xeef   :  { %9152 = vst [vmem:[#allocation37_spill] sm:$0xff] %v7682_v23 }
 0xef0   :  { %3431 = vmatpush.msra.mxu1 %v7280_v45  ;;  %v7685_v45 = vld [vmem:[#allocation5 + $0xb0] sm:$0xff] }
 0xef1   :  { %9153 = vst [vmem:[#allocation35_spill] sm:$0xff] %v7685_v45 }
 0xef2   :  { %3432 = vmatpush.msra.mxu1 %v7287_v62  ;;  %v7688_v62 = vld [vmem:[#allocation5 + $0x90] sm:$0xff] }
 0xef3   :  { %9154 = vst [vmem:[#allocation67_spill] sm:$0xff] %v7688_v62 }
 0xef4   :  { %3433 = vmatpush.msra.mxu1 %v7294_v60  ;;  %v7691_v60 = vld [vmem:[#allocation5 + $0x70] sm:$0xff] }
 0xef5   :  { %9155 = vst [vmem:[#allocation41_spill] sm:$0xff] %v7691_v60 }
 0xef6   :  { %3434 = vmatpush.msra.mxu1 %v7301_v32  ;;  %v7694_v32 = vld [vmem:[#allocation5 + $0x50] sm:$0xff] }
 0xef7   :  { %9156 = vst [vmem:[#allocation39_spill] sm:$0xff] %v7694_v32 }
 0xef8   :  { %3435 = vmatpush.msra.mxu1 %v7308_v14  ;;  %v7697_v14 = vld [vmem:[#allocation5 + $0x30] sm:$0xff] }
 0xef9   :  { %9157 = vst [vmem:[#allocation56_spill] sm:$0xff] %v7697_v14 }
 0xefa   :  { %3436 = vmatpush.msra.mxu1 %v7315_v43  ;;  %v7700_v43 = vld [vmem:[#allocation5 + $0x10] sm:$0xff] }
 0xefb   :  { %9158 = vst [vmem:[#allocation28_spill] sm:$0xff] %v7700_v43 }
 0xefc   :  { %3531 = vmatpush.msrb.mxu1 %v7655_v50 }
 0xefe   :  { %3532 = vmatpush.msrb.mxu1 %v7658_v42 }
 0xf00   :  { %3533 = vmatpush.msrb.mxu1 %v7661_v19 }
 0xf02   :  { %3534 = vmatpush.msrb.mxu1 %v7664_v39 }
 0xf04   :  { %3535 = vmatpush.msrb.mxu1 %v7667_v1 }
 0xf06   :  { %3536 = vmatpush.msrb.mxu1 %v7670_v53 }
 0xf08   :  { %3537 = vmatpush.msrb.mxu1 %v7673_v30  ;;  %v3214_v30 = vpop.f32.mrf.mxu3 }
 0xf0a   :  { %3538 = vmatpush.msrb.mxu1 %v7676_v47 }
 0xf0c   :  { %3539 = vmatpush.msrb.mxu1 %v7679_v52 }
 0xf0e   :  { %3540 = vmatpush.msrb.mxu1 %v7682_v23 }
 0xf10   :  { %3541 = vmatpush.msrb.mxu1 %v7685_v45 }
 0xf12   :  { %3542 = vmatpush.msrb.mxu1 %v7688_v62  ;;  %v3135_v62 = vadd.f32 %v3134_v56, %v9084_v61 }
 0xf14   :  { %3543 = vmatpush.msrb.mxu1 %v7691_v60  ;;  %v3095_v60 = vadd.f32 %v3094_v57, %v9085_v17  ;;  %v3155_v45 = vadd.f32 %v3154_v29, %v3135_v62 }
 0xf16   :  { %3544 = vmatpush.msrb.mxu1 %v7694_v32  ;;  %v3115_v23 = vadd.f32 %v3114_v63, %v3095_v60  ;;  %v3194_v32 = vpop.f32.mrf.mxu2  ;;  %v4342_v52 = vmul.f32 -1.442695, %v3155_v45 }
 0xf18   :  { %3545 = vmatpush.msrb.mxu1 %v7697_v14  ;;  %v4341_v47 = vmul.f32 -1.442695, %v3115_v23  ;;  %4548 = vpow2.f32 %v4342_v52  ;;  %v3215_v14 = vadd.f32 %v3214_v30, %v9086_v3  ;;  %v3045_v52 = vadd.f32 %v7379_v27, %v3044_v37 }
 0xf1a   :  { %3546 = vmatpush.msrb.mxu1 %v7700_v43  ;;  %4550 = vpow2.f32 %v4341_v47 }
 0xf1e   :  { %v3234_v43 = vpop.f32.mrf.mxu2  ;;  %v4549_v53 = vpop.eup %4548 }
 0xf1f   :  { %v3235_v1 = vadd.f32 %v3234_v43, %v3215_v14  ;;  %v3259_v19 = vadd.f32 1.0, %v4549_v53 }
 0xf20   :  { %v4551_v39 = vpop.eup %4550 }
 0xf21   :  { %v4343_v42 = vmul.f32 -1.442695, %v3235_v1  ;;  %v3240_v50 = vadd.f32 1.0, %v4551_v39  ;;  %4552 = vrcp.f32 %v3259_v19  ;;  %vm3265_vm15 = vweird.f32 %v3259_v19 }
 0xf23   :  { %4554 = vpow2.f32 %v4343_v42  ;;  %vm3246_vm2 = vweird.f32 %v3240_v50 }
 0xf24   :  { %4556 = vrcp.f32 %v3240_v50 }
 0xf27   :  { %v4553_v62 = vpop.eup %4552 }
 0xf28   :  { %v3261_v45 = vmul.f32 %v4553_v62, %v3259_v19  ;;  %vm3266_vm14 = vweird.f32 %v4553_v62 }
 0xf29   :  { %v4555_v60 = vpop.eup %4554  ;;  %vm3267_vm1 = vmor %vm3265_vm15, %vm3266_vm14 }
 0xf2a   :  { %v4557_v63 = vpop.eup %4556  ;;  %v3279_v23 = vadd.f32 1.0, %v4555_v60  ;;  %v3262_v56 = vsub.f32 1.0, %v3261_v45  ;;  %v3271_v60 = vand.u32 2147483648, %v3259_v19 }
 0xf2b   :  { %v3242_v57 = vmul.f32 %v4557_v63, %v3240_v50  ;;  %vm3247_vm13 = vweird.f32 %v4557_v63 }
 0xf2c   :  { %4558 = vrcp.f32 %v3279_v23  ;;  %v3263_v1 = vmul.f32 %v4553_v62, %v3262_v56  ;;  %v3272_v56 = vor.u32 1.1754944e-38, %v3271_v60  ;;  %vm3248_vm3 = vmor %vm3246_vm2, %vm3247_vm13  ;;  %vm3285_vm7 = vweird.f32 %v3279_v23 }
 0xf2d   :  { %v3243_v39 = vsub.f32 1.0, %v3242_v57  ;;  %v3250_v57 = vand.u32 2147483647, %v3240_v50 }
 0xf2e   :  { %v3264_v29 = vadd.f32 %v4553_v62, %v3263_v1 }
 0xf2f   :  { %v3244_v14 = vmul.f32 %v4557_v63, %v3243_v39  ;;  %vm3251_vm5 = vcmp.eq.f32.partialorder %v3250_v57, 8.507059e+37  ;;  %v7766_v57 = vld [vmem:[%s8185_s8 + $0x48] sm:$0xff] }
 0xf31   :  { %v3245_v45 = vadd.f32 %v4557_v63, %v3244_v14 }
 0xf32   :  { %v4559_v42 = vpop.eup %4558 }
 0xf33   :  { %v3281_v37 = vmul.f32 %v4559_v42, %v3279_v23  ;;  %v3249_v39 = vsel %vm3248_vm3, %v4557_v63, %v3245_v45  ;;  %vm3286_vm6 = vweird.f32 %v4559_v42  ;;  %v7752_v45 = vld [vmem:[%s8185_s8 + $0x58] sm:$0xff] }
 0xf34   :  { %vm3287_vm8 = vmor %vm3285_vm7, %vm3286_vm6 }
 0xf35   :  { %v3282_v3 = vsub.f32 1.0, %v3281_v37 }
 0xf58   :  { %v3064_v30 = vpop.f32.mrf.mxu1 }
 0xf59   :  { %v3065_v47 = vadd.f32 %v3064_v30, %v3045_v52  ;;  %v3269_v52 = vand.u32 2147483647, %v3259_v19  ;;  %v3252_v30 = vand.u32 2147483648, %v3240_v50  ;;  %v3291_v50 = vand.u32 2147483648, %v3279_v23 }
 0xf5b   :  { %4335 = vst [vmem:[%s8188_s11 + $0x2] sm:$0x3] %v3065_v47  ;;  %v3268_v47 = vsel %vm3267_vm1, %v4553_v62, %v3264_v29  ;;  %vm3270_vm4 = vcmp.eq.f32.partialorder %v3269_v52, 8.507059e+37  ;;  %v3253_v1 = vor.u32 1.1754944e-38, %v3252_v30  ;;  %v3289_v62 = vand.u32 2147483647, %v3279_v23 }
 0xf5c   :  { %v3292_v29 = vor.u32 1.1754944e-38, %v3291_v50  ;;  %v7738_v23 = vld [vmem:[%s8185_s8 + $0x68] sm:$0xff]  ;;  %v7759_v30 = vld [vmem:[%s8185_s8 + $0x50] sm:$0xff]  ;;  %v4347_v50 = vld [vmem:[%s8178_s1 + $0x6] sm:$0x3] }
 0xf5d   :  { %vm3290_vm9 = vcmp.eq.f32.partialorder %v3289_v62, 8.507059e+37 }
 0xf60   :  { %v3174_v53 = vpop.f32.mrf.mxu1 }
 0xf61   :  { %v3175_v43 = vadd.f32 %v3174_v53, %v9088_v36  ;;  %v3273_v53 = vsel %vm3270_vm4, %v3272_v56, %v3268_v47  ;;  %v7773_v47 = vld [vmem:[%s8185_s8 + $0x40] sm:$0xff]  ;;  %v7780_v56 = vld [vmem:[%s8185_s8 + $0x38] sm:$0xff] }
 0xf62   :  { %v3295_v19 = vmul.f32 %v3273_v53, %v7387_v44  ;;  %v7731_v44 = vld [vmem:[%s8185_s8 + $0x70] sm:$0xff]  ;;  %v7801_v53 = vld [vmem:[%s8185_s8 + $0x20] sm:$0xff] }
 0xf63   :  { %v3195_v27 = vadd.f32 %v3194_v32, %v3175_v43  ;;  %v3254_v32 = vsel %vm3251_vm5, %v3253_v1, %v3249_v39  ;;  %v3283_v43 = vmul.f32 %v4559_v42, %v3282_v3  ;;  %v7787_v39 = vld [vmem:[%s8185_s8 + $0x30] sm:$0xff]  ;;  %v7794_v1 = vld [vmem:[%s8185_s8 + $0x28] sm:$0xff] }
 0xf65   :  { %4560 = vtanh.f32 %v3195_v27  ;;  %v3284_v27 = vadd.f32 %v4559_v42, %v3283_v43  ;;  %v7815_v43 = vld [vmem:[%s8185_s8 + $0x10] sm:$0xff] }
 0xf67   :  { %v3288_v63 = vsel %vm3287_vm8, %v4559_v42, %v3284_v27  ;;  %v7745_v42 = vld [vmem:[%s8185_s8 + $0x60] sm:$0xff] }
 0xf68   :  { %v3293_v37 = vsel %vm3290_vm9, %v3292_v29, %v3288_v63 }
 0xf6b   :  { %v4561_v36 = vpop.eup %4560 }
 0xf6c   :  { %v3296_v14 = vmul.f32 %v4561_v36, %v3254_v32  ;;  %v7724_v36 = vld [vmem:[%s8185_s8 + $0x78] sm:$0xff] }
 0xf6d   :  { %v7808_v32 = vld [vmem:[%s8185_s8 + $0x18] sm:$0xff] }
 0xf6e   :  { %v7712_v17 = vadd.f32 %v3296_v14, %v3295_v19  ;;  %v7822_v19 = vld [vmem:[%s8185_s8 + $0x8] sm:$0xff]  ;;  %v7829_v14 = vld [vmem:[%s8185_s8] sm:$0xff] }
 0xf6f   :  { %9159 = vst [vmem:[#allocation43_spill] sm:$0xff] %v7822_v19 }
 0xf70   :  { %4562 = vtanh.f32 %v7712_v17  ;;  %9160 = vst [vmem:[#allocation77_spill] sm:$0xff] %v7829_v14 }
 0xf76   :  { %v4563_v60 = vpop.eup %4562 }
 0xf77   :  { %v7715_v52 = vmul.f32 %v4563_v60, %v3293_v37 }
 0xf79   :  { %3445 = vrot.lane.b32.xlu0 %v7715_v52, %s5045_s17  ;;  %3319 = vmatmul.f32.vlgmr.msrb.gmra.mxu0 %v7715_v52  ;;  %v3301_v3 = vrot.slane %v7715_v52, 1 }
 0xf7a   :  { %3401 = vmatpush.msrb.mxu0 %v7724_v36 }
 0xf7b   :  { %3339 = vmatmul.f32.vlgmr.msrb.gmra.mxu2 %v3301_v3 }
 0xf7c   :  { %3451 = vmatpush.msrb.mxu2 %v7397_v49  ;;  %3402 = vmatpush.msrb.mxu0 %v7731_v44 }
 0xf7e   :  { %3452 = vmatpush.msrb.mxu2 %v7401_v28  ;;  %3403 = vmatpush.msrb.mxu0 %v7738_v23 }
 0xf80   :  { %3453 = vmatpush.msrb.mxu2 %v7405_v26  ;;  %3404 = vmatpush.msrb.mxu0 %v7745_v42 }
 0xf82   :  { %3454 = vmatpush.msrb.mxu2 %v7409_v21  ;;  %3405 = vmatpush.msrb.mxu0 %v7752_v45 }
 0xf84   :  { %3455 = vmatpush.msrb.mxu2 %v7413_v38  ;;  %3406 = vmatpush.msrb.mxu0 %v7759_v30 }
 0xf86   :  { %3456 = vmatpush.msrb.mxu2 %v7417_v51  ;;  %3407 = vmatpush.msrb.mxu0 %v7766_v57 }
 0xf88   :  { %3457 = vmatpush.msrb.mxu2 %v7421_v41  ;;  %3408 = vmatpush.msrb.mxu0 %v7773_v47 }
 0xf8a   :  { %3458 = vmatpush.msrb.mxu2 %v7425_v24  ;;  %3409 = vmatpush.msrb.mxu0 %v7780_v56 }
 0xf8c   :  { %3459 = vmatpush.msrb.mxu2 %v7429_v22  ;;  %3410 = vmatpush.msrb.mxu0 %v7787_v39 }
 0xf8e   :  { %3460 = vmatpush.msrb.mxu2 %v7433_v40  ;;  %3411 = vmatpush.msrb.mxu0 %v7794_v1 }
 0xf90   :  { %3461 = vmatpush.msrb.mxu2 %v7437_v46  ;;  %3412 = vmatpush.msrb.mxu0 %v7801_v53 }
 0xf92   :  { %3462 = vmatpush.msrb.mxu2 %v7441_v59  ;;  %3413 = vmatpush.msrb.mxu0 %v7808_v32 }
 0xf94   :  { %3463 = vmatpush.msrb.mxu2 %v7445_v9  ;;  %3414 = vmatpush.msrb.mxu0 %v7815_v43 }
 0xf96   :  { %3464 = vmatpush.msrb.mxu2 %v7449_v7  ;;  %3415 = vmatpush.msrb.mxu0 %v7822_v19 }
 0xf98   :  { %3465 = vmatpush.msrb.mxu2 %v7453_v16  ;;  %3416 = vmatpush.msrb.mxu0 %v7829_v14 }
 0xf9a   :  { %3466 = vmatpush.msrb.mxu2 %v7457_v20 }
 0xfeb   :  { %v3446_v27 = vpop.permute.xlu0 %3445 }
 0xfec   :  { %4348 = vmatmul.msk.f32.vlgmr.msra.gmra.mxu3 %vm177_vm0, %v3446_v27  ;;  %v7839_v62 = vsel %vm177_vm0, %v4347_v50, %v3446_v27 }
 0xfed   :  { %3692 = vmatpush.xpose.msra.mxu3 %v6996_v34 }
 0xff4   :  { %3507 = vmatmul.f32.vlgmr.msrb.gmra.mxu3 %v7839_v62 }
 0xff5   :  { %3746 = vmatpush.msrb.mxu3 %v7473_v13 }
 0xff6   :  { %v3320_v63 = vpop.f32.mrf.mxu0 }
 0xffe   :  { %v3340_v29 = vpop.f32.mrf.mxu2 }
 0xfff   :  { %v3341_v60 = vadd.f32 %v3340_v29, %v3320_v63  ;;  %v9168_v63 = vld [vmem:[#allocation20_spill] sm:$0xff]  ;;  %v9169_v29 = vld [vmem:[#allocation23_spill] sm:$0xff] }
0x1001   :  { %v3343_v37 = vsel %vm2590_vm10, %v3341_v60, -inf }
0x1002   :  { %3344 = vmax.xlane.f32.xlu2 %v3343_v37  ;;  %v9171_v37 = vld [vmem:[#allocation65_spill] sm:$0xff] }
0x1075   :  { %v3345_v3 = vpop.xlane.xlu2 %3344 }
0x1076   :  { %v3346_v20 = vsub.f32 %v3341_v60, %v3345_v3  ;;  %v9170_v60 = vld [vmem:[#allocation27_spill] sm:$0xff]  ;;  %v9172_v3 = vld [vmem:[#allocation40_spill] sm:$0xff] }
0x1078   :  { %v3347_v34 = vmul.f32 1.442695, %v3346_v20  ;;  %v9164_v20 = vld [vmem:[#allocation50_spill] sm:$0xff] }
0x107a   :  { %4564 = vpow2.f32 %v3347_v34  ;;  %v9161_v34 = vld [vmem:[#allocation48_spill] sm:$0xff] }
0x1080   :  { %v4565_v14 = vpop.eup %4564 }
0x1081   :  { %v3349_v16 = vsel %vm2590_vm10, %v4565_v14, 0.0 }
0x1082   :  { %3350 = vadd.xlane.f32.xlu2 %v3349_v16  ;;  %v9163_v16 = vld [vmem:[#allocation58_spill] sm:$0xff] }
0x10f5   :  { %v3351_v50 = vpop.xlane.xlu2 %3350 }
0x10f6   :  { %4566 = vrcp.f32 %v3351_v50  ;;  %v9173_v50 = vld [vmem:[#allocation61_spill] sm:$0xff] }
0x10fc   :  { %v4567_v19 = vpop.eup %4566 }
0x10fd   :  { %v3353_v7 = vmul.f32 %v4567_v19, %v4565_v14  ;;  %v9166_v19 = vld [vmem:[#allocation70_spill] sm:$0xff] }
0x10fe   :  { %v9167_v14 = vld [vmem:[#allocation18_spill] sm:$0xff] }
0x10ff   :  { %4344 = vmatmul.msk.f32.vlgmr.msra.gmra.mxu0 %vm2602_vm11, %v3353_v7  ;;  %4345 = vmatmul.msk.f32.vlgmr.msra.gmra.mxu2 %vm2602_vm11, %v3353_v7  ;;  %v9162_v7 = vld [vmem:[#allocation52_spill] sm:$0xff] }
0x1100   :  { %3523 = vmatpush.msra.mxu0 %v7480_v12  ;;  %3563 = vmatpush.msra.mxu2 %v7483_v8 }
0x1102   :  { %3524 = vmatpush.msra.mxu0 %v7486_v2  ;;  %3564 = vmatpush.msra.mxu2 %v7489_v4 }
0x1104   :  { %3525 = vmatpush.msra.mxu0 %v7492_v6  ;;  %3565 = vmatpush.msra.mxu2 %v7495_v11 }
0x1106   :  { %3526 = vmatpush.msra.mxu0 %v7498_v55  ;;  %3566 = vmatpush.msra.mxu2 %v7501_v35 }
0x1107   :  { %3417 = vmatmul.f32.vlgmr.msrb.gmra.mxu0 %v7715_v52  ;;  %3467 = vmatmul.f32.vlgmr.msrb.gmra.mxu2 %v7839_v62  ;;  %v9165_v52 = vld [vmem:[#allocation60_spill] sm:$0xff] }
0x1108   :  { %3571 = vmatpush.msrb.mxu0 %v7506_v25  ;;  %3603 = vmatpush.msrb.mxu2 %v7509_v33 }
0x110a   :  { %3572 = vmatpush.msrb.mxu0 %v7512_v10  ;;  %3604 = vmatpush.msrb.mxu2 %v7515_v31 }
0x110c   :  { %3573 = vmatpush.msrb.mxu0 %v7518_v15  ;;  %3605 = vmatpush.msrb.mxu2 %v7521_v58 }
0x110e   :  { %3574 = vmatpush.msrb.mxu0 %v7524_v18  ;;  %3606 = vmatpush.msrb.mxu2 %v9161_v34 }
0x110f   :  { %4349 = vmatmul.msk.f32.vlgmr.msra.gmra.mxu0 %vm177_vm0, %v3446_v27  ;;  %4350 = vmatmul.msk.f32.vlgmr.msra.gmra.mxu2 %vm177_vm0, %v3446_v27 }
0x1110   :  { %3575 = vmatpush.msrb.mxu0 %v9162_v7  ;;  %3712 = vmatpush.xpose.msra.mxu2 %v9163_v16 }
0x1112   :  { %3576 = vmatpush.msrb.mxu0 %v9164_v20  ;;  %v9174_v20 = vld [vmem:[#allocation51_spill] sm:$0xff] }
0x1114   :  { %3577 = vmatpush.msrb.mxu0 %v9165_v52  ;;  %v9175_v52 = vld [vmem:[#allocation71_spill] sm:$0xff] }
0x1116   :  { %3578 = vmatpush.msrb.mxu0 %v9166_v19  ;;  %v9186_v19 = vld [vmem:[#allocation38_spill] sm:$0xff] }
0x1117   :  { %4351 = vmatmul.msk.f32.vlgmr.msrb.gmra.mxu2 %vm177_vm0, %v3446_v27  ;;  %v9176_v27 = vld [vmem:[#allocation53_spill] sm:$0xff] }
0x1118   :  { %3579 = vmatpush.msrb.mxu0 %v9167_v14  ;;  %3766 = vmatpush.msrb.mxu2 %v9168_v63  ;;  %v9177_v14 = vld [vmem:[#allocation72_spill] sm:$0xff]  ;;  %v9178_v63 = vld [vmem:[#allocation45_spill] sm:$0xff] }
0x111a   :  { %3580 = vmatpush.msrb.mxu0 %v9169_v29  ;;  %v9179_v29 = vld [vmem:[#allocation73_spill] sm:$0xff] }
0x111c   :  { %3581 = vmatpush.msrb.mxu0 %v9170_v60  ;;  %v9180_v60 = vld [vmem:[#allocation74_spill] sm:$0xff] }
0x111e   :  { %3582 = vmatpush.msrb.mxu0 %v9171_v37  ;;  %v9181_v37 = vld [vmem:[#allocation75_spill] sm:$0xff] }
0x1120   :  { %3583 = vmatpush.msrb.mxu0 %v9172_v3  ;;  %v9182_v3 = vld [vmem:[#allocation54_spill] sm:$0xff] }
0x1122   :  { %3584 = vmatpush.msrb.mxu0 %v9173_v50  ;;  %v9183_v50 = vld [vmem:[#allocation76_spill] sm:$0xff] }
0x1124   :  { %3585 = vmatpush.msrb.mxu0 %v9174_v20  ;;  %v9184_v20 = vld [vmem:[#allocation30_spill] sm:$0xff] }
0x1126   :  { %3586 = vmatpush.msrb.mxu0 %v9175_v52  ;;  %v9185_v52 = vld [vmem:[#allocation34_spill] sm:$0xff] }
0x1127   :  { %3587 = vmatmul.f32.vlgmr.msrb.gmra.mxu0 %v7839_v62 }
0x1128   :  { %3857 = vmatpush.msra.mxu0 %v9176_v27  ;;  %v9187_v27 = vld [vmem:[#allocation42_spill] sm:$0xff] }
0x112a   :  { %3858 = vmatpush.msra.mxu0 %v9177_v14  ;;  %v9188_v14 = vld [vmem:[#allocation55_spill] sm:$0xff] }
0x112c   :  { %3859 = vmatpush.msra.mxu0 %v9178_v63  ;;  %v9189_v63 = vld [vmem:[#allocation15_spill] sm:$0xff] }
0x112e   :  { %3860 = vmatpush.msra.mxu0 %v9179_v29  ;;  %v9190_v29 = vld [vmem:[#allocation17_spill] sm:$0xff] }
0x1130   :  { %3865 = vmatpush.msrb.mxu0 %v9180_v60  ;;  %v9191_v60 = vld [vmem:[#allocation26_spill] sm:$0xff] }
0x1132   :  { %3866 = vmatpush.msrb.mxu0 %v9181_v37 }
0x1134   :  { %3867 = vmatpush.msrb.mxu0 %v9182_v3  ;;  %v7907_v3 = vld [vmem:[%s8185_s8 + $0xf8] sm:$0xff] }
0x1135   :  { %9192 = vst [vmem:[#allocation53_spill] sm:$0xff] %v7907_v3 }
0x1136   :  { %3868 = vmatpush.msrb.mxu0 %v9183_v50  ;;  %v7938_v50 = vld [vmem:[%s8185_s8 + $0xd0] sm:$0xff] }
0x1137   :  { %9197 = vst [vmem:[#allocation75_spill] sm:$0xff] %v7938_v50 }
0x1138   :  { %3869 = vmatpush.msrb.mxu0 %v9184_v20 }
0x113a   :  { %3870 = vmatpush.msrb.mxu0 %v9185_v52 }
0x113c   :  { %3871 = vmatpush.msrb.mxu0 %v9186_v19 }
0x113e   :  { %3872 = vmatpush.msrb.mxu0 %v9187_v27  ;;  %v7944_v27 = vld [vmem:[%s8185_s8 + $0xc8] sm:$0xff] }
0x113f   :  { %9198 = vst [vmem:[#allocation54_spill] sm:$0xff] %v7944_v27 }
0x1140   :  { %3873 = vmatpush.msrb.mxu0 %v9188_v14  ;;  %v7956_v14 = vld [vmem:[%s8185_s8 + $0xb8] sm:$0xff] }
0x1141   :  { %9200 = vst [vmem:[#allocation30_spill] sm:$0xff] %v7956_v14 }
0x1142   :  { %3874 = vmatpush.msrb.mxu0 %v9189_v63  ;;  %v7962_v63 = vld [vmem:[%s8185_s8 + $0xb0] sm:$0xff] }
0x1143   :  { %9201 = vst [vmem:[#allocation34_spill] sm:$0xff] %v7962_v63 }
0x1144   :  { %3875 = vmatpush.msrb.mxu0 %v9190_v29  ;;  %v7968_v29 = vld [vmem:[%s8185_s8 + $0xa8] sm:$0xff] }
0x1145   :  { %9202 = vst [vmem:[#allocation38_spill] sm:$0xff] %v7968_v29 }
0x1146   :  { %3876 = vmatpush.msrb.mxu0 %v9191_v60  ;;  %v7974_v60 = vld [vmem:[%s8185_s8 + $0xa0] sm:$0xff] }
0x1147   :  { %9203 = vst [vmem:[#allocation42_spill] sm:$0xff] %v7974_v60 }
0x1148   :  { %3877 = vmatpush.msrb.mxu0 %v7625_v48  ;;  %v7913_v48 = vld [vmem:[%s8185_s8 + $0xf0] sm:$0xff] }
0x1149   :  { %9193 = vst [vmem:[#allocation72_spill] sm:$0xff] %v7913_v48 }
0x114a   :  { %3878 = vmatpush.msrb.mxu0 %v7628_v5  ;;  %v7919_v5 = vld [vmem:[%s8185_s8 + $0xe8] sm:$0xff] }
0x114b   :  { %9194 = vst [vmem:[#allocation45_spill] sm:$0xff] %v7919_v5 }
0x114c   :  { %3879 = vmatpush.msrb.mxu0 %v7631_v0  ;;  %v7925_v0 = vld [vmem:[%s8185_s8 + $0xe0] sm:$0xff] }
0x114d   :  { %9195 = vst [vmem:[#allocation73_spill] sm:$0xff] %v7925_v0 }
0x114e   :  { %3880 = vmatpush.msrb.mxu0 %v7634_v54  ;;  %v7932_v54 = vld [vmem:[%s8185_s8 + $0xd8] sm:$0xff] }
0x114f   :  { %9196 = vst [vmem:[#allocation74_spill] sm:$0xff] %v7932_v54 }
0x117c   :  { %v3374_v19 = vpop.f32.mrf.mxu0 }
0x1182   :  { %v3394_v20 = vpop.f32.mrf.mxu2 }
0x1183   :  { %v3398_v52 = vrot.slane %v3394_v20, 7  ;;  %v7980_v20 = vld [vmem:[%s8185_s8 + $0x98] sm:$0xff] }
0x1184   :  { %9204 = vst [vmem:[#allocation55_spill] sm:$0xff] %v7980_v20 }
0x1185   :  { %v3400_v37 = vsel %vm2649_vm12, %v3374_v19, %v3398_v52  ;;  %v7986_v52 = vld [vmem:[%s8185_s8 + $0x90] sm:$0xff]  ;;  %v7992_v19 = vld [vmem:[%s8185_s8 + $0x88] sm:$0xff] }
0x1186   :  { %3437 = vmatmul.f32.vlgmr.msra.gmra.mxu1 %v3400_v37  ;;  %9205 = vst [vmem:[#allocation15_spill] sm:$0xff] %v7986_v52  ;;  %v7998_v37 = vld [vmem:[%s8185_s8 + $0x80] sm:$0xff] }
0x1187   :  { %3795 = vmatpush.msra.mxu1 %v7907_v3  ;;  %9206 = vst [vmem:[#allocation17_spill] sm:$0xff] %v7992_v19 }
0x1188   :  { %9207 = vst [vmem:[#allocation26_spill] sm:$0xff] %v7998_v37 }
0x1189   :  { %3796 = vmatpush.msra.mxu1 %v7913_v48 }
0x118b   :  { %3797 = vmatpush.msra.mxu1 %v7919_v5 }
0x118d   :  { %3798 = vmatpush.msra.mxu1 %v7925_v0 }
0x118e   :  { %3547 = vmatmul.f32.vlgmr.msrb.gmra.mxu1 %v7839_v62  ;;  %v7950_v62 = vld [vmem:[%s8185_s8 + $0xc0] sm:$0xff] }
0x118f   :  { %3799 = vmatpush.msra.mxu1 %v7932_v54  ;;  %9199 = vst [vmem:[#allocation76_spill] sm:$0xff] %v7950_v62  ;;  %v3468_v54 = vpop.f32.mrf.mxu2 }
0x1191   :  { %3800 = vmatpush.msra.mxu1 %v7938_v50  ;;  %v9217_v50 = vld [vmem:[#allocation37_spill] sm:$0xff] }
0x1193   :  { %3801 = vmatpush.msra.mxu1 %v7944_v27  ;;  %v9216_v27 = vld [vmem:[#allocation66_spill] sm:$0xff] }
0x1195   :  { %3802 = vmatpush.msra.mxu1 %v7950_v62  ;;  %v9215_v62 = vld [vmem:[#allocation21_spill] sm:$0xff] }
0x1197   :  { %3803 = vmatpush.msra.mxu1 %v7956_v14  ;;  %v9213_v14 = vld [vmem:[#allocation19_spill] sm:$0xff] }
0x1199   :  { %3804 = vmatpush.msra.mxu1 %v7962_v63  ;;  %v9212_v63 = vld [vmem:[#allocation25_spill] sm:$0xff] }
0x119b   :  { %3805 = vmatpush.msra.mxu1 %v7968_v29  ;;  %v9210_v29 = vld [vmem:[#allocation63_spill] sm:$0xff] }
0x119d   :  { %3806 = vmatpush.msra.mxu1 %v7974_v60  ;;  %v9209_v60 = vld [vmem:[#allocation16_spill] sm:$0xff] }
0x119f   :  { %3807 = vmatpush.msra.mxu1 %v7980_v20  ;;  %v9208_v20 = vld [vmem:[#allocation22_spill] sm:$0xff] }
0x11a1   :  { %3808 = vmatpush.msra.mxu1 %v7986_v52  ;;  %v9211_v52 = vld [vmem:[#allocation29_spill] sm:$0xff] }
0x11a3   :  { %3809 = vmatpush.msra.mxu1 %v7992_v19  ;;  %v9214_v19 = vld [vmem:[#allocation64_spill] sm:$0xff] }
0x11a5   :  { %3810 = vmatpush.msra.mxu1 %v7998_v37  ;;  %v9218_v37 = vld [vmem:[#allocation35_spill] sm:$0xff] }
0x11a7   :  { %3905 = vmatpush.msrb.mxu1 %v9208_v20  ;;  %v9219_v20 = vld [vmem:[#allocation67_spill] sm:$0xff] }
0x11a9   :  { %3906 = vmatpush.msrb.mxu1 %v9209_v60  ;;  %v9220_v60 = vld [vmem:[#allocation41_spill] sm:$0xff] }
0x11ab   :  { %3907 = vmatpush.msrb.mxu1 %v9210_v29  ;;  %v9221_v29 = vld [vmem:[#allocation39_spill] sm:$0xff] }
0x11ad   :  { %3908 = vmatpush.msrb.mxu1 %v9211_v52  ;;  %v9222_v52 = vld [vmem:[#allocation56_spill] sm:$0xff] }
0x11af   :  { %3909 = vmatpush.msrb.mxu1 %v9212_v63  ;;  %v9223_v63 = vld [vmem:[#allocation28_spill] sm:$0xff] }
0x11b1   :  { %3910 = vmatpush.msrb.mxu1 %v9213_v14  ;;  %v3488_v14 = vpop.f32.mrf.mxu3 }
0x11b3   :  { %3911 = vmatpush.msrb.mxu1 %v9214_v19  ;;  %v3418_v19 = vpop.f32.mrf.mxu0 }
0x11b5   :  { %3912 = vmatpush.msrb.mxu1 %v9215_v62 }
0x11b7   :  { %3913 = vmatpush.msrb.mxu1 %v9216_v27 }
0x11b9   :  { %3914 = vmatpush.msrb.mxu1 %v9217_v50  ;;  %v3508_v62 = vpop.f32.mrf.mxu3  ;;  %v9224_v50 = vld [vmem:[#allocation33_spill] sm:$0xff] }
0x11ba   :  { %v3509_v27 = vadd.f32 %v3508_v62, %v9084_v61  ;;  %v3469_v5 = vadd.f32 %v3468_v54, %v9224_v50  ;;  %v9226_v62 = vld [vmem:[#allocation49_spill] sm:$0xff] }
0x11bb   :  { %3915 = vmatpush.msrb.mxu1 %v9218_v37  ;;  %v3528_v0 = vpop.f32.mrf.mxu0 }
0x11bc   :  { %v3529_v37 = vadd.f32 %v3528_v0, %v3509_v27  ;;  %v3489_v48 = vadd.f32 %v3488_v14, %v3469_v5 }
0x11bd   :  { %3916 = vmatpush.msrb.mxu1 %v9219_v20  ;;  %v3568_v20 = vpop.f32.mrf.mxu2 }
0x11be   :  { %v4353_v3 = vmul.f32 -1.442695, %v3529_v37 }
0x11bf   :  { %3917 = vmatpush.msrb.mxu1 %v9220_v60  ;;  %v4352_v60 = vmul.f32 -1.442695, %v3489_v48 }
0x11c0   :  { %4568 = vpow2.f32 %v4353_v3  ;;  %v3419_v3 = vadd.f32 %v9226_v62, %v3418_v19 }
0x11c1   :  { %3918 = vmatpush.msrb.mxu1 %v9221_v29  ;;  %v9225_v29 = vld [vmem:[#allocation24_spill] sm:$0xff]  ;;  %4570 = vpow2.f32 %v4352_v60 }
0x11c3   :  { %3919 = vmatpush.msrb.mxu1 %v9222_v52  ;;  %v3588_v16 = vpop.f32.mrf.mxu0 }
0x11c4   :  { %v3589_v52 = vadd.f32 %v3588_v16, %v9225_v29 }
0x11c5   :  { %3920 = vmatpush.msrb.mxu1 %v9223_v63  ;;  %v3608_v63 = vpop.f32.mrf.mxu2 }
0x11c6   :  { %v4569_v7 = vpop.eup %4568  ;;  %v3609_v34 = vadd.f32 %v3608_v63, %v3589_v52  ;;  %v9227_v63 = vld [vmem:[#allocation44_spill] sm:$0xff] }
0x11c7   :  { %v4571_v18 = vpop.eup %4570  ;;  %v3633_v58 = vadd.f32 1.0, %v4569_v7 }
0x11c8   :  { %v4354_v15 = vmul.f32 -1.442695, %v3609_v34  ;;  %v3614_v31 = vadd.f32 1.0, %v4571_v18 }
0x11c9   :  { %4572 = vrcp.f32 %v3633_v58  ;;  %vm3639_vm15 = vweird.f32 %v3633_v58 }
0x11ca   :  { %4574 = vpow2.f32 %v4354_v15  ;;  %vm3620_vm2 = vweird.f32 %v3614_v31 }
0x11cb   :  { %4576 = vrcp.f32 %v3614_v31 }
0x11cf   :  { %v4573_v0 = vpop.eup %4572 }
0x11d0   :  { %v4575_v5 = vpop.eup %4574  ;;  %v3635_v14 = vmul.f32 %v4573_v0, %v3633_v58  ;;  %vm3640_vm14 = vweird.f32 %v4573_v0 }
0x11d1   :  { %v4577_v54 = vpop.eup %4576  ;;  %v3653_v48 = vadd.f32 1.0, %v4575_v5  ;;  %v3645_v5 = vand.u32 2147483648, %v3633_v58  ;;  %vm3641_vm1 = vmor %vm3639_vm15, %vm3640_vm14 }
0x11d2   :  { %v3616_v27 = vmul.f32 %v4577_v54, %v3614_v31  ;;  %v3636_v60 = vsub.f32 1.0, %v3635_v14  ;;  %vm3621_vm13 = vweird.f32 %v4577_v54 }
0x11d3   :  { %4578 = vrcp.f32 %v3653_v48  ;;  %vm3622_vm3 = vmor %vm3620_vm2, %vm3621_vm13  ;;  %vm3659_vm7 = vweird.f32 %v3653_v48 }
0x11d4   :  { %v3617_v18 = vsub.f32 1.0, %v3616_v27  ;;  %v3637_v34 = vmul.f32 %v4573_v0, %v3636_v60  ;;  %v3624_v27 = vand.u32 2147483647, %v3614_v31  ;;  %v3646_v60 = vor.u32 1.1754944e-38, %v3645_v5 }
0x11d6   :  { %v3618_v52 = vmul.f32 %v4577_v54, %v3617_v18  ;;  %v3638_v50 = vadd.f32 %v4573_v0, %v3637_v34  ;;  %vm3625_vm5 = vcmp.eq.f32.partialorder %v3624_v27, 8.507059e+37 }
0x11d8   :  { %v3619_v14 = vadd.f32 %v4577_v54, %v3618_v52 }
0x11d9   :  { %v4579_v15 = vpop.eup %4578 }
0x11da   :  { %v3655_v19 = vmul.f32 %v4579_v15, %v3653_v48  ;;  %v3623_v18 = vsel %vm3622_vm3, %v4577_v54, %v3619_v14  ;;  %vm3660_vm6 = vweird.f32 %v4579_v15 }
0x11db   :  { %vm3661_vm8 = vmor %vm3659_vm7, %vm3660_vm6 }
0x11dc   :  { %v3656_v61 = vsub.f32 1.0, %v3655_v19 }
0x1203   :  { %v3438_v16 = vpop.f32.mrf.mxu1 }
0x1204   :  { %v3439_v37 = vadd.f32 %v3438_v16, %v3419_v3  ;;  %v3643_v3 = vand.u32 2147483647, %v3633_v58  ;;  %v3626_v16 = vand.u32 2147483648, %v3614_v31  ;;  %v3665_v31 = vand.u32 2147483648, %v3653_v48 }
0x1206   :  { %4346 = vst [vmem:[%s8188_s11 + $0x4] sm:$0x3] %v3439_v37  ;;  %v3642_v37 = vsel %vm3641_vm1, %v4573_v0, %v3638_v50  ;;  %vm3644_vm4 = vcmp.eq.f32.partialorder %v3643_v3, 8.507059e+37  ;;  %v3627_v34 = vor.u32 1.1754944e-38, %v3626_v16  ;;  %v3663_v50 = vand.u32 2147483647, %v3653_v48 }
0x1207   :  { %v3666_v54 = vor.u32 1.1754944e-38, %v3665_v31  ;;  %v9233_v48 = vld [vmem:[#allocation62_spill] sm:$0xff]  ;;  %v4358_v3 = vld [vmem:[%s8178_s1 + $0x8] sm:$0x3] }
0x1208   :  { %vm3664_vm9 = vcmp.eq.f32.partialorder %v3663_v50, 8.507059e+37 }
0x120b   :  { %v3548_v7 = vpop.f32.mrf.mxu1 }
0x120c   :  { %v3549_v29 = vadd.f32 %v3548_v7, %v9227_v63  ;;  %v3647_v7 = vsel %vm3644_vm4, %v3646_v60, %v3642_v37  ;;  %v9245_v60 = vld [vmem:[#allocation18_spill] sm:$0xff] }
0x120d   :  { %v3669_v58 = vmul.f32 %v3647_v7, %v7712_v17  ;;  %v9248_v7 = vld [vmem:[#allocation27_spill] sm:$0xff] }
0x120e   :  { %v3569_v62 = vadd.f32 %v3568_v20, %v3549_v29  ;;  %v3657_v20 = vmul.f32 %v4579_v15, %v3656_v61  ;;  %v3628_v29 = vsel %vm3625_vm5, %v3627_v34, %v3623_v18  ;;  %v9246_v18 = vld [vmem:[#allocation20_spill] sm:$0xff]  ;;  %v9247_v34 = vld [vmem:[#allocation23_spill] sm:$0xff] }
0x1210   :  { %4580 = vtanh.f32 %v3569_v62  ;;  %v3658_v62 = vadd.f32 %v4579_v15, %v3657_v20  ;;  %v9249_v20 = vld [vmem:[#allocation65_spill] sm:$0xff] }
0x1212   :  { %v3662_v0 = vsel %vm3661_vm8, %v4579_v15, %v3658_v62  ;;  %v9253_v62 = vld [vmem:[#allocation71_spill] sm:$0xff] }
0x1213   :  { %v3667_v19 = vsel %vm3664_vm9, %v3666_v54, %v3662_v0 }
0x1216   :  { %v4581_v63 = vpop.eup %4580 }
0x1217   :  { %v3670_v52 = vmul.f32 %v4581_v63, %v3628_v29  ;;  %v9250_v29 = vld [vmem:[#allocation40_spill] sm:$0xff] }
0x1219   :  { %v8026_v10 = vadd.f32 %v3670_v52, %v3669_v58  ;;  %v9251_v58 = vld [vmem:[#allocation61_spill] sm:$0xff]  ;;  %v9252_v52 = vld [vmem:[#allocation51_spill] sm:$0xff] }
0x121b   :  { %4582 = vtanh.f32 %v8026_v10 }
0x1221   :  { %v4583_v5 = vpop.eup %4582 }
0x1222   :  { %v8029_v61 = vmul.f32 %v4583_v5, %v3667_v19  ;;  %v9254_v5 = vld [vmem:[#allocation53_spill] sm:$0xff]  ;;  %v9255_v19 = vld [vmem:[#allocation72_spill] sm:$0xff] }
0x1224   :  { %3693 = vmatmul.f32.vlgmr.msra.gmra.mxu3 %v8029_v61  ;;  %v3675_v17 = vrot.slane %v8029_v61, 1 }
0x1225   :  { %3775 = vmatpush.msra.mxu3 %v7724_v36 }
0x1226   :  { %3713 = vmatmul.f32.vlgmr.msra.gmra.mxu2 %v3675_v17  ;;  %v9257_v17 = vld [vmem:[#allocation73_spill] sm:$0xff] }
0x1227   :  { %3825 = vmatpush.msra.mxu2 %v7397_v49  ;;  %3776 = vmatpush.msra.mxu3 %v7731_v44  ;;  %v9228_v49 = vld [vmem:[#allocation68_spill] sm:$0xff] }
0x1229   :  { %3826 = vmatpush.msra.mxu2 %v7401_v28  ;;  %3777 = vmatpush.msra.mxu3 %v7738_v23  ;;  %v9229_v28 = vld [vmem:[#allocation43_spill] sm:$0xff] }
0x122b   :  { %3827 = vmatpush.msra.mxu2 %v7405_v26  ;;  %3778 = vmatpush.msra.mxu3 %v7745_v42  ;;  %v9230_v26 = vld [vmem:[#allocation32_spill] sm:$0xff] }
0x122d   :  { %3828 = vmatpush.msra.mxu2 %v7409_v21  ;;  %3779 = vmatpush.msra.mxu3 %v7752_v45  ;;  %v9231_v21 = vld [vmem:[#allocation77_spill] sm:$0xff] }
0x122f   :  { %3829 = vmatpush.msra.mxu2 %v7413_v38  ;;  %3780 = vmatpush.msra.mxu3 %v7759_v30  ;;  %v9232_v38 = vld [vmem:[#allocation46_spill] sm:$0xff] }
0x1231   :  { %3830 = vmatpush.msra.mxu2 %v7417_v51  ;;  %3781 = vmatpush.msra.mxu3 %v7766_v57 }
0x1233   :  { %3831 = vmatpush.msra.mxu2 %v7421_v41  ;;  %3782 = vmatpush.msra.mxu3 %v7773_v47 }
0x1235   :  { %3832 = vmatpush.msra.mxu2 %v7425_v24  ;;  %3783 = vmatpush.msra.mxu3 %v7780_v56 }
0x1237   :  { %3833 = vmatpush.msra.mxu2 %v7429_v22  ;;  %3784 = vmatpush.msra.mxu3 %v7787_v39 }
0x1239   :  { %3834 = vmatpush.msra.mxu2 %v7433_v40  ;;  %3785 = vmatpush.msra.mxu3 %v7794_v1 }
0x123b   :  { %3835 = vmatpush.msra.mxu2 %v7437_v46  ;;  %3786 = vmatpush.msra.mxu3 %v7801_v53 }
0x123d   :  { %3836 = vmatpush.msra.mxu2 %v7441_v59  ;;  %3787 = vmatpush.msra.mxu3 %v7808_v32 }
0x123f   :  { %3837 = vmatpush.msra.mxu2 %v7445_v9  ;;  %3788 = vmatpush.msra.mxu3 %v7815_v43 }
0x1241   :  { %3838 = vmatpush.msra.mxu2 %v9228_v49  ;;  %3789 = vmatpush.msra.mxu3 %v9229_v28  ;;  %v9258_v49 = vld [vmem:[#allocation74_spill] sm:$0xff] }
0x1243   :  { %3839 = vmatpush.msra.mxu2 %v9230_v26  ;;  %3790 = vmatpush.msra.mxu3 %v9231_v21  ;;  %v9259_v26 = vld [vmem:[#allocation75_spill] sm:$0xff] }
0x1245   :  { %3840 = vmatpush.msra.mxu2 %v9232_v38  ;;  %v9260_v38 = vld [vmem:[#allocation54_spill] sm:$0xff] }
0x12a7   :  { %v3694_v51 = vpop.f32.mrf.mxu3 }
0x12a9   :  { %v3714_v41 = vpop.f32.mrf.mxu2 }
0x12aa   :  { %v3715_v24 = vadd.f32 %v3714_v41, %v3694_v51  ;;  %v9261_v51 = vld [vmem:[#allocation76_spill] sm:$0xff]  ;;  %v9262_v41 = vld [vmem:[#allocation30_spill] sm:$0xff] }
0x12ac   :  { %v3717_v22 = vsel %vm2590_vm10, %v3715_v24, -inf }
0x12ad   :  { %3718 = vmax.xlane.f32.xlu2 %v3717_v22  ;;  %v9264_v22 = vld [vmem:[#allocation38_spill] sm:$0xff] }
0x12c5   :  { %3819 = vrot.lane.b32.xlu2 %v8029_v61, %s5045_s17 }
0x1320   :  { %v3719_v40 = vpop.xlane.xlu2 %3718 }
0x1321   :  { %v3720_v46 = vsub.f32 %v3715_v24, %v3719_v40  ;;  %v9263_v24 = vld [vmem:[#allocation34_spill] sm:$0xff] }
0x1322   :  { %v9265_v40 = vld [vmem:[#allocation42_spill] sm:$0xff] }
0x1323   :  { %v3721_v59 = vmul.f32 1.442695, %v3720_v46  ;;  %v9266_v46 = vld [vmem:[#allocation55_spill] sm:$0xff] }
0x1325   :  { %4584 = vpow2.f32 %v3721_v59  ;;  %v9267_v59 = vld [vmem:[#allocation15_spill] sm:$0xff] }
0x1328   :  { %v3820_v9 = vpop.permute.xlu2 %3819 }
0x1329   :  { %4359 = vmatmul.msk.f32.vlgmr.msra.gmra.mxu0 %vm177_vm0, %v3820_v9  ;;  %v3822_v14 = vsel %vm177_vm0, %v4358_v3, %v3820_v9 }
0x132a   :  { %4066 = vmatpush.xpose.msra.mxu0 %v9233_v48  ;;  %v9269_v48 = vld [vmem:[#allocation26_spill] sm:$0xff] }
0x132b   :  { %v4585_v15 = vpop.eup %4584 }
0x132c   :  { %v3723_v63 = vsel %vm2590_vm10, %v4585_v15, 0.0 }
0x132d   :  { %3724 = vadd.xlane.f32.xlu1 %v3723_v63 }
0x1331   :  { %3881 = vmatmul.f32.vlgmr.msrb.gmra.mxu0 %v3822_v14 }
0x1332   :  { %4120 = vmatpush.msrb.mxu0 %v7473_v13  ;;  %v9234_v13 = vld [vmem:[#allocation57_spill] sm:$0xff] }
0x13a0   :  { %v3725_v16 = vpop.xlane.xlu1 %3724 }
0x13a1   :  { %4586 = vrcp.f32 %v3725_v16 }
0x13a7   :  { %v4587_v27 = vpop.eup %4586 }
0x13a8   :  { %v3727_v37 = vmul.f32 %v4587_v27, %v4585_v15  ;;  %v3862_v15 = vpop.f32.mrf.mxu0  ;;  %v9270_v27 = vld [vmem:[#allocation31_spill] sm:$0xff] }
0x13aa   :  { %4355 = vmatmul.msk.f32.vlgmr.msrb.gmra.mxu3 %vm2602_vm11, %v3727_v37  ;;  %4356 = vmatmul.msk.f32.vlgmr.msrb.gmra.mxu2 %vm2602_vm11, %v3727_v37 }
0x13ab   :  { %3897 = vmatpush.msrb.mxu3 %v7480_v12  ;;  %3937 = vmatpush.msrb.mxu2 %v7483_v8  ;;  %v9235_v12 = vld [vmem:[#allocation47_spill] sm:$0xff]  ;;  %v9236_v8 = vld [vmem:[#allocation69_spill] sm:$0xff] }
0x13ad   :  { %3898 = vmatpush.msrb.mxu3 %v7486_v2  ;;  %3938 = vmatpush.msrb.mxu2 %v7489_v4  ;;  %v9237_v2 = vld [vmem:[#allocation36_spill] sm:$0xff]  ;;  %v9238_v4 = vld [vmem:[#allocation59_spill] sm:$0xff] }
0x13af   :  { %3899 = vmatpush.msrb.mxu3 %v7492_v6  ;;  %3939 = vmatpush.msrb.mxu2 %v7495_v11  ;;  %v9239_v6 = vld [vmem:[#allocation48_spill] sm:$0xff] }
0x13b0   :  { %v9240_v11 = vld [vmem:[#allocation52_spill] sm:$0xff] }
0x13b1   :  { %3900 = vmatpush.msrb.mxu3 %v7498_v55  ;;  %3940 = vmatpush.msrb.mxu2 %v7501_v35  ;;  %v9241_v55 = vld [vmem:[#allocation58_spill] sm:$0xff] }
0x13b2   :  { %3791 = vmatmul.f32.vlgmr.msra.gmra.mxu3 %v8029_v61  ;;  %3841 = vmatmul.f32.vlgmr.msra.gmra.mxu2 %v3822_v14  ;;  %v9242_v35 = vld [vmem:[#allocation50_spill] sm:$0xff]  ;;  %v9256_v61 = vld [vmem:[#allocation45_spill] sm:$0xff] }
0x13b3   :  { %3945 = vmatpush.msra.mxu3 %v7506_v25  ;;  %3977 = vmatpush.msra.mxu2 %v7509_v33  ;;  %v9243_v25 = vld [vmem:[#allocation60_spill] sm:$0xff]  ;;  %v9244_v33 = vld [vmem:[#allocation70_spill] sm:$0xff] }
0x13b5   :  { %3946 = vmatpush.msra.mxu3 %v9234_v13  ;;  %3978 = vmatpush.msra.mxu2 %v9235_v12  ;;  %v9271_v13 = vld [vmem:[#allocation33_spill] sm:$0xff] }
0x13b7   :  { %3947 = vmatpush.msra.mxu3 %v9236_v8  ;;  %3979 = vmatpush.msra.mxu2 %v9237_v2 }
0x13b9   :  { %3948 = vmatpush.msra.mxu3 %v9238_v4  ;;  %3980 = vmatpush.msra.mxu2 %v9239_v6 }
0x13ba   :  { %4360 = vmatmul.msk.f32.vlgmr.msrb.gmra.mxu3 %vm177_vm0, %v3820_v9  ;;  %4361 = vmatmul.msk.f32.vlgmr.msrb.gmra.mxu2 %vm177_vm0, %v3820_v9 }
0x13bb   :  { %3949 = vmatpush.msra.mxu3 %v9240_v11  ;;  %4086 = vmatpush.xpose.msrb.mxu2 %v9241_v55 }
0x13bd   :  { %3950 = vmatpush.msra.mxu3 %v9242_v35  ;;  %v9272_v35 = vld [vmem:[#allocation24_spill] sm:$0xff] }
0x13bf   :  { %3951 = vmatpush.msra.mxu3 %v9243_v25 }
0x13c1   :  { %3952 = vmatpush.msra.mxu3 %v9244_v33 }
0x13c2   :  { %4362 = vmatmul.msk.f32.vlgmr.msra.gmra.mxu2 %vm177_vm0, %v3820_v9  ;;  %v9268_v9 = vld [vmem:[#allocation17_spill] sm:$0xff] }
0x13c3   :  { %3953 = vmatpush.msra.mxu3 %v9245_v60  ;;  %4140 = vmatpush.msra.mxu2 %v9246_v18 }
0x13c5   :  { %3954 = vmatpush.msra.mxu3 %v9247_v34 }
0x13c7   :  { %3955 = vmatpush.msra.mxu3 %v9248_v7 }
0x13c9   :  { %3956 = vmatpush.msra.mxu3 %v9249_v20 }
0x13cb   :  { %3957 = vmatpush.msra.mxu3 %v9250_v29 }
0x13cd   :  { %3958 = vmatpush.msra.mxu3 %v9251_v58 }
0x13cf   :  { %3959 = vmatpush.msra.mxu3 %v9252_v52 }
0x13d1   :  { %3960 = vmatpush.msra.mxu3 %v9253_v62 }
0x13d2   :  { %3961 = vmatmul.f32.vlgmr.msra.gmra.mxu3 %v3822_v14 }
0x142d   :  { %v3768_v31 = vpop.f32.mrf.mxu2  ;;  %v3748_v0 = vpop.f32.mrf.mxu3 }
0x142e   :  { %v3772_v50 = vrot.slane %v3768_v31, 7 }
0x1430   :  { %v3774_v54 = vsel %vm2649_vm12, %v3748_v0, %v3772_v50  ;;  %v8135_v0 = vld [vmem:[%s8186_s9] ss:$0 sm:$0xff]  ;;  %s5049_s9 = smov [#allocation8]  }
0x1431   :  { %3811 = vmatmul.f32.vlgmr.msra.gmra.mxu1 %v3774_v54  ;;  %s4211_s19 = sshll.u32 %s5049_s9, 4  ;;  %s4212_s19 = int_to_ptr.vmem [resolvable:$true] %s4211_s19 }
0x1432   :  { %4169 = vmatpush.msra.mxu1 %v9254_v5 }
0x1434   :  { %4170 = vmatpush.msra.mxu1 %v9255_v19 }
0x1435   :  { %v3792_v63 = vpop.f32.mrf.mxu3  ;;  %v3842_v3 = vpop.f32.mrf.mxu2 }
0x1436   :  { %4171 = vmatpush.msra.mxu1 %v9256_v61  ;;  %v3843_v12 = vadd.f32 %v3842_v3, %v9271_v13  ;;  %v3793_v54 = vadd.f32 %v8135_v0, %v3792_v63 }
0x1438   :  { %4172 = vmatpush.msra.mxu1 %v9257_v17  ;;  %v3863_v2 = vadd.f32 %v3862_v15, %v3843_v12 }
0x1439   :  { %3921 = vmatmul.f32.vlgmr.msrb.gmra.mxu1 %v3822_v14  ;;  %v3882_v14 = vpop.f32.mrf.mxu0 }
0x143a   :  { %4173 = vmatpush.msra.mxu1 %v9258_v49  ;;  %v3883_v37 = vadd.f32 %v3882_v14, %v9270_v27  ;;  %v4363_v11 = vmul.f32 -1.442695, %v3863_v2 }
0x143c   :  { %4174 = vmatpush.msra.mxu1 %v9259_v26 }
0x143d   :  { %v3902_v16 = vpop.f32.mrf.mxu3  ;;  %v3942_v4 = vpop.f32.mrf.mxu2 }
0x143e   :  { %4175 = vmatpush.msra.mxu1 %v9260_v38  ;;  %v3903_v8 = vadd.f32 %v3902_v16, %v3883_v37 }
0x1440   :  { %4176 = vmatpush.msra.mxu1 %v9261_v51  ;;  %v4364_v6 = vmul.f32 -1.442695, %v3903_v8 }
0x1442   :  { %4177 = vmatpush.msra.mxu1 %v9262_v41  ;;  %4588 = vpow2.f32 %v4364_v6 }
0x1443   :  { %4590 = vpow2.f32 %v4363_v11 }
0x1444   :  { %4178 = vmatpush.msra.mxu1 %v9263_v24  ;;  %v9273_v24 = vld [vmem:[#allocation44_spill] sm:$0xff] }
0x1445   :  { %v3982_v33 = vpop.f32.mrf.mxu2 }
0x1446   :  { %4179 = vmatpush.msra.mxu1 %v9264_v22 }
0x1448   :  { %4180 = vmatpush.msra.mxu1 %v9265_v40  ;;  %v4589_v60 = vpop.eup %4588 }
0x1449   :  { %v4591_v34 = vpop.eup %4590  ;;  %v4007_v7 = vadd.f32 1.0, %v4589_v60 }
0x144a   :  { %4181 = vmatpush.msra.mxu1 %v9266_v46  ;;  %v3988_v29 = vadd.f32 1.0, %v4591_v34 }
0x144b   :  { %4592 = vrcp.f32 %v4007_v7  ;;  %v4019_v46 = vand.u32 2147483648, %v4007_v7  ;;  %vm4013_vm14 = vweird.f32 %v4007_v7 }
0x144c   :  { %4182 = vmatpush.msra.mxu1 %v9267_v59  ;;  %v4000_v63 = vand.u32 2147483648, %v3988_v29  ;;  %vm3994_vm1 = vweird.f32 %v3988_v29  ;;  %v3998_v3 = vand.u32 2147483647, %v3988_v29 }
0x144d   :  { %v4020_v16 = vor.u32 1.1754944e-38, %v4019_v46 }
0x144e   :  { %4183 = vmatpush.msra.mxu1 %v9268_v9  ;;  %v4001_v13 = vor.u32 1.1754944e-38, %v4000_v63  ;;  %vm3999_vm4 = vcmp.eq.f32.partialorder %v3998_v3, 8.507059e+37 }
0x1450   :  { %4184 = vmatpush.msra.mxu1 %v9269_v48  ;;  %v4017_v48 = vand.u32 2147483647, %v4007_v7 }
0x1451   :  { %v4593_v58 = vpop.eup %4592 }
0x1452   :  { %v4009_v31 = vmul.f32 %v4593_v58, %v4007_v7  ;;  %vm4014_vm0 = vweird.f32 %v4593_v58  ;;  %vm4018_vm3 = vcmp.eq.f32.partialorder %v4017_v48, 8.507059e+37 }
0x1453   :  { %vm4015_vm13 = vmor %vm4013_vm14, %vm4014_vm0 }
0x1454   :  { %v4010_v17 = vsub.f32 1.0, %v4009_v31 }
0x1455   :  { %v3962_v55 = vpop.f32.mrf.mxu3 }
0x1456   :  { %v3963_v25 = vadd.f32 %v3962_v55, %v9272_v35  ;;  %v4011_v26 = vmul.f32 %v4593_v58, %v4010_v17 }
0x1458   :  { %v3983_v18 = vadd.f32 %v3982_v33, %v3963_v25  ;;  %v4012_v40 = vadd.f32 %v4593_v58, %v4011_v26 }
0x145a   :  { %v4365_v20 = vmul.f32 -1.442695, %v3983_v18  ;;  %v4016_v14 = vsel %vm4015_vm13, %v4593_v58, %v4012_v40 }
0x145b   :  { %v4021_v12 = vsel %vm4018_vm3, %v4020_v16, %v4016_v14 }
0x145c   :  { %4594 = vpow2.f32 %v4365_v20  ;;  %v4043_v6 = vmul.f32 %v4021_v12, %v8026_v10 }
0x145d   :  { %4596 = vrcp.f32 %v3988_v29 }
0x1462   :  { %v4595_v52 = vpop.eup %4594 }
0x1463   :  { %v4597_v62 = vpop.eup %4596  ;;  %v4027_v50 = vadd.f32 1.0, %v4595_v52 }
0x1464   :  { %v3990_v5 = vmul.f32 %v4597_v62, %v3988_v29  ;;  %vm3995_vm15 = vweird.f32 %v4597_v62 }
0x1465   :  { %4598 = vrcp.f32 %v4027_v50  ;;  %vm3996_vm2 = vmor %vm3994_vm1, %vm3995_vm15  ;;  %v4039_v25 = vand.u32 2147483648, %v4027_v50  ;;  %vm4033_vm6 = vweird.f32 %v4027_v50  ;;  %v4037_v33 = vand.u32 2147483647, %v4027_v50 }
0x1466   :  { %v3991_v49 = vsub.f32 1.0, %v3990_v5 }
0x1467   :  { %v4040_v18 = vor.u32 1.1754944e-38, %v4039_v25  ;;  %vm4038_vm8 = vcmp.eq.f32.partialorder %v4037_v33, 8.507059e+37 }
0x1468   :  { %v3992_v41 = vmul.f32 %v4597_v62, %v3991_v49 }
0x146a   :  { %v3993_v15 = vadd.f32 %v4597_v62, %v3992_v41 }
0x146b   :  { %v4599_v38 = vpop.eup %4598 }
0x146c   :  { %v4029_v59 = vmul.f32 %v4599_v38, %v4027_v50  ;;  %v3997_v37 = vsel %vm3996_vm2, %v4597_v62, %v3993_v15  ;;  %vm4034_vm5 = vweird.f32 %v4599_v38 }
0x146d   :  { %vm4035_vm7 = vmor %vm4033_vm6, %vm4034_vm5 }
0x146e   :  { %v4030_v27 = vsub.f32 1.0, %v4029_v59 }
0x1470   :  { %v4031_v2 = vmul.f32 %v4599_v38, %v4030_v27 }
0x1472   :  { %v4032_v35 = vadd.f32 %v4599_v38, %v4031_v2 }
0x1474   :  { %v4036_v60 = vsel %vm4035_vm7, %v4599_v38, %v4032_v35 }
0x1475   :  { %v4041_v7 = vsel %vm4038_vm8, %v4040_v18, %v4036_v60 }
0x14ae   :  { %v3812_v19 = vpop.f32.mrf.mxu1 }
0x14af   :  { %v3813_v61 = vadd.f32 %v3812_v19, %v3793_v54 }
0x14b1   :  { %4357 = vst [vmem:[%s8188_s11 + $0x6] sm:$0x3] %v3813_v61 }
0x14b6   :  { %v3922_v51 = vpop.f32.mrf.mxu1 }
0x14b7   :  { %v3923_v22 = vadd.f32 %v3922_v51, %v9273_v24 }
0x14b9   :  { %v3943_v9 = vadd.f32 %v3942_v4, %v3923_v22  ;;  %v4002_v4 = vsel %vm3999_vm4, %v4001_v13, %v3997_v37 }
0x14bb   :  { %4600 = vtanh.f32 %v3943_v9 }
0x14c1   :  { %v4601_v8 = vpop.eup %4600 }
0x14c2   :  { %v4044_v11 = vmul.f32 %v4601_v8, %v4002_v4 }
0x14c4   :  { %v4045_v55 = vadd.f32 %v4044_v11, %v4043_v6 }
0x14c6   :  { %4602 = vtanh.f32 %v4045_v55  ;;  %4192 = vst [vmem:[#allocation10] sm:$0x3] %v4045_v55 }
0x14cc   :  { %v4603_v34 = vpop.eup %4602 }
0x14cd   :  { %v4047_v20 = vmul.f32 %v4603_v34, %v4041_v7 }
0x14cf   :  { %4067 = vmatmul.f32.vlgmr.msra.gmra.mxu0 %v4047_v20  ;;  %4191 = vst [vmem:[#allocation8] sm:$0x3] %v4047_v20  ;;  %v4049_v29 = vrot.slane %v4047_v20, 1 }
0x14d0   :  { %4149 = vmatpush.msra.mxu0 %v7724_v36  ;;  %4216 = dma.vmem_to_hbm [thread:$0]  %s4212_s19, 32, %s4214_s4, [#allocation9]  }
0x14d1   :  { %4087 = vmatmul.f32.vlgmr.msrb.gmra.mxu2 %v4049_v29  ;;  %4227 = dma.vmem_to_hbm [thread:$0]  %s4223_s6, 32, %s4225_s28, [#allocation9]  }
0x14d2   :  { %4150 = vmatpush.msra.mxu0 %v7731_v44 }
0x14d4   :  { %4151 = vmatpush.msra.mxu0 %v7738_v23 }
0x14d6   :  { %4152 = vmatpush.msra.mxu0 %v7745_v42 }
0x14d8   :  { %4153 = vmatpush.msra.mxu0 %v7752_v45 }
0x14da   :  { %4154 = vmatpush.msra.mxu0 %v7759_v30 }
0x14dc   :  { %4155 = vmatpush.msra.mxu0 %v7766_v57 }
0x14de   :  { %4156 = vmatpush.msra.mxu0 %v7773_v47 }
0x14e0   :  { %4157 = vmatpush.msra.mxu0 %v7780_v56 }
0x14e2   :  { %4158 = vmatpush.msra.mxu0 %v7787_v39 }
0x14e4   :  { %4159 = vmatpush.msra.mxu0 %v7794_v1 }
0x14e6   :  { %4160 = vmatpush.msra.mxu0 %v7801_v53 }
0x14e8   :  { %4161 = vmatpush.msra.mxu0 %v7808_v32 }
0x14ea   :  { %4162 = vmatpush.msra.mxu0 %v7815_v43 }
0x14ec   :  { %4163 = vmatpush.msra.mxu0 %v9229_v28 }
0x14ee   :  { %4164 = vmatpush.msra.mxu0 %v9231_v21 }
0x154c   :  { %v4068_v10 = vpop.f32.mrf.mxu0 }
0x1554   :  { %v4088_v36 = vpop.f32.mrf.mxu2 }
0x1555   :  { %v4089_v44 = vadd.f32 %v4088_v36, %v4068_v10 }
0x1557   :  { %v4091_v23 = vsel %vm2590_vm10, %v4089_v44, -inf }
0x1558   :  { %4092 = vmax.xlane.f32.xlu0 %v4091_v23 }
0x15cb   :  { %v4093_v42 = vpop.xlane.xlu0 %4092 }
0x15cc   :  { %v4094_v45 = vsub.f32 %v4089_v44, %v4093_v42 }
0x15ce   :  { %v4095_v30 = vmul.f32 1.442695, %v4094_v45 }
0x15d0   :  { %4604 = vpow2.f32 %v4095_v30 }
0x15d6   :  { %v4605_v57 = vpop.eup %4604 }
0x15d7   :  { %v4097_v47 = vsel %vm2590_vm10, %v4605_v57, 0.0 }
0x15d8   :  { %4098 = vadd.xlane.f32.xlu2 %v4097_v47 }
0x164b   :  { %v4099_v56 = vpop.xlane.xlu2 %4098 }
0x164c   :  { %4606 = vrcp.f32 %v4099_v56 }
0x1652   :  { %v4607_v39 = vpop.eup %4606 }
0x1653   :  { %v4101_v1 = vmul.f32 %v4607_v39, %v4605_v57 }
0x1655   :  { %4366 = vmatmul.msk.f32.vlgmr.msrb.gmra.mxu0 %vm2602_vm11, %v4101_v1  ;;  %4367 = vmatmul.msk.f32.vlgmr.msra.gmra.mxu2 %vm2602_vm11, %v4101_v1 }
0x165d   :  { %4165 = vmatmul.f32.vlgmr.msra.gmra.mxu0 %v4047_v20 }
0x16d2   :  { %v4122_v43 = vpop.f32.mrf.mxu0 }
0x16d8   :  { %v4142_v53 = vpop.f32.mrf.mxu2 }
0x16d9   :  { %v4146_v32 = vrot.slane %v4142_v53, 7 }
0x16da   :  { %v4166_v21 = vpop.f32.mrf.mxu0 }
0x16db   :  { %v4148_v28 = vsel %vm2649_vm12, %v4122_v43, %v4146_v32  ;;  %v4167_v58 = vadd.f32 %v8135_v0, %v4166_v21 }
0x16dc   :  { %4185 = vmatmul.f32.vlgmr.msra.gmra.mxu1 %v4148_v28 }
0x1759   :  { %v4186_v52 = vpop.f32.mrf.mxu1 }
0x175a   :  { %v4187_v62 = vadd.f32 %v4186_v52, %v4167_v58 }
0x175c   :  { %4368 = vst [vmem:[%s8188_s11 + $0x8] sm:$0x3] %v4187_v62 }
0x175d   :  { %5039 = dma.done.wait [#allocation4], 256  }
0x175e   :  { %5040 = vsyncadd [#allocation4], 4294967040 }
0x175f   :  { %5041 = dma.done.wait [#allocation9], 64  }
0x1760   :  { %5042 = vsyncadd [#allocation9], 4294967232 }
0x1761   :  { %4242 = vsyncpa [#allocation3], 1 }
0x1762   :  { %4243 = vsyncpa [#allocation6], 1 }
0x1763   :  { %4244 = vsyncpa [#allocation4], 1 }
0x1764   :  { %4245 = vsyncpa [#allocation9], 1 }

</bundles_post_ra>
